<compile_context>
chip_gen: v7x
topology: tpu7x:2x2x1
jax: 0.10.0
libtpu: 0.0.40
codegen_flags: <defaults>
</compile_context>

<pallas_src>
import jax
import jax.numpy as jnp
from jax.experimental import pallas as pl
from jax.experimental.pallas import tpu as pltpu


def _add_relu_matmul_kernel(a_ref, b_ref, w_ref, o_ref):
    # a_ref, b_ref: (C_in, tn)  activation tiles (channels x flattened spatial)
    # w_ref:        (tco, C_in) weight tile
    # o_ref:        (tco, tn)   output tile
    x = jnp.maximum(a_ref[...] + b_ref[...], 0.0)
    o_ref[...] = jnp.dot(
        w_ref[...], x, preferred_element_type=jnp.float32
    ).astype(o_ref.dtype)


def add_relu_conv1x1(x170, x162, weight):
    """x170, x162: [N, C_in, H, W] float32; weight: [C_out, C_in, 1, 1].

    Returns [N, C_out, H, W], matching
        conv2d(relu(x170 + x162), weight, bias=None, kernel=1x1, stride=1).
    """
    N, C_in, H, W = x170.shape
    C_out = weight.shape[0]
    HW = H * W

    # Free, contiguous reshapes (no transposes, no extra HBM traffic).
    a = x170.reshape(N, C_in, HW)
    b = x162.reshape(N, C_in, HW)
    w = weight.reshape(C_out, C_in)  # 1x1 kernel -> (C_out, C_in), no .T needed

    # C_out tile: 128 rows -> 2 parallel grid steps for C_out=256 (feeds both
    # v7x TensorCores; on v5e/v6e the weight tile is simply double-buffered).
    tco = 128 if C_out % 128 == 0 else C_out

    # Spatial tile: biggest divisor of HW whose lane dim is a multiple of 128;
    # otherwise take the full spatial extent (784 here -> full block, which
    # satisfies the "equals full array dim" layout rule).
    tn = HW
    for cand in (2048, 1024, 512, 256, 128):
        if HW % cand == 0:
            tn = cand
            break

    grid = (N, C_out // tco, HW // tn)

    out_flat = pl.pallas_call(
        _add_relu_matmul_kernel,
        out_shape=jax.ShapeDtypeStruct((N, C_out, HW), x170.dtype),
        grid_spec=pltpu.PrefetchScalarGridSpec(
            num_scalar_prefetch=0,
            grid=grid,
            in_specs=[
                # Activations: constant block index across the C_out axis, so
                # the (C_in, tn) tile is fetched once per (n, s) and reused.
                pl.BlockSpec((None, C_in, tn), lambda n, j, s: (n, 0, s)),
                pl.BlockSpec((None, C_in, tn), lambda n, j, s: (n, 0, s)),
                pl.BlockSpec((tco, C_in), lambda n, j, s: (j, 0)),
            ],
            out_specs=pl.BlockSpec((None, tco, tn), lambda n, j, s: (n, j, s)),
        ),
        compiler_params=pltpu.CompilerParams(
            # All grid axes are independent (no cross-step reduction).
            dimension_semantics=("parallel", "parallel", "parallel"),
            # ~14.7 MiB of double-buffered fp32 tiles; raise the scoped VMEM
            # limit so v5e's 16 MiB default is never the constraint.
            vmem_limit_bytes=32 * 1024 * 1024,
        ),
    )(a, b, w)

    # (N, C_out, H*W) -> (N, C_out, H, W): contiguous reshape, no transpose.
    return out_flat.reshape(N, C_out, H, W)


if __name__ == "__main__":
    key = jax.random.PRNGKey(0)
    k1, k2, k3 = jax.random.split(key, 3)

    # Shapes fixed by the PyTorch module: Conv2d(1024, 256, 1, bias=False) on
    # [1, 1024, 28, 28] inputs.
    N, C_in, H, W = 1, 1024, 28, 28
    C_out = 256

    x170 = jax.random.normal(k1, (N, C_in, H, W), dtype=jnp.float32)
    x162 = jax.random.normal(k2, (N, C_in, H, W), dtype=jnp.float32)
    weight = jax.random.normal(k3, (C_out, C_in, 1, 1), dtype=jnp.float32) * 0.02

    out = add_relu_conv1x1(x170, x162, weight)
    jax.block_until_ready(out)

    # Sanity check against a plain-JAX reference of the same math.
    ref = jnp.einsum(
        "nchw,oc->nohw", jnp.maximum(x170 + x162, 0.0), weight[:, :, 0, 0]
    )
    assert out.shape == (N, C_out, H, W)
    assert jnp.allclose(out, ref, atol=1e-3, rtol=1e-3)

    print("KERNEL_OK")
</pallas_src>

<mosaic_0001>
module attributes {stable_mosaic.version = 11 : i64} {
  func.func @_add_relu_matmul_kernel(%arg0: i32, %arg1: i32, %arg2: i32, %arg3: memref<1x1024x784xf32, #tpu.memory_space<vmem>>, %arg4: memref<1x1024x784xf32, #tpu.memory_space<vmem>>, %arg5: memref<128x1024xf32, #tpu.memory_space<vmem>>, %arg6: memref<1x128x784xf32, #tpu.memory_space<vmem>>) attributes {dimension_semantics = [#tpu.dimension_semantics<parallel>, #tpu.dimension_semantics<parallel>, #tpu.dimension_semantics<parallel>], iteration_bounds = array<i64: 1, 2, 1>, scalar_prefetch = 0 : i64, scratch_operands = 0 : i64, tpu.core_type = #tpu.core_type<tc>, window_params = [{transform_indices = @transform_0, window_bounds = array<i64: 1, 1024, 784>}, {transform_indices = @transform_1, window_bounds = array<i64: 1, 1024, 784>}, {transform_indices = @transform_2, window_bounds = array<i64: 128, 1024>}, {transform_indices = @transform_3, window_bounds = array<i64: 1, 128, 784>}]} {
    %c0 = arith.constant 0 : index
    %c0_0 = arith.constant 0 : index
    %c0_1 = arith.constant 0 : index
    %0 = vector.load %arg3[%c0, %c0_0, %c0_1] : memref<1x1024x784xf32, #tpu.memory_space<vmem>>, vector<1x1024x784xf32>
    %1 = vector.shape_cast %0 : vector<1x1024x784xf32> to vector<1024x784xf32>
    %c0_2 = arith.constant 0 : index
    %c0_3 = arith.constant 0 : index
    %c0_4 = arith.constant 0 : index
    %2 = vector.load %arg4[%c0_2, %c0_3, %c0_4] : memref<1x1024x784xf32, #tpu.memory_space<vmem>>, vector<1x1024x784xf32>
    %3 = vector.shape_cast %2 : vector<1x1024x784xf32> to vector<1024x784xf32>
    %4 = arith.addf %1, %3 : vector<1024x784xf32>
    %cst = arith.constant 0.000000e+00 : f32
    %5 = vector.broadcast %cst : f32 to vector<1024x784xf32>
    %6 = arith.maximumf %4, %5 : vector<1024x784xf32>
    %c0_5 = arith.constant 0 : index
    %c0_6 = arith.constant 0 : index
    %7 = vector.load %arg5[%c0_5, %c0_6] : memref<128x1024xf32, #tpu.memory_space<vmem>>, vector<128x1024xf32>
    %cst_7 = arith.constant dense<0.000000e+00> : vector<128x784xf32>
    %8 = tpu.matmul %7, %6, %cst_7 {dimension_numbers = #tpu.dot_dimension_numbers<[1], [0], [0], [1], [0, 0, 1, 1], [], []>} : vector<128x1024xf32>, vector<1024x784xf32>, vector<128x784xf32> -> vector<128x784xf32>
    %c0_8 = arith.constant 0 : index
    %c0_9 = arith.constant 0 : index
    %c0_10 = arith.constant 0 : index
    %9 = vector.load %arg6[%c0_8, %c0_9, %c0_10] : memref<1x128x784xf32, #tpu.memory_space<vmem>>, vector<1x128x784xf32>
    %10 = vector.shape_cast %9 : vector<1x128x784xf32> to vector<128x784xf32>
    %11 = vector.shape_cast %8 : vector<128x784xf32> to vector<1x128x784xf32>
    tpu.vector_store %arg6[%c0_8, %c0_9, %c0_10], %11 {strides = array<i32>} : memref<1x128x784xf32, #tpu.memory_space<vmem>>, vector<1x128x784xf32>,
    return
  }
  func.func @transform_0(%arg0: i32, %arg1: i32, %arg2: i32) -> (i32, i32, i32) {
    %c0_i32 = arith.constant 0 : i32
    %c0_i32_0 = arith.constant 0 : i32
    return %arg0, %c0_i32, %arg2 : i32, i32, i32
  }
  func.func @transform_1(%arg0: i32, %arg1: i32, %arg2: i32) -> (i32, i32, i32) {
    %c0_i32 = arith.constant 0 : i32
    %c0_i32_0 = arith.constant 0 : i32
    return %arg0, %c0_i32, %arg2 : i32, i32, i32
  }
  func.func @transform_2(%arg0: i32, %arg1: i32, %arg2: i32) -> (i32, i32) {
    %c0_i32 = arith.constant 0 : i32
    %c0_i32_0 = arith.constant 0 : i32
    return %arg1, %c0_i32 : i32, i32
  }
  func.func @transform_3(%arg0: i32, %arg1: i32, %arg2: i32) -> (i32, i32, i32) {
    %c0_i32 = arith.constant 0 : i32
    return %arg0, %arg1, %arg2 : i32, i32, i32
  }
}

</mosaic_0001>

<bundles_post_ra>
// kernel: tpu_custom_call.1
= control target key start
LH: loop header
LB: loop body
LE: loop exit
PB: predicated region body
PF: predicated region fallthrough
CT: control target
= control target key end

     0   :  { %s8489_s12 = smov 0   ;;  %s8491_s13 = smov 0   ;;  %s14437_s0 = inlined_call_operand.vmem [shape: f32[1,1024,784], index: 0, kind: input, shape index: {}]   ;;  %s14438_s1 = inlined_call_operand.vmem [shape: f32[1,1024,784], index: 1, kind: input, shape index: {}]   ;;  %s14439_s2 = inlined_call_operand.vmem [shape: f32[256,1024], index: 2, kind: input, shape index: {}]   ;;  %s14440_s3 = inlined_call_operand.vmem [shape: f32[1,256,784], index: 3, kind: output, shape index: {}]  }
   0x1   :  { %s8493_s14 = smov 0  }
   0x2 LB: > { %s28_s15 = sadd.s32 1, %s8463_s13  ;;  %p6779_p0 = scmp.ge.s32.totalorder %s8467_s14, 1  ;;  %s8467_s14 = sphi %s8493_s14, %s13_s14   ;;  %s8463_s13 = sphi %s8491_s13, %s14443_s13   ;;  %s8459_s12 = sphi %s8489_s12, %s14442_s12  }
   0x3   : > { %p30_p1 = scmp.ge.s32.totalorder %s28_s15, 2  ;;  %p196_p2 = scmp.lt.s32.totalorder %s8467_s14, 3 }
   0x5   : > { %s14445_s15 = smov (%p30_p1, %s28_s15), 0  ;;  %p197_p3 = pnand %p6779_p0, %p196_p2 }
   0x6   : > { %v292_v0 = vld [vmem:[%s14437_s0 + $0x8] sm:$0xff] (!%p197_p3)  ;;  %v299_v1 = vld [vmem:[%s14437_s0 + $0x40] sm:$0xff] (!%p197_p3)  ;;  %v294_v5 = vld [vmem:[%s14437_s0 + $0x18] sm:$0xff] (!%p197_p3)  ;;  %s6780_s16 = sshll.u32 (!%p197_p3), %s8459_s12, 4  ;;  %vm6521_vm0 = vcmask (!%p197_p3), 130048  }
   0x7   : > { %200 = sbr.rel (%p197_p3) target bundleno = 963 (0x3c3), region = 32  ;;  %v1188_v2 = vld [vmem:[%s14438_s1 + $0x8] sm:$0xff] (!%p197_p3)  ;;  %v1195_v3 = vld [vmem:[%s14438_s1 + $0x40] sm:$0xff] (!%p197_p3)  ;;  %v301_v6 = vld [vmem:[%s14437_s0 + $0x50] sm:$0xff] (!%p197_p3)  ;;  %p9160_p4 = scmp.lt.s32.totalorder (!%p197_p3), %s6780_s16, 31 }
   0x8   : > { %v2084_v4 = vadd.f32 (!%p197_p3), %v1188_v2, %v292_v0  ;;  %v2091_v7 = vadd.f32 (!%p197_p3), %v1195_v3, %v299_v1  ;;  %v1190_v8 = vld [vmem:[%s14438_s1 + $0x18] sm:$0xff] (!%p197_p3)  ;;  %v1197_v9 = vld [vmem:[%s14438_s1 + $0x50] sm:$0xff] (!%p197_p3)  ;;  %v291_v10 = vld [vmem:[%s14437_s0] sm:$0xff] (!%p197_p3) }
   0x9   : > { %v2086_v12 = vadd.f32 (!%p197_p3), %v1190_v8, %v294_v5  ;;  %v2093_v13 = vadd.f32 (!%p197_p3), %v1197_v9, %v301_v6  ;;  %v298_v14 = vld [vmem:[%s14437_s0 + $0x38] sm:$0xff] (!%p197_p3)  ;;  %v1187_v15 = vld [vmem:[%s14438_s1] sm:$0xff] (!%p197_p3)  ;;  %v293_v20 = vld [vmem:[%s14437_s0 + $0x10] sm:$0xff] (!%p197_p3) }
   0xa   : > { %v2980_v11 = vmax.f32 (!%p197_p3), %v2084_v4, 0.0  ;;  %v1194_v16 = vld [vmem:[%s14438_s1 + $0x38] sm:$0xff] (!%p197_p3)  ;;  %v2987_v17 = vmax.f32 (!%p197_p3), %v2091_v7, 0.0  ;;  %v2083_v18 = vadd.f32 (!%p197_p3), %v1187_v15, %v291_v10  ;;  %v300_v21 = vld [vmem:[%s14437_s0 + $0x48] sm:$0xff] (!%p197_p3)  ;;  %v1189_v22 = vld [vmem:[%s14438_s1 + $0x10] sm:$0xff] (!%p197_p3) }
   0xb   : > { %v2090_v19 = vadd.f32 (!%p197_p3), %v1194_v16, %v298_v14  ;;  %v2982_v23 = vmax.f32 (!%p197_p3), %v2086_v12, 0.0  ;;  %v2989_v24 = vmax.f32 (!%p197_p3), %v2093_v13, 0.0  ;;  %v1196_v25 = vld [vmem:[%s14438_s1 + $0x48] sm:$0xff] (!%p197_p3)  ;;  %v2085_v26 = vadd.f32 (!%p197_p3), %v1189_v22, %v293_v20  ;;  %v306_v27 = vld [vmem:[%s14437_s0 + $0x78] sm:$0xff] (!%p197_p3)  ;;  %v313_v28 = vld [vmem:[%s14437_s0 + $0xb0] sm:$0xff] (!%p197_p3) }
   0xc   : > { %v7108_v29 = vpack.c.bf16 (!%p197_p3), %v2987_v17, %v2980_v11  ;;  %v2979_v30 = vmax.f32 (!%p197_p3), %v2083_v18, 0.0  ;;  %v2092_v32 = vadd.f32 (!%p197_p3), %v1196_v25, %v300_v21  ;;  %v1202_v33 = vld [vmem:[%s14438_s1 + $0x78] sm:$0xff] (!%p197_p3)  ;;  %v1209_v34 = vld [vmem:[%s14438_s1 + $0xb0] sm:$0xff] (!%p197_p3)  ;;  %v308_v35 = vld [vmem:[%s14437_s0 + $0x88] sm:$0xff] (!%p197_p3) }
   0xd   : > { %v2986_v31 = vmax.f32 (!%p197_p3), %v2090_v19, 0.0  ;;  %v7364_v36 = vpack.c.bf16 (!%p197_p3), %v2989_v24, %v2982_v23  ;;  %v2981_v37 = vmax.f32 (!%p197_p3), %v2085_v26, 0.0  ;;  %v2098_v38 = vadd.f32 (!%p197_p3), %v1202_v33, %v306_v27  ;;  %v315_v40 = vld [vmem:[%s14437_s0 + $0xc0] sm:$0xff] (!%p197_p3)  ;;  %v1204_v41 = vld [vmem:[%s14438_s1 + $0x88] sm:$0xff] (!%p197_p3)  ;;  %v305_v47 = vld [vmem:[%s14437_s0 + $0x70] sm:$0xff] (!%p197_p3) }
   0xe   : > { %v2105_v39 = vadd.f32 %v1209_v34, %v313_v28  ;;  %v1211_v42 = vld [vmem:[%s14438_s1 + $0xc0] sm:$0xff]  ;;  %7109 = vmatprep.subr.bf16.mxu0 %v7108_v29  ;;  %v2988_v44 = vmax.f32 %v2092_v32, 0.0  ;;  %v2100_v45 = vadd.f32 %v1204_v41, %v308_v35  ;;  %v312_v48 = vld [vmem:[%s14437_s0 + $0xa8] sm:$0xff]  ;;  %v1201_v49 = vld [vmem:[%s14438_s1 + $0x70] sm:$0xff]  ;;  %s14447_s16 = smov (!%p9160_p4, %s6780_s16), 31 }
   0xf   : > { %v7110_v43 = vpack.c.bf16 %v2986_v31, %v2979_v30  ;;  %v2107_v46 = vadd.f32 %v1211_v42, %v315_v40  ;;  %7365 = vmatprep.subr.bf16.mxu1 %v7364_v36  ;;  %v2994_v50 = vmax.f32 %v2098_v38, 0.0  ;;  %v1208_v52 = vld [vmem:[%s14438_s1 + $0xa8] sm:$0xff]  ;;  %v2097_v53 = vadd.f32 %v1201_v49, %v305_v47  ;;  %v307_v54 = vld [vmem:[%s14437_s0 + $0x80] sm:$0xff]  ;;  %v314_v55 = vld [vmem:[%s14437_s0 + $0xb8] sm:$0xff]  ;;  %s6787_s18 = sshll.u32 %s14447_s16, 6  ;;  %s8292_s6 = smul.u32 56, %s14447_s16 }
  0x10   : > { %v3001_v51 = vmax.f32 %v2105_v39, 0.0  ;;  %v7366_v56 = vpack.c.bf16 %v2988_v44, %v2981_v37  ;;  %v2996_v57 = vmax.f32 %v2100_v45, 0.0  ;;  %v2104_v59 = vadd.f32 %v1208_v52, %v312_v48  ;;  %v1203_v60 = vld [vmem:[%s14438_s1 + $0x80] sm:$0xff]  ;;  %v1210_v61 = vld [vmem:[%s14438_s1 + $0xb8] sm:$0xff]  ;;  %v320_v62 = vld [vmem:[%s14437_s0 + $0xe8] sm:$0xff]  ;;  %s9273_s11 = scalar_lea.vmem %s14439_s2, %s6787_s18 }
  0x11   : > { %7111 = vmatpush1.bf16.msra.mxu0 %v7110_v43  ;;  %v3003_v58 = vmax.f32 %v2107_v46, 0.0  ;;  %v2993_v0 = vmax.f32 %v2097_v53, 0.0  ;;  %v2099_v1 = vadd.f32 %v1203_v60, %v307_v54  ;;  %v2106_v2 = vadd.f32 %v1210_v61, %v314_v55  ;;  %v327_v3 = vld [vmem:[%s14437_s0 + $0x120] sm:$0xff]  ;;  %v1216_v4 = vld [vmem:[%s14438_s1 + $0xe8] sm:$0xff]  ;;  %v322_v10 = vld [vmem:[%s14437_s0 + $0xf8] sm:$0xff]  ;;  %s13666_s20 = scalar_lea.vmem %s14440_s3, %s8292_s6 }
  0x12   : > { %v7112_v63 = vpack.c.bf16 %v3001_v51, %v2994_v50  ;;  %v1223_v5 = vld [vmem:[%s14438_s1 + $0x120] sm:$0xff]  ;;  %7367 = vmatpush1.bf16.msra.mxu1 %v7366_v56  ;;  %v3000_v7 = vmax.f32 %v2104_v59, 0.0  ;;  %v2112_v8 = vadd.f32 %v1216_v4, %v320_v62  ;;  %v329_v11 = vld [vmem:[%s14437_s0 + $0x130] sm:$0xff]  ;;  %v1218_v12 = vld [vmem:[%s14438_s1 + $0xf8] sm:$0xff] }
  0x13   : > { %v7368_v6 = vpack.c.bf16 %v3003_v58, %v2996_v57  ;;  %v2119_v9 = vadd.f32 %v1223_v5, %v327_v3  ;;  %v2995_v13 = vmax.f32 %v2099_v1, 0.0  ;;  %v3002_v14 = vmax.f32 %v2106_v2, 0.0  ;;  %v1225_v15 = vld [vmem:[%s14438_s1 + $0x130] sm:$0xff]  ;;  %v319_v17 = vld [vmem:[%s14437_s0 + $0xe0] sm:$0xff]  ;;  %v326_v18 = vld [vmem:[%s14437_s0 + $0x118] sm:$0xff] }
  0x14   : > { %7113 = vmatprep.subr.bf16.mxu0 %v7112_v63  ;;  %v2114_v16 = vadd.f32 %v1218_v12, %v322_v10  ;;  %v7114_v19 = vpack.c.bf16 %v3000_v7, %v2993_v0  ;;  %v3008_v20 = vmax.f32 %v2112_v8, 0.0  ;;  %v2121_v22 = vadd.f32 %v1225_v15, %v329_v11  ;;  %v1215_v23 = vld [vmem:[%s14438_s1 + $0xe0] sm:$0xff]  ;;  %v1222_v24 = vld [vmem:[%s14438_s1 + $0x118] sm:$0xff]  ;;  %v321_v25 = vld [vmem:[%s14437_s0 + $0xf0] sm:$0xff] }
  0x15   : > { %7369 = vmatprep.subr.bf16.mxu1 %v7368_v6  ;;  %v3015_v21 = vmax.f32 %v2119_v9, 0.0  ;;  %v7370_v26 = vpack.c.bf16 %v3002_v14, %v2995_v13  ;;  %v2111_v28 = vadd.f32 %v1215_v23, %v319_v17  ;;  %v2118_v29 = vadd.f32 %v1222_v24, %v326_v18  ;;  %v328_v30 = vld [vmem:[%s14437_s0 + $0x128] sm:$0xff]  ;;  %v1217_v31 = vld [vmem:[%s14438_s1 + $0xf0] sm:$0xff]  ;;  %v334_v37 = vld [vmem:[%s14437_s0 + $0x158] sm:$0xff] }
  0x16   : > { %v3010_v27 = vmax.f32 %v2114_v16, 0.0  ;;  %v1224_v32 = vld [vmem:[%s14438_s1 + $0x128] sm:$0xff]  ;;  %7115 = vmatpush1.bf16.msra.mxu0 %v7114_v19  ;;  %v3017_v34 = vmax.f32 %v2121_v22, 0.0  ;;  %v2113_v35 = vadd.f32 %v1217_v31, %v321_v25  ;;  %v341_v38 = vld [vmem:[%s14437_s0 + $0x190] sm:$0xff]  ;;  %v1230_v39 = vld [vmem:[%s14438_s1 + $0x158] sm:$0xff] }
  0x17   : > { %v7116_v33 = vpack.c.bf16 %v3015_v21, %v3008_v20  ;;  %v2120_v36 = vadd.f32 %v1224_v32, %v328_v30  ;;  %7371 = vmatpush1.bf16.msra.mxu1 %v7370_v26  ;;  %v3007_v40 = vmax.f32 %v2111_v28, 0.0  ;;  %v3014_v41 = vmax.f32 %v2118_v29, 0.0  ;;  %v1237_v42 = vld [vmem:[%s14438_s1 + $0x190] sm:$0xff]  ;;  %v336_v44 = vld [vmem:[%s14437_s0 + $0x168] sm:$0xff]  ;;  %v343_v45 = vld [vmem:[%s14437_s0 + $0x1a0] sm:$0xff] }
  0x18   : > { %v2126_v43 = vadd.f32 %v1230_v39, %v334_v37  ;;  %v7372_v46 = vpack.c.bf16 %v3017_v34, %v3010_v27  ;;  %v3009_v47 = vmax.f32 %v2113_v35, 0.0  ;;  %v2133_v49 = vadd.f32 %v1237_v42, %v341_v38  ;;  %v1232_v50 = vld [vmem:[%s14438_s1 + $0x168] sm:$0xff]  ;;  %v1239_v51 = vld [vmem:[%s14438_s1 + $0x1a0] sm:$0xff]  ;;  %v333_v52 = vld [vmem:[%s14437_s0 + $0x150] sm:$0xff] }
  0x19   : > { %7117 = vmatprep.subr.bf16.mxu0 %v7116_v33  ;;  %v3016_v48 = vmax.f32 %v2120_v36, 0.0  ;;  %v7118_v53 = vpack.c.bf16 %v3014_v41, %v3007_v40  ;;  %v2128_v55 = vadd.f32 %v1232_v50, %v336_v44  ;;  %v2135_v56 = vadd.f32 %v1239_v51, %v343_v45  ;;  %v340_v57 = vld [vmem:[%s14437_s0 + $0x188] sm:$0xff]  ;;  %v1229_v58 = vld [vmem:[%s14438_s1 + $0x150] sm:$0xff]  ;;  %v335_v0 = vld [vmem:[%s14437_s0 + $0x160] sm:$0xff] }
  0x1a   : > { %v3022_v54 = vmax.f32 %v2126_v43, 0.0  ;;  %v1236_v59 = vld [vmem:[%s14438_s1 + $0x188] sm:$0xff]  ;;  %7373 = vmatprep.subr.bf16.mxu1 %v7372_v46  ;;  %v3029_v61 = vmax.f32 %v2133_v49, 0.0  ;;  %v2125_v62 = vadd.f32 %v1229_v58, %v333_v52  ;;  %v342_v1 = vld [vmem:[%s14437_s0 + $0x198] sm:$0xff]  ;;  %v1231_v2 = vld [vmem:[%s14438_s1 + $0x160] sm:$0xff] }
  0x1b   : > { %v7374_v60 = vpack.c.bf16 %v3016_v48, %v3009_v47  ;;  %v2132_v63 = vadd.f32 %v1236_v59, %v340_v57  ;;  %7119 = vmatpush1.bf16.msra.mxu0 %v7118_v53  ;;  %v3024_v3 = vmax.f32 %v2128_v55, 0.0  ;;  %v3031_v4 = vmax.f32 %v2135_v56, 0.0  ;;  %v1238_v5 = vld [vmem:[%s14438_s1 + $0x198] sm:$0xff]  ;;  %v348_v7 = vld [vmem:[%s14437_s0 + $0x1c8] sm:$0xff]  ;;  %v355_v8 = vld [vmem:[%s14437_s0 + $0x200] sm:$0xff] }
  0x1c   : > { %v2127_v6 = vadd.f32 %v1231_v2, %v335_v0  ;;  %v7120_v9 = vpack.c.bf16 %v3029_v61, %v3022_v54  ;;  %v3021_v10 = vmax.f32 %v2125_v62, 0.0  ;;  %v2134_v12 = vadd.f32 %v1238_v5, %v342_v1  ;;  %v1244_v13 = vld [vmem:[%s14438_s1 + $0x1c8] sm:$0xff]  ;;  %v1251_v14 = vld [vmem:[%s14438_s1 + $0x200] sm:$0xff]  ;;  %v350_v15 = vld [vmem:[%s14437_s0 + $0x1d8] sm:$0xff] }
  0x1d   : > { %7375 = vmatpush1.bf16.msra.mxu1 %v7374_v60  ;;  %v3028_v11 = vmax.f32 %v2132_v63, 0.0  ;;  %v7376_v16 = vpack.c.bf16 %v3031_v4, %v3024_v3  ;;  %v2140_v18 = vadd.f32 %v1244_v13, %v348_v7  ;;  %v2147_v19 = vadd.f32 %v1251_v14, %v355_v8  ;;  %v357_v20 = vld [vmem:[%s14437_s0 + $0x210] sm:$0xff]  ;;  %v1246_v21 = vld [vmem:[%s14438_s1 + $0x1d8] sm:$0xff]  ;;  %v347_v27 = vld [vmem:[%s14437_s0 + $0x1c0] sm:$0xff] }
  0x1e   : > { %v3023_v17 = vmax.f32 %v2127_v6, 0.0  ;;  %v1253_v22 = vld [vmem:[%s14438_s1 + $0x210] sm:$0xff]  ;;  %7121 = vmatprep.subr.bf16.mxu0 %v7120_v9  ;;  %v3030_v24 = vmax.f32 %v2134_v12, 0.0  ;;  %v2142_v25 = vadd.f32 %v1246_v21, %v350_v15  ;;  %v354_v28 = vld [vmem:[%s14437_s0 + $0x1f8] sm:$0xff]  ;;  %v1243_v29 = vld [vmem:[%s14438_s1 + $0x1c0] sm:$0xff] }
  0x1f   : > { %v7122_v23 = vpack.c.bf16 %v3028_v11, %v3021_v10  ;;  %v2149_v26 = vadd.f32 %v1253_v22, %v357_v20  ;;  %7377 = vmatprep.subr.bf16.mxu1 %v7376_v16  ;;  %v3036_v30 = vmax.f32 %v2140_v18, 0.0  ;;  %v3043_v31 = vmax.f32 %v2147_v19, 0.0  ;;  %v1250_v32 = vld [vmem:[%s14438_s1 + $0x1f8] sm:$0xff]  ;;  %v349_v34 = vld [vmem:[%s14437_s0 + $0x1d0] sm:$0xff]  ;;  %v356_v35 = vld [vmem:[%s14437_s0 + $0x208] sm:$0xff] }
  0x20   : > { %v2139_v33 = vadd.f32 %v1243_v29, %v347_v27  ;;  %v7378_v36 = vpack.c.bf16 %v3030_v24, %v3023_v17  ;;  %v3038_v37 = vmax.f32 %v2142_v25, 0.0  ;;  %v2146_v39 = vadd.f32 %v1250_v32, %v354_v28  ;;  %v1245_v40 = vld [vmem:[%s14438_s1 + $0x1d0] sm:$0xff]  ;;  %v1252_v41 = vld [vmem:[%s14438_s1 + $0x208] sm:$0xff]  ;;  %v362_v42 = vld [vmem:[%s14437_s0 + $0x238] sm:$0xff] }
  0x21   : > { %7123 = vmatpush1.bf16.msra.mxu0 %v7122_v23  ;;  %v3045_v38 = vmax.f32 %v2149_v26, 0.0  ;;  %v7124_v43 = vpack.c.bf16 %v3043_v31, %v3036_v30  ;;  %v2141_v45 = vadd.f32 %v1245_v40, %v349_v34  ;;  %v2148_v46 = vadd.f32 %v1252_v41, %v356_v35  ;;  %v369_v47 = vld [vmem:[%s14437_s0 + $0x270] sm:$0xff]  ;;  %v1258_v48 = vld [vmem:[%s14438_s1 + $0x238] sm:$0xff]  ;;  %v364_v54 = vld [vmem:[%s14437_s0 + $0x248] sm:$0xff] }
  0x22   : > { %v3035_v44 = vmax.f32 %v2139_v33, 0.0  ;;  %v1265_v49 = vld [vmem:[%s14438_s1 + $0x270] sm:$0xff]  ;;  %7379 = vmatpush1.bf16.msra.mxu1 %v7378_v36  ;;  %v3042_v51 = vmax.f32 %v2146_v39, 0.0  ;;  %v2154_v52 = vadd.f32 %v1258_v48, %v362_v42  ;;  %v371_v55 = vld [vmem:[%s14437_s0 + $0x280] sm:$0xff]  ;;  %v1260_v56 = vld [vmem:[%s14438_s1 + $0x248] sm:$0xff] }
  0x23   : > { %v7380_v50 = vpack.c.bf16 %v3045_v38, %v3038_v37  ;;  %v2161_v53 = vadd.f32 %v1265_v49, %v369_v47  ;;  %7125 = vmatprep.subr.bf16.mxu0 %v7124_v43  ;;  %v3037_v57 = vmax.f32 %v2141_v45, 0.0  ;;  %v3044_v58 = vmax.f32 %v2148_v46, 0.0  ;;  %v1267_v59 = vld [vmem:[%s14438_s1 + $0x280] sm:$0xff]  ;;  %v361_v61 = vld [vmem:[%s14437_s0 + $0x230] sm:$0xff]  ;;  %v368_v62 = vld [vmem:[%s14437_s0 + $0x268] sm:$0xff] }
  0x24   : > { %v2156_v60 = vadd.f32 %v1260_v56, %v364_v54  ;;  %v7126_v63 = vpack.c.bf16 %v3042_v51, %v3035_v44  ;;  %v3050_v0 = vmax.f32 %v2154_v52, 0.0  ;;  %v2163_v2 = vadd.f32 %v1267_v59, %v371_v55  ;;  %v1257_v3 = vld [vmem:[%s14438_s1 + $0x230] sm:$0xff]  ;;  %v1264_v4 = vld [vmem:[%s14438_s1 + $0x268] sm:$0xff]  ;;  %v363_v5 = vld [vmem:[%s14437_s0 + $0x240] sm:$0xff] }
  0x25   : > { %7381 = vmatprep.subr.bf16.mxu1 %v7380_v50  ;;  %v3057_v1 = vmax.f32 %v2161_v53, 0.0  ;;  %v7382_v6 = vpack.c.bf16 %v3044_v58, %v3037_v57  ;;  %v2153_v8 = vadd.f32 %v1257_v3, %v361_v61  ;;  %v2160_v9 = vadd.f32 %v1264_v4, %v368_v62  ;;  %v370_v10 = vld [vmem:[%s14437_s0 + $0x278] sm:$0xff]  ;;  %v1259_v11 = vld [vmem:[%s14438_s1 + $0x240] sm:$0xff]  ;;  %v376_v17 = vld [vmem:[%s14437_s0 + $0x2a8] sm:$0xff] }
  0x26   : > { %v3052_v7 = vmax.f32 %v2156_v60, 0.0  ;;  %v1266_v12 = vld [vmem:[%s14438_s1 + $0x278] sm:$0xff]  ;;  %7127 = vmatpush1.bf16.msra.mxu0 %v7126_v63  ;;  %v3059_v14 = vmax.f32 %v2163_v2, 0.0  ;;  %v2155_v15 = vadd.f32 %v1259_v11, %v363_v5  ;;  %v383_v18 = vld [vmem:[%s14437_s0 + $0x2e0] sm:$0xff]  ;;  %v1272_v19 = vld [vmem:[%s14438_s1 + $0x2a8] sm:$0xff] }
  0x27   : > { %v7128_v13 = vpack.c.bf16 %v3057_v1, %v3050_v0  ;;  %v2162_v16 = vadd.f32 %v1266_v12, %v370_v10  ;;  %7383 = vmatpush1.bf16.msra.mxu1 %v7382_v6  ;;  %v3049_v20 = vmax.f32 %v2153_v8, 0.0  ;;  %v3056_v21 = vmax.f32 %v2160_v9, 0.0  ;;  %v1279_v22 = vld [vmem:[%s14438_s1 + $0x2e0] sm:$0xff]  ;;  %v378_v24 = vld [vmem:[%s14437_s0 + $0x2b8] sm:$0xff]  ;;  %v385_v25 = vld [vmem:[%s14437_s0 + $0x2f0] sm:$0xff] }
  0x28   : > { %v2168_v23 = vadd.f32 %v1272_v19, %v376_v17  ;;  %v7384_v26 = vpack.c.bf16 %v3059_v14, %v3052_v7  ;;  %v3051_v27 = vmax.f32 %v2155_v15, 0.0  ;;  %v2175_v29 = vadd.f32 %v1279_v22, %v383_v18  ;;  %v1274_v30 = vld [vmem:[%s14438_s1 + $0x2b8] sm:$0xff]  ;;  %v1281_v31 = vld [vmem:[%s14438_s1 + $0x2f0] sm:$0xff]  ;;  %v375_v32 = vld [vmem:[%s14437_s0 + $0x2a0] sm:$0xff] }
  0x29   : > { %7129 = vmatprep.subr.bf16.mxu0 %v7128_v13  ;;  %v3058_v28 = vmax.f32 %v2162_v16, 0.0  ;;  %v7130_v33 = vpack.c.bf16 %v3056_v21, %v3049_v20  ;;  %v2170_v35 = vadd.f32 %v1274_v30, %v378_v24  ;;  %v2177_v36 = vadd.f32 %v1281_v31, %v385_v25  ;;  %v382_v37 = vld [vmem:[%s14437_s0 + $0x2d8] sm:$0xff]  ;;  %v1271_v38 = vld [vmem:[%s14438_s1 + $0x2a0] sm:$0xff]  ;;  %v377_v44 = vld [vmem:[%s14437_s0 + $0x2b0] sm:$0xff] }
  0x2a   : > { %v3064_v34 = vmax.f32 %v2168_v23, 0.0  ;;  %v1278_v39 = vld [vmem:[%s14438_s1 + $0x2d8] sm:$0xff]  ;;  %7385 = vmatprep.subr.bf16.mxu1 %v7384_v26  ;;  %v3071_v41 = vmax.f32 %v2175_v29, 0.0  ;;  %v2167_v42 = vadd.f32 %v1271_v38, %v375_v32  ;;  %v384_v45 = vld [vmem:[%s14437_s0 + $0x2e8] sm:$0xff]  ;;  %v1273_v46 = vld [vmem:[%s14438_s1 + $0x2b0] sm:$0xff] }
  0x2b   : > { %v7386_v40 = vpack.c.bf16 %v3058_v28, %v3051_v27  ;;  %v2174_v43 = vadd.f32 %v1278_v39, %v382_v37  ;;  %7131 = vmatpush1.bf16.msra.mxu0 %v7130_v33  ;;  %v3066_v47 = vmax.f32 %v2170_v35, 0.0  ;;  %v3073_v48 = vmax.f32 %v2177_v36, 0.0  ;;  %v1280_v49 = vld [vmem:[%s14438_s1 + $0x2e8] sm:$0xff]  ;;  %v390_v51 = vld [vmem:[%s14437_s0 + $0x318] sm:$0xff]  ;;  %v397_v52 = vld [vmem:[%s14437_s0 + $0x350] sm:$0xff] }
  0x2c   : > { %v2169_v50 = vadd.f32 %v1273_v46, %v377_v44  ;;  %v7132_v53 = vpack.c.bf16 %v3071_v41, %v3064_v34  ;;  %v3063_v54 = vmax.f32 %v2167_v42, 0.0  ;;  %v2176_v56 = vadd.f32 %v1280_v49, %v384_v45  ;;  %v1286_v57 = vld [vmem:[%s14438_s1 + $0x318] sm:$0xff]  ;;  %v1293_v58 = vld [vmem:[%s14438_s1 + $0x350] sm:$0xff]  ;;  %v392_v59 = vld [vmem:[%s14437_s0 + $0x328] sm:$0xff] }
  0x2d   : > { %7387 = vmatpush1.bf16.msra.mxu1 %v7386_v40  ;;  %v3070_v55 = vmax.f32 %v2174_v43, 0.0  ;;  %v7388_v60 = vpack.c.bf16 %v3073_v48, %v3066_v47  ;;  %v2182_v62 = vadd.f32 %v1286_v57, %v390_v51  ;;  %v2189_v63 = vadd.f32 %v1293_v58, %v397_v52  ;;  %v399_v0 = vld [vmem:[%s14437_s0 + $0x360] sm:$0xff]  ;;  %v1288_v1 = vld [vmem:[%s14438_s1 + $0x328] sm:$0xff]  ;;  %v389_v7 = vld [vmem:[%s14437_s0 + $0x310] sm:$0xff] }
  0x2e   : > { %v3065_v61 = vmax.f32 %v2169_v50, 0.0  ;;  %v1295_v2 = vld [vmem:[%s14438_s1 + $0x360] sm:$0xff]  ;;  %7133 = vmatprep.subr.bf16.mxu0 %v7132_v53  ;;  %v3072_v4 = vmax.f32 %v2176_v56, 0.0  ;;  %v2184_v5 = vadd.f32 %v1288_v1, %v392_v59  ;;  %v396_v8 = vld [vmem:[%s14437_s0 + $0x348] sm:$0xff]  ;;  %v1285_v9 = vld [vmem:[%s14438_s1 + $0x310] sm:$0xff] }
  0x2f   : > { %v7134_v3 = vpack.c.bf16 %v3070_v55, %v3063_v54  ;;  %v2191_v6 = vadd.f32 %v1295_v2, %v399_v0  ;;  %7389 = vmatprep.subr.bf16.mxu1 %v7388_v60  ;;  %v3078_v10 = vmax.f32 %v2182_v62, 0.0  ;;  %v3085_v11 = vmax.f32 %v2189_v63, 0.0  ;;  %v1292_v12 = vld [vmem:[%s14438_s1 + $0x348] sm:$0xff]  ;;  %v391_v14 = vld [vmem:[%s14437_s0 + $0x320] sm:$0xff]  ;;  %v398_v15 = vld [vmem:[%s14437_s0 + $0x358] sm:$0xff] }
  0x30   : > { %v2181_v13 = vadd.f32 %v1285_v9, %v389_v7  ;;  %v7390_v16 = vpack.c.bf16 %v3072_v4, %v3065_v61  ;;  %v3080_v17 = vmax.f32 %v2184_v5, 0.0  ;;  %v2188_v19 = vadd.f32 %v1292_v12, %v396_v8  ;;  %v1287_v20 = vld [vmem:[%s14438_s1 + $0x320] sm:$0xff]  ;;  %v1294_v21 = vld [vmem:[%s14438_s1 + $0x358] sm:$0xff]  ;;  %v404_v22 = vld [vmem:[%s14437_s0 + $0x388] sm:$0xff] }
  0x31   : > { %7135 = vmatpush1.bf16.msra.mxu0 %v7134_v3  ;;  %v3087_v18 = vmax.f32 %v2191_v6, 0.0  ;;  %v7136_v23 = vpack.c.bf16 %v3085_v11, %v3078_v10  ;;  %v2183_v25 = vadd.f32 %v1287_v20, %v391_v14  ;;  %v2190_v26 = vadd.f32 %v1294_v21, %v398_v15  ;;  %v411_v27 = vld [vmem:[%s14437_s0 + $0x3c0] sm:$0xff]  ;;  %v1300_v28 = vld [vmem:[%s14438_s1 + $0x388] sm:$0xff]  ;;  %v406_v34 = vld [vmem:[%s14437_s0 + $0x398] sm:$0xff] }
  0x32   : > { %v3077_v24 = vmax.f32 %v2181_v13, 0.0  ;;  %v1307_v29 = vld [vmem:[%s14438_s1 + $0x3c0] sm:$0xff]  ;;  %7391 = vmatpush1.bf16.msra.mxu1 %v7390_v16  ;;  %v3084_v31 = vmax.f32 %v2188_v19, 0.0  ;;  %v2196_v32 = vadd.f32 %v1300_v28, %v404_v22  ;;  %v413_v35 = vld [vmem:[%s14437_s0 + $0x3d0] sm:$0xff]  ;;  %v1302_v36 = vld [vmem:[%s14438_s1 + $0x398] sm:$0xff] }
  0x33   : > { %v7392_v30 = vpack.c.bf16 %v3087_v18, %v3080_v17  ;;  %v2203_v33 = vadd.f32 %v1307_v29, %v411_v27  ;;  %7137 = vmatprep.subr.bf16.mxu0 %v7136_v23  ;;  %v3079_v37 = vmax.f32 %v2183_v25, 0.0  ;;  %v3086_v38 = vmax.f32 %v2190_v26, 0.0  ;;  %v1309_v39 = vld [vmem:[%s14438_s1 + $0x3d0] sm:$0xff]  ;;  %v403_v41 = vld [vmem:[%s14437_s0 + $0x380] sm:$0xff]  ;;  %v410_v42 = vld [vmem:[%s14437_s0 + $0x3b8] sm:$0xff] }
  0x34   : > { %v2198_v40 = vadd.f32 %v1302_v36, %v406_v34  ;;  %v7138_v43 = vpack.c.bf16 %v3084_v31, %v3077_v24  ;;  %v3092_v44 = vmax.f32 %v2196_v32, 0.0  ;;  %v2205_v46 = vadd.f32 %v1309_v39, %v413_v35  ;;  %v1299_v47 = vld [vmem:[%s14438_s1 + $0x380] sm:$0xff]  ;;  %v1306_v48 = vld [vmem:[%s14438_s1 + $0x3b8] sm:$0xff]  ;;  %v405_v49 = vld [vmem:[%s14437_s0 + $0x390] sm:$0xff] }
  0x35   : > { %7393 = vmatprep.subr.bf16.mxu1 %v7392_v30  ;;  %v3099_v45 = vmax.f32 %v2203_v33, 0.0  ;;  %v7394_v50 = vpack.c.bf16 %v3086_v38, %v3079_v37  ;;  %v2195_v52 = vadd.f32 %v1299_v47, %v403_v41  ;;  %v2202_v53 = vadd.f32 %v1306_v48, %v410_v42  ;;  %v412_v54 = vld [vmem:[%s14437_s0 + $0x3c8] sm:$0xff]  ;;  %v1301_v55 = vld [vmem:[%s14438_s1 + $0x390] sm:$0xff]  ;;  %v418_v61 = vld [vmem:[%s14437_s0 + $0x3f8] sm:$0xff] }
  0x36   : > { %v3094_v51 = vmax.f32 %v2198_v40, 0.0  ;;  %v1308_v56 = vld [vmem:[%s14438_s1 + $0x3c8] sm:$0xff]  ;;  %7139 = vmatpush1.bf16.msra.mxu0 %v7138_v43  ;;  %v3101_v58 = vmax.f32 %v2205_v46, 0.0  ;;  %v2197_v59 = vadd.f32 %v1301_v55, %v405_v49  ;;  %v425_v62 = vld [vmem:[%s14437_s0 + $0x430] sm:$0xff]  ;;  %v1314_v63 = vld [vmem:[%s14438_s1 + $0x3f8] sm:$0xff] }
  0x37   : > { %v7140_v57 = vpack.c.bf16 %v3099_v45, %v3092_v44  ;;  %v2204_v60 = vadd.f32 %v1308_v56, %v412_v54  ;;  %7395 = vmatpush1.bf16.msra.mxu1 %v7394_v50  ;;  %v3091_v0 = vmax.f32 %v2195_v52, 0.0  ;;  %v3098_v1 = vmax.f32 %v2202_v53, 0.0  ;;  %v1321_v2 = vld [vmem:[%s14438_s1 + $0x430] sm:$0xff]  ;;  %v420_v4 = vld [vmem:[%s14437_s0 + $0x408] sm:$0xff]  ;;  %v427_v5 = vld [vmem:[%s14437_s0 + $0x440] sm:$0xff] }
  0x38   : > { %v2210_v3 = vadd.f32 %v1314_v63, %v418_v61  ;;  %v7396_v6 = vpack.c.bf16 %v3101_v58, %v3094_v51  ;;  %v3093_v7 = vmax.f32 %v2197_v59, 0.0  ;;  %v2217_v9 = vadd.f32 %v1321_v2, %v425_v62  ;;  %v1316_v10 = vld [vmem:[%s14438_s1 + $0x408] sm:$0xff]  ;;  %v1323_v11 = vld [vmem:[%s14438_s1 + $0x440] sm:$0xff]  ;;  %v417_v12 = vld [vmem:[%s14437_s0 + $0x3f0] sm:$0xff] }
  0x39   : > { %7141 = vmatprep.subr.bf16.mxu0 %v7140_v57  ;;  %v3100_v8 = vmax.f32 %v2204_v60, 0.0  ;;  %v7142_v13 = vpack.c.bf16 %v3098_v1, %v3091_v0  ;;  %v2212_v15 = vadd.f32 %v1316_v10, %v420_v4  ;;  %v2219_v16 = vadd.f32 %v1323_v11, %v427_v5  ;;  %v424_v17 = vld [vmem:[%s14437_s0 + $0x428] sm:$0xff]  ;;  %v1313_v18 = vld [vmem:[%s14438_s1 + $0x3f0] sm:$0xff]  ;;  %v419_v24 = vld [vmem:[%s14437_s0 + $0x400] sm:$0xff] }
  0x3a   : > { %v3106_v14 = vmax.f32 %v2210_v3, 0.0  ;;  %v1320_v19 = vld [vmem:[%s14438_s1 + $0x428] sm:$0xff]  ;;  %7397 = vmatprep.subr.bf16.mxu1 %v7396_v6  ;;  %v3113_v21 = vmax.f32 %v2217_v9, 0.0  ;;  %v2209_v22 = vadd.f32 %v1313_v18, %v417_v12  ;;  %v426_v25 = vld [vmem:[%s14437_s0 + $0x438] sm:$0xff]  ;;  %v1315_v26 = vld [vmem:[%s14438_s1 + $0x400] sm:$0xff] }
  0x3b   : > { %v7398_v20 = vpack.c.bf16 %v3100_v8, %v3093_v7  ;;  %v2216_v23 = vadd.f32 %v1320_v19, %v424_v17  ;;  %7143 = vmatpush1.bf16.msra.mxu0 %v7142_v13  ;;  %v3108_v27 = vmax.f32 %v2212_v15, 0.0  ;;  %v3115_v28 = vmax.f32 %v2219_v16, 0.0  ;;  %v1322_v29 = vld [vmem:[%s14438_s1 + $0x438] sm:$0xff]  ;;  %v432_v31 = vld [vmem:[%s14437_s0 + $0x468] sm:$0xff]  ;;  %v439_v32 = vld [vmem:[%s14437_s0 + $0x4a0] sm:$0xff] }
  0x3c   : > { %v2211_v30 = vadd.f32 %v1315_v26, %v419_v24  ;;  %v7144_v33 = vpack.c.bf16 %v3113_v21, %v3106_v14  ;;  %v3105_v34 = vmax.f32 %v2209_v22, 0.0  ;;  %v2218_v36 = vadd.f32 %v1322_v29, %v426_v25  ;;  %v1328_v37 = vld [vmem:[%s14438_s1 + $0x468] sm:$0xff]  ;;  %v1335_v38 = vld [vmem:[%s14438_s1 + $0x4a0] sm:$0xff]  ;;  %v434_v39 = vld [vmem:[%s14437_s0 + $0x478] sm:$0xff] }
  0x3d   : > { %7399 = vmatpush1.bf16.msra.mxu1 %v7398_v20  ;;  %v3112_v35 = vmax.f32 %v2216_v23, 0.0  ;;  %v7400_v40 = vpack.c.bf16 %v3115_v28, %v3108_v27  ;;  %v2224_v42 = vadd.f32 %v1328_v37, %v432_v31  ;;  %v2231_v43 = vadd.f32 %v1335_v38, %v439_v32  ;;  %v441_v44 = vld [vmem:[%s14437_s0 + $0x4b0] sm:$0xff]  ;;  %v1330_v45 = vld [vmem:[%s14438_s1 + $0x478] sm:$0xff]  ;;  %v431_v51 = vld [vmem:[%s14437_s0 + $0x460] sm:$0xff] }
  0x3e   : > { %v3107_v41 = vmax.f32 %v2211_v30, 0.0  ;;  %v1337_v46 = vld [vmem:[%s14438_s1 + $0x4b0] sm:$0xff]  ;;  %7145 = vmatprep.subr.bf16.mxu0 %v7144_v33  ;;  %v3114_v48 = vmax.f32 %v2218_v36, 0.0  ;;  %v2226_v49 = vadd.f32 %v1330_v45, %v434_v39  ;;  %v438_v52 = vld [vmem:[%s14437_s0 + $0x498] sm:$0xff]  ;;  %v1327_v53 = vld [vmem:[%s14438_s1 + $0x460] sm:$0xff] }
  0x3f   : > { %v7146_v47 = vpack.c.bf16 %v3112_v35, %v3105_v34  ;;  %v2233_v50 = vadd.f32 %v1337_v46, %v441_v44  ;;  %7401 = vmatprep.subr.bf16.mxu1 %v7400_v40  ;;  %v3120_v54 = vmax.f32 %v2224_v42, 0.0  ;;  %v3127_v55 = vmax.f32 %v2231_v43, 0.0  ;;  %v1334_v56 = vld [vmem:[%s14438_s1 + $0x498] sm:$0xff]  ;;  %v433_v58 = vld [vmem:[%s14437_s0 + $0x470] sm:$0xff]  ;;  %v440_v59 = vld [vmem:[%s14437_s0 + $0x4a8] sm:$0xff] }
  0x40   : > { %v2223_v57 = vadd.f32 %v1327_v53, %v431_v51  ;;  %v7402_v60 = vpack.c.bf16 %v3114_v48, %v3107_v41  ;;  %v3122_v61 = vmax.f32 %v2226_v49, 0.0  ;;  %v2230_v63 = vadd.f32 %v1334_v56, %v438_v52  ;;  %v1329_v0 = vld [vmem:[%s14438_s1 + $0x470] sm:$0xff]  ;;  %v1336_v1 = vld [vmem:[%s14438_s1 + $0x4a8] sm:$0xff]  ;;  %v446_v2 = vld [vmem:[%s14437_s0 + $0x4d8] sm:$0xff] }
  0x41   : > { %7147 = vmatpush1.bf16.msra.mxu0 %v7146_v47  ;;  %v3129_v62 = vmax.f32 %v2233_v50, 0.0  ;;  %v7148_v3 = vpack.c.bf16 %v3127_v55, %v3120_v54  ;;  %v2225_v5 = vadd.f32 %v1329_v0, %v433_v58  ;;  %v2232_v6 = vadd.f32 %v1336_v1, %v440_v59  ;;  %v453_v7 = vld [vmem:[%s14437_s0 + $0x510] sm:$0xff]  ;;  %v1342_v8 = vld [vmem:[%s14438_s1 + $0x4d8] sm:$0xff]  ;;  %v448_v14 = vld [vmem:[%s14437_s0 + $0x4e8] sm:$0xff] }
  0x42   : > { %v3119_v4 = vmax.f32 %v2223_v57, 0.0  ;;  %v1349_v9 = vld [vmem:[%s14438_s1 + $0x510] sm:$0xff]  ;;  %7403 = vmatpush1.bf16.msra.mxu1 %v7402_v60  ;;  %v3126_v11 = vmax.f32 %v2230_v63, 0.0  ;;  %v2238_v12 = vadd.f32 %v1342_v8, %v446_v2  ;;  %v455_v15 = vld [vmem:[%s14437_s0 + $0x520] sm:$0xff]  ;;  %v1344_v16 = vld [vmem:[%s14438_s1 + $0x4e8] sm:$0xff] }
  0x43   : > { %v7404_v10 = vpack.c.bf16 %v3129_v62, %v3122_v61  ;;  %v2245_v13 = vadd.f32 %v1349_v9, %v453_v7  ;;  %7149 = vmatprep.subr.bf16.mxu0 %v7148_v3  ;;  %v3121_v17 = vmax.f32 %v2225_v5, 0.0  ;;  %v3128_v18 = vmax.f32 %v2232_v6, 0.0  ;;  %v1351_v19 = vld [vmem:[%s14438_s1 + $0x520] sm:$0xff]  ;;  %v445_v21 = vld [vmem:[%s14437_s0 + $0x4d0] sm:$0xff]  ;;  %v452_v22 = vld [vmem:[%s14437_s0 + $0x508] sm:$0xff] }
  0x44   : > { %v2240_v20 = vadd.f32 %v1344_v16, %v448_v14  ;;  %v7150_v23 = vpack.c.bf16 %v3126_v11, %v3119_v4  ;;  %v3134_v24 = vmax.f32 %v2238_v12, 0.0  ;;  %v2247_v26 = vadd.f32 %v1351_v19, %v455_v15  ;;  %v1341_v27 = vld [vmem:[%s14438_s1 + $0x4d0] sm:$0xff]  ;;  %v1348_v28 = vld [vmem:[%s14438_s1 + $0x508] sm:$0xff]  ;;  %v447_v29 = vld [vmem:[%s14437_s0 + $0x4e0] sm:$0xff] }
  0x45   : > { %7405 = vmatprep.subr.bf16.mxu1 %v7404_v10  ;;  %v3141_v25 = vmax.f32 %v2245_v13, 0.0  ;;  %v7406_v30 = vpack.c.bf16 %v3128_v18, %v3121_v17  ;;  %v2237_v32 = vadd.f32 %v1341_v27, %v445_v21  ;;  %v2244_v33 = vadd.f32 %v1348_v28, %v452_v22  ;;  %v454_v34 = vld [vmem:[%s14437_s0 + $0x518] sm:$0xff]  ;;  %v1343_v35 = vld [vmem:[%s14438_s1 + $0x4e0] sm:$0xff]  ;;  %v460_v41 = vld [vmem:[%s14437_s0 + $0x548] sm:$0xff] }
  0x46   : > { %v3136_v31 = vmax.f32 %v2240_v20, 0.0  ;;  %v1350_v36 = vld [vmem:[%s14438_s1 + $0x518] sm:$0xff]  ;;  %7151 = vmatpush1.bf16.msra.mxu0 %v7150_v23  ;;  %v3143_v38 = vmax.f32 %v2247_v26, 0.0  ;;  %v2239_v39 = vadd.f32 %v1343_v35, %v447_v29  ;;  %v467_v42 = vld [vmem:[%s14437_s0 + $0x580] sm:$0xff]  ;;  %v1356_v43 = vld [vmem:[%s14438_s1 + $0x548] sm:$0xff] }
  0x47   : > { %v7152_v37 = vpack.c.bf16 %v3141_v25, %v3134_v24  ;;  %v2246_v40 = vadd.f32 %v1350_v36, %v454_v34  ;;  %7407 = vmatpush1.bf16.msra.mxu1 %v7406_v30  ;;  %v3133_v44 = vmax.f32 %v2237_v32, 0.0  ;;  %v3140_v45 = vmax.f32 %v2244_v33, 0.0  ;;  %v1363_v46 = vld [vmem:[%s14438_s1 + $0x580] sm:$0xff]  ;;  %v462_v48 = vld [vmem:[%s14437_s0 + $0x558] sm:$0xff]  ;;  %v469_v49 = vld [vmem:[%s14437_s0 + $0x590] sm:$0xff] }
  0x48   : > { %v2252_v47 = vadd.f32 %v1356_v43, %v460_v41  ;;  %v7408_v50 = vpack.c.bf16 %v3143_v38, %v3136_v31  ;;  %v3135_v51 = vmax.f32 %v2239_v39, 0.0  ;;  %v2259_v53 = vadd.f32 %v1363_v46, %v467_v42  ;;  %v1358_v54 = vld [vmem:[%s14438_s1 + $0x558] sm:$0xff]  ;;  %v1365_v55 = vld [vmem:[%s14438_s1 + $0x590] sm:$0xff]  ;;  %v459_v56 = vld [vmem:[%s14437_s0 + $0x540] sm:$0xff] }
  0x49   : > { %7153 = vmatprep.subr.bf16.mxu0 %v7152_v37  ;;  %v3142_v52 = vmax.f32 %v2246_v40, 0.0  ;;  %v7154_v57 = vpack.c.bf16 %v3140_v45, %v3133_v44  ;;  %v2254_v59 = vadd.f32 %v1358_v54, %v462_v48  ;;  %v2261_v60 = vadd.f32 %v1365_v55, %v469_v49  ;;  %v466_v61 = vld [vmem:[%s14437_s0 + $0x578] sm:$0xff]  ;;  %v1355_v62 = vld [vmem:[%s14438_s1 + $0x540] sm:$0xff]  ;;  %v461_v4 = vld [vmem:[%s14437_s0 + $0x550] sm:$0xff] }
  0x4a   : > { %v3148_v58 = vmax.f32 %v2252_v47, 0.0  ;;  %v1362_v63 = vld [vmem:[%s14438_s1 + $0x578] sm:$0xff]  ;;  %7409 = vmatprep.subr.bf16.mxu1 %v7408_v50  ;;  %v3155_v1 = vmax.f32 %v2259_v53, 0.0  ;;  %v2251_v2 = vadd.f32 %v1355_v62, %v459_v56  ;;  %v468_v5 = vld [vmem:[%s14437_s0 + $0x588] sm:$0xff]  ;;  %v1357_v6 = vld [vmem:[%s14438_s1 + $0x550] sm:$0xff] }
  0x4b   : > { %v7410_v0 = vpack.c.bf16 %v3142_v52, %v3135_v51  ;;  %v2258_v3 = vadd.f32 %v1362_v63, %v466_v61  ;;  %7155 = vmatpush1.bf16.msra.mxu0 %v7154_v57  ;;  %v3150_v7 = vmax.f32 %v2254_v59, 0.0  ;;  %v3157_v8 = vmax.f32 %v2261_v60, 0.0  ;;  %v1364_v9 = vld [vmem:[%s14438_s1 + $0x588] sm:$0xff]  ;;  %v474_v11 = vld [vmem:[%s14437_s0 + $0x5b8] sm:$0xff]  ;;  %v481_v12 = vld [vmem:[%s14437_s0 + $0x5f0] sm:$0xff] }
  0x4c   : > { %v2253_v10 = vadd.f32 %v1357_v6, %v461_v4  ;;  %v7156_v13 = vpack.c.bf16 %v3155_v1, %v3148_v58  ;;  %v3147_v14 = vmax.f32 %v2251_v2, 0.0  ;;  %v2260_v16 = vadd.f32 %v1364_v9, %v468_v5  ;;  %v1370_v17 = vld [vmem:[%s14438_s1 + $0x5b8] sm:$0xff]  ;;  %v1377_v18 = vld [vmem:[%s14438_s1 + $0x5f0] sm:$0xff]  ;;  %v476_v19 = vld [vmem:[%s14437_s0 + $0x5c8] sm:$0xff] }
  0x4d   : > { %7411 = vmatpush1.bf16.msra.mxu1 %v7410_v0  ;;  %v3154_v15 = vmax.f32 %v2258_v3, 0.0  ;;  %v7412_v20 = vpack.c.bf16 %v3157_v8, %v3150_v7  ;;  %v2266_v22 = vadd.f32 %v1370_v17, %v474_v11  ;;  %v2273_v23 = vadd.f32 %v1377_v18, %v481_v12  ;;  %v483_v24 = vld [vmem:[%s14437_s0 + $0x600] sm:$0xff]  ;;  %v1372_v25 = vld [vmem:[%s14438_s1 + $0x5c8] sm:$0xff]  ;;  %v473_v31 = vld [vmem:[%s14437_s0 + $0x5b0] sm:$0xff] }
  0x4e   : > { %v3149_v21 = vmax.f32 %v2253_v10, 0.0  ;;  %v1379_v26 = vld [vmem:[%s14438_s1 + $0x600] sm:$0xff]  ;;  %7157 = vmatprep.subr.bf16.mxu0 %v7156_v13  ;;  %v3156_v28 = vmax.f32 %v2260_v16, 0.0  ;;  %v2268_v29 = vadd.f32 %v1372_v25, %v476_v19  ;;  %v480_v32 = vld [vmem:[%s14437_s0 + $0x5e8] sm:$0xff]  ;;  %v1369_v33 = vld [vmem:[%s14438_s1 + $0x5b0] sm:$0xff] }
  0x4f   : > { %v7158_v27 = vpack.c.bf16 %v3154_v15, %v3147_v14  ;;  %v2275_v30 = vadd.f32 %v1379_v26, %v483_v24  ;;  %7413 = vmatprep.subr.bf16.mxu1 %v7412_v20  ;;  %v3162_v34 = vmax.f32 %v2266_v22, 0.0  ;;  %v3169_v35 = vmax.f32 %v2273_v23, 0.0  ;;  %v1376_v36 = vld [vmem:[%s14438_s1 + $0x5e8] sm:$0xff]  ;;  %v475_v38 = vld [vmem:[%s14437_s0 + $0x5c0] sm:$0xff]  ;;  %v482_v39 = vld [vmem:[%s14437_s0 + $0x5f8] sm:$0xff] }
  0x50   : > { %v2265_v37 = vadd.f32 %v1369_v33, %v473_v31  ;;  %v7414_v40 = vpack.c.bf16 %v3156_v28, %v3149_v21  ;;  %v3164_v41 = vmax.f32 %v2268_v29, 0.0  ;;  %v2272_v43 = vadd.f32 %v1376_v36, %v480_v32  ;;  %v1371_v44 = vld [vmem:[%s14438_s1 + $0x5c0] sm:$0xff]  ;;  %v1378_v45 = vld [vmem:[%s14438_s1 + $0x5f8] sm:$0xff]  ;;  %v488_v46 = vld [vmem:[%s14437_s0 + $0x628] sm:$0xff] }
  0x51   : > { %7159 = vmatpush1.bf16.msra.mxu0 %v7158_v27  ;;  %v3171_v42 = vmax.f32 %v2275_v30, 0.0  ;;  %v7160_v47 = vpack.c.bf16 %v3169_v35, %v3162_v34  ;;  %v2267_v49 = vadd.f32 %v1371_v44, %v475_v38  ;;  %v2274_v50 = vadd.f32 %v1378_v45, %v482_v39  ;;  %v495_v51 = vld [vmem:[%s14437_s0 + $0x660] sm:$0xff]  ;;  %v1384_v52 = vld [vmem:[%s14438_s1 + $0x628] sm:$0xff]  ;;  %v490_v58 = vld [vmem:[%s14437_s0 + $0x638] sm:$0xff] }
  0x52   : > { %v3161_v48 = vmax.f32 %v2265_v37, 0.0  ;;  %v1391_v53 = vld [vmem:[%s14438_s1 + $0x660] sm:$0xff]  ;;  %7415 = vmatpush1.bf16.msra.mxu1 %v7414_v40  ;;  %v3168_v55 = vmax.f32 %v2272_v43, 0.0  ;;  %v2280_v56 = vadd.f32 %v1384_v52, %v488_v46  ;;  %v497_v59 = vld [vmem:[%s14437_s0 + $0x670] sm:$0xff]  ;;  %v1386_v60 = vld [vmem:[%s14438_s1 + $0x638] sm:$0xff] }
  0x53   : > { %v7416_v54 = vpack.c.bf16 %v3171_v42, %v3164_v41  ;;  %v2287_v57 = vadd.f32 %v1391_v53, %v495_v51  ;;  %7161 = vmatprep.subr.bf16.mxu0 %v7160_v47  ;;  %v3163_v61 = vmax.f32 %v2267_v49, 0.0  ;;  %v3170_v62 = vmax.f32 %v2274_v50, 0.0  ;;  %v1393_v63 = vld [vmem:[%s14438_s1 + $0x670] sm:$0xff]  ;;  %v487_v1 = vld [vmem:[%s14437_s0 + $0x620] sm:$0xff]  ;;  %v494_v2 = vld [vmem:[%s14437_s0 + $0x658] sm:$0xff] }
  0x54   : > { %v2282_v0 = vadd.f32 %v1386_v60, %v490_v58  ;;  %v7162_v3 = vpack.c.bf16 %v3168_v55, %v3161_v48  ;;  %v3176_v4 = vmax.f32 %v2280_v56, 0.0  ;;  %v2289_v6 = vadd.f32 %v1393_v63, %v497_v59  ;;  %v1383_v7 = vld [vmem:[%s14438_s1 + $0x620] sm:$0xff]  ;;  %v1390_v8 = vld [vmem:[%s14438_s1 + $0x658] sm:$0xff]  ;;  %v489_v9 = vld [vmem:[%s14437_s0 + $0x630] sm:$0xff] }
  0x55   : > { %7417 = vmatprep.subr.bf16.mxu1 %v7416_v54  ;;  %v3183_v5 = vmax.f32 %v2287_v57, 0.0  ;;  %v7418_v10 = vpack.c.bf16 %v3170_v62, %v3163_v61  ;;  %v2279_v12 = vadd.f32 %v1383_v7, %v487_v1  ;;  %v2286_v13 = vadd.f32 %v1390_v8, %v494_v2  ;;  %v496_v14 = vld [vmem:[%s14437_s0 + $0x668] sm:$0xff]  ;;  %v1385_v15 = vld [vmem:[%s14438_s1 + $0x630] sm:$0xff]  ;;  %v502_v21 = vld [vmem:[%s14437_s0 + $0x698] sm:$0xff] }
  0x56   : > { %v3178_v11 = vmax.f32 %v2282_v0, 0.0  ;;  %v1392_v16 = vld [vmem:[%s14438_s1 + $0x668] sm:$0xff]  ;;  %7163 = vmatpush1.bf16.msra.mxu0 %v7162_v3  ;;  %v3185_v18 = vmax.f32 %v2289_v6, 0.0  ;;  %v2281_v19 = vadd.f32 %v1385_v15, %v489_v9  ;;  %v509_v22 = vld [vmem:[%s14437_s0 + $0x6d0] sm:$0xff]  ;;  %v1398_v23 = vld [vmem:[%s14438_s1 + $0x698] sm:$0xff] }
  0x57   : > { %v7164_v17 = vpack.c.bf16 %v3183_v5, %v3176_v4  ;;  %v2288_v20 = vadd.f32 %v1392_v16, %v496_v14  ;;  %7419 = vmatpush1.bf16.msra.mxu1 %v7418_v10  ;;  %v3175_v24 = vmax.f32 %v2279_v12, 0.0  ;;  %v3182_v25 = vmax.f32 %v2286_v13, 0.0  ;;  %v1405_v26 = vld [vmem:[%s14438_s1 + $0x6d0] sm:$0xff]  ;;  %v504_v28 = vld [vmem:[%s14437_s0 + $0x6a8] sm:$0xff]  ;;  %v511_v29 = vld [vmem:[%s14437_s0 + $0x6e0] sm:$0xff] }
  0x58   : > { %v2294_v27 = vadd.f32 %v1398_v23, %v502_v21  ;;  %v7420_v30 = vpack.c.bf16 %v3185_v18, %v3178_v11  ;;  %v3177_v31 = vmax.f32 %v2281_v19, 0.0  ;;  %v2301_v33 = vadd.f32 %v1405_v26, %v509_v22  ;;  %v1400_v34 = vld [vmem:[%s14438_s1 + $0x6a8] sm:$0xff]  ;;  %v1407_v35 = vld [vmem:[%s14438_s1 + $0x6e0] sm:$0xff]  ;;  %v501_v36 = vld [vmem:[%s14437_s0 + $0x690] sm:$0xff] }
  0x59   : > { %7165 = vmatprep.subr.bf16.mxu0 %v7164_v17  ;;  %v3184_v32 = vmax.f32 %v2288_v20, 0.0  ;;  %v7166_v37 = vpack.c.bf16 %v3182_v25, %v3175_v24  ;;  %v2296_v39 = vadd.f32 %v1400_v34, %v504_v28  ;;  %v2303_v40 = vadd.f32 %v1407_v35, %v511_v29  ;;  %v508_v41 = vld [vmem:[%s14437_s0 + $0x6c8] sm:$0xff]  ;;  %v1397_v42 = vld [vmem:[%s14438_s1 + $0x690] sm:$0xff]  ;;  %v503_v48 = vld [vmem:[%s14437_s0 + $0x6a0] sm:$0xff] }
  0x5a   : > { %v3190_v38 = vmax.f32 %v2294_v27, 0.0  ;;  %v1404_v43 = vld [vmem:[%s14438_s1 + $0x6c8] sm:$0xff]  ;;  %7421 = vmatprep.subr.bf16.mxu1 %v7420_v30  ;;  %v3197_v45 = vmax.f32 %v2301_v33, 0.0  ;;  %v2293_v46 = vadd.f32 %v1397_v42, %v501_v36  ;;  %v510_v49 = vld [vmem:[%s14437_s0 + $0x6d8] sm:$0xff]  ;;  %v1399_v50 = vld [vmem:[%s14438_s1 + $0x6a0] sm:$0xff] }
  0x5b   : > { %v7422_v44 = vpack.c.bf16 %v3184_v32, %v3177_v31  ;;  %v2300_v47 = vadd.f32 %v1404_v43, %v508_v41  ;;  %7167 = vmatpush1.bf16.msra.mxu0 %v7166_v37  ;;  %v3192_v51 = vmax.f32 %v2296_v39, 0.0  ;;  %v3199_v52 = vmax.f32 %v2303_v40, 0.0  ;;  %v1406_v53 = vld [vmem:[%s14438_s1 + $0x6d8] sm:$0xff]  ;;  %v3876_v55 = vld [vmem:[%s9273_s11 + $0x8] sm:$0xff]  ;;  %v523_v61 = vld [vmem:[%s14437_s0 + $0x740] sm:$0xff] }
  0x5c   : > { %v2295_v54 = vadd.f32 %v1399_v50, %v503_v48  ;;  %v7168_v56 = vpack.c.bf16 %v3197_v45, %v3190_v38  ;;  %v3189_v57 = vmax.f32 %v2293_v46, 0.0  ;;  %v2302_v59 = vadd.f32 %v1406_v53, %v510_v49  ;;  %4067 = vmatprep.mubr.f32.mxu0 %v3876_v55  ;;  %v516_v60 = vld [vmem:[%s14437_s0 + $0x708] sm:$0xff]  ;;  %4711 = vmatprep.mubr.f32.mxu1 %v3876_v55  ;;  %v1419_v1 = vld [vmem:[%s14438_s1 + $0x740] sm:$0xff]  ;;  %v518_v3 = vld [vmem:[%s14437_s0 + $0x718] sm:$0xff] }
  0x5d   : > { %7423 = vmatpush1.bf16.msra.mxu1 %v7422_v44  ;;  %v3196_v58 = vmax.f32 %v2300_v47, 0.0  ;;  %v1412_v62 = vld [vmem:[%s14438_s1 + $0x708] sm:$0xff]  ;;  %v7424_v63 = vpack.c.bf16 %v3199_v52, %v3192_v51  ;;  %v525_v4 = vld [vmem:[%s14437_s0 + $0x750] sm:$0xff]  ;;  %v3875_v7 = vld [vmem:[%s9273_s11] sm:$0xff]  ;;  %v2315_v8 = vadd.f32 %v1419_v1, %v523_v61 }
  0x5e   : > { %v3191_v0 = vmax.f32 %v2295_v54, 0.0  ;;  %v2308_v2 = vadd.f32 %v1412_v62, %v516_v60  ;;  %7169 = vmatprep.subr.bf16.mxu0 %v7168_v56  ;;  %v3198_v6 = vmax.f32 %v2302_v59, 0.0  ;;  %v1414_v9 = vld [vmem:[%s14438_s1 + $0x718] sm:$0xff]  ;;  %v1421_v10 = vld [vmem:[%s14438_s1 + $0x750] sm:$0xff]  ;;  %v515_v11 = vld [vmem:[%s14437_s0 + $0x700] sm:$0xff] }
  0x5f   : > { %v7170_v5 = vpack.c.bf16 %v3196_v58, %v3189_v57  ;;  %7425 = vmatprep.subr.bf16.mxu1 %v7424_v63  ;;  %v2310_v13 = vadd.f32 %v1414_v9, %v518_v3  ;;  %v2317_v14 = vadd.f32 %v1421_v10, %v525_v4  ;;  %v522_v15 = vld [vmem:[%s14437_s0 + $0x738] sm:$0xff]  ;;  %v1411_v16 = vld [vmem:[%s14438_s1 + $0x700] sm:$0xff]  ;;  %v3211_v19 = vmax.f32 %v2315_v8, 0.0  ;;  %v517_v22 = vld [vmem:[%s14437_s0 + $0x710] sm:$0xff] }
  0x60   : > { %v3204_v12 = vmax.f32 %v2308_v2, 0.0  ;;  %v1418_v17 = vld [vmem:[%s14438_s1 + $0x738] sm:$0xff]  ;;  %v7426_v18 = vpack.c.bf16 %v3198_v6, %v3191_v0  ;;  %v2307_v20 = vadd.f32 %v1411_v16, %v515_v11  ;;  %v524_v23 = vld [vmem:[%s14437_s0 + $0x748] sm:$0xff]  ;;  %v1413_v24 = vld [vmem:[%s14438_s1 + $0x710] sm:$0xff] }
  0x61   : > { %7171 = vmatpush1.bf16.msra.mxu0 %v7170_v5  ;;  %v2314_v21 = vadd.f32 %v1418_v17, %v522_v15  ;;  %v3206_v25 = vmax.f32 %v2310_v13, 0.0  ;;  %v3213_v26 = vmax.f32 %v2317_v14, 0.0  ;;  %v1420_v27 = vld [vmem:[%s14438_s1 + $0x748] sm:$0xff]  ;;  %v2309_v28 = vadd.f32 %v1413_v24, %v517_v22  ;;  %v3883_v34 = vld [vmem:[%s9273_s11 + $0x40] sm:$0xff]  ;;  %v530_v35 = vld [vmem:[%s14437_s0 + $0x778] sm:$0xff] }
  0x62   : > { %v3884_v29 = vld [vmem:[%s9273_s11 + $0x48] sm:$0xff]  ;;  %7427 = vmatpush1.bf16.msra.mxu1 %v7426_v18  ;;  %v7172_v30 = vpack.c.bf16 %v3211_v19, %v3204_v12  ;;  %v3203_v31 = vmax.f32 %v2307_v20, 0.0  ;;  %v2316_v33 = vadd.f32 %v1420_v27, %v524_v23  ;;  %v537_v36 = vld [vmem:[%s14437_s0 + $0x7b0] sm:$0xff]  ;;  %v1426_v37 = vld [vmem:[%s14438_s1 + $0x778] sm:$0xff] }
  0x63   : > { %v3210_v32 = vmax.f32 %v2314_v21, 0.0  ;;  %v7428_v38 = vpack.c.bf16 %v3213_v26, %v3206_v25  ;;  %v3205_v39 = vmax.f32 %v2309_v28, 0.0  ;;  %v1433_v40 = vld [vmem:[%s14438_s1 + $0x7b0] sm:$0xff]  ;;  %v2322_v41 = vadd.f32 %v1426_v37, %v530_v35  ;;  %v532_v42 = vld [vmem:[%s14437_s0 + $0x788] sm:$0xff]  ;;  %v539_v43 = vld [vmem:[%s14437_s0 + $0x7c0] sm:$0xff] }
  0x64   : > { %4068 = vmatmul.mubr.f32.vlgmr.msra.gmra.mrb[0].mxu0 %v3875_v7  ;;  %7173 = vmatprep.subr.bf16.mxu0 %v7172_v30  ;;  %v3212_v45 = vmax.f32 %v2316_v33, 0.0  ;;  %v2329_v46 = vadd.f32 %v1433_v40, %v537_v36  ;;  %v1428_v47 = vld [vmem:[%s14438_s1 + $0x788] sm:$0xff]  ;;  %v1435_v48 = vld [vmem:[%s14438_s1 + $0x7c0] sm:$0xff]  ;;  %v529_v49 = vld [vmem:[%s14437_s0 + $0x770] sm:$0xff] }
  0x65   : > { %v7174_v44 = vpack.c.bf16 %v3210_v32, %v3203_v31  ;;  %4073 = vmatprep.mubr.f32.mxu0 %v3884_v29  ;;  %4712 = vmatmul.mubr.f32.vlgmr.msra.gmra.mrb[0].mxu1 %v3875_v7  ;;  %v3218_v50 = vmax.f32 %v2322_v41, 0.0  ;;  %v2324_v51 = vadd.f32 %v1428_v47, %v532_v42  ;;  %v2331_v52 = vadd.f32 %v1435_v48, %v539_v43  ;;  %v536_v53 = vld [vmem:[%s14437_s0 + $0x7a8] sm:$0xff]  ;;  %v1425_v54 = vld [vmem:[%s14438_s1 + $0x770] sm:$0xff]  ;;  %v531_v60 = vld [vmem:[%s14437_s0 + $0x780] sm:$0xff] }
  0x66   : > { %7429 = vmatprep.subr.bf16.mxu1 %v7428_v38  ;;  %v1432_v55 = vld [vmem:[%s14438_s1 + $0x7a8] sm:$0xff]  ;;  %v7430_v56 = vpack.c.bf16 %v3212_v45, %v3205_v39  ;;  %4717 = vmatprep.mubr.f32.mxu1 %v3884_v29  ;;  %v3225_v57 = vmax.f32 %v2329_v46, 0.0  ;;  %v2321_v58 = vadd.f32 %v1425_v54, %v529_v49  ;;  %v538_v61 = vld [vmem:[%s14437_s0 + $0x7b8] sm:$0xff]  ;;  %v1427_v62 = vld [vmem:[%s14438_s1 + $0x780] sm:$0xff] }
  0x67   : > { %7175 = vmatpush1.bf16.msra.mxu0 %v7174_v44  ;;  %v2328_v59 = vadd.f32 %v1432_v55, %v536_v53  ;;  %v3220_v63 = vmax.f32 %v2324_v51, 0.0  ;;  %v3227_v0 = vmax.f32 %v2331_v52, 0.0  ;;  %v1434_v1 = vld [vmem:[%s14438_s1 + $0x7b8] sm:$0xff]  ;;  %v2323_v2 = vadd.f32 %v1427_v62, %v531_v60  ;;  %v3892_v3 = vld [vmem:[%s9273_s11 + $0x88] sm:$0xff]  ;;  %v3891_v4 = vld [vmem:[%s9273_s11 + $0x80] sm:$0xff] }
  0x68   : > { %4074 = vmatmul.mubr.f32.gmra.mrb[2].mxu0 %v3883_v34  ;;  %7431 = vmatpush1.bf16.msra.mxu1 %v7430_v56  ;;  %v7176_v5 = vpack.c.bf16 %v3225_v57, %v3218_v50  ;;  %v3217_v6 = vmax.f32 %v2321_v58, 0.0  ;;  %v2330_v8 = vadd.f32 %v1434_v1, %v538_v61  ;;  %v544_v9 = vld [vmem:[%s14437_s0 + $0x7e8] sm:$0xff]  ;;  %v551_v10 = vld [vmem:[%s14437_s0 + $0x820] sm:$0xff]  ;;  %v546_v16 = vld [vmem:[%s14437_s0 + $0x7f8] sm:$0xff] }
  0x69   : > { %v3224_v7 = vmax.f32 %v2328_v59, 0.0  ;;  %4079 = vmatprep.mubr.f32.mxu0 %v3892_v3  ;;  %v1440_v11 = vld [vmem:[%s14438_s1 + $0x7e8] sm:$0xff]  ;;  %4718 = vmatmul.mubr.f32.gmra.mrb[2].mxu1 %v3883_v34  ;;  %v7432_v12 = vpack.c.bf16 %v3227_v0, %v3220_v63  ;;  %v3219_v13 = vmax.f32 %v2323_v2, 0.0  ;;  %v1447_v14 = vld [vmem:[%s14438_s1 + $0x820] sm:$0xff]  ;;  %v553_v17 = vld [vmem:[%s14437_s0 + $0x830] sm:$0xff] }
  0x6a   : > { %v2336_v15 = vadd.f32 %v1440_v11, %v544_v9  ;;  %7177 = vmatprep.subr.bf16.mxu0 %v7176_v5  ;;  %v3226_v19 = vmax.f32 %v2330_v8, 0.0  ;;  %4723 = vmatprep.mubr.f32.mxu1 %v3892_v3  ;;  %v2343_v20 = vadd.f32 %v1447_v14, %v551_v10  ;;  %v1442_v21 = vld [vmem:[%s14438_s1 + $0x7f8] sm:$0xff]  ;;  %v1449_v22 = vld [vmem:[%s14438_s1 + $0x830] sm:$0xff]  ;;  %v543_v23 = vld [vmem:[%s14437_s0 + $0x7e0] sm:$0xff] }
  0x6b   : > { %v7178_v18 = vpack.c.bf16 %v3224_v7, %v3217_v6  ;;  %7433 = vmatprep.subr.bf16.mxu1 %v7432_v12  ;;  %v2338_v25 = vadd.f32 %v1442_v21, %v546_v16  ;;  %v2345_v26 = vadd.f32 %v1449_v22, %v553_v17  ;;  %v550_v27 = vld [vmem:[%s14437_s0 + $0x818] sm:$0xff]  ;;  %v1439_v28 = vld [vmem:[%s14438_s1 + $0x7e0] sm:$0xff]  ;;  %v545_v34 = vld [vmem:[%s14437_s0 + $0x7f0] sm:$0xff] }
  0x6c   : > { %4080 = vmatmul.mubr.f32.gmra.mrb[4].mxu0 %v3891_v4  ;;  %v3232_v24 = vmax.f32 %v2336_v15, 0.0  ;;  %v1446_v29 = vld [vmem:[%s14438_s1 + $0x818] sm:$0xff]  ;;  %v7434_v30 = vpack.c.bf16 %v3226_v19, %v3219_v13  ;;  %v3239_v31 = vmax.f32 %v2343_v20, 0.0  ;;  %v2335_v32 = vadd.f32 %v1439_v28, %v543_v23  ;;  %v552_v35 = vld [vmem:[%s14437_s0 + $0x828] sm:$0xff]  ;;  %v1441_v36 = vld [vmem:[%s14438_s1 + $0x7f0] sm:$0xff] }
  0x6d   : > { %7179 = vmatpush1.bf16.msra.mxu0 %v7178_v18  ;;  %v2342_v33 = vadd.f32 %v1446_v29, %v550_v27  ;;  %4724 = vmatmul.mubr.f32.gmra.mrb[4].mxu1 %v3891_v4  ;;  %v3234_v37 = vmax.f32 %v2338_v25, 0.0  ;;  %v3241_v38 = vmax.f32 %v2345_v26, 0.0  ;;  %v1448_v39 = vld [vmem:[%s14438_s1 + $0x828] sm:$0xff]  ;;  %v2337_v40 = vadd.f32 %v1441_v36, %v545_v34  ;;  %v3899_v42 = vld [vmem:[%s9273_s11 + $0xc0] sm:$0xff]  ;;  %v558_v47 = vld [vmem:[%s14437_s0 + $0x858] sm:$0xff] }
  0x6e   : > { %v3900_v41 = vld [vmem:[%s9273_s11 + $0xc8] sm:$0xff]  ;;  %7435 = vmatpush1.bf16.msra.mxu1 %v7434_v30  ;;  %v7180_v43 = vpack.c.bf16 %v3239_v31, %v3232_v24  ;;  %v3231_v44 = vmax.f32 %v2335_v32, 0.0  ;;  %v2344_v46 = vadd.f32 %v1448_v39, %v552_v35  ;;  %v565_v48 = vld [vmem:[%s14437_s0 + $0x890] sm:$0xff]  ;;  %v1454_v49 = vld [vmem:[%s14438_s1 + $0x858] sm:$0xff] }
  0x6f   : > { %v3238_v45 = vmax.f32 %v2342_v33, 0.0  ;;  %4085 = vmatprep.mubr.f32.mxu0 %v3900_v41  ;;  %v7436_v50 = vpack.c.bf16 %v3241_v38, %v3234_v37  ;;  %v3233_v51 = vmax.f32 %v2337_v40, 0.0  ;;  %4729 = vmatprep.mubr.f32.mxu1 %v3900_v41  ;;  %v1461_v52 = vld [vmem:[%s14438_s1 + $0x890] sm:$0xff]  ;;  %v2350_v53 = vadd.f32 %v1454_v49, %v558_v47  ;;  %v560_v54 = vld [vmem:[%s14437_s0 + $0x868] sm:$0xff]  ;;  %v567_v55 = vld [vmem:[%s14437_s0 + $0x8a0] sm:$0xff] }
  0x70   : > { %4086 = vmatmul.mubr.f32.gmra.mrb[6].mxu0 %v3899_v42  ;;  %7181 = vmatprep.subr.bf16.mxu0 %v7180_v43  ;;  %v3240_v57 = vmax.f32 %v2344_v46, 0.0  ;;  %v2357_v58 = vadd.f32 %v1461_v52, %v565_v48  ;;  %v1456_v59 = vld [vmem:[%s14438_s1 + $0x868] sm:$0xff]  ;;  %v1463_v60 = vld [vmem:[%s14438_s1 + $0x8a0] sm:$0xff]  ;;  %v557_v61 = vld [vmem:[%s14437_s0 + $0x850] sm:$0xff] }
  0x71   : > { %v7182_v56 = vpack.c.bf16 %v3238_v45, %v3231_v44  ;;  %7437 = vmatprep.subr.bf16.mxu1 %v7436_v50  ;;  %v3246_v62 = vmax.f32 %v2350_v53, 0.0  ;;  %4730 = vmatmul.mubr.f32.gmra.mrb[6].mxu1 %v3899_v42  ;;  %v2352_v63 = vadd.f32 %v1456_v59, %v560_v54  ;;  %v2359_v0 = vadd.f32 %v1463_v60, %v567_v55  ;;  %v564_v1 = vld [vmem:[%s14437_s0 + $0x888] sm:$0xff]  ;;  %v1453_v2 = vld [vmem:[%s14438_s1 + $0x850] sm:$0xff]  ;;  %v559_v8 = vld [vmem:[%s14437_s0 + $0x860] sm:$0xff] }
  0x72   : > { %v1460_v3 = vld [vmem:[%s14438_s1 + $0x888] sm:$0xff]  ;;  %v7438_v4 = vpack.c.bf16 %v3240_v57, %v3233_v51  ;;  %v3253_v5 = vmax.f32 %v2357_v58, 0.0  ;;  %v2349_v6 = vadd.f32 %v1453_v2, %v557_v61  ;;  %v566_v9 = vld [vmem:[%s14437_s0 + $0x898] sm:$0xff]  ;;  %v1455_v10 = vld [vmem:[%s14438_s1 + $0x860] sm:$0xff] }
  0x73   : > { %7183 = vmatpush1.bf16.msra.mxu0 %v7182_v56  ;;  %v2356_v7 = vadd.f32 %v1460_v3, %v564_v1  ;;  %v3248_v11 = vmax.f32 %v2352_v63, 0.0  ;;  %v3255_v12 = vmax.f32 %v2359_v0, 0.0  ;;  %v1462_v13 = vld [vmem:[%s14438_s1 + $0x898] sm:$0xff]  ;;  %v2351_v14 = vadd.f32 %v1455_v10, %v559_v8  ;;  %v3908_v15 = vld [vmem:[%s9273_s11 + $0x108] sm:$0xff]  ;;  %v3907_v16 = vld [vmem:[%s9273_s11 + $0x100] sm:$0xff] }
  0x74   : > { %7439 = vmatpush1.bf16.msra.mxu1 %v7438_v4  ;;  %v7184_v17 = vpack.c.bf16 %v3253_v5, %v3246_v62  ;;  %v3245_v18 = vmax.f32 %v2349_v6, 0.0  ;;  %v2358_v20 = vadd.f32 %v1462_v13, %v566_v9  ;;  %4091 = vmatprep.mubr.f32.mxu0 %v3908_v15  ;;  %v572_v21 = vld [vmem:[%s14437_s0 + $0x8c8] sm:$0xff]  ;;  %v579_v22 = vld [vmem:[%s14437_s0 + $0x900] sm:$0xff]  ;;  %v574_v28 = vld [vmem:[%s14437_s0 + $0x8d8] sm:$0xff] }
  0x75   : > { %v3252_v19 = vmax.f32 %v2356_v7, 0.0  ;;  %v1468_v23 = vld [vmem:[%s14438_s1 + $0x8c8] sm:$0xff]  ;;  %v7440_v24 = vpack.c.bf16 %v3255_v12, %v3248_v11  ;;  %v3247_v25 = vmax.f32 %v2351_v14, 0.0  ;;  %4735 = vmatprep.mubr.f32.mxu1 %v3908_v15  ;;  %4092 = vmatmul.mubr.f32.gmra.mrb[8].mxu0 %v3907_v16  ;;  %v1475_v26 = vld [vmem:[%s14438_s1 + $0x900] sm:$0xff]  ;;  %v581_v29 = vld [vmem:[%s14437_s0 + $0x910] sm:$0xff] }
  0x76   : > { %v2364_v27 = vadd.f32 %v1468_v23, %v572_v21  ;;  %7185 = vmatprep.subr.bf16.mxu0 %v7184_v17  ;;  %v3254_v31 = vmax.f32 %v2358_v20, 0.0  ;;  %v2371_v32 = vadd.f32 %v1475_v26, %v579_v22  ;;  %4736 = vmatmul.mubr.f32.gmra.mrb[8].mxu1 %v3907_v16  ;;  %v1470_v33 = vld [vmem:[%s14438_s1 + $0x8d8] sm:$0xff]  ;;  %v1477_v34 = vld [vmem:[%s14438_s1 + $0x910] sm:$0xff]  ;;  %v571_v35 = vld [vmem:[%s14437_s0 + $0x8c0] sm:$0xff] }
  0x77   : > { %v7186_v30 = vpack.c.bf16 %v3252_v19, %v3245_v18  ;;  %7441 = vmatprep.subr.bf16.mxu1 %v7440_v24  ;;  %v2366_v37 = vadd.f32 %v1470_v33, %v574_v28  ;;  %v2373_v38 = vadd.f32 %v1477_v34, %v581_v29  ;;  %v578_v39 = vld [vmem:[%s14437_s0 + $0x8f8] sm:$0xff]  ;;  %v1467_v40 = vld [vmem:[%s14438_s1 + $0x8c0] sm:$0xff]  ;;  %v573_v46 = vld [vmem:[%s14437_s0 + $0x8d0] sm:$0xff] }
  0x78   : > { %v3260_v36 = vmax.f32 %v2364_v27, 0.0  ;;  %v1474_v41 = vld [vmem:[%s14438_s1 + $0x8f8] sm:$0xff]  ;;  %v7442_v42 = vpack.c.bf16 %v3254_v31, %v3247_v25  ;;  %v3267_v43 = vmax.f32 %v2371_v32, 0.0  ;;  %v2363_v44 = vadd.f32 %v1467_v40, %v571_v35  ;;  %v580_v47 = vld [vmem:[%s14437_s0 + $0x908] sm:$0xff]  ;;  %v1469_v48 = vld [vmem:[%s14438_s1 + $0x8d0] sm:$0xff] }
  0x79   : > { %7187 = vmatpush1.bf16.msra.mxu0 %v7186_v30  ;;  %v2370_v45 = vadd.f32 %v1474_v41, %v578_v39  ;;  %v3262_v49 = vmax.f32 %v2366_v37, 0.0  ;;  %v3269_v50 = vmax.f32 %v2373_v38, 0.0  ;;  %v1476_v51 = vld [vmem:[%s14438_s1 + $0x908] sm:$0xff]  ;;  %v2365_v52 = vadd.f32 %v1469_v48, %v573_v46  ;;  %v3915_v54 = vld [vmem:[%s9273_s11 + $0x140] sm:$0xff]  ;;  %v586_v59 = vld [vmem:[%s14437_s0 + $0x938] sm:$0xff] }
  0x7a   : > { %v3916_v53 = vld [vmem:[%s9273_s11 + $0x148] sm:$0xff]  ;;  %7443 = vmatpush1.bf16.msra.mxu1 %v7442_v42  ;;  %v7188_v55 = vpack.c.bf16 %v3267_v43, %v3260_v36  ;;  %v3259_v56 = vmax.f32 %v2363_v44, 0.0  ;;  %v2372_v58 = vadd.f32 %v1476_v51, %v580_v47  ;;  %v593_v60 = vld [vmem:[%s14437_s0 + $0x970] sm:$0xff]  ;;  %v1482_v61 = vld [vmem:[%s14438_s1 + $0x938] sm:$0xff] }
  0x7b   : > { %v3266_v57 = vmax.f32 %v2370_v45, 0.0  ;;  %4097 = vmatprep.mubr.f32.mxu0 %v3916_v53  ;;  %v7444_v62 = vpack.c.bf16 %v3269_v50, %v3262_v49  ;;  %v3261_v63 = vmax.f32 %v2365_v52, 0.0  ;;  %4741 = vmatprep.mubr.f32.mxu1 %v3916_v53  ;;  %v1489_v0 = vld [vmem:[%s14438_s1 + $0x970] sm:$0xff]  ;;  %v2378_v1 = vadd.f32 %v1482_v61, %v586_v59  ;;  %v588_v2 = vld [vmem:[%s14437_s0 + $0x948] sm:$0xff]  ;;  %v595_v3 = vld [vmem:[%s14437_s0 + $0x980] sm:$0xff] }
  0x7c   : > { %4098 = vmatmul.mubr.f32.gmra.mrb[10].mxu0 %v3915_v54  ;;  %7189 = vmatprep.subr.bf16.mxu0 %v7188_v55  ;;  %v3268_v5 = vmax.f32 %v2372_v58, 0.0  ;;  %v2385_v6 = vadd.f32 %v1489_v0, %v593_v60  ;;  %v1484_v7 = vld [vmem:[%s14438_s1 + $0x948] sm:$0xff]  ;;  %v1491_v8 = vld [vmem:[%s14438_s1 + $0x980] sm:$0xff]  ;;  %v585_v9 = vld [vmem:[%s14437_s0 + $0x930] sm:$0xff] }
  0x7d   : > { %v7190_v4 = vpack.c.bf16 %v3266_v57, %v3259_v56  ;;  %4742 = vmatmul.mubr.f32.gmra.mrb[10].mxu1 %v3915_v54  ;;  %7445 = vmatprep.subr.bf16.mxu1 %v7444_v62  ;;  %v3274_v10 = vmax.f32 %v2378_v1, 0.0  ;;  %v2380_v11 = vadd.f32 %v1484_v7, %v588_v2  ;;  %v2387_v12 = vadd.f32 %v1491_v8, %v595_v3  ;;  %v592_v13 = vld [vmem:[%s14437_s0 + $0x968] sm:$0xff]  ;;  %v1481_v14 = vld [vmem:[%s14438_s1 + $0x930] sm:$0xff]  ;;  %v587_v20 = vld [vmem:[%s14437_s0 + $0x940] sm:$0xff] }
  0x7e   : > { %v1488_v15 = vld [vmem:[%s14438_s1 + $0x968] sm:$0xff]  ;;  %v7446_v16 = vpack.c.bf16 %v3268_v5, %v3261_v63  ;;  %v3281_v17 = vmax.f32 %v2385_v6, 0.0  ;;  %v2377_v18 = vadd.f32 %v1481_v14, %v585_v9  ;;  %v594_v21 = vld [vmem:[%s14437_s0 + $0x978] sm:$0xff]  ;;  %v1483_v22 = vld [vmem:[%s14438_s1 + $0x940] sm:$0xff] }
  0x7f   : > { %7191 = vmatpush1.bf16.msra.mxu0 %v7190_v4  ;;  %v2384_v19 = vadd.f32 %v1488_v15, %v592_v13  ;;  %v3276_v23 = vmax.f32 %v2380_v11, 0.0  ;;  %v3283_v24 = vmax.f32 %v2387_v12, 0.0  ;;  %v1490_v25 = vld [vmem:[%s14438_s1 + $0x978] sm:$0xff]  ;;  %v2379_v26 = vadd.f32 %v1483_v22, %v587_v20  ;;  %v3924_v27 = vld [vmem:[%s9273_s11 + $0x188] sm:$0xff]  ;;  %v3923_v28 = vld [vmem:[%s9273_s11 + $0x180] sm:$0xff] }
  0x80   : > { %7447 = vmatpush1.bf16.msra.mxu1 %v7446_v16  ;;  %v7192_v29 = vpack.c.bf16 %v3281_v17, %v3274_v10  ;;  %v3273_v30 = vmax.f32 %v2377_v18, 0.0  ;;  %v2386_v32 = vadd.f32 %v1490_v25, %v594_v21  ;;  %4103 = vmatprep.mubr.f32.mxu0 %v3924_v27  ;;  %v600_v33 = vld [vmem:[%s14437_s0 + $0x9a8] sm:$0xff]  ;;  %v607_v34 = vld [vmem:[%s14437_s0 + $0x9e0] sm:$0xff]  ;;  %v602_v40 = vld [vmem:[%s14437_s0 + $0x9b8] sm:$0xff] }
  0x81   : > { %v3280_v31 = vmax.f32 %v2384_v19, 0.0  ;;  %v1496_v35 = vld [vmem:[%s14438_s1 + $0x9a8] sm:$0xff]  ;;  %v7448_v36 = vpack.c.bf16 %v3283_v24, %v3276_v23  ;;  %v3275_v37 = vmax.f32 %v2379_v26, 0.0  ;;  %4747 = vmatprep.mubr.f32.mxu1 %v3924_v27  ;;  %4104 = vmatmul.mubr.f32.gmra.mrb[12].mxu0 %v3923_v28  ;;  %v1503_v38 = vld [vmem:[%s14438_s1 + $0x9e0] sm:$0xff]  ;;  %v609_v41 = vld [vmem:[%s14437_s0 + $0x9f0] sm:$0xff] }
  0x82   : > { %v2392_v39 = vadd.f32 %v1496_v35, %v600_v33  ;;  %7193 = vmatprep.subr.bf16.mxu0 %v7192_v29  ;;  %v3282_v43 = vmax.f32 %v2386_v32, 0.0  ;;  %v2399_v44 = vadd.f32 %v1503_v38, %v607_v34  ;;  %4748 = vmatmul.mubr.f32.gmra.mrb[12].mxu1 %v3923_v28  ;;  %v1498_v45 = vld [vmem:[%s14438_s1 + $0x9b8] sm:$0xff]  ;;  %v1505_v46 = vld [vmem:[%s14438_s1 + $0x9f0] sm:$0xff]  ;;  %v599_v47 = vld [vmem:[%s14437_s0 + $0x9a0] sm:$0xff] }
  0x83   : > { %v7194_v42 = vpack.c.bf16 %v3280_v31, %v3273_v30  ;;  %7449 = vmatprep.subr.bf16.mxu1 %v7448_v36  ;;  %v2394_v49 = vadd.f32 %v1498_v45, %v602_v40  ;;  %v2401_v50 = vadd.f32 %v1505_v46, %v609_v41  ;;  %v606_v51 = vld [vmem:[%s14437_s0 + $0x9d8] sm:$0xff]  ;;  %v1495_v52 = vld [vmem:[%s14438_s1 + $0x9a0] sm:$0xff]  ;;  %v601_v58 = vld [vmem:[%s14437_s0 + $0x9b0] sm:$0xff] }
  0x84   : > { %v3288_v48 = vmax.f32 %v2392_v39, 0.0  ;;  %v1502_v53 = vld [vmem:[%s14438_s1 + $0x9d8] sm:$0xff]  ;;  %v7450_v54 = vpack.c.bf16 %v3282_v43, %v3275_v37  ;;  %v3295_v55 = vmax.f32 %v2399_v44, 0.0  ;;  %v2391_v56 = vadd.f32 %v1495_v52, %v599_v47  ;;  %v608_v59 = vld [vmem:[%s14437_s0 + $0x9e8] sm:$0xff]  ;;  %v1497_v60 = vld [vmem:[%s14438_s1 + $0x9b0] sm:$0xff] }
  0x85   : > { %7195 = vmatpush1.bf16.msra.mxu0 %v7194_v42  ;;  %v2398_v57 = vadd.f32 %v1502_v53, %v606_v51  ;;  %v3290_v61 = vmax.f32 %v2394_v49, 0.0  ;;  %v3297_v62 = vmax.f32 %v2401_v50, 0.0  ;;  %v1504_v63 = vld [vmem:[%s14438_s1 + $0x9e8] sm:$0xff]  ;;  %v2393_v0 = vadd.f32 %v1497_v60, %v601_v58  ;;  %v3931_v2 = vld [vmem:[%s9273_s11 + $0x1c0] sm:$0xff]  ;;  %v614_v7 = vld [vmem:[%s14437_s0 + $0xa18] sm:$0xff] }
  0x86   : > { %v3932_v1 = vld [vmem:[%s9273_s11 + $0x1c8] sm:$0xff]  ;;  %7451 = vmatpush1.bf16.msra.mxu1 %v7450_v54  ;;  %v7196_v3 = vpack.c.bf16 %v3295_v55, %v3288_v48  ;;  %v3287_v4 = vmax.f32 %v2391_v56, 0.0  ;;  %v2400_v6 = vadd.f32 %v1504_v63, %v608_v59  ;;  %v621_v8 = vld [vmem:[%s14437_s0 + $0xa50] sm:$0xff]  ;;  %v1510_v9 = vld [vmem:[%s14438_s1 + $0xa18] sm:$0xff] }
  0x87   : > { %v3294_v5 = vmax.f32 %v2398_v57, 0.0  ;;  %4109 = vmatprep.mubr.f32.mxu0 %v3932_v1  ;;  %v7452_v10 = vpack.c.bf16 %v3297_v62, %v3290_v61  ;;  %v3289_v11 = vmax.f32 %v2393_v0, 0.0  ;;  %4753 = vmatprep.mubr.f32.mxu1 %v3932_v1  ;;  %v1517_v12 = vld [vmem:[%s14438_s1 + $0xa50] sm:$0xff]  ;;  %v2406_v13 = vadd.f32 %v1510_v9, %v614_v7  ;;  %v616_v14 = vld [vmem:[%s14437_s0 + $0xa28] sm:$0xff]  ;;  %v623_v15 = vld [vmem:[%s14437_s0 + $0xa60] sm:$0xff] }
  0x88   : > { %4110 = vmatmul.mubr.f32.gmra.mrb[14].mxu0 %v3931_v2  ;;  %7197 = vmatprep.subr.bf16.mxu0 %v7196_v3  ;;  %v3296_v17 = vmax.f32 %v2400_v6, 0.0  ;;  %v2413_v18 = vadd.f32 %v1517_v12, %v621_v8  ;;  %v1512_v19 = vld [vmem:[%s14438_s1 + $0xa28] sm:$0xff]  ;;  %v1519_v20 = vld [vmem:[%s14438_s1 + $0xa60] sm:$0xff]  ;;  %v613_v21 = vld [vmem:[%s14437_s0 + $0xa10] sm:$0xff] }
  0x89   : > { %v7198_v16 = vpack.c.bf16 %v3294_v5, %v3287_v4  ;;  %4754 = vmatmul.mubr.f32.gmra.mrb[14].mxu1 %v3931_v2  ;;  %7453 = vmatprep.subr.bf16.mxu1 %v7452_v10  ;;  %v3302_v22 = vmax.f32 %v2406_v13, 0.0  ;;  %v2408_v23 = vadd.f32 %v1512_v19, %v616_v14  ;;  %v2415_v24 = vadd.f32 %v1519_v20, %v623_v15  ;;  %v620_v25 = vld [vmem:[%s14437_s0 + $0xa48] sm:$0xff]  ;;  %v1509_v26 = vld [vmem:[%s14438_s1 + $0xa10] sm:$0xff]  ;;  %v615_v32 = vld [vmem:[%s14437_s0 + $0xa20] sm:$0xff] }
  0x8a   : > { %v1516_v27 = vld [vmem:[%s14438_s1 + $0xa48] sm:$0xff]  ;;  %v7454_v28 = vpack.c.bf16 %v3296_v17, %v3289_v11  ;;  %v3309_v29 = vmax.f32 %v2413_v18, 0.0  ;;  %v2405_v30 = vadd.f32 %v1509_v26, %v613_v21  ;;  %v622_v33 = vld [vmem:[%s14437_s0 + $0xa58] sm:$0xff]  ;;  %v1511_v34 = vld [vmem:[%s14438_s1 + $0xa20] sm:$0xff] }
  0x8b   : > { %7199 = vmatpush1.bf16.msra.mxu0 %v7198_v16  ;;  %v2412_v31 = vadd.f32 %v1516_v27, %v620_v25  ;;  %v3304_v35 = vmax.f32 %v2408_v23, 0.0  ;;  %v3311_v36 = vmax.f32 %v2415_v24, 0.0  ;;  %v1518_v37 = vld [vmem:[%s14438_s1 + $0xa58] sm:$0xff]  ;;  %v2407_v38 = vadd.f32 %v1511_v34, %v615_v32  ;;  %v3940_v39 = vld [vmem:[%s9273_s11 + $0x208] sm:$0xff]  ;;  %v3939_v40 = vld [vmem:[%s9273_s11 + $0x200] sm:$0xff] }
  0x8c   : > { %7455 = vmatpush1.bf16.msra.mxu1 %v7454_v28  ;;  %v7200_v41 = vpack.c.bf16 %v3309_v29, %v3302_v22  ;;  %v3301_v42 = vmax.f32 %v2405_v30, 0.0  ;;  %v2414_v44 = vadd.f32 %v1518_v37, %v622_v33  ;;  %4115 = vmatprep.mubr.f32.mxu0 %v3940_v39  ;;  %v628_v45 = vld [vmem:[%s14437_s0 + $0xa88] sm:$0xff]  ;;  %v635_v46 = vld [vmem:[%s14437_s0 + $0xac0] sm:$0xff]  ;;  %v630_v52 = vld [vmem:[%s14437_s0 + $0xa98] sm:$0xff] }
  0x8d   : > { %v3308_v43 = vmax.f32 %v2412_v31, 0.0  ;;  %v1524_v47 = vld [vmem:[%s14438_s1 + $0xa88] sm:$0xff]  ;;  %v7456_v48 = vpack.c.bf16 %v3311_v36, %v3304_v35  ;;  %v3303_v49 = vmax.f32 %v2407_v38, 0.0  ;;  %4759 = vmatprep.mubr.f32.mxu1 %v3940_v39  ;;  %4116 = vmatmul.mubr.f32.gmra.mrb[16].mxu0 %v3939_v40  ;;  %v1531_v50 = vld [vmem:[%s14438_s1 + $0xac0] sm:$0xff]  ;;  %v637_v53 = vld [vmem:[%s14437_s0 + $0xad0] sm:$0xff] }
  0x8e   : > { %v2420_v51 = vadd.f32 %v1524_v47, %v628_v45  ;;  %7201 = vmatprep.subr.bf16.mxu0 %v7200_v41  ;;  %v3310_v55 = vmax.f32 %v2414_v44, 0.0  ;;  %v2427_v56 = vadd.f32 %v1531_v50, %v635_v46  ;;  %4760 = vmatmul.mubr.f32.gmra.mrb[16].mxu1 %v3939_v40  ;;  %v1526_v57 = vld [vmem:[%s14438_s1 + $0xa98] sm:$0xff]  ;;  %v1533_v58 = vld [vmem:[%s14438_s1 + $0xad0] sm:$0xff]  ;;  %v627_v59 = vld [vmem:[%s14437_s0 + $0xa80] sm:$0xff] }
  0x8f   : > { %v7202_v54 = vpack.c.bf16 %v3308_v43, %v3301_v42  ;;  %7457 = vmatprep.subr.bf16.mxu1 %v7456_v48  ;;  %v2422_v61 = vadd.f32 %v1526_v57, %v630_v52  ;;  %v2429_v62 = vadd.f32 %v1533_v58, %v637_v53  ;;  %v634_v63 = vld [vmem:[%s14437_s0 + $0xab8] sm:$0xff]  ;;  %v1523_v0 = vld [vmem:[%s14438_s1 + $0xa80] sm:$0xff]  ;;  %v629_v6 = vld [vmem:[%s14437_s0 + $0xa90] sm:$0xff] }
  0x90   : > { %v3316_v60 = vmax.f32 %v2420_v51, 0.0  ;;  %v1530_v1 = vld [vmem:[%s14438_s1 + $0xab8] sm:$0xff]  ;;  %v7458_v2 = vpack.c.bf16 %v3310_v55, %v3303_v49  ;;  %v3323_v3 = vmax.f32 %v2427_v56, 0.0  ;;  %v2419_v4 = vadd.f32 %v1523_v0, %v627_v59  ;;  %v636_v7 = vld [vmem:[%s14437_s0 + $0xac8] sm:$0xff]  ;;  %v1525_v8 = vld [vmem:[%s14438_s1 + $0xa90] sm:$0xff] }
  0x91   : > { %7203 = vmatpush1.bf16.msra.mxu0 %v7202_v54  ;;  %v2426_v5 = vadd.f32 %v1530_v1, %v634_v63  ;;  %v3318_v9 = vmax.f32 %v2422_v61, 0.0  ;;  %v3325_v10 = vmax.f32 %v2429_v62, 0.0  ;;  %v1532_v11 = vld [vmem:[%s14438_s1 + $0xac8] sm:$0xff]  ;;  %v2421_v12 = vadd.f32 %v1525_v8, %v629_v6  ;;  %v3947_v14 = vld [vmem:[%s9273_s11 + $0x240] sm:$0xff]  ;;  %v642_v19 = vld [vmem:[%s14437_s0 + $0xaf8] sm:$0xff] }
  0x92   : > { %v3948_v13 = vld [vmem:[%s9273_s11 + $0x248] sm:$0xff]  ;;  %7459 = vmatpush1.bf16.msra.mxu1 %v7458_v2  ;;  %v7204_v15 = vpack.c.bf16 %v3323_v3, %v3316_v60  ;;  %v3315_v16 = vmax.f32 %v2419_v4, 0.0  ;;  %v2428_v18 = vadd.f32 %v1532_v11, %v636_v7  ;;  %v649_v20 = vld [vmem:[%s14437_s0 + $0xb30] sm:$0xff]  ;;  %v1538_v21 = vld [vmem:[%s14438_s1 + $0xaf8] sm:$0xff] }
  0x93   : > { %v3322_v17 = vmax.f32 %v2426_v5, 0.0  ;;  %4121 = vmatprep.mubr.f32.mxu0 %v3948_v13  ;;  %v7460_v22 = vpack.c.bf16 %v3325_v10, %v3318_v9  ;;  %v3317_v23 = vmax.f32 %v2421_v12, 0.0  ;;  %4765 = vmatprep.mubr.f32.mxu1 %v3948_v13  ;;  %v1545_v24 = vld [vmem:[%s14438_s1 + $0xb30] sm:$0xff]  ;;  %v2434_v25 = vadd.f32 %v1538_v21, %v642_v19  ;;  %v644_v26 = vld [vmem:[%s14437_s0 + $0xb08] sm:$0xff]  ;;  %v651_v27 = vld [vmem:[%s14437_s0 + $0xb40] sm:$0xff] }
  0x94   : > { %4122 = vmatmul.mubr.f32.gmra.mrb[18].mxu0 %v3947_v14  ;;  %7205 = vmatprep.subr.bf16.mxu0 %v7204_v15  ;;  %v3324_v29 = vmax.f32 %v2428_v18, 0.0  ;;  %v2441_v30 = vadd.f32 %v1545_v24, %v649_v20  ;;  %v1540_v31 = vld [vmem:[%s14438_s1 + $0xb08] sm:$0xff]  ;;  %v1547_v32 = vld [vmem:[%s14438_s1 + $0xb40] sm:$0xff]  ;;  %v641_v33 = vld [vmem:[%s14437_s0 + $0xaf0] sm:$0xff] }
  0x95   : > { %v7206_v28 = vpack.c.bf16 %v3322_v17, %v3315_v16  ;;  %4766 = vmatmul.mubr.f32.gmra.mrb[18].mxu1 %v3947_v14  ;;  %7461 = vmatprep.subr.bf16.mxu1 %v7460_v22  ;;  %v3330_v34 = vmax.f32 %v2434_v25, 0.0  ;;  %v2436_v35 = vadd.f32 %v1540_v31, %v644_v26  ;;  %v2443_v36 = vadd.f32 %v1547_v32, %v651_v27  ;;  %v648_v37 = vld [vmem:[%s14437_s0 + $0xb28] sm:$0xff]  ;;  %v1537_v38 = vld [vmem:[%s14438_s1 + $0xaf0] sm:$0xff]  ;;  %v643_v44 = vld [vmem:[%s14437_s0 + $0xb00] sm:$0xff] }
  0x96   : > { %v1544_v39 = vld [vmem:[%s14438_s1 + $0xb28] sm:$0xff]  ;;  %v7462_v40 = vpack.c.bf16 %v3324_v29, %v3317_v23  ;;  %v3337_v41 = vmax.f32 %v2441_v30, 0.0  ;;  %v2433_v42 = vadd.f32 %v1537_v38, %v641_v33  ;;  %v650_v45 = vld [vmem:[%s14437_s0 + $0xb38] sm:$0xff]  ;;  %v1539_v46 = vld [vmem:[%s14438_s1 + $0xb00] sm:$0xff] }
  0x97   : > { %7207 = vmatpush1.bf16.msra.mxu0 %v7206_v28  ;;  %v2440_v43 = vadd.f32 %v1544_v39, %v648_v37  ;;  %v3332_v47 = vmax.f32 %v2436_v35, 0.0  ;;  %v3339_v48 = vmax.f32 %v2443_v36, 0.0  ;;  %v1546_v49 = vld [vmem:[%s14438_s1 + $0xb38] sm:$0xff]  ;;  %v2435_v50 = vadd.f32 %v1539_v46, %v643_v44  ;;  %v3956_v51 = vld [vmem:[%s9273_s11 + $0x288] sm:$0xff]  ;;  %v3955_v52 = vld [vmem:[%s9273_s11 + $0x280] sm:$0xff] }
  0x98   : > { %7463 = vmatpush1.bf16.msra.mxu1 %v7462_v40  ;;  %v7208_v53 = vpack.c.bf16 %v3337_v41, %v3330_v34  ;;  %v3329_v54 = vmax.f32 %v2433_v42, 0.0  ;;  %v2442_v56 = vadd.f32 %v1546_v49, %v650_v45  ;;  %4127 = vmatprep.mubr.f32.mxu0 %v3956_v51  ;;  %v656_v57 = vld [vmem:[%s14437_s0 + $0xb68] sm:$0xff]  ;;  %v663_v58 = vld [vmem:[%s14437_s0 + $0xba0] sm:$0xff]  ;;  %v658_v0 = vld [vmem:[%s14437_s0 + $0xb78] sm:$0xff] }
  0x99   : > { %v3336_v55 = vmax.f32 %v2440_v43, 0.0  ;;  %v1552_v59 = vld [vmem:[%s14438_s1 + $0xb68] sm:$0xff]  ;;  %v7464_v60 = vpack.c.bf16 %v3339_v48, %v3332_v47  ;;  %v3331_v61 = vmax.f32 %v2435_v50, 0.0  ;;  %4771 = vmatprep.mubr.f32.mxu1 %v3956_v51  ;;  %4128 = vmatmul.mubr.f32.gmra.mrb[20].mxu0 %v3955_v52  ;;  %v1559_v62 = vld [vmem:[%s14438_s1 + $0xba0] sm:$0xff]  ;;  %v665_v1 = vld [vmem:[%s14437_s0 + $0xbb0] sm:$0xff] }
  0x9a   : > { %v2448_v63 = vadd.f32 %v1552_v59, %v656_v57  ;;  %7209 = vmatprep.subr.bf16.mxu0 %v7208_v53  ;;  %v3338_v3 = vmax.f32 %v2442_v56, 0.0  ;;  %v2455_v4 = vadd.f32 %v1559_v62, %v663_v58  ;;  %4772 = vmatmul.mubr.f32.gmra.mrb[20].mxu1 %v3955_v52  ;;  %v1554_v5 = vld [vmem:[%s14438_s1 + $0xb78] sm:$0xff]  ;;  %v1561_v6 = vld [vmem:[%s14438_s1 + $0xbb0] sm:$0xff]  ;;  %v655_v7 = vld [vmem:[%s14437_s0 + $0xb60] sm:$0xff] }
  0x9b   : > { %v7210_v2 = vpack.c.bf16 %v3336_v55, %v3329_v54  ;;  %7465 = vmatprep.subr.bf16.mxu1 %v7464_v60  ;;  %v2450_v9 = vadd.f32 %v1554_v5, %v658_v0  ;;  %v2457_v10 = vadd.f32 %v1561_v6, %v665_v1  ;;  %v662_v11 = vld [vmem:[%s14437_s0 + $0xb98] sm:$0xff]  ;;  %v1551_v12 = vld [vmem:[%s14438_s1 + $0xb60] sm:$0xff]  ;;  %v657_v18 = vld [vmem:[%s14437_s0 + $0xb70] sm:$0xff] }
  0x9c   : > { %v3344_v8 = vmax.f32 %v2448_v63, 0.0  ;;  %v1558_v13 = vld [vmem:[%s14438_s1 + $0xb98] sm:$0xff]  ;;  %v7466_v14 = vpack.c.bf16 %v3338_v3, %v3331_v61  ;;  %v3351_v15 = vmax.f32 %v2455_v4, 0.0  ;;  %v2447_v16 = vadd.f32 %v1551_v12, %v655_v7  ;;  %v664_v19 = vld [vmem:[%s14437_s0 + $0xba8] sm:$0xff]  ;;  %v1553_v20 = vld [vmem:[%s14438_s1 + $0xb70] sm:$0xff] }
  0x9d   : > { %7211 = vmatpush1.bf16.msra.mxu0 %v7210_v2  ;;  %v2454_v17 = vadd.f32 %v1558_v13, %v662_v11  ;;  %v3346_v21 = vmax.f32 %v2450_v9, 0.0  ;;  %v3353_v22 = vmax.f32 %v2457_v10, 0.0  ;;  %v1560_v23 = vld [vmem:[%s14438_s1 + $0xba8] sm:$0xff]  ;;  %v2449_v24 = vadd.f32 %v1553_v20, %v657_v18  ;;  %v3963_v26 = vld [vmem:[%s9273_s11 + $0x2c0] sm:$0xff]  ;;  %v670_v31 = vld [vmem:[%s14437_s0 + $0xbd8] sm:$0xff] }
  0x9e   : > { %v3964_v25 = vld [vmem:[%s9273_s11 + $0x2c8] sm:$0xff]  ;;  %7467 = vmatpush1.bf16.msra.mxu1 %v7466_v14  ;;  %v7212_v27 = vpack.c.bf16 %v3351_v15, %v3344_v8  ;;  %v3343_v28 = vmax.f32 %v2447_v16, 0.0  ;;  %v2456_v30 = vadd.f32 %v1560_v23, %v664_v19  ;;  %v677_v32 = vld [vmem:[%s14437_s0 + $0xc10] sm:$0xff]  ;;  %v1566_v33 = vld [vmem:[%s14438_s1 + $0xbd8] sm:$0xff] }
  0x9f   : > { %v3350_v29 = vmax.f32 %v2454_v17, 0.0  ;;  %4133 = vmatprep.mubr.f32.mxu0 %v3964_v25  ;;  %v7468_v34 = vpack.c.bf16 %v3353_v22, %v3346_v21  ;;  %v3345_v35 = vmax.f32 %v2449_v24, 0.0  ;;  %4777 = vmatprep.mubr.f32.mxu1 %v3964_v25  ;;  %v1573_v36 = vld [vmem:[%s14438_s1 + $0xc10] sm:$0xff]  ;;  %v2462_v37 = vadd.f32 %v1566_v33, %v670_v31  ;;  %v672_v38 = vld [vmem:[%s14437_s0 + $0xbe8] sm:$0xff]  ;;  %v679_v39 = vld [vmem:[%s14437_s0 + $0xc20] sm:$0xff] }
  0xa0   : > { %4134 = vmatmul.mubr.f32.gmra.mrb[22].mxu0 %v3963_v26  ;;  %7213 = vmatprep.subr.bf16.mxu0 %v7212_v27  ;;  %v3352_v41 = vmax.f32 %v2456_v30, 0.0  ;;  %v2469_v42 = vadd.f32 %v1573_v36, %v677_v32  ;;  %v1568_v43 = vld [vmem:[%s14438_s1 + $0xbe8] sm:$0xff]  ;;  %v1575_v44 = vld [vmem:[%s14438_s1 + $0xc20] sm:$0xff]  ;;  %v669_v45 = vld [vmem:[%s14437_s0 + $0xbd0] sm:$0xff] }
  0xa1   : > { %v7214_v40 = vpack.c.bf16 %v3350_v29, %v3343_v28  ;;  %4778 = vmatmul.mubr.f32.gmra.mrb[22].mxu1 %v3963_v26  ;;  %7469 = vmatprep.subr.bf16.mxu1 %v7468_v34  ;;  %v3358_v46 = vmax.f32 %v2462_v37, 0.0  ;;  %v2464_v47 = vadd.f32 %v1568_v43, %v672_v38  ;;  %v2471_v48 = vadd.f32 %v1575_v44, %v679_v39  ;;  %v676_v49 = vld [vmem:[%s14437_s0 + $0xc08] sm:$0xff]  ;;  %v1565_v50 = vld [vmem:[%s14438_s1 + $0xbd0] sm:$0xff]  ;;  %v671_v56 = vld [vmem:[%s14437_s0 + $0xbe0] sm:$0xff] }
  0xa2   : > { %v1572_v51 = vld [vmem:[%s14438_s1 + $0xc08] sm:$0xff]  ;;  %v7470_v52 = vpack.c.bf16 %v3352_v41, %v3345_v35  ;;  %v3365_v53 = vmax.f32 %v2469_v42, 0.0  ;;  %v2461_v54 = vadd.f32 %v1565_v50, %v669_v45  ;;  %v678_v57 = vld [vmem:[%s14437_s0 + $0xc18] sm:$0xff]  ;;  %v1567_v58 = vld [vmem:[%s14438_s1 + $0xbe0] sm:$0xff] }
  0xa3   : > { %7215 = vmatpush1.bf16.msra.mxu0 %v7214_v40  ;;  %v2468_v55 = vadd.f32 %v1572_v51, %v676_v49  ;;  %v3360_v59 = vmax.f32 %v2464_v47, 0.0  ;;  %v3367_v60 = vmax.f32 %v2471_v48, 0.0  ;;  %v1574_v61 = vld [vmem:[%s14438_s1 + $0xc18] sm:$0xff]  ;;  %v2463_v62 = vadd.f32 %v1567_v58, %v671_v56  ;;  %v3972_v63 = vld [vmem:[%s9273_s11 + $0x308] sm:$0xff]  ;;  %v3971_v0 = vld [vmem:[%s9273_s11 + $0x300] sm:$0xff] }
  0xa4   : > { %7471 = vmatpush1.bf16.msra.mxu1 %v7470_v52  ;;  %v7216_v1 = vpack.c.bf16 %v3365_v53, %v3358_v46  ;;  %v3357_v2 = vmax.f32 %v2461_v54, 0.0  ;;  %v2470_v4 = vadd.f32 %v1574_v61, %v678_v57  ;;  %4139 = vmatprep.mubr.f32.mxu0 %v3972_v63  ;;  %v684_v5 = vld [vmem:[%s14437_s0 + $0xc48] sm:$0xff]  ;;  %v691_v6 = vld [vmem:[%s14437_s0 + $0xc80] sm:$0xff]  ;;  %v686_v12 = vld [vmem:[%s14437_s0 + $0xc58] sm:$0xff] }
  0xa5   : > { %v3364_v3 = vmax.f32 %v2468_v55, 0.0  ;;  %v1580_v7 = vld [vmem:[%s14438_s1 + $0xc48] sm:$0xff]  ;;  %v7472_v8 = vpack.c.bf16 %v3367_v60, %v3360_v59  ;;  %v3359_v9 = vmax.f32 %v2463_v62, 0.0  ;;  %4783 = vmatprep.mubr.f32.mxu1 %v3972_v63  ;;  %4140 = vmatmul.mubr.f32.gmra.mrb[24].mxu0 %v3971_v0  ;;  %v1587_v10 = vld [vmem:[%s14438_s1 + $0xc80] sm:$0xff]  ;;  %v693_v13 = vld [vmem:[%s14437_s0 + $0xc90] sm:$0xff] }
  0xa6   : > { %v2476_v11 = vadd.f32 %v1580_v7, %v684_v5  ;;  %7217 = vmatprep.subr.bf16.mxu0 %v7216_v1  ;;  %v3366_v15 = vmax.f32 %v2470_v4, 0.0  ;;  %v2483_v16 = vadd.f32 %v1587_v10, %v691_v6  ;;  %4784 = vmatmul.mubr.f32.gmra.mrb[24].mxu1 %v3971_v0  ;;  %v1582_v17 = vld [vmem:[%s14438_s1 + $0xc58] sm:$0xff]  ;;  %v1589_v18 = vld [vmem:[%s14438_s1 + $0xc90] sm:$0xff]  ;;  %v683_v19 = vld [vmem:[%s14437_s0 + $0xc40] sm:$0xff] }
  0xa7   : > { %v7218_v14 = vpack.c.bf16 %v3364_v3, %v3357_v2  ;;  %7473 = vmatprep.subr.bf16.mxu1 %v7472_v8  ;;  %v2478_v21 = vadd.f32 %v1582_v17, %v686_v12  ;;  %v2485_v22 = vadd.f32 %v1589_v18, %v693_v13  ;;  %v690_v23 = vld [vmem:[%s14437_s0 + $0xc78] sm:$0xff]  ;;  %v1579_v24 = vld [vmem:[%s14438_s1 + $0xc40] sm:$0xff]  ;;  %v685_v30 = vld [vmem:[%s14437_s0 + $0xc50] sm:$0xff] }
  0xa8   : > { %v3372_v20 = vmax.f32 %v2476_v11, 0.0  ;;  %v1586_v25 = vld [vmem:[%s14438_s1 + $0xc78] sm:$0xff]  ;;  %v7474_v26 = vpack.c.bf16 %v3366_v15, %v3359_v9  ;;  %v3379_v27 = vmax.f32 %v2483_v16, 0.0  ;;  %v2475_v28 = vadd.f32 %v1579_v24, %v683_v19  ;;  %v692_v31 = vld [vmem:[%s14437_s0 + $0xc88] sm:$0xff]  ;;  %v1581_v32 = vld [vmem:[%s14438_s1 + $0xc50] sm:$0xff] }
  0xa9   : > { %7219 = vmatpush1.bf16.msra.mxu0 %v7218_v14  ;;  %v2482_v29 = vadd.f32 %v1586_v25, %v690_v23  ;;  %v3374_v33 = vmax.f32 %v2478_v21, 0.0  ;;  %v3381_v34 = vmax.f32 %v2485_v22, 0.0  ;;  %v1588_v35 = vld [vmem:[%s14438_s1 + $0xc88] sm:$0xff]  ;;  %v2477_v36 = vadd.f32 %v1581_v32, %v685_v30  ;;  %v3979_v38 = vld [vmem:[%s9273_s11 + $0x340] sm:$0xff]  ;;  %v698_v43 = vld [vmem:[%s14437_s0 + $0xcb8] sm:$0xff] }
  0xaa   : > { %v3980_v37 = vld [vmem:[%s9273_s11 + $0x348] sm:$0xff]  ;;  %7475 = vmatpush1.bf16.msra.mxu1 %v7474_v26  ;;  %v7220_v39 = vpack.c.bf16 %v3379_v27, %v3372_v20  ;;  %v3371_v40 = vmax.f32 %v2475_v28, 0.0  ;;  %v2484_v42 = vadd.f32 %v1588_v35, %v692_v31  ;;  %v705_v44 = vld [vmem:[%s14437_s0 + $0xcf0] sm:$0xff]  ;;  %v1594_v45 = vld [vmem:[%s14438_s1 + $0xcb8] sm:$0xff] }
  0xab   : > { %v3378_v41 = vmax.f32 %v2482_v29, 0.0  ;;  %4145 = vmatprep.mubr.f32.mxu0 %v3980_v37  ;;  %v7476_v46 = vpack.c.bf16 %v3381_v34, %v3374_v33  ;;  %v3373_v47 = vmax.f32 %v2477_v36, 0.0  ;;  %4789 = vmatprep.mubr.f32.mxu1 %v3980_v37  ;;  %v1601_v48 = vld [vmem:[%s14438_s1 + $0xcf0] sm:$0xff]  ;;  %v2490_v49 = vadd.f32 %v1594_v45, %v698_v43  ;;  %v700_v50 = vld [vmem:[%s14437_s0 + $0xcc8] sm:$0xff]  ;;  %v707_v51 = vld [vmem:[%s14437_s0 + $0xd00] sm:$0xff] }
  0xac   : > { %4146 = vmatmul.mubr.f32.gmra.mrb[26].mxu0 %v3979_v38  ;;  %7221 = vmatprep.subr.bf16.mxu0 %v7220_v39  ;;  %v3380_v53 = vmax.f32 %v2484_v42, 0.0  ;;  %v2497_v54 = vadd.f32 %v1601_v48, %v705_v44  ;;  %v1596_v55 = vld [vmem:[%s14438_s1 + $0xcc8] sm:$0xff]  ;;  %v1603_v56 = vld [vmem:[%s14438_s1 + $0xd00] sm:$0xff]  ;;  %v697_v57 = vld [vmem:[%s14437_s0 + $0xcb0] sm:$0xff] }
  0xad   : > { %v7222_v52 = vpack.c.bf16 %v3378_v41, %v3371_v40  ;;  %4790 = vmatmul.mubr.f32.gmra.mrb[26].mxu1 %v3979_v38  ;;  %7477 = vmatprep.subr.bf16.mxu1 %v7476_v46  ;;  %v3386_v58 = vmax.f32 %v2490_v49, 0.0  ;;  %v2492_v59 = vadd.f32 %v1596_v55, %v700_v50  ;;  %v2499_v60 = vadd.f32 %v1603_v56, %v707_v51  ;;  %v704_v61 = vld [vmem:[%s14437_s0 + $0xce8] sm:$0xff]  ;;  %v1593_v62 = vld [vmem:[%s14438_s1 + $0xcb0] sm:$0xff]  ;;  %v699_v4 = vld [vmem:[%s14437_s0 + $0xcc0] sm:$0xff] }
  0xae   : > { %v1600_v63 = vld [vmem:[%s14438_s1 + $0xce8] sm:$0xff]  ;;  %v7478_v0 = vpack.c.bf16 %v3380_v53, %v3373_v47  ;;  %v3393_v1 = vmax.f32 %v2497_v54, 0.0  ;;  %v2489_v2 = vadd.f32 %v1593_v62, %v697_v57  ;;  %v706_v5 = vld [vmem:[%s14437_s0 + $0xcf8] sm:$0xff]  ;;  %v1595_v6 = vld [vmem:[%s14438_s1 + $0xcc0] sm:$0xff] }
  0xaf   : > { %7223 = vmatpush1.bf16.msra.mxu0 %v7222_v52  ;;  %v2496_v3 = vadd.f32 %v1600_v63, %v704_v61  ;;  %v3388_v7 = vmax.f32 %v2492_v59, 0.0  ;;  %v3395_v8 = vmax.f32 %v2499_v60, 0.0  ;;  %v1602_v9 = vld [vmem:[%s14438_s1 + $0xcf8] sm:$0xff]  ;;  %v2491_v10 = vadd.f32 %v1595_v6, %v699_v4  ;;  %v3988_v11 = vld [vmem:[%s9273_s11 + $0x388] sm:$0xff]  ;;  %v3987_v12 = vld [vmem:[%s9273_s11 + $0x380] sm:$0xff] }
  0xb0   : > { %7479 = vmatpush1.bf16.msra.mxu1 %v7478_v0  ;;  %v7224_v13 = vpack.c.bf16 %v3393_v1, %v3386_v58  ;;  %v3385_v14 = vmax.f32 %v2489_v2, 0.0  ;;  %v2498_v16 = vadd.f32 %v1602_v9, %v706_v5  ;;  %4151 = vmatprep.mubr.f32.mxu0 %v3988_v11  ;;  %v712_v17 = vld [vmem:[%s14437_s0 + $0xd28] sm:$0xff]  ;;  %v719_v18 = vld [vmem:[%s14437_s0 + $0xd60] sm:$0xff]  ;;  %v714_v24 = vld [vmem:[%s14437_s0 + $0xd38] sm:$0xff] }
  0xb1   : > { %v3392_v15 = vmax.f32 %v2496_v3, 0.0  ;;  %v1608_v19 = vld [vmem:[%s14438_s1 + $0xd28] sm:$0xff]  ;;  %v7480_v20 = vpack.c.bf16 %v3395_v8, %v3388_v7  ;;  %v3387_v21 = vmax.f32 %v2491_v10, 0.0  ;;  %4795 = vmatprep.mubr.f32.mxu1 %v3988_v11  ;;  %4152 = vmatmul.mubr.f32.gmra.mrb[28].mxu0 %v3987_v12  ;;  %v1615_v22 = vld [vmem:[%s14438_s1 + $0xd60] sm:$0xff]  ;;  %v721_v25 = vld [vmem:[%s14437_s0 + $0xd70] sm:$0xff] }
  0xb2   : > { %v2504_v23 = vadd.f32 %v1608_v19, %v712_v17  ;;  %7225 = vmatprep.subr.bf16.mxu0 %v7224_v13  ;;  %v3394_v27 = vmax.f32 %v2498_v16, 0.0  ;;  %v2511_v28 = vadd.f32 %v1615_v22, %v719_v18  ;;  %4796 = vmatmul.mubr.f32.gmra.mrb[28].mxu1 %v3987_v12  ;;  %v1610_v29 = vld [vmem:[%s14438_s1 + $0xd38] sm:$0xff]  ;;  %v1617_v30 = vld [vmem:[%s14438_s1 + $0xd70] sm:$0xff]  ;;  %v711_v31 = vld [vmem:[%s14437_s0 + $0xd20] sm:$0xff] }
  0xb3   : > { %v7226_v26 = vpack.c.bf16 %v3392_v15, %v3385_v14  ;;  %7481 = vmatprep.subr.bf16.mxu1 %v7480_v20  ;;  %v2506_v33 = vadd.f32 %v1610_v29, %v714_v24  ;;  %v2513_v34 = vadd.f32 %v1617_v30, %v721_v25  ;;  %v718_v35 = vld [vmem:[%s14437_s0 + $0xd58] sm:$0xff]  ;;  %v1607_v36 = vld [vmem:[%s14438_s1 + $0xd20] sm:$0xff]  ;;  %v713_v42 = vld [vmem:[%s14437_s0 + $0xd30] sm:$0xff] }
  0xb4   : > { %v3400_v32 = vmax.f32 %v2504_v23, 0.0  ;;  %v1614_v37 = vld [vmem:[%s14438_s1 + $0xd58] sm:$0xff]  ;;  %v7482_v38 = vpack.c.bf16 %v3394_v27, %v3387_v21  ;;  %v3407_v39 = vmax.f32 %v2511_v28, 0.0  ;;  %v2503_v40 = vadd.f32 %v1607_v36, %v711_v31  ;;  %v720_v43 = vld [vmem:[%s14437_s0 + $0xd68] sm:$0xff]  ;;  %v1609_v44 = vld [vmem:[%s14438_s1 + $0xd30] sm:$0xff] }
  0xb5   : > { %7227 = vmatpush1.bf16.msra.mxu0 %v7226_v26  ;;  %v2510_v41 = vadd.f32 %v1614_v37, %v718_v35  ;;  %v3402_v45 = vmax.f32 %v2506_v33, 0.0  ;;  %v3409_v46 = vmax.f32 %v2513_v34, 0.0  ;;  %v1616_v47 = vld [vmem:[%s14438_s1 + $0xd68] sm:$0xff]  ;;  %v2505_v48 = vadd.f32 %v1609_v44, %v713_v42  ;;  %v3995_v50 = vld [vmem:[%s9273_s11 + $0x3c0] sm:$0xff]  ;;  %v726_v55 = vld [vmem:[%s14437_s0 + $0xd98] sm:$0xff] }
  0xb6   : > { %v3996_v49 = vld [vmem:[%s9273_s11 + $0x3c8] sm:$0xff]  ;;  %7483 = vmatpush1.bf16.msra.mxu1 %v7482_v38  ;;  %v7228_v51 = vpack.c.bf16 %v3407_v39, %v3400_v32  ;;  %v3399_v52 = vmax.f32 %v2503_v40, 0.0  ;;  %v2512_v54 = vadd.f32 %v1616_v47, %v720_v43  ;;  %v733_v56 = vld [vmem:[%s14437_s0 + $0xdd0] sm:$0xff]  ;;  %v1622_v57 = vld [vmem:[%s14438_s1 + $0xd98] sm:$0xff] }
  0xb7   : > { %v3406_v53 = vmax.f32 %v2510_v41, 0.0  ;;  %4157 = vmatprep.mubr.f32.mxu0 %v3996_v49  ;;  %v7484_v58 = vpack.c.bf16 %v3409_v46, %v3402_v45  ;;  %v3401_v59 = vmax.f32 %v2505_v48, 0.0  ;;  %4801 = vmatprep.mubr.f32.mxu1 %v3996_v49  ;;  %v1629_v60 = vld [vmem:[%s14438_s1 + $0xdd0] sm:$0xff]  ;;  %v2518_v61 = vadd.f32 %v1622_v57, %v726_v55  ;;  %v728_v62 = vld [vmem:[%s14437_s0 + $0xda8] sm:$0xff]  ;;  %v735_v63 = vld [vmem:[%s14437_s0 + $0xde0] sm:$0xff] }
  0xb8   : > { %4158 = vmatmul.mubr.f32.gmra.mrb[30].mxu0 %v3995_v50  ;;  %7229 = vmatprep.subr.bf16.mxu0 %v7228_v51  ;;  %v3408_v1 = vmax.f32 %v2512_v54, 0.0  ;;  %v2525_v2 = vadd.f32 %v1629_v60, %v733_v56  ;;  %v1624_v3 = vld [vmem:[%s14438_s1 + $0xda8] sm:$0xff]  ;;  %v1631_v4 = vld [vmem:[%s14438_s1 + $0xde0] sm:$0xff]  ;;  %v725_v5 = vld [vmem:[%s14437_s0 + $0xd90] sm:$0xff] }
  0xb9   : > { %v7230_v0 = vpack.c.bf16 %v3406_v53, %v3399_v52  ;;  %4802 = vmatmul.mubr.f32.gmra.mrb[30].mxu1 %v3995_v50  ;;  %7485 = vmatprep.subr.bf16.mxu1 %v7484_v58  ;;  %v3414_v6 = vmax.f32 %v2518_v61, 0.0  ;;  %v2520_v7 = vadd.f32 %v1624_v3, %v728_v62  ;;  %v2527_v8 = vadd.f32 %v1631_v4, %v735_v63  ;;  %v732_v9 = vld [vmem:[%s14437_s0 + $0xdc8] sm:$0xff]  ;;  %v1621_v10 = vld [vmem:[%s14438_s1 + $0xd90] sm:$0xff]  ;;  %v727_v16 = vld [vmem:[%s14437_s0 + $0xda0] sm:$0xff] }
  0xba   : > { %v1628_v11 = vld [vmem:[%s14438_s1 + $0xdc8] sm:$0xff]  ;;  %v7486_v12 = vpack.c.bf16 %v3408_v1, %v3401_v59  ;;  %v3421_v13 = vmax.f32 %v2525_v2, 0.0  ;;  %v2517_v14 = vadd.f32 %v1621_v10, %v725_v5  ;;  %v734_v17 = vld [vmem:[%s14437_s0 + $0xdd8] sm:$0xff]  ;;  %v1623_v18 = vld [vmem:[%s14438_s1 + $0xda0] sm:$0xff] }
  0xbb   : > { %7231 = vmatpush1.bf16.msra.mxu0 %v7230_v0  ;;  %v2524_v15 = vadd.f32 %v1628_v11, %v732_v9  ;;  %v3416_v19 = vmax.f32 %v2520_v7, 0.0  ;;  %v3423_v20 = vmax.f32 %v2527_v8, 0.0  ;;  %v1630_v21 = vld [vmem:[%s14438_s1 + $0xdd8] sm:$0xff]  ;;  %v2519_v22 = vadd.f32 %v1623_v18, %v727_v16  ;;  %v740_v28 = vld [vmem:[%s14437_s0 + $0xe08] sm:$0xff]  ;;  %v747_v29 = vld [vmem:[%s14437_s0 + $0xe40] sm:$0xff] }
  0xbc   : > { %v3878_v23 = vld [vmem:[%s9273_s11 + $0x18] sm:$0xff]  ;;  %7487 = vmatpush1.bf16.msra.mxu1 %v7486_v12  ;;  %v7232_v24 = vpack.c.bf16 %v3421_v13, %v3414_v6  ;;  %v3413_v25 = vmax.f32 %v2517_v14, 0.0  ;;  %v2526_v27 = vadd.f32 %v1630_v21, %v734_v17  ;;  %v1636_v30 = vld [vmem:[%s14438_s1 + $0xe08] sm:$0xff]  ;;  %v1643_v33 = vld [vmem:[%s14438_s1 + $0xe40] sm:$0xff] }
  0xbd   : > { %v3420_v26 = vmax.f32 %v2524_v15, 0.0  ;;  %4228 = vmatprep.mubr.f32.mxu0 %v3878_v23  ;;  %v7488_v31 = vpack.c.bf16 %v3423_v20, %v3416_v19  ;;  %v3415_v32 = vmax.f32 %v2519_v22, 0.0  ;;  %4872 = vmatprep.mubr.f32.mxu1 %v3878_v23  ;;  %v2532_v34 = vadd.f32 %v1636_v30, %v740_v28  ;;  %v742_v35 = vld [vmem:[%s14437_s0 + $0xe18] sm:$0xff]  ;;  %v749_v36 = vld [vmem:[%s14437_s0 + $0xe50] sm:$0xff]  ;;  %v739_v43 = vld [vmem:[%s14437_s0 + $0xe00] sm:$0xff] }
  0xbe   : > { %7233 = vmatprep.subr.bf16.mxu0 %v7232_v24  ;;  %v3422_v38 = vmax.f32 %v2526_v27, 0.0  ;;  %v3877_v39 = vld [vmem:[%s9273_s11 + $0x10] sm:$0xff]  ;;  %v2539_v40 = vadd.f32 %v1643_v33, %v747_v29  ;;  %v1638_v41 = vld [vmem:[%s14438_s1 + $0xe18] sm:$0xff]  ;;  %v1635_v48 = vld [vmem:[%s14438_s1 + $0xe00] sm:$0xff] }
  0xbf   : > { %v7234_v37 = vpack.c.bf16 %v3420_v26, %v3413_v25  ;;  %v1645_v42 = vld [vmem:[%s14438_s1 + $0xe50] sm:$0xff]  ;;  %7489 = vmatprep.subr.bf16.mxu1 %v7488_v31  ;;  %v3428_v44 = vmax.f32 %v2532_v34, 0.0  ;;  %v2534_v45 = vadd.f32 %v1638_v41, %v742_v35  ;;  %v746_v47 = vld [vmem:[%s14437_s0 + $0xe38] sm:$0xff]  ;;  %v2531_v52 = vadd.f32 %v1635_v48, %v739_v43  ;;  %v748_v55 = vld [vmem:[%s14437_s0 + $0xe48] sm:$0xff] }
  0xc0   : > { %v2541_v46 = vadd.f32 %v1645_v42, %v749_v36  ;;  %v1642_v49 = vld [vmem:[%s14438_s1 + $0xe38] sm:$0xff]  ;;  %v7490_v50 = vpack.c.bf16 %v3422_v38, %v3415_v32  ;;  %v3435_v51 = vmax.f32 %v2539_v40, 0.0  ;;  %v741_v54 = vld [vmem:[%s14437_s0 + $0xe10] sm:$0xff]  ;;  %v1644_v59 = vld [vmem:[%s14438_s1 + $0xe48] sm:$0xff] }
  0xc1   : > { %7235 = vmatpush1.bf16.msra.mxu0 %v7234_v37  ;;  %v2538_v53 = vadd.f32 %v1642_v49, %v746_v47  ;;  %v1637_v56 = vld [vmem:[%s14438_s1 + $0xe10] sm:$0xff]  ;;  %v3430_v57 = vmax.f32 %v2534_v45, 0.0  ;;  %v3886_v61 = vld [vmem:[%s9273_s11 + $0x58] sm:$0xff]  ;;  %v3427_v63 = vmax.f32 %v2531_v52, 0.0  ;;  %v2540_v1 = vadd.f32 %v1644_v59, %v748_v55  ;;  %v756_v10 = vld [vmem:[%s14437_s0 + $0xe88] sm:$0xff] }
  0xc2   : > { %v3437_v58 = vmax.f32 %v2541_v46, 0.0  ;;  %v2533_v60 = vadd.f32 %v1637_v56, %v741_v54  ;;  %7491 = vmatpush1.bf16.msra.mxu1 %v7490_v50  ;;  %v7236_v62 = vpack.c.bf16 %v3435_v51, %v3428_v44  ;;  %v3885_v2 = vld [vmem:[%s9273_s11 + $0x50] sm:$0xff]  ;;  %v754_v3 = vld [vmem:[%s14437_s0 + $0xe78] sm:$0xff]  ;;  %v763_v11 = vld [vmem:[%s14437_s0 + $0xec0] sm:$0xff] }
  0xc3   : > { %v3434_v0 = vmax.f32 %v2538_v53, 0.0  ;;  %v761_v4 = vld [vmem:[%s14437_s0 + $0xeb0] sm:$0xff]  ;;  %v1650_v5 = vld [vmem:[%s14438_s1 + $0xe78] sm:$0xff]  ;;  %v3436_v13 = vmax.f32 %v2540_v1, 0.0  ;;  %v1652_v15 = vld [vmem:[%s14438_s1 + $0xe88] sm:$0xff] }
  0xc4   : > { %4229 = vmatmul.mubr.f32.vlgmr.msra.gmra.mrb[0].mxu0 %v3877_v39  ;;  %v7492_v6 = vpack.c.bf16 %v3437_v58, %v3430_v57  ;;  %v3429_v7 = vmax.f32 %v2533_v60, 0.0  ;;  %v1657_v8 = vld [vmem:[%s14438_s1 + $0xeb0] sm:$0xff]  ;;  %v2546_v9 = vadd.f32 %v1650_v5, %v754_v3  ;;  %7237 = vmatprep.subr.bf16.mxu0 %v7236_v62  ;;  %v1659_v16 = vld [vmem:[%s14438_s1 + $0xec0] sm:$0xff]  ;;  %v2548_v19 = vadd.f32 %v1652_v15, %v756_v10  ;;  %v760_v21 = vld [vmem:[%s14437_s0 + $0xea8] sm:$0xff] }
  0xc5   : > { %v7238_v12 = vpack.c.bf16 %v3434_v0, %v3427_v63  ;;  %4234 = vmatprep.mubr.f32.mxu0 %v3886_v61  ;;  %v2553_v14 = vadd.f32 %v1657_v8, %v761_v4  ;;  %v753_v17 = vld [vmem:[%s14437_s0 + $0xe70] sm:$0xff]  ;;  %4873 = vmatmul.mubr.f32.vlgmr.msra.gmra.mrb[0].mxu1 %v3877_v39  ;;  %v2555_v20 = vadd.f32 %v1659_v16, %v763_v11  ;;  %v1656_v23 = vld [vmem:[%s14438_s1 + $0xea8] sm:$0xff]  ;;  %v755_v28 = vld [vmem:[%s14437_s0 + $0xe80] sm:$0xff] }
  0xc6   : > { %7493 = vmatprep.subr.bf16.mxu1 %v7492_v6  ;;  %v3442_v18 = vmax.f32 %v2546_v9, 0.0  ;;  %v1649_v22 = vld [vmem:[%s14438_s1 + $0xe70] sm:$0xff]  ;;  %v7494_v24 = vpack.c.bf16 %v3436_v13, %v3429_v7  ;;  %4878 = vmatprep.mubr.f32.mxu1 %v3886_v61  ;;  %v2552_v27 = vadd.f32 %v1656_v23, %v760_v21  ;;  %v762_v29 = vld [vmem:[%s14437_s0 + $0xeb8] sm:$0xff]  ;;  %v1651_v30 = vld [vmem:[%s14438_s1 + $0xe80] sm:$0xff]  ;;  %v3444_v31 = vmax.f32 %v2548_v19, 0.0 }
  0xc7   : > { %7239 = vmatpush1.bf16.msra.mxu0 %v7238_v12  ;;  %v3449_v25 = vmax.f32 %v2553_v14, 0.0  ;;  %v2545_v26 = vadd.f32 %v1649_v22, %v753_v17  ;;  %v3451_v32 = vmax.f32 %v2555_v20, 0.0  ;;  %v1658_v33 = vld [vmem:[%s14438_s1 + $0xeb8] sm:$0xff]  ;;  %v2547_v34 = vadd.f32 %v1651_v30, %v755_v28  ;;  %v3893_v36 = vld [vmem:[%s9273_s11 + $0x90] sm:$0xff]  ;;  %v768_v41 = vld [vmem:[%s14437_s0 + $0xee8] sm:$0xff] }
  0xc8   : > { %4235 = vmatmul.mubr.f32.gmra.mrb[2].mxu0 %v3885_v2  ;;  %v3894_v35 = vld [vmem:[%s9273_s11 + $0x98] sm:$0xff]  ;;  %7495 = vmatpush1.bf16.msra.mxu1 %v7494_v24  ;;  %v3448_v39 = vmax.f32 %v2552_v27, 0.0  ;;  %v2554_v40 = vadd.f32 %v1658_v33, %v762_v29  ;;  %v775_v42 = vld [vmem:[%s14437_s0 + $0xf20] sm:$0xff]  ;;  %v1664_v43 = vld [vmem:[%s14438_s1 + $0xee8] sm:$0xff] }
  0xc9   : > { %v7240_v37 = vpack.c.bf16 %v3449_v25, %v3442_v18  ;;  %v3441_v38 = vmax.f32 %v2545_v26, 0.0  ;;  %4240 = vmatprep.mubr.f32.mxu0 %v3894_v35  ;;  %4879 = vmatmul.mubr.f32.gmra.mrb[2].mxu1 %v3885_v2  ;;  %v7496_v44 = vpack.c.bf16 %v3451_v32, %v3444_v31  ;;  %v3443_v45 = vmax.f32 %v2547_v34, 0.0  ;;  %v1671_v46 = vld [vmem:[%s14438_s1 + $0xf20] sm:$0xff]  ;;  %v770_v48 = vld [vmem:[%s14437_s0 + $0xef8] sm:$0xff]  ;;  %v777_v49 = vld [vmem:[%s14437_s0 + $0xf30] sm:$0xff] }
  0xca   : > { %v2560_v47 = vadd.f32 %v1664_v43, %v768_v41  ;;  %v3450_v51 = vmax.f32 %v2554_v40, 0.0  ;;  %4884 = vmatprep.mubr.f32.mxu1 %v3894_v35  ;;  %v2567_v52 = vadd.f32 %v1671_v46, %v775_v42  ;;  %v1666_v53 = vld [vmem:[%s14438_s1 + $0xef8] sm:$0xff]  ;;  %v1673_v54 = vld [vmem:[%s14438_s1 + $0xf30] sm:$0xff]  ;;  %v767_v55 = vld [vmem:[%s14437_s0 + $0xee0] sm:$0xff] }
  0xcb   : > { %7241 = vmatprep.subr.bf16.mxu0 %v7240_v37  ;;  %v7242_v50 = vpack.c.bf16 %v3448_v39, %v3441_v38  ;;  %7497 = vmatprep.subr.bf16.mxu1 %v7496_v44  ;;  %v2562_v57 = vadd.f32 %v1666_v53, %v770_v48  ;;  %v2569_v58 = vadd.f32 %v1673_v54, %v777_v49  ;;  %v774_v59 = vld [vmem:[%s14437_s0 + $0xf18] sm:$0xff]  ;;  %v1663_v60 = vld [vmem:[%s14438_s1 + $0xee0] sm:$0xff]  ;;  %v769_v2 = vld [vmem:[%s14437_s0 + $0xef0] sm:$0xff] }
  0xcc   : > { %4241 = vmatmul.mubr.f32.gmra.mrb[4].mxu0 %v3893_v36  ;;  %v3456_v56 = vmax.f32 %v2560_v47, 0.0  ;;  %v1670_v61 = vld [vmem:[%s14438_s1 + $0xf18] sm:$0xff]  ;;  %v7498_v62 = vpack.c.bf16 %v3450_v51, %v3443_v45  ;;  %v3463_v63 = vmax.f32 %v2567_v52, 0.0  ;;  %v2559_v0 = vadd.f32 %v1663_v60, %v767_v55  ;;  %v776_v3 = vld [vmem:[%s14437_s0 + $0xf28] sm:$0xff]  ;;  %v1665_v4 = vld [vmem:[%s14438_s1 + $0xef0] sm:$0xff] }
  0xcd   : > { %7243 = vmatpush1.bf16.msra.mxu0 %v7242_v50  ;;  %v2566_v1 = vadd.f32 %v1670_v61, %v774_v59  ;;  %4885 = vmatmul.mubr.f32.gmra.mrb[4].mxu1 %v3893_v36  ;;  %v3458_v5 = vmax.f32 %v2562_v57, 0.0  ;;  %v3465_v6 = vmax.f32 %v2569_v58, 0.0  ;;  %v1672_v7 = vld [vmem:[%s14438_s1 + $0xf28] sm:$0xff]  ;;  %v2561_v8 = vadd.f32 %v1665_v4, %v769_v2  ;;  %v3902_v9 = vld [vmem:[%s9273_s11 + $0xd8] sm:$0xff]  ;;  %v3901_v10 = vld [vmem:[%s9273_s11 + $0xd0] sm:$0xff] }
  0xce   : > { %7499 = vmatpush1.bf16.msra.mxu1 %v7498_v62  ;;  %v7244_v11 = vpack.c.bf16 %v3463_v63, %v3456_v56  ;;  %v3455_v12 = vmax.f32 %v2559_v0, 0.0  ;;  %v2568_v14 = vadd.f32 %v1672_v7, %v776_v3  ;;  %4246 = vmatprep.mubr.f32.mxu0 %v3902_v9  ;;  %v782_v15 = vld [vmem:[%s14437_s0 + $0xf58] sm:$0xff]  ;;  %v789_v16 = vld [vmem:[%s14437_s0 + $0xf90] sm:$0xff]  ;;  %v784_v22 = vld [vmem:[%s14437_s0 + $0xf68] sm:$0xff] }
  0xcf   : > { %v3462_v13 = vmax.f32 %v2566_v1, 0.0  ;;  %v1678_v17 = vld [vmem:[%s14438_s1 + $0xf58] sm:$0xff]  ;;  %v7500_v18 = vpack.c.bf16 %v3465_v6, %v3458_v5  ;;  %v3457_v19 = vmax.f32 %v2561_v8, 0.0  ;;  %4890 = vmatprep.mubr.f32.mxu1 %v3902_v9  ;;  %v1685_v20 = vld [vmem:[%s14438_s1 + $0xf90] sm:$0xff]  ;;  %v791_v23 = vld [vmem:[%s14437_s0 + $0xfa0] sm:$0xff] }
  0xd0   : > { %4247 = vmatmul.mubr.f32.gmra.mrb[6].mxu0 %v3901_v10  ;;  %v2574_v21 = vadd.f32 %v1678_v17, %v782_v15  ;;  %7245 = vmatprep.subr.bf16.mxu0 %v7244_v11  ;;  %v3464_v25 = vmax.f32 %v2568_v14, 0.0  ;;  %v2581_v26 = vadd.f32 %v1685_v20, %v789_v16  ;;  %v1680_v27 = vld [vmem:[%s14438_s1 + $0xf68] sm:$0xff]  ;;  %v1687_v28 = vld [vmem:[%s14438_s1 + $0xfa0] sm:$0xff]  ;;  %v781_v29 = vld [vmem:[%s14437_s0 + $0xf50] sm:$0xff] }
  0xd1   : > { %v7246_v24 = vpack.c.bf16 %v3462_v13, %v3455_v12  ;;  %7501 = vmatprep.subr.bf16.mxu1 %v7500_v18  ;;  %4891 = vmatmul.mubr.f32.gmra.mrb[6].mxu1 %v3901_v10  ;;  %v2576_v31 = vadd.f32 %v1680_v27, %v784_v22  ;;  %v2583_v32 = vadd.f32 %v1687_v28, %v791_v23  ;;  %v788_v33 = vld [vmem:[%s14437_s0 + $0xf88] sm:$0xff]  ;;  %v1677_v34 = vld [vmem:[%s14438_s1 + $0xf50] sm:$0xff]  ;;  %v783_v40 = vld [vmem:[%s14437_s0 + $0xf60] sm:$0xff] }
  0xd2   : > { %v3470_v30 = vmax.f32 %v2574_v21, 0.0  ;;  %v1684_v35 = vld [vmem:[%s14438_s1 + $0xf88] sm:$0xff]  ;;  %v7502_v36 = vpack.c.bf16 %v3464_v25, %v3457_v19  ;;  %v3477_v37 = vmax.f32 %v2581_v26, 0.0  ;;  %v2573_v38 = vadd.f32 %v1677_v34, %v781_v29  ;;  %v790_v41 = vld [vmem:[%s14437_s0 + $0xf98] sm:$0xff]  ;;  %v1679_v42 = vld [vmem:[%s14438_s1 + $0xf60] sm:$0xff] }
  0xd3   : > { %7247 = vmatpush1.bf16.msra.mxu0 %v7246_v24  ;;  %v2580_v39 = vadd.f32 %v1684_v35, %v788_v33  ;;  %v3472_v43 = vmax.f32 %v2576_v31, 0.0  ;;  %v3479_v44 = vmax.f32 %v2583_v32, 0.0  ;;  %v1686_v45 = vld [vmem:[%s14438_s1 + $0xf98] sm:$0xff]  ;;  %v2575_v46 = vadd.f32 %v1679_v42, %v783_v40  ;;  %v3909_v48 = vld [vmem:[%s9273_s11 + $0x110] sm:$0xff]  ;;  %v796_v53 = vld [vmem:[%s14437_s0 + $0xfc8] sm:$0xff] }
  0xd4   : > { %v3910_v47 = vld [vmem:[%s9273_s11 + $0x118] sm:$0xff]  ;;  %7503 = vmatpush1.bf16.msra.mxu1 %v7502_v36  ;;  %v7248_v49 = vpack.c.bf16 %v3477_v37, %v3470_v30  ;;  %v3469_v50 = vmax.f32 %v2573_v38, 0.0  ;;  %v2582_v52 = vadd.f32 %v1686_v45, %v790_v41  ;;  %v803_v54 = vld [vmem:[%s14437_s0 + $0x1000] sm:$0xff]  ;;  %v1692_v55 = vld [vmem:[%s14438_s1 + $0xfc8] sm:$0xff] }
  0xd5   : > { %v3476_v51 = vmax.f32 %v2580_v39, 0.0  ;;  %4252 = vmatprep.mubr.f32.mxu0 %v3910_v47  ;;  %v7504_v56 = vpack.c.bf16 %v3479_v44, %v3472_v43  ;;  %v3471_v57 = vmax.f32 %v2575_v46, 0.0  ;;  %4896 = vmatprep.mubr.f32.mxu1 %v3910_v47  ;;  %v1699_v58 = vld [vmem:[%s14438_s1 + $0x1000] sm:$0xff]  ;;  %v2588_v59 = vadd.f32 %v1692_v55, %v796_v53  ;;  %v798_v60 = vld [vmem:[%s14437_s0 + $0xfd8] sm:$0xff]  ;;  %v805_v61 = vld [vmem:[%s14437_s0 + $0x1010] sm:$0xff] }
  0xd6   : > { %4253 = vmatmul.mubr.f32.gmra.mrb[8].mxu0 %v3909_v48  ;;  %7249 = vmatprep.subr.bf16.mxu0 %v7248_v49  ;;  %v3478_v63 = vmax.f32 %v2582_v52, 0.0  ;;  %v2595_v0 = vadd.f32 %v1699_v58, %v803_v54  ;;  %v1694_v1 = vld [vmem:[%s14438_s1 + $0xfd8] sm:$0xff]  ;;  %v1701_v2 = vld [vmem:[%s14438_s1 + $0x1010] sm:$0xff]  ;;  %v795_v3 = vld [vmem:[%s14437_s0 + $0xfc0] sm:$0xff] }
  0xd7   : > { %v7250_v62 = vpack.c.bf16 %v3476_v51, %v3469_v50  ;;  %4897 = vmatmul.mubr.f32.gmra.mrb[8].mxu1 %v3909_v48  ;;  %7505 = vmatprep.subr.bf16.mxu1 %v7504_v56  ;;  %v3484_v4 = vmax.f32 %v2588_v59, 0.0  ;;  %v2590_v5 = vadd.f32 %v1694_v1, %v798_v60  ;;  %v2597_v6 = vadd.f32 %v1701_v2, %v805_v61  ;;  %v802_v7 = vld [vmem:[%s14437_s0 + $0xff8] sm:$0xff]  ;;  %v1691_v8 = vld [vmem:[%s14438_s1 + $0xfc0] sm:$0xff]  ;;  %v797_v14 = vld [vmem:[%s14437_s0 + $0xfd0] sm:$0xff] }
  0xd8   : > { %v1698_v9 = vld [vmem:[%s14438_s1 + $0xff8] sm:$0xff]  ;;  %v7506_v10 = vpack.c.bf16 %v3478_v63, %v3471_v57  ;;  %v3491_v11 = vmax.f32 %v2595_v0, 0.0  ;;  %v2587_v12 = vadd.f32 %v1691_v8, %v795_v3  ;;  %v804_v15 = vld [vmem:[%s14437_s0 + $0x1008] sm:$0xff]  ;;  %v1693_v16 = vld [vmem:[%s14438_s1 + $0xfd0] sm:$0xff] }
  0xd9   : > { %7251 = vmatpush1.bf16.msra.mxu0 %v7250_v62  ;;  %v2594_v13 = vadd.f32 %v1698_v9, %v802_v7  ;;  %v3486_v17 = vmax.f32 %v2590_v5, 0.0  ;;  %v3493_v18 = vmax.f32 %v2597_v6, 0.0  ;;  %v1700_v19 = vld [vmem:[%s14438_s1 + $0x1008] sm:$0xff]  ;;  %v2589_v20 = vadd.f32 %v1693_v16, %v797_v14  ;;  %v3918_v21 = vld [vmem:[%s9273_s11 + $0x158] sm:$0xff]  ;;  %v3917_v22 = vld [vmem:[%s9273_s11 + $0x150] sm:$0xff] }
  0xda   : > { %7507 = vmatpush1.bf16.msra.mxu1 %v7506_v10  ;;  %v7252_v23 = vpack.c.bf16 %v3491_v11, %v3484_v4  ;;  %v3483_v24 = vmax.f32 %v2587_v12, 0.0  ;;  %v2596_v26 = vadd.f32 %v1700_v19, %v804_v15  ;;  %4258 = vmatprep.mubr.f32.mxu0 %v3918_v21  ;;  %v810_v27 = vld [vmem:[%s14437_s0 + $0x1038] sm:$0xff]  ;;  %v817_v28 = vld [vmem:[%s14437_s0 + $0x1070] sm:$0xff]  ;;  %v812_v34 = vld [vmem:[%s14437_s0 + $0x1048] sm:$0xff] }
  0xdb   : > { %v3490_v25 = vmax.f32 %v2594_v13, 0.0  ;;  %v1706_v29 = vld [vmem:[%s14438_s1 + $0x1038] sm:$0xff]  ;;  %v7508_v30 = vpack.c.bf16 %v3493_v18, %v3486_v17  ;;  %v3485_v31 = vmax.f32 %v2589_v20, 0.0  ;;  %4902 = vmatprep.mubr.f32.mxu1 %v3918_v21  ;;  %4259 = vmatmul.mubr.f32.gmra.mrb[10].mxu0 %v3917_v22  ;;  %v1713_v32 = vld [vmem:[%s14438_s1 + $0x1070] sm:$0xff]  ;;  %v819_v35 = vld [vmem:[%s14437_s0 + $0x1080] sm:$0xff] }
  0xdc   : > { %v2602_v33 = vadd.f32 %v1706_v29, %v810_v27  ;;  %7253 = vmatprep.subr.bf16.mxu0 %v7252_v23  ;;  %v3492_v37 = vmax.f32 %v2596_v26, 0.0  ;;  %v2609_v38 = vadd.f32 %v1713_v32, %v817_v28  ;;  %4903 = vmatmul.mubr.f32.gmra.mrb[10].mxu1 %v3917_v22  ;;  %v1708_v39 = vld [vmem:[%s14438_s1 + $0x1048] sm:$0xff]  ;;  %v1715_v40 = vld [vmem:[%s14438_s1 + $0x1080] sm:$0xff]  ;;  %v809_v41 = vld [vmem:[%s14437_s0 + $0x1030] sm:$0xff] }
  0xdd   : > { %v7254_v36 = vpack.c.bf16 %v3490_v25, %v3483_v24  ;;  %7509 = vmatprep.subr.bf16.mxu1 %v7508_v30  ;;  %v2604_v43 = vadd.f32 %v1708_v39, %v812_v34  ;;  %v2611_v44 = vadd.f32 %v1715_v40, %v819_v35  ;;  %v816_v45 = vld [vmem:[%s14437_s0 + $0x1068] sm:$0xff]  ;;  %v1705_v46 = vld [vmem:[%s14438_s1 + $0x1030] sm:$0xff]  ;;  %v811_v52 = vld [vmem:[%s14437_s0 + $0x1040] sm:$0xff] }
  0xde   : > { %v3498_v42 = vmax.f32 %v2602_v33, 0.0  ;;  %v1712_v47 = vld [vmem:[%s14438_s1 + $0x1068] sm:$0xff]  ;;  %v7510_v48 = vpack.c.bf16 %v3492_v37, %v3485_v31  ;;  %v3505_v49 = vmax.f32 %v2609_v38, 0.0  ;;  %v2601_v50 = vadd.f32 %v1705_v46, %v809_v41  ;;  %v818_v53 = vld [vmem:[%s14437_s0 + $0x1078] sm:$0xff]  ;;  %v1707_v54 = vld [vmem:[%s14438_s1 + $0x1040] sm:$0xff] }
  0xdf   : > { %7255 = vmatpush1.bf16.msra.mxu0 %v7254_v36  ;;  %v2608_v51 = vadd.f32 %v1712_v47, %v816_v45  ;;  %v3500_v55 = vmax.f32 %v2604_v43, 0.0  ;;  %v3507_v56 = vmax.f32 %v2611_v44, 0.0  ;;  %v1714_v57 = vld [vmem:[%s14438_s1 + $0x1078] sm:$0xff]  ;;  %v2603_v58 = vadd.f32 %v1707_v54, %v811_v52  ;;  %v3925_v60 = vld [vmem:[%s9273_s11 + $0x190] sm:$0xff]  ;;  %v824_v1 = vld [vmem:[%s14437_s0 + $0x10a8] sm:$0xff] }
  0xe0   : > { %v3926_v59 = vld [vmem:[%s9273_s11 + $0x198] sm:$0xff]  ;;  %7511 = vmatpush1.bf16.msra.mxu1 %v7510_v48  ;;  %v7256_v61 = vpack.c.bf16 %v3505_v49, %v3498_v42  ;;  %v3497_v62 = vmax.f32 %v2601_v50, 0.0  ;;  %v2610_v0 = vadd.f32 %v1714_v57, %v818_v53  ;;  %v831_v2 = vld [vmem:[%s14437_s0 + $0x10e0] sm:$0xff]  ;;  %v1720_v3 = vld [vmem:[%s14438_s1 + $0x10a8] sm:$0xff] }
  0xe1   : > { %v3504_v63 = vmax.f32 %v2608_v51, 0.0  ;;  %4264 = vmatprep.mubr.f32.mxu0 %v3926_v59  ;;  %v7512_v4 = vpack.c.bf16 %v3507_v56, %v3500_v55  ;;  %v3499_v5 = vmax.f32 %v2603_v58, 0.0  ;;  %4908 = vmatprep.mubr.f32.mxu1 %v3926_v59  ;;  %v1727_v6 = vld [vmem:[%s14438_s1 + $0x10e0] sm:$0xff]  ;;  %v2616_v7 = vadd.f32 %v1720_v3, %v824_v1  ;;  %v826_v8 = vld [vmem:[%s14437_s0 + $0x10b8] sm:$0xff]  ;;  %v833_v9 = vld [vmem:[%s14437_s0 + $0x10f0] sm:$0xff] }
  0xe2   : > { %4265 = vmatmul.mubr.f32.gmra.mrb[12].mxu0 %v3925_v60  ;;  %7257 = vmatprep.subr.bf16.mxu0 %v7256_v61  ;;  %v3506_v11 = vmax.f32 %v2610_v0, 0.0  ;;  %v2623_v12 = vadd.f32 %v1727_v6, %v831_v2  ;;  %v1722_v13 = vld [vmem:[%s14438_s1 + $0x10b8] sm:$0xff]  ;;  %v1729_v14 = vld [vmem:[%s14438_s1 + $0x10f0] sm:$0xff]  ;;  %v823_v15 = vld [vmem:[%s14437_s0 + $0x10a0] sm:$0xff] }
  0xe3   : > { %v7258_v10 = vpack.c.bf16 %v3504_v63, %v3497_v62  ;;  %4909 = vmatmul.mubr.f32.gmra.mrb[12].mxu1 %v3925_v60  ;;  %7513 = vmatprep.subr.bf16.mxu1 %v7512_v4  ;;  %v3512_v16 = vmax.f32 %v2616_v7, 0.0  ;;  %v2618_v17 = vadd.f32 %v1722_v13, %v826_v8  ;;  %v2625_v18 = vadd.f32 %v1729_v14, %v833_v9  ;;  %v830_v19 = vld [vmem:[%s14437_s0 + $0x10d8] sm:$0xff]  ;;  %v1719_v20 = vld [vmem:[%s14438_s1 + $0x10a0] sm:$0xff]  ;;  %v825_v26 = vld [vmem:[%s14437_s0 + $0x10b0] sm:$0xff] }
  0xe4   : > { %v1726_v21 = vld [vmem:[%s14438_s1 + $0x10d8] sm:$0xff]  ;;  %v7514_v22 = vpack.c.bf16 %v3506_v11, %v3499_v5  ;;  %v3519_v23 = vmax.f32 %v2623_v12, 0.0  ;;  %v2615_v24 = vadd.f32 %v1719_v20, %v823_v15  ;;  %v832_v27 = vld [vmem:[%s14437_s0 + $0x10e8] sm:$0xff]  ;;  %v1721_v28 = vld [vmem:[%s14438_s1 + $0x10b0] sm:$0xff] }
  0xe5   : > { %7259 = vmatpush1.bf16.msra.mxu0 %v7258_v10  ;;  %v2622_v25 = vadd.f32 %v1726_v21, %v830_v19  ;;  %v3514_v29 = vmax.f32 %v2618_v17, 0.0  ;;  %v3521_v30 = vmax.f32 %v2625_v18, 0.0  ;;  %v1728_v31 = vld [vmem:[%s14438_s1 + $0x10e8] sm:$0xff]  ;;  %v2617_v32 = vadd.f32 %v1721_v28, %v825_v26  ;;  %v3934_v33 = vld [vmem:[%s9273_s11 + $0x1d8] sm:$0xff]  ;;  %v3933_v34 = vld [vmem:[%s9273_s11 + $0x1d0] sm:$0xff] }
  0xe6   : > { %7515 = vmatpush1.bf16.msra.mxu1 %v7514_v22  ;;  %v7260_v35 = vpack.c.bf16 %v3519_v23, %v3512_v16  ;;  %v3511_v36 = vmax.f32 %v2615_v24, 0.0  ;;  %v2624_v38 = vadd.f32 %v1728_v31, %v832_v27  ;;  %4270 = vmatprep.mubr.f32.mxu0 %v3934_v33  ;;  %v838_v39 = vld [vmem:[%s14437_s0 + $0x1118] sm:$0xff]  ;;  %v845_v40 = vld [vmem:[%s14437_s0 + $0x1150] sm:$0xff]  ;;  %v840_v46 = vld [vmem:[%s14437_s0 + $0x1128] sm:$0xff] }
  0xe7   : > { %v3518_v37 = vmax.f32 %v2622_v25, 0.0  ;;  %v1734_v41 = vld [vmem:[%s14438_s1 + $0x1118] sm:$0xff]  ;;  %v7516_v42 = vpack.c.bf16 %v3521_v30, %v3514_v29  ;;  %v3513_v43 = vmax.f32 %v2617_v32, 0.0  ;;  %4914 = vmatprep.mubr.f32.mxu1 %v3934_v33  ;;  %4271 = vmatmul.mubr.f32.gmra.mrb[14].mxu0 %v3933_v34  ;;  %v1741_v44 = vld [vmem:[%s14438_s1 + $0x1150] sm:$0xff]  ;;  %v847_v47 = vld [vmem:[%s14437_s0 + $0x1160] sm:$0xff] }
  0xe8   : > { %v2630_v45 = vadd.f32 %v1734_v41, %v838_v39  ;;  %7261 = vmatprep.subr.bf16.mxu0 %v7260_v35  ;;  %v3520_v49 = vmax.f32 %v2624_v38, 0.0  ;;  %v2637_v50 = vadd.f32 %v1741_v44, %v845_v40  ;;  %4915 = vmatmul.mubr.f32.gmra.mrb[14].mxu1 %v3933_v34  ;;  %v1736_v51 = vld [vmem:[%s14438_s1 + $0x1128] sm:$0xff]  ;;  %v1743_v52 = vld [vmem:[%s14438_s1 + $0x1160] sm:$0xff]  ;;  %v837_v53 = vld [vmem:[%s14437_s0 + $0x1110] sm:$0xff] }
  0xe9   : > { %v7262_v48 = vpack.c.bf16 %v3518_v37, %v3511_v36  ;;  %7517 = vmatprep.subr.bf16.mxu1 %v7516_v42  ;;  %v2632_v55 = vadd.f32 %v1736_v51, %v840_v46  ;;  %v2639_v56 = vadd.f32 %v1743_v52, %v847_v47  ;;  %v844_v57 = vld [vmem:[%s14437_s0 + $0x1148] sm:$0xff]  ;;  %v1733_v58 = vld [vmem:[%s14438_s1 + $0x1110] sm:$0xff]  ;;  %v839_v0 = vld [vmem:[%s14437_s0 + $0x1120] sm:$0xff] }
  0xea   : > { %v3526_v54 = vmax.f32 %v2630_v45, 0.0  ;;  %v1740_v59 = vld [vmem:[%s14438_s1 + $0x1148] sm:$0xff]  ;;  %v7518_v60 = vpack.c.bf16 %v3520_v49, %v3513_v43  ;;  %v3533_v61 = vmax.f32 %v2637_v50, 0.0  ;;  %v2629_v62 = vadd.f32 %v1733_v58, %v837_v53  ;;  %v846_v1 = vld [vmem:[%s14437_s0 + $0x1158] sm:$0xff]  ;;  %v1735_v2 = vld [vmem:[%s14438_s1 + $0x1120] sm:$0xff] }
  0xeb   : > { %7263 = vmatpush1.bf16.msra.mxu0 %v7262_v48  ;;  %v2636_v63 = vadd.f32 %v1740_v59, %v844_v57  ;;  %v3528_v3 = vmax.f32 %v2632_v55, 0.0  ;;  %v3535_v4 = vmax.f32 %v2639_v56, 0.0  ;;  %v1742_v5 = vld [vmem:[%s14438_s1 + $0x1158] sm:$0xff]  ;;  %v2631_v6 = vadd.f32 %v1735_v2, %v839_v0  ;;  %v3941_v8 = vld [vmem:[%s9273_s11 + $0x210] sm:$0xff]  ;;  %v852_v13 = vld [vmem:[%s14437_s0 + $0x1188] sm:$0xff] }
  0xec   : > { %v3942_v7 = vld [vmem:[%s9273_s11 + $0x218] sm:$0xff]  ;;  %7519 = vmatpush1.bf16.msra.mxu1 %v7518_v60  ;;  %v7264_v9 = vpack.c.bf16 %v3533_v61, %v3526_v54  ;;  %v3525_v10 = vmax.f32 %v2629_v62, 0.0  ;;  %v2638_v12 = vadd.f32 %v1742_v5, %v846_v1  ;;  %v859_v14 = vld [vmem:[%s14437_s0 + $0x11c0] sm:$0xff]  ;;  %v1748_v15 = vld [vmem:[%s14438_s1 + $0x1188] sm:$0xff] }
  0xed   : > { %v3532_v11 = vmax.f32 %v2636_v63, 0.0  ;;  %4276 = vmatprep.mubr.f32.mxu0 %v3942_v7  ;;  %v7520_v16 = vpack.c.bf16 %v3535_v4, %v3528_v3  ;;  %v3527_v17 = vmax.f32 %v2631_v6, 0.0  ;;  %4920 = vmatprep.mubr.f32.mxu1 %v3942_v7  ;;  %v1755_v18 = vld [vmem:[%s14438_s1 + $0x11c0] sm:$0xff]  ;;  %v2644_v19 = vadd.f32 %v1748_v15, %v852_v13  ;;  %v854_v20 = vld [vmem:[%s14437_s0 + $0x1198] sm:$0xff]  ;;  %v861_v21 = vld [vmem:[%s14437_s0 + $0x11d0] sm:$0xff] }
  0xee   : > { %4277 = vmatmul.mubr.f32.gmra.mrb[16].mxu0 %v3941_v8  ;;  %7265 = vmatprep.subr.bf16.mxu0 %v7264_v9  ;;  %v3534_v23 = vmax.f32 %v2638_v12, 0.0  ;;  %v2651_v24 = vadd.f32 %v1755_v18, %v859_v14  ;;  %v1750_v25 = vld [vmem:[%s14438_s1 + $0x1198] sm:$0xff]  ;;  %v1757_v26 = vld [vmem:[%s14438_s1 + $0x11d0] sm:$0xff]  ;;  %v851_v27 = vld [vmem:[%s14437_s0 + $0x1180] sm:$0xff] }
  0xef   : > { %v7266_v22 = vpack.c.bf16 %v3532_v11, %v3525_v10  ;;  %4921 = vmatmul.mubr.f32.gmra.mrb[16].mxu1 %v3941_v8  ;;  %7521 = vmatprep.subr.bf16.mxu1 %v7520_v16  ;;  %v3540_v28 = vmax.f32 %v2644_v19, 0.0  ;;  %v2646_v29 = vadd.f32 %v1750_v25, %v854_v20  ;;  %v2653_v30 = vadd.f32 %v1757_v26, %v861_v21  ;;  %v858_v31 = vld [vmem:[%s14437_s0 + $0x11b8] sm:$0xff]  ;;  %v1747_v32 = vld [vmem:[%s14438_s1 + $0x1180] sm:$0xff]  ;;  %v853_v38 = vld [vmem:[%s14437_s0 + $0x1190] sm:$0xff] }
  0xf0   : > { %v1754_v33 = vld [vmem:[%s14438_s1 + $0x11b8] sm:$0xff]  ;;  %v7522_v34 = vpack.c.bf16 %v3534_v23, %v3527_v17  ;;  %v3547_v35 = vmax.f32 %v2651_v24, 0.0  ;;  %v2643_v36 = vadd.f32 %v1747_v32, %v851_v27  ;;  %v860_v39 = vld [vmem:[%s14437_s0 + $0x11c8] sm:$0xff]  ;;  %v1749_v40 = vld [vmem:[%s14438_s1 + $0x1190] sm:$0xff] }
  0xf1   : > { %7267 = vmatpush1.bf16.msra.mxu0 %v7266_v22  ;;  %v2650_v37 = vadd.f32 %v1754_v33, %v858_v31  ;;  %v3542_v41 = vmax.f32 %v2646_v29, 0.0  ;;  %v3549_v42 = vmax.f32 %v2653_v30, 0.0  ;;  %v1756_v43 = vld [vmem:[%s14438_s1 + $0x11c8] sm:$0xff]  ;;  %v2645_v44 = vadd.f32 %v1749_v40, %v853_v38  ;;  %v3950_v45 = vld [vmem:[%s9273_s11 + $0x258] sm:$0xff]  ;;  %v3949_v46 = vld [vmem:[%s9273_s11 + $0x250] sm:$0xff] }
  0xf2   : > { %7523 = vmatpush1.bf16.msra.mxu1 %v7522_v34  ;;  %v7268_v47 = vpack.c.bf16 %v3547_v35, %v3540_v28  ;;  %v3539_v48 = vmax.f32 %v2643_v36, 0.0  ;;  %v2652_v50 = vadd.f32 %v1756_v43, %v860_v39  ;;  %4282 = vmatprep.mubr.f32.mxu0 %v3950_v45  ;;  %v866_v51 = vld [vmem:[%s14437_s0 + $0x11f8] sm:$0xff]  ;;  %v873_v52 = vld [vmem:[%s14437_s0 + $0x1230] sm:$0xff]  ;;  %v868_v58 = vld [vmem:[%s14437_s0 + $0x1208] sm:$0xff] }
  0xf3   : > { %v3546_v49 = vmax.f32 %v2650_v37, 0.0  ;;  %v1762_v53 = vld [vmem:[%s14438_s1 + $0x11f8] sm:$0xff]  ;;  %v7524_v54 = vpack.c.bf16 %v3549_v42, %v3542_v41  ;;  %v3541_v55 = vmax.f32 %v2645_v44, 0.0  ;;  %4926 = vmatprep.mubr.f32.mxu1 %v3950_v45  ;;  %4283 = vmatmul.mubr.f32.gmra.mrb[18].mxu0 %v3949_v46  ;;  %v1769_v56 = vld [vmem:[%s14438_s1 + $0x1230] sm:$0xff]  ;;  %v875_v59 = vld [vmem:[%s14437_s0 + $0x1240] sm:$0xff] }
  0xf4   : > { %v2658_v57 = vadd.f32 %v1762_v53, %v866_v51  ;;  %7269 = vmatprep.subr.bf16.mxu0 %v7268_v47  ;;  %v3548_v61 = vmax.f32 %v2652_v50, 0.0  ;;  %v2665_v62 = vadd.f32 %v1769_v56, %v873_v52  ;;  %4927 = vmatmul.mubr.f32.gmra.mrb[18].mxu1 %v3949_v46  ;;  %v1764_v63 = vld [vmem:[%s14438_s1 + $0x1208] sm:$0xff]  ;;  %v1771_v0 = vld [vmem:[%s14438_s1 + $0x1240] sm:$0xff]  ;;  %v865_v1 = vld [vmem:[%s14437_s0 + $0x11f0] sm:$0xff] }
  0xf5   : > { %v7270_v60 = vpack.c.bf16 %v3546_v49, %v3539_v48  ;;  %7525 = vmatprep.subr.bf16.mxu1 %v7524_v54  ;;  %v2660_v3 = vadd.f32 %v1764_v63, %v868_v58  ;;  %v2667_v4 = vadd.f32 %v1771_v0, %v875_v59  ;;  %v872_v5 = vld [vmem:[%s14437_s0 + $0x1228] sm:$0xff]  ;;  %v1761_v6 = vld [vmem:[%s14438_s1 + $0x11f0] sm:$0xff]  ;;  %v867_v12 = vld [vmem:[%s14437_s0 + $0x1200] sm:$0xff] }
  0xf6   : > { %v3554_v2 = vmax.f32 %v2658_v57, 0.0  ;;  %v1768_v7 = vld [vmem:[%s14438_s1 + $0x1228] sm:$0xff]  ;;  %v7526_v8 = vpack.c.bf16 %v3548_v61, %v3541_v55  ;;  %v3561_v9 = vmax.f32 %v2665_v62, 0.0  ;;  %v2657_v10 = vadd.f32 %v1761_v6, %v865_v1  ;;  %v874_v13 = vld [vmem:[%s14437_s0 + $0x1238] sm:$0xff]  ;;  %v1763_v14 = vld [vmem:[%s14438_s1 + $0x1200] sm:$0xff] }
  0xf7   : > { %7271 = vmatpush1.bf16.msra.mxu0 %v7270_v60  ;;  %v2664_v11 = vadd.f32 %v1768_v7, %v872_v5  ;;  %v3556_v15 = vmax.f32 %v2660_v3, 0.0  ;;  %v3563_v16 = vmax.f32 %v2667_v4, 0.0  ;;  %v1770_v17 = vld [vmem:[%s14438_s1 + $0x1238] sm:$0xff]  ;;  %v2659_v18 = vadd.f32 %v1763_v14, %v867_v12  ;;  %v3957_v20 = vld [vmem:[%s9273_s11 + $0x290] sm:$0xff]  ;;  %v880_v25 = vld [vmem:[%s14437_s0 + $0x1268] sm:$0xff] }
  0xf8   : > { %v3958_v19 = vld [vmem:[%s9273_s11 + $0x298] sm:$0xff]  ;;  %7527 = vmatpush1.bf16.msra.mxu1 %v7526_v8  ;;  %v7272_v21 = vpack.c.bf16 %v3561_v9, %v3554_v2  ;;  %v3553_v22 = vmax.f32 %v2657_v10, 0.0  ;;  %v2666_v24 = vadd.f32 %v1770_v17, %v874_v13  ;;  %v887_v26 = vld [vmem:[%s14437_s0 + $0x12a0] sm:$0xff]  ;;  %v1776_v27 = vld [vmem:[%s14438_s1 + $0x1268] sm:$0xff] }
  0xf9   : > { %v3560_v23 = vmax.f32 %v2664_v11, 0.0  ;;  %4288 = vmatprep.mubr.f32.mxu0 %v3958_v19  ;;  %v7528_v28 = vpack.c.bf16 %v3563_v16, %v3556_v15  ;;  %v3555_v29 = vmax.f32 %v2659_v18, 0.0  ;;  %4932 = vmatprep.mubr.f32.mxu1 %v3958_v19  ;;  %v1783_v30 = vld [vmem:[%s14438_s1 + $0x12a0] sm:$0xff]  ;;  %v2672_v31 = vadd.f32 %v1776_v27, %v880_v25  ;;  %v882_v32 = vld [vmem:[%s14437_s0 + $0x1278] sm:$0xff]  ;;  %v889_v33 = vld [vmem:[%s14437_s0 + $0x12b0] sm:$0xff] }
  0xfa   : > { %4289 = vmatmul.mubr.f32.gmra.mrb[20].mxu0 %v3957_v20  ;;  %7273 = vmatprep.subr.bf16.mxu0 %v7272_v21  ;;  %v3562_v35 = vmax.f32 %v2666_v24, 0.0  ;;  %v2679_v36 = vadd.f32 %v1783_v30, %v887_v26  ;;  %v1778_v37 = vld [vmem:[%s14438_s1 + $0x1278] sm:$0xff]  ;;  %v1785_v38 = vld [vmem:[%s14438_s1 + $0x12b0] sm:$0xff]  ;;  %v879_v39 = vld [vmem:[%s14437_s0 + $0x1260] sm:$0xff] }
  0xfb   : > { %v7274_v34 = vpack.c.bf16 %v3560_v23, %v3553_v22  ;;  %4933 = vmatmul.mubr.f32.gmra.mrb[20].mxu1 %v3957_v20  ;;  %7529 = vmatprep.subr.bf16.mxu1 %v7528_v28  ;;  %v3568_v40 = vmax.f32 %v2672_v31, 0.0  ;;  %v2674_v41 = vadd.f32 %v1778_v37, %v882_v32  ;;  %v2681_v42 = vadd.f32 %v1785_v38, %v889_v33  ;;  %v886_v43 = vld [vmem:[%s14437_s0 + $0x1298] sm:$0xff]  ;;  %v1775_v44 = vld [vmem:[%s14438_s1 + $0x1260] sm:$0xff]  ;;  %v881_v50 = vld [vmem:[%s14437_s0 + $0x1270] sm:$0xff] }
  0xfc   : > { %v1782_v45 = vld [vmem:[%s14438_s1 + $0x1298] sm:$0xff]  ;;  %v7530_v46 = vpack.c.bf16 %v3562_v35, %v3555_v29  ;;  %v3575_v47 = vmax.f32 %v2679_v36, 0.0  ;;  %v2671_v48 = vadd.f32 %v1775_v44, %v879_v39  ;;  %v888_v51 = vld [vmem:[%s14437_s0 + $0x12a8] sm:$0xff]  ;;  %v1777_v52 = vld [vmem:[%s14438_s1 + $0x1270] sm:$0xff] }
  0xfd   : > { %7275 = vmatpush1.bf16.msra.mxu0 %v7274_v34  ;;  %v2678_v49 = vadd.f32 %v1782_v45, %v886_v43  ;;  %v3570_v53 = vmax.f32 %v2674_v41, 0.0  ;;  %v3577_v54 = vmax.f32 %v2681_v42, 0.0  ;;  %v1784_v55 = vld [vmem:[%s14438_s1 + $0x12a8] sm:$0xff]  ;;  %v2673_v56 = vadd.f32 %v1777_v52, %v881_v50  ;;  %v3966_v57 = vld [vmem:[%s9273_s11 + $0x2d8] sm:$0xff]  ;;  %v3965_v58 = vld [vmem:[%s9273_s11 + $0x2d0] sm:$0xff] }
  0xfe   : > { %7531 = vmatpush1.bf16.msra.mxu1 %v7530_v46  ;;  %v7276_v59 = vpack.c.bf16 %v3575_v47, %v3568_v40  ;;  %v3567_v60 = vmax.f32 %v2671_v48, 0.0  ;;  %v2680_v62 = vadd.f32 %v1784_v55, %v888_v51  ;;  %4294 = vmatprep.mubr.f32.mxu0 %v3966_v57  ;;  %v894_v63 = vld [vmem:[%s14437_s0 + $0x12d8] sm:$0xff]  ;;  %v901_v0 = vld [vmem:[%s14437_s0 + $0x1310] sm:$0xff]  ;;  %v896_v6 = vld [vmem:[%s14437_s0 + $0x12e8] sm:$0xff] }
  0xff   : > { %v3574_v61 = vmax.f32 %v2678_v49, 0.0  ;;  %v1790_v1 = vld [vmem:[%s14438_s1 + $0x12d8] sm:$0xff]  ;;  %v7532_v2 = vpack.c.bf16 %v3577_v54, %v3570_v53  ;;  %v3569_v3 = vmax.f32 %v2673_v56, 0.0  ;;  %4938 = vmatprep.mubr.f32.mxu1 %v3966_v57  ;;  %4295 = vmatmul.mubr.f32.gmra.mrb[22].mxu0 %v3965_v58  ;;  %v1797_v4 = vld [vmem:[%s14438_s1 + $0x1310] sm:$0xff]  ;;  %v903_v7 = vld [vmem:[%s14437_s0 + $0x1320] sm:$0xff] }
 0x100   : > { %v2686_v5 = vadd.f32 %v1790_v1, %v894_v63  ;;  %7277 = vmatprep.subr.bf16.mxu0 %v7276_v59  ;;  %v3576_v9 = vmax.f32 %v2680_v62, 0.0  ;;  %v2693_v10 = vadd.f32 %v1797_v4, %v901_v0  ;;  %4939 = vmatmul.mubr.f32.gmra.mrb[22].mxu1 %v3965_v58  ;;  %v1792_v11 = vld [vmem:[%s14438_s1 + $0x12e8] sm:$0xff]  ;;  %v1799_v12 = vld [vmem:[%s14438_s1 + $0x1320] sm:$0xff]  ;;  %v893_v13 = vld [vmem:[%s14437_s0 + $0x12d0] sm:$0xff] }
 0x101   : > { %v7278_v8 = vpack.c.bf16 %v3574_v61, %v3567_v60  ;;  %7533 = vmatprep.subr.bf16.mxu1 %v7532_v2  ;;  %v2688_v15 = vadd.f32 %v1792_v11, %v896_v6  ;;  %v2695_v16 = vadd.f32 %v1799_v12, %v903_v7  ;;  %v900_v17 = vld [vmem:[%s14437_s0 + $0x1308] sm:$0xff]  ;;  %v1789_v18 = vld [vmem:[%s14438_s1 + $0x12d0] sm:$0xff]  ;;  %v895_v24 = vld [vmem:[%s14437_s0 + $0x12e0] sm:$0xff] }
 0x102   : > { %v3582_v14 = vmax.f32 %v2686_v5, 0.0  ;;  %v1796_v19 = vld [vmem:[%s14438_s1 + $0x1308] sm:$0xff]  ;;  %v7534_v20 = vpack.c.bf16 %v3576_v9, %v3569_v3  ;;  %v3589_v21 = vmax.f32 %v2693_v10, 0.0  ;;  %v2685_v22 = vadd.f32 %v1789_v18, %v893_v13  ;;  %v902_v25 = vld [vmem:[%s14437_s0 + $0x1318] sm:$0xff]  ;;  %v1791_v26 = vld [vmem:[%s14438_s1 + $0x12e0] sm:$0xff] }
 0x103   : > { %7279 = vmatpush1.bf16.msra.mxu0 %v7278_v8  ;;  %v2692_v23 = vadd.f32 %v1796_v19, %v900_v17  ;;  %v3584_v27 = vmax.f32 %v2688_v15, 0.0  ;;  %v3591_v28 = vmax.f32 %v2695_v16, 0.0  ;;  %v1798_v29 = vld [vmem:[%s14438_s1 + $0x1318] sm:$0xff]  ;;  %v2687_v30 = vadd.f32 %v1791_v26, %v895_v24  ;;  %v3973_v32 = vld [vmem:[%s9273_s11 + $0x310] sm:$0xff]  ;;  %v908_v37 = vld [vmem:[%s14437_s0 + $0x1348] sm:$0xff] }
 0x104   : > { %v3974_v31 = vld [vmem:[%s9273_s11 + $0x318] sm:$0xff]  ;;  %7535 = vmatpush1.bf16.msra.mxu1 %v7534_v20  ;;  %v7280_v33 = vpack.c.bf16 %v3589_v21, %v3582_v14  ;;  %v3581_v34 = vmax.f32 %v2685_v22, 0.0  ;;  %v2694_v36 = vadd.f32 %v1798_v29, %v902_v25  ;;  %v915_v38 = vld [vmem:[%s14437_s0 + $0x1380] sm:$0xff]  ;;  %v1804_v39 = vld [vmem:[%s14438_s1 + $0x1348] sm:$0xff] }
 0x105   : > { %v3588_v35 = vmax.f32 %v2692_v23, 0.0  ;;  %4300 = vmatprep.mubr.f32.mxu0 %v3974_v31  ;;  %v7536_v40 = vpack.c.bf16 %v3591_v28, %v3584_v27  ;;  %v3583_v41 = vmax.f32 %v2687_v30, 0.0  ;;  %4944 = vmatprep.mubr.f32.mxu1 %v3974_v31  ;;  %v1811_v42 = vld [vmem:[%s14438_s1 + $0x1380] sm:$0xff]  ;;  %v2700_v43 = vadd.f32 %v1804_v39, %v908_v37  ;;  %v910_v44 = vld [vmem:[%s14437_s0 + $0x1358] sm:$0xff]  ;;  %v917_v45 = vld [vmem:[%s14437_s0 + $0x1390] sm:$0xff] }
 0x106   : > { %4301 = vmatmul.mubr.f32.gmra.mrb[24].mxu0 %v3973_v32  ;;  %7281 = vmatprep.subr.bf16.mxu0 %v7280_v33  ;;  %v3590_v47 = vmax.f32 %v2694_v36, 0.0  ;;  %v2707_v48 = vadd.f32 %v1811_v42, %v915_v38  ;;  %v1806_v49 = vld [vmem:[%s14438_s1 + $0x1358] sm:$0xff]  ;;  %v1813_v50 = vld [vmem:[%s14438_s1 + $0x1390] sm:$0xff]  ;;  %v907_v51 = vld [vmem:[%s14437_s0 + $0x1340] sm:$0xff] }
 0x107   : > { %v7282_v46 = vpack.c.bf16 %v3588_v35, %v3581_v34  ;;  %4945 = vmatmul.mubr.f32.gmra.mrb[24].mxu1 %v3973_v32  ;;  %7537 = vmatprep.subr.bf16.mxu1 %v7536_v40  ;;  %v3596_v52 = vmax.f32 %v2700_v43, 0.0  ;;  %v2702_v53 = vadd.f32 %v1806_v49, %v910_v44  ;;  %v2709_v54 = vadd.f32 %v1813_v50, %v917_v45  ;;  %v914_v55 = vld [vmem:[%s14437_s0 + $0x1378] sm:$0xff]  ;;  %v1803_v56 = vld [vmem:[%s14438_s1 + $0x1340] sm:$0xff]  ;;  %v909_v62 = vld [vmem:[%s14437_s0 + $0x1350] sm:$0xff] }
 0x108   : > { %v1810_v57 = vld [vmem:[%s14438_s1 + $0x1378] sm:$0xff]  ;;  %v7538_v58 = vpack.c.bf16 %v3590_v47, %v3583_v41  ;;  %v3603_v59 = vmax.f32 %v2707_v48, 0.0  ;;  %v2699_v60 = vadd.f32 %v1803_v56, %v907_v51  ;;  %v916_v63 = vld [vmem:[%s14437_s0 + $0x1388] sm:$0xff]  ;;  %v1805_v0 = vld [vmem:[%s14438_s1 + $0x1350] sm:$0xff] }
 0x109   : > { %7283 = vmatpush1.bf16.msra.mxu0 %v7282_v46  ;;  %v2706_v61 = vadd.f32 %v1810_v57, %v914_v55  ;;  %v3598_v1 = vmax.f32 %v2702_v53, 0.0  ;;  %v3605_v2 = vmax.f32 %v2709_v54, 0.0  ;;  %v1812_v3 = vld [vmem:[%s14438_s1 + $0x1388] sm:$0xff]  ;;  %v2701_v4 = vadd.f32 %v1805_v0, %v909_v62  ;;  %v3982_v5 = vld [vmem:[%s9273_s11 + $0x358] sm:$0xff]  ;;  %v3981_v6 = vld [vmem:[%s9273_s11 + $0x350] sm:$0xff] }
 0x10a   : > { %7539 = vmatpush1.bf16.msra.mxu1 %v7538_v58  ;;  %v7284_v7 = vpack.c.bf16 %v3603_v59, %v3596_v52  ;;  %v3595_v8 = vmax.f32 %v2699_v60, 0.0  ;;  %v2708_v10 = vadd.f32 %v1812_v3, %v916_v63  ;;  %4306 = vmatprep.mubr.f32.mxu0 %v3982_v5  ;;  %v922_v11 = vld [vmem:[%s14437_s0 + $0x13b8] sm:$0xff]  ;;  %v929_v12 = vld [vmem:[%s14437_s0 + $0x13f0] sm:$0xff]  ;;  %v924_v18 = vld [vmem:[%s14437_s0 + $0x13c8] sm:$0xff] }
 0x10b   : > { %v3602_v9 = vmax.f32 %v2706_v61, 0.0  ;;  %v1818_v13 = vld [vmem:[%s14438_s1 + $0x13b8] sm:$0xff]  ;;  %v7540_v14 = vpack.c.bf16 %v3605_v2, %v3598_v1  ;;  %v3597_v15 = vmax.f32 %v2701_v4, 0.0  ;;  %4950 = vmatprep.mubr.f32.mxu1 %v3982_v5  ;;  %4307 = vmatmul.mubr.f32.gmra.mrb[26].mxu0 %v3981_v6  ;;  %v1825_v16 = vld [vmem:[%s14438_s1 + $0x13f0] sm:$0xff]  ;;  %v931_v19 = vld [vmem:[%s14437_s0 + $0x1400] sm:$0xff] }
 0x10c   : > { %v2714_v17 = vadd.f32 %v1818_v13, %v922_v11  ;;  %7285 = vmatprep.subr.bf16.mxu0 %v7284_v7  ;;  %v3604_v21 = vmax.f32 %v2708_v10, 0.0  ;;  %v2721_v22 = vadd.f32 %v1825_v16, %v929_v12  ;;  %4951 = vmatmul.mubr.f32.gmra.mrb[26].mxu1 %v3981_v6  ;;  %v1820_v23 = vld [vmem:[%s14438_s1 + $0x13c8] sm:$0xff]  ;;  %v1827_v24 = vld [vmem:[%s14438_s1 + $0x1400] sm:$0xff]  ;;  %v921_v25 = vld [vmem:[%s14437_s0 + $0x13b0] sm:$0xff] }
 0x10d   : > { %v7286_v20 = vpack.c.bf16 %v3602_v9, %v3595_v8  ;;  %7541 = vmatprep.subr.bf16.mxu1 %v7540_v14  ;;  %v2716_v27 = vadd.f32 %v1820_v23, %v924_v18  ;;  %v2723_v28 = vadd.f32 %v1827_v24, %v931_v19  ;;  %v928_v29 = vld [vmem:[%s14437_s0 + $0x13e8] sm:$0xff]  ;;  %v1817_v30 = vld [vmem:[%s14438_s1 + $0x13b0] sm:$0xff]  ;;  %v923_v36 = vld [vmem:[%s14437_s0 + $0x13c0] sm:$0xff] }
 0x10e   : > { %v3610_v26 = vmax.f32 %v2714_v17, 0.0  ;;  %v1824_v31 = vld [vmem:[%s14438_s1 + $0x13e8] sm:$0xff]  ;;  %v7542_v32 = vpack.c.bf16 %v3604_v21, %v3597_v15  ;;  %v3617_v33 = vmax.f32 %v2721_v22, 0.0  ;;  %v2713_v34 = vadd.f32 %v1817_v30, %v921_v25  ;;  %v930_v37 = vld [vmem:[%s14437_s0 + $0x13f8] sm:$0xff]  ;;  %v1819_v38 = vld [vmem:[%s14438_s1 + $0x13c0] sm:$0xff] }
 0x10f   : > { %7287 = vmatpush1.bf16.msra.mxu0 %v7286_v20  ;;  %v2720_v35 = vadd.f32 %v1824_v31, %v928_v29  ;;  %v3612_v39 = vmax.f32 %v2716_v27, 0.0  ;;  %v3619_v40 = vmax.f32 %v2723_v28, 0.0  ;;  %v1826_v41 = vld [vmem:[%s14438_s1 + $0x13f8] sm:$0xff]  ;;  %v2715_v42 = vadd.f32 %v1819_v38, %v923_v36  ;;  %v3989_v44 = vld [vmem:[%s9273_s11 + $0x390] sm:$0xff]  ;;  %v936_v49 = vld [vmem:[%s14437_s0 + $0x1428] sm:$0xff] }
 0x110   : > { %v3990_v43 = vld [vmem:[%s9273_s11 + $0x398] sm:$0xff]  ;;  %7543 = vmatpush1.bf16.msra.mxu1 %v7542_v32  ;;  %v7288_v45 = vpack.c.bf16 %v3617_v33, %v3610_v26  ;;  %v3609_v46 = vmax.f32 %v2713_v34, 0.0  ;;  %v2722_v48 = vadd.f32 %v1826_v41, %v930_v37  ;;  %v943_v50 = vld [vmem:[%s14437_s0 + $0x1460] sm:$0xff]  ;;  %v1832_v51 = vld [vmem:[%s14438_s1 + $0x1428] sm:$0xff] }
 0x111   : > { %v3616_v47 = vmax.f32 %v2720_v35, 0.0  ;;  %4312 = vmatprep.mubr.f32.mxu0 %v3990_v43  ;;  %v7544_v52 = vpack.c.bf16 %v3619_v40, %v3612_v39  ;;  %v3611_v53 = vmax.f32 %v2715_v42, 0.0  ;;  %4956 = vmatprep.mubr.f32.mxu1 %v3990_v43  ;;  %v1839_v54 = vld [vmem:[%s14438_s1 + $0x1460] sm:$0xff]  ;;  %v2728_v55 = vadd.f32 %v1832_v51, %v936_v49  ;;  %v938_v56 = vld [vmem:[%s14437_s0 + $0x1438] sm:$0xff]  ;;  %v945_v57 = vld [vmem:[%s14437_s0 + $0x1470] sm:$0xff] }
 0x112   : > { %4313 = vmatmul.mubr.f32.gmra.mrb[28].mxu0 %v3989_v44  ;;  %7289 = vmatprep.subr.bf16.mxu0 %v7288_v45  ;;  %v3618_v59 = vmax.f32 %v2722_v48, 0.0  ;;  %v2735_v60 = vadd.f32 %v1839_v54, %v943_v50  ;;  %v1834_v61 = vld [vmem:[%s14438_s1 + $0x1438] sm:$0xff]  ;;  %v1841_v62 = vld [vmem:[%s14438_s1 + $0x1470] sm:$0xff]  ;;  %v935_v63 = vld [vmem:[%s14437_s0 + $0x1420] sm:$0xff] }
 0x113   : > { %v7290_v58 = vpack.c.bf16 %v3616_v47, %v3609_v46  ;;  %4957 = vmatmul.mubr.f32.gmra.mrb[28].mxu1 %v3989_v44  ;;  %7545 = vmatprep.subr.bf16.mxu1 %v7544_v52  ;;  %v3624_v0 = vmax.f32 %v2728_v55, 0.0  ;;  %v2730_v1 = vadd.f32 %v1834_v61, %v938_v56  ;;  %v2737_v2 = vadd.f32 %v1841_v62, %v945_v57  ;;  %v942_v3 = vld [vmem:[%s14437_s0 + $0x1458] sm:$0xff]  ;;  %v1831_v4 = vld [vmem:[%s14438_s1 + $0x1420] sm:$0xff]  ;;  %v937_v10 = vld [vmem:[%s14437_s0 + $0x1430] sm:$0xff] }
 0x114   : > { %v1838_v5 = vld [vmem:[%s14438_s1 + $0x1458] sm:$0xff]  ;;  %v7546_v6 = vpack.c.bf16 %v3618_v59, %v3611_v53  ;;  %v3631_v7 = vmax.f32 %v2735_v60, 0.0  ;;  %v2727_v8 = vadd.f32 %v1831_v4, %v935_v63  ;;  %v944_v11 = vld [vmem:[%s14437_s0 + $0x1468] sm:$0xff]  ;;  %v1833_v12 = vld [vmem:[%s14438_s1 + $0x1430] sm:$0xff] }
 0x115   : > { %7291 = vmatpush1.bf16.msra.mxu0 %v7290_v58  ;;  %v2734_v9 = vadd.f32 %v1838_v5, %v942_v3  ;;  %v3626_v13 = vmax.f32 %v2730_v1, 0.0  ;;  %v3633_v14 = vmax.f32 %v2737_v2, 0.0  ;;  %v1840_v15 = vld [vmem:[%s14438_s1 + $0x1468] sm:$0xff]  ;;  %v2729_v16 = vadd.f32 %v1833_v12, %v937_v10  ;;  %v3998_v17 = vld [vmem:[%s9273_s11 + $0x3d8] sm:$0xff]  ;;  %v3997_v18 = vld [vmem:[%s9273_s11 + $0x3d0] sm:$0xff] }
 0x116   : > { %7547 = vmatpush1.bf16.msra.mxu1 %v7546_v6  ;;  %v7292_v19 = vpack.c.bf16 %v3631_v7, %v3624_v0  ;;  %v3623_v20 = vmax.f32 %v2727_v8, 0.0  ;;  %v2736_v22 = vadd.f32 %v1840_v15, %v944_v11  ;;  %4318 = vmatprep.mubr.f32.mxu0 %v3998_v17  ;;  %v950_v23 = vld [vmem:[%s14437_s0 + $0x1498] sm:$0xff]  ;;  %v957_v24 = vld [vmem:[%s14437_s0 + $0x14d0] sm:$0xff]  ;;  %v952_v30 = vld [vmem:[%s14437_s0 + $0x14a8] sm:$0xff] }
 0x117   : > { %v3630_v21 = vmax.f32 %v2734_v9, 0.0  ;;  %v1846_v25 = vld [vmem:[%s14438_s1 + $0x1498] sm:$0xff]  ;;  %v7548_v26 = vpack.c.bf16 %v3633_v14, %v3626_v13  ;;  %v3625_v27 = vmax.f32 %v2729_v16, 0.0  ;;  %4962 = vmatprep.mubr.f32.mxu1 %v3998_v17  ;;  %4319 = vmatmul.mubr.f32.gmra.mrb[30].mxu0 %v3997_v18  ;;  %v1853_v28 = vld [vmem:[%s14438_s1 + $0x14d0] sm:$0xff]  ;;  %v959_v31 = vld [vmem:[%s14437_s0 + $0x14e0] sm:$0xff] }
 0x118   : > { %v2742_v29 = vadd.f32 %v1846_v25, %v950_v23  ;;  %7293 = vmatprep.subr.bf16.mxu0 %v7292_v19  ;;  %v3632_v33 = vmax.f32 %v2736_v22, 0.0  ;;  %v2749_v34 = vadd.f32 %v1853_v28, %v957_v24  ;;  %4963 = vmatmul.mubr.f32.gmra.mrb[30].mxu1 %v3997_v18  ;;  %v1848_v35 = vld [vmem:[%s14438_s1 + $0x14a8] sm:$0xff]  ;;  %v1855_v36 = vld [vmem:[%s14438_s1 + $0x14e0] sm:$0xff]  ;;  %v949_v37 = vld [vmem:[%s14437_s0 + $0x1490] sm:$0xff] }
 0x119   : > { %v7294_v32 = vpack.c.bf16 %v3630_v21, %v3623_v20  ;;  %7549 = vmatprep.subr.bf16.mxu1 %v7548_v26  ;;  %v2744_v39 = vadd.f32 %v1848_v35, %v952_v30  ;;  %v2751_v40 = vadd.f32 %v1855_v36, %v959_v31  ;;  %v956_v41 = vld [vmem:[%s14437_s0 + $0x14c8] sm:$0xff]  ;;  %v1845_v42 = vld [vmem:[%s14438_s1 + $0x1490] sm:$0xff]  ;;  %v951_v48 = vld [vmem:[%s14437_s0 + $0x14a0] sm:$0xff] }
 0x11a   : > { %v3638_v38 = vmax.f32 %v2742_v29, 0.0  ;;  %v1852_v43 = vld [vmem:[%s14438_s1 + $0x14c8] sm:$0xff]  ;;  %v7550_v44 = vpack.c.bf16 %v3632_v33, %v3625_v27  ;;  %v3645_v45 = vmax.f32 %v2749_v34, 0.0  ;;  %v2741_v46 = vadd.f32 %v1845_v42, %v949_v37  ;;  %v958_v49 = vld [vmem:[%s14437_s0 + $0x14d8] sm:$0xff]  ;;  %v1847_v50 = vld [vmem:[%s14438_s1 + $0x14a0] sm:$0xff] }
 0x11b   : > { %7295 = vmatpush1.bf16.msra.mxu0 %v7294_v32  ;;  %v2748_v47 = vadd.f32 %v1852_v43, %v956_v41  ;;  %v3640_v51 = vmax.f32 %v2744_v39, 0.0  ;;  %v3647_v52 = vmax.f32 %v2751_v40, 0.0  ;;  %v1854_v53 = vld [vmem:[%s14438_s1 + $0x14d8] sm:$0xff]  ;;  %v2743_v54 = vadd.f32 %v1847_v50, %v951_v48  ;;  %v3880_v55 = vld [vmem:[%s9273_s11 + $0x28] sm:$0xff]  ;;  %v971_v61 = vld [vmem:[%s14437_s0 + $0x1540] sm:$0xff] }
 0x11c   : > { %7551 = vmatpush1.bf16.msra.mxu1 %v7550_v44  ;;  %v7296_v56 = vpack.c.bf16 %v3645_v45, %v3638_v38  ;;  %v3637_v57 = vmax.f32 %v2741_v46, 0.0  ;;  %v2750_v59 = vadd.f32 %v1854_v53, %v958_v49  ;;  %4389 = vmatprep.mubr.f32.mxu0 %v3880_v55  ;;  %v964_v60 = vld [vmem:[%s14437_s0 + $0x1508] sm:$0xff]  ;;  %v1867_v1 = vld [vmem:[%s14438_s1 + $0x1540] sm:$0xff]  ;;  %v966_v3 = vld [vmem:[%s14437_s0 + $0x1518] sm:$0xff] }
 0x11d   : > { %v3644_v58 = vmax.f32 %v2748_v47, 0.0  ;;  %v1860_v62 = vld [vmem:[%s14438_s1 + $0x1508] sm:$0xff]  ;;  %v7552_v63 = vpack.c.bf16 %v3647_v52, %v3640_v51  ;;  %v3639_v0 = vmax.f32 %v2743_v54, 0.0  ;;  %5033 = vmatprep.mubr.f32.mxu1 %v3880_v55  ;;  %v973_v4 = vld [vmem:[%s14437_s0 + $0x1550] sm:$0xff]  ;;  %v3879_v7 = vld [vmem:[%s9273_s11 + $0x20] sm:$0xff]  ;;  %v2763_v8 = vadd.f32 %v1867_v1, %v971_v61 }
 0x11e   : > { %v2756_v2 = vadd.f32 %v1860_v62, %v964_v60  ;;  %7297 = vmatprep.subr.bf16.mxu0 %v7296_v56  ;;  %v3646_v6 = vmax.f32 %v2750_v59, 0.0  ;;  %v1862_v9 = vld [vmem:[%s14438_s1 + $0x1518] sm:$0xff]  ;;  %v1869_v10 = vld [vmem:[%s14438_s1 + $0x1550] sm:$0xff]  ;;  %v963_v11 = vld [vmem:[%s14437_s0 + $0x1500] sm:$0xff] }
 0x11f   : > { %v7298_v5 = vpack.c.bf16 %v3644_v58, %v3637_v57  ;;  %7553 = vmatprep.subr.bf16.mxu1 %v7552_v63  ;;  %v2758_v13 = vadd.f32 %v1862_v9, %v966_v3  ;;  %v2765_v14 = vadd.f32 %v1869_v10, %v973_v4  ;;  %v970_v15 = vld [vmem:[%s14437_s0 + $0x1538] sm:$0xff]  ;;  %v1859_v16 = vld [vmem:[%s14438_s1 + $0x1500] sm:$0xff]  ;;  %v3659_v19 = vmax.f32 %v2763_v8, 0.0  ;;  %v965_v22 = vld [vmem:[%s14437_s0 + $0x1510] sm:$0xff] }
 0x120   : > { %v3652_v12 = vmax.f32 %v2756_v2, 0.0  ;;  %v1866_v17 = vld [vmem:[%s14438_s1 + $0x1538] sm:$0xff]  ;;  %v7554_v18 = vpack.c.bf16 %v3646_v6, %v3639_v0  ;;  %v2755_v20 = vadd.f32 %v1859_v16, %v963_v11  ;;  %v972_v23 = vld [vmem:[%s14437_s0 + $0x1548] sm:$0xff]  ;;  %v1861_v24 = vld [vmem:[%s14438_s1 + $0x1510] sm:$0xff] }
 0x121   : > { %7299 = vmatpush1.bf16.msra.mxu0 %v7298_v5  ;;  %v2762_v21 = vadd.f32 %v1866_v17, %v970_v15  ;;  %v3654_v25 = vmax.f32 %v2758_v13, 0.0  ;;  %v3661_v26 = vmax.f32 %v2765_v14, 0.0  ;;  %v1868_v27 = vld [vmem:[%s14438_s1 + $0x1548] sm:$0xff]  ;;  %v2757_v28 = vadd.f32 %v1861_v24, %v965_v22  ;;  %v3887_v34 = vld [vmem:[%s9273_s11 + $0x60] sm:$0xff]  ;;  %v978_v35 = vld [vmem:[%s14437_s0 + $0x1578] sm:$0xff] }
 0x122   : > { %v3888_v29 = vld [vmem:[%s9273_s11 + $0x68] sm:$0xff]  ;;  %7555 = vmatpush1.bf16.msra.mxu1 %v7554_v18  ;;  %v7300_v30 = vpack.c.bf16 %v3659_v19, %v3652_v12  ;;  %v3651_v31 = vmax.f32 %v2755_v20, 0.0  ;;  %v2764_v33 = vadd.f32 %v1868_v27, %v972_v23  ;;  %v985_v36 = vld [vmem:[%s14437_s0 + $0x15b0] sm:$0xff]  ;;  %v1874_v37 = vld [vmem:[%s14438_s1 + $0x1578] sm:$0xff] }
 0x123   : > { %v3658_v32 = vmax.f32 %v2762_v21, 0.0  ;;  %v7556_v38 = vpack.c.bf16 %v3661_v26, %v3654_v25  ;;  %v3653_v39 = vmax.f32 %v2757_v28, 0.0  ;;  %v1881_v40 = vld [vmem:[%s14438_s1 + $0x15b0] sm:$0xff]  ;;  %v2770_v41 = vadd.f32 %v1874_v37, %v978_v35  ;;  %v980_v42 = vld [vmem:[%s14437_s0 + $0x1588] sm:$0xff]  ;;  %v987_v43 = vld [vmem:[%s14437_s0 + $0x15c0] sm:$0xff] }
 0x124   : > { %4390 = vmatmul.mubr.f32.vlgmr.msra.gmra.mrb[0].mxu0 %v3879_v7  ;;  %7301 = vmatprep.subr.bf16.mxu0 %v7300_v30  ;;  %v3660_v45 = vmax.f32 %v2764_v33, 0.0  ;;  %v2777_v46 = vadd.f32 %v1881_v40, %v985_v36  ;;  %v1876_v47 = vld [vmem:[%s14438_s1 + $0x1588] sm:$0xff]  ;;  %v1883_v48 = vld [vmem:[%s14438_s1 + $0x15c0] sm:$0xff]  ;;  %v977_v49 = vld [vmem:[%s14437_s0 + $0x1570] sm:$0xff] }
 0x125   : > { %v7302_v44 = vpack.c.bf16 %v3658_v32, %v3651_v31  ;;  %4395 = vmatprep.mubr.f32.mxu0 %v3888_v29  ;;  %5034 = vmatmul.mubr.f32.vlgmr.msra.gmra.mrb[0].mxu1 %v3879_v7  ;;  %v3666_v50 = vmax.f32 %v2770_v41, 0.0  ;;  %v2772_v51 = vadd.f32 %v1876_v47, %v980_v42  ;;  %v2779_v52 = vadd.f32 %v1883_v48, %v987_v43  ;;  %v984_v53 = vld [vmem:[%s14437_s0 + $0x15a8] sm:$0xff]  ;;  %v1873_v54 = vld [vmem:[%s14438_s1 + $0x1570] sm:$0xff]  ;;  %v979_v60 = vld [vmem:[%s14437_s0 + $0x1580] sm:$0xff] }
 0x126   : > { %7557 = vmatprep.subr.bf16.mxu1 %v7556_v38  ;;  %v1880_v55 = vld [vmem:[%s14438_s1 + $0x15a8] sm:$0xff]  ;;  %v7558_v56 = vpack.c.bf16 %v3660_v45, %v3653_v39  ;;  %5039 = vmatprep.mubr.f32.mxu1 %v3888_v29  ;;  %v3673_v57 = vmax.f32 %v2777_v46, 0.0  ;;  %v2769_v58 = vadd.f32 %v1873_v54, %v977_v49  ;;  %v986_v61 = vld [vmem:[%s14437_s0 + $0x15b8] sm:$0xff]  ;;  %v1875_v62 = vld [vmem:[%s14438_s1 + $0x1580] sm:$0xff] }
 0x127   : > { %7303 = vmatpush1.bf16.msra.mxu0 %v7302_v44  ;;  %v2776_v59 = vadd.f32 %v1880_v55, %v984_v53  ;;  %v3668_v63 = vmax.f32 %v2772_v51, 0.0  ;;  %v3675_v0 = vmax.f32 %v2779_v52, 0.0  ;;  %v1882_v1 = vld [vmem:[%s14438_s1 + $0x15b8] sm:$0xff]  ;;  %v2771_v2 = vadd.f32 %v1875_v62, %v979_v60  ;;  %v3896_v3 = vld [vmem:[%s9273_s11 + $0xa8] sm:$0xff]  ;;  %v3895_v4 = vld [vmem:[%s9273_s11 + $0xa0] sm:$0xff] }
 0x128   : > { %4396 = vmatmul.mubr.f32.gmra.mrb[2].mxu0 %v3887_v34  ;;  %7559 = vmatpush1.bf16.msra.mxu1 %v7558_v56  ;;  %v7304_v5 = vpack.c.bf16 %v3673_v57, %v3666_v50  ;;  %v3665_v6 = vmax.f32 %v2769_v58, 0.0  ;;  %v2778_v8 = vadd.f32 %v1882_v1, %v986_v61  ;;  %v992_v9 = vld [vmem:[%s14437_s0 + $0x15e8] sm:$0xff]  ;;  %v999_v10 = vld [vmem:[%s14437_s0 + $0x1620] sm:$0xff]  ;;  %v994_v16 = vld [vmem:[%s14437_s0 + $0x15f8] sm:$0xff] }
 0x129   : > { %v3672_v7 = vmax.f32 %v2776_v59, 0.0  ;;  %4401 = vmatprep.mubr.f32.mxu0 %v3896_v3  ;;  %v1888_v11 = vld [vmem:[%s14438_s1 + $0x15e8] sm:$0xff]  ;;  %5040 = vmatmul.mubr.f32.gmra.mrb[2].mxu1 %v3887_v34  ;;  %v7560_v12 = vpack.c.bf16 %v3675_v0, %v3668_v63  ;;  %v3667_v13 = vmax.f32 %v2771_v2, 0.0  ;;  %v1895_v14 = vld [vmem:[%s14438_s1 + $0x1620] sm:$0xff]  ;;  %v1001_v17 = vld [vmem:[%s14437_s0 + $0x1630] sm:$0xff] }
 0x12a   : > { %v2784_v15 = vadd.f32 %v1888_v11, %v992_v9  ;;  %7305 = vmatprep.subr.bf16.mxu0 %v7304_v5  ;;  %v3674_v19 = vmax.f32 %v2778_v8, 0.0  ;;  %5045 = vmatprep.mubr.f32.mxu1 %v3896_v3  ;;  %v2791_v20 = vadd.f32 %v1895_v14, %v999_v10  ;;  %v1890_v21 = vld [vmem:[%s14438_s1 + $0x15f8] sm:$0xff]  ;;  %v1897_v22 = vld [vmem:[%s14438_s1 + $0x1630] sm:$0xff]  ;;  %v991_v23 = vld [vmem:[%s14437_s0 + $0x15e0] sm:$0xff] }
 0x12b   : > { %v7306_v18 = vpack.c.bf16 %v3672_v7, %v3665_v6  ;;  %7561 = vmatprep.subr.bf16.mxu1 %v7560_v12  ;;  %v2786_v25 = vadd.f32 %v1890_v21, %v994_v16  ;;  %v2793_v26 = vadd.f32 %v1897_v22, %v1001_v17  ;;  %v998_v27 = vld [vmem:[%s14437_s0 + $0x1618] sm:$0xff]  ;;  %v1887_v28 = vld [vmem:[%s14438_s1 + $0x15e0] sm:$0xff]  ;;  %v993_v34 = vld [vmem:[%s14437_s0 + $0x15f0] sm:$0xff] }
 0x12c   : > { %4402 = vmatmul.mubr.f32.gmra.mrb[4].mxu0 %v3895_v4  ;;  %v3680_v24 = vmax.f32 %v2784_v15, 0.0  ;;  %v1894_v29 = vld [vmem:[%s14438_s1 + $0x1618] sm:$0xff]  ;;  %v7562_v30 = vpack.c.bf16 %v3674_v19, %v3667_v13  ;;  %v3687_v31 = vmax.f32 %v2791_v20, 0.0  ;;  %v2783_v32 = vadd.f32 %v1887_v28, %v991_v23  ;;  %v1000_v35 = vld [vmem:[%s14437_s0 + $0x1628] sm:$0xff]  ;;  %v1889_v36 = vld [vmem:[%s14438_s1 + $0x15f0] sm:$0xff] }
 0x12d   : > { %7307 = vmatpush1.bf16.msra.mxu0 %v7306_v18  ;;  %v2790_v33 = vadd.f32 %v1894_v29, %v998_v27  ;;  %5046 = vmatmul.mubr.f32.gmra.mrb[4].mxu1 %v3895_v4  ;;  %v3682_v37 = vmax.f32 %v2786_v25, 0.0  ;;  %v3689_v38 = vmax.f32 %v2793_v26, 0.0  ;;  %v1896_v39 = vld [vmem:[%s14438_s1 + $0x1628] sm:$0xff]  ;;  %v2785_v40 = vadd.f32 %v1889_v36, %v993_v34  ;;  %v3903_v42 = vld [vmem:[%s9273_s11 + $0xe0] sm:$0xff]  ;;  %v1006_v47 = vld [vmem:[%s14437_s0 + $0x1658] sm:$0xff] }
 0x12e   : > { %v3904_v41 = vld [vmem:[%s9273_s11 + $0xe8] sm:$0xff]  ;;  %7563 = vmatpush1.bf16.msra.mxu1 %v7562_v30  ;;  %v7308_v43 = vpack.c.bf16 %v3687_v31, %v3680_v24  ;;  %v3679_v44 = vmax.f32 %v2783_v32, 0.0  ;;  %v2792_v46 = vadd.f32 %v1896_v39, %v1000_v35  ;;  %v1013_v48 = vld [vmem:[%s14437_s0 + $0x1690] sm:$0xff]  ;;  %v1902_v49 = vld [vmem:[%s14438_s1 + $0x1658] sm:$0xff] }
 0x12f   : > { %v3686_v45 = vmax.f32 %v2790_v33, 0.0  ;;  %4407 = vmatprep.mubr.f32.mxu0 %v3904_v41  ;;  %v7564_v50 = vpack.c.bf16 %v3689_v38, %v3682_v37  ;;  %v3681_v51 = vmax.f32 %v2785_v40, 0.0  ;;  %5051 = vmatprep.mubr.f32.mxu1 %v3904_v41  ;;  %v1909_v52 = vld [vmem:[%s14438_s1 + $0x1690] sm:$0xff]  ;;  %v2798_v53 = vadd.f32 %v1902_v49, %v1006_v47  ;;  %v1008_v54 = vld [vmem:[%s14437_s0 + $0x1668] sm:$0xff]  ;;  %v1015_v55 = vld [vmem:[%s14437_s0 + $0x16a0] sm:$0xff] }
 0x130   : > { %4408 = vmatmul.mubr.f32.gmra.mrb[6].mxu0 %v3903_v42  ;;  %7309 = vmatprep.subr.bf16.mxu0 %v7308_v43  ;;  %v3688_v57 = vmax.f32 %v2792_v46, 0.0  ;;  %v2805_v58 = vadd.f32 %v1909_v52, %v1013_v48  ;;  %v1904_v59 = vld [vmem:[%s14438_s1 + $0x1668] sm:$0xff]  ;;  %v1911_v60 = vld [vmem:[%s14438_s1 + $0x16a0] sm:$0xff]  ;;  %v1005_v61 = vld [vmem:[%s14437_s0 + $0x1650] sm:$0xff] }
 0x131   : > { %v7310_v56 = vpack.c.bf16 %v3686_v45, %v3679_v44  ;;  %7565 = vmatprep.subr.bf16.mxu1 %v7564_v50  ;;  %v3694_v62 = vmax.f32 %v2798_v53, 0.0  ;;  %5052 = vmatmul.mubr.f32.gmra.mrb[6].mxu1 %v3903_v42  ;;  %v2800_v63 = vadd.f32 %v1904_v59, %v1008_v54  ;;  %v2807_v0 = vadd.f32 %v1911_v60, %v1015_v55  ;;  %v1012_v1 = vld [vmem:[%s14437_s0 + $0x1688] sm:$0xff]  ;;  %v1901_v2 = vld [vmem:[%s14438_s1 + $0x1650] sm:$0xff]  ;;  %v1007_v8 = vld [vmem:[%s14437_s0 + $0x1660] sm:$0xff] }
 0x132   : > { %v1908_v3 = vld [vmem:[%s14438_s1 + $0x1688] sm:$0xff]  ;;  %v7566_v4 = vpack.c.bf16 %v3688_v57, %v3681_v51  ;;  %v3701_v5 = vmax.f32 %v2805_v58, 0.0  ;;  %v2797_v6 = vadd.f32 %v1901_v2, %v1005_v61  ;;  %v1014_v9 = vld [vmem:[%s14437_s0 + $0x1698] sm:$0xff]  ;;  %v1903_v10 = vld [vmem:[%s14438_s1 + $0x1660] sm:$0xff] }
 0x133   : > { %7311 = vmatpush1.bf16.msra.mxu0 %v7310_v56  ;;  %v2804_v7 = vadd.f32 %v1908_v3, %v1012_v1  ;;  %v3696_v11 = vmax.f32 %v2800_v63, 0.0  ;;  %v3703_v12 = vmax.f32 %v2807_v0, 0.0  ;;  %v1910_v13 = vld [vmem:[%s14438_s1 + $0x1698] sm:$0xff]  ;;  %v2799_v14 = vadd.f32 %v1903_v10, %v1007_v8  ;;  %v3912_v15 = vld [vmem:[%s9273_s11 + $0x128] sm:$0xff]  ;;  %v3911_v16 = vld [vmem:[%s9273_s11 + $0x120] sm:$0xff] }
 0x134   : > { %7567 = vmatpush1.bf16.msra.mxu1 %v7566_v4  ;;  %v7312_v17 = vpack.c.bf16 %v3701_v5, %v3694_v62  ;;  %v3693_v18 = vmax.f32 %v2797_v6, 0.0  ;;  %v2806_v20 = vadd.f32 %v1910_v13, %v1014_v9  ;;  %4413 = vmatprep.mubr.f32.mxu0 %v3912_v15  ;;  %v1020_v21 = vld [vmem:[%s14437_s0 + $0x16c8] sm:$0xff]  ;;  %v1027_v22 = vld [vmem:[%s14437_s0 + $0x1700] sm:$0xff]  ;;  %v1022_v28 = vld [vmem:[%s14437_s0 + $0x16d8] sm:$0xff] }
 0x135   : > { %v3700_v19 = vmax.f32 %v2804_v7, 0.0  ;;  %v1916_v23 = vld [vmem:[%s14438_s1 + $0x16c8] sm:$0xff]  ;;  %v7568_v24 = vpack.c.bf16 %v3703_v12, %v3696_v11  ;;  %v3695_v25 = vmax.f32 %v2799_v14, 0.0  ;;  %5057 = vmatprep.mubr.f32.mxu1 %v3912_v15  ;;  %4414 = vmatmul.mubr.f32.gmra.mrb[8].mxu0 %v3911_v16  ;;  %v1923_v26 = vld [vmem:[%s14438_s1 + $0x1700] sm:$0xff]  ;;  %v1029_v29 = vld [vmem:[%s14437_s0 + $0x1710] sm:$0xff] }
 0x136   : > { %v2812_v27 = vadd.f32 %v1916_v23, %v1020_v21  ;;  %7313 = vmatprep.subr.bf16.mxu0 %v7312_v17  ;;  %v3702_v31 = vmax.f32 %v2806_v20, 0.0  ;;  %v2819_v32 = vadd.f32 %v1923_v26, %v1027_v22  ;;  %5058 = vmatmul.mubr.f32.gmra.mrb[8].mxu1 %v3911_v16  ;;  %v1918_v33 = vld [vmem:[%s14438_s1 + $0x16d8] sm:$0xff]  ;;  %v1925_v34 = vld [vmem:[%s14438_s1 + $0x1710] sm:$0xff]  ;;  %v1019_v35 = vld [vmem:[%s14437_s0 + $0x16c0] sm:$0xff] }
 0x137   : > { %v7314_v30 = vpack.c.bf16 %v3700_v19, %v3693_v18  ;;  %7569 = vmatprep.subr.bf16.mxu1 %v7568_v24  ;;  %v2814_v37 = vadd.f32 %v1918_v33, %v1022_v28  ;;  %v2821_v38 = vadd.f32 %v1925_v34, %v1029_v29  ;;  %v1026_v39 = vld [vmem:[%s14437_s0 + $0x16f8] sm:$0xff]  ;;  %v1915_v40 = vld [vmem:[%s14438_s1 + $0x16c0] sm:$0xff]  ;;  %v1021_v46 = vld [vmem:[%s14437_s0 + $0x16d0] sm:$0xff] }
 0x138   : > { %v3708_v36 = vmax.f32 %v2812_v27, 0.0  ;;  %v1922_v41 = vld [vmem:[%s14438_s1 + $0x16f8] sm:$0xff]  ;;  %v7570_v42 = vpack.c.bf16 %v3702_v31, %v3695_v25  ;;  %v3715_v43 = vmax.f32 %v2819_v32, 0.0  ;;  %v2811_v44 = vadd.f32 %v1915_v40, %v1019_v35  ;;  %v1028_v47 = vld [vmem:[%s14437_s0 + $0x1708] sm:$0xff]  ;;  %v1917_v48 = vld [vmem:[%s14438_s1 + $0x16d0] sm:$0xff] }
 0x139   : > { %7315 = vmatpush1.bf16.msra.mxu0 %v7314_v30  ;;  %v2818_v45 = vadd.f32 %v1922_v41, %v1026_v39  ;;  %v3710_v49 = vmax.f32 %v2814_v37, 0.0  ;;  %v3717_v50 = vmax.f32 %v2821_v38, 0.0  ;;  %v1924_v51 = vld [vmem:[%s14438_s1 + $0x1708] sm:$0xff]  ;;  %v2813_v52 = vadd.f32 %v1917_v48, %v1021_v46  ;;  %v3919_v54 = vld [vmem:[%s9273_s11 + $0x160] sm:$0xff]  ;;  %v1034_v59 = vld [vmem:[%s14437_s0 + $0x1738] sm:$0xff] }
 0x13a   : > { %v3920_v53 = vld [vmem:[%s9273_s11 + $0x168] sm:$0xff]  ;;  %7571 = vmatpush1.bf16.msra.mxu1 %v7570_v42  ;;  %v7316_v55 = vpack.c.bf16 %v3715_v43, %v3708_v36  ;;  %v3707_v56 = vmax.f32 %v2811_v44, 0.0  ;;  %v2820_v58 = vadd.f32 %v1924_v51, %v1028_v47  ;;  %v1041_v60 = vld [vmem:[%s14437_s0 + $0x1770] sm:$0xff]  ;;  %v1930_v61 = vld [vmem:[%s14438_s1 + $0x1738] sm:$0xff] }
 0x13b   : > { %v3714_v57 = vmax.f32 %v2818_v45, 0.0  ;;  %4419 = vmatprep.mubr.f32.mxu0 %v3920_v53  ;;  %v7572_v62 = vpack.c.bf16 %v3717_v50, %v3710_v49  ;;  %v3709_v63 = vmax.f32 %v2813_v52, 0.0  ;;  %5063 = vmatprep.mubr.f32.mxu1 %v3920_v53  ;;  %v1937_v0 = vld [vmem:[%s14438_s1 + $0x1770] sm:$0xff]  ;;  %v2826_v1 = vadd.f32 %v1930_v61, %v1034_v59  ;;  %v1036_v2 = vld [vmem:[%s14437_s0 + $0x1748] sm:$0xff]  ;;  %v1043_v3 = vld [vmem:[%s14437_s0 + $0x1780] sm:$0xff] }
 0x13c   : > { %4420 = vmatmul.mubr.f32.gmra.mrb[10].mxu0 %v3919_v54  ;;  %7317 = vmatprep.subr.bf16.mxu0 %v7316_v55  ;;  %v3716_v5 = vmax.f32 %v2820_v58, 0.0  ;;  %v2833_v6 = vadd.f32 %v1937_v0, %v1041_v60  ;;  %v1932_v7 = vld [vmem:[%s14438_s1 + $0x1748] sm:$0xff]  ;;  %v1939_v8 = vld [vmem:[%s14438_s1 + $0x1780] sm:$0xff]  ;;  %v1033_v9 = vld [vmem:[%s14437_s0 + $0x1730] sm:$0xff] }
 0x13d   : > { %v7318_v4 = vpack.c.bf16 %v3714_v57, %v3707_v56  ;;  %5064 = vmatmul.mubr.f32.gmra.mrb[10].mxu1 %v3919_v54  ;;  %7573 = vmatprep.subr.bf16.mxu1 %v7572_v62  ;;  %v3722_v10 = vmax.f32 %v2826_v1, 0.0  ;;  %v2828_v11 = vadd.f32 %v1932_v7, %v1036_v2  ;;  %v2835_v12 = vadd.f32 %v1939_v8, %v1043_v3  ;;  %v1040_v13 = vld [vmem:[%s14437_s0 + $0x1768] sm:$0xff]  ;;  %v1929_v14 = vld [vmem:[%s14438_s1 + $0x1730] sm:$0xff]  ;;  %v1035_v20 = vld [vmem:[%s14437_s0 + $0x1740] sm:$0xff] }
 0x13e   : > { %v1936_v15 = vld [vmem:[%s14438_s1 + $0x1768] sm:$0xff]  ;;  %v7574_v16 = vpack.c.bf16 %v3716_v5, %v3709_v63  ;;  %v3729_v17 = vmax.f32 %v2833_v6, 0.0  ;;  %v2825_v18 = vadd.f32 %v1929_v14, %v1033_v9  ;;  %v1042_v21 = vld [vmem:[%s14437_s0 + $0x1778] sm:$0xff]  ;;  %v1931_v22 = vld [vmem:[%s14438_s1 + $0x1740] sm:$0xff] }
 0x13f   : > { %7319 = vmatpush1.bf16.msra.mxu0 %v7318_v4  ;;  %v2832_v19 = vadd.f32 %v1936_v15, %v1040_v13  ;;  %v3724_v23 = vmax.f32 %v2828_v11, 0.0  ;;  %v3731_v24 = vmax.f32 %v2835_v12, 0.0  ;;  %v1938_v25 = vld [vmem:[%s14438_s1 + $0x1778] sm:$0xff]  ;;  %v2827_v26 = vadd.f32 %v1931_v22, %v1035_v20  ;;  %v3928_v27 = vld [vmem:[%s9273_s11 + $0x1a8] sm:$0xff]  ;;  %v3927_v28 = vld [vmem:[%s9273_s11 + $0x1a0] sm:$0xff] }
 0x140   : > { %7575 = vmatpush1.bf16.msra.mxu1 %v7574_v16  ;;  %v7320_v29 = vpack.c.bf16 %v3729_v17, %v3722_v10  ;;  %v3721_v30 = vmax.f32 %v2825_v18, 0.0  ;;  %v2834_v32 = vadd.f32 %v1938_v25, %v1042_v21  ;;  %4425 = vmatprep.mubr.f32.mxu0 %v3928_v27  ;;  %v1048_v33 = vld [vmem:[%s14437_s0 + $0x17a8] sm:$0xff]  ;;  %v1055_v34 = vld [vmem:[%s14437_s0 + $0x17e0] sm:$0xff]  ;;  %v1050_v40 = vld [vmem:[%s14437_s0 + $0x17b8] sm:$0xff] }
 0x141   : > { %v3728_v31 = vmax.f32 %v2832_v19, 0.0  ;;  %v1944_v35 = vld [vmem:[%s14438_s1 + $0x17a8] sm:$0xff]  ;;  %v7576_v36 = vpack.c.bf16 %v3731_v24, %v3724_v23  ;;  %v3723_v37 = vmax.f32 %v2827_v26, 0.0  ;;  %5069 = vmatprep.mubr.f32.mxu1 %v3928_v27  ;;  %4426 = vmatmul.mubr.f32.gmra.mrb[12].mxu0 %v3927_v28  ;;  %v1951_v38 = vld [vmem:[%s14438_s1 + $0x17e0] sm:$0xff]  ;;  %v1057_v41 = vld [vmem:[%s14437_s0 + $0x17f0] sm:$0xff] }
 0x142   : > { %v2840_v39 = vadd.f32 %v1944_v35, %v1048_v33  ;;  %7321 = vmatprep.subr.bf16.mxu0 %v7320_v29  ;;  %v3730_v43 = vmax.f32 %v2834_v32, 0.0  ;;  %v2847_v44 = vadd.f32 %v1951_v38, %v1055_v34  ;;  %5070 = vmatmul.mubr.f32.gmra.mrb[12].mxu1 %v3927_v28  ;;  %v1946_v45 = vld [vmem:[%s14438_s1 + $0x17b8] sm:$0xff]  ;;  %v1953_v46 = vld [vmem:[%s14438_s1 + $0x17f0] sm:$0xff]  ;;  %v1047_v47 = vld [vmem:[%s14437_s0 + $0x17a0] sm:$0xff] }
 0x143   : > { %v7322_v42 = vpack.c.bf16 %v3728_v31, %v3721_v30  ;;  %7577 = vmatprep.subr.bf16.mxu1 %v7576_v36  ;;  %v2842_v49 = vadd.f32 %v1946_v45, %v1050_v40  ;;  %v2849_v50 = vadd.f32 %v1953_v46, %v1057_v41  ;;  %v1054_v51 = vld [vmem:[%s14437_s0 + $0x17d8] sm:$0xff]  ;;  %v1943_v52 = vld [vmem:[%s14438_s1 + $0x17a0] sm:$0xff]  ;;  %v1049_v58 = vld [vmem:[%s14437_s0 + $0x17b0] sm:$0xff] }
 0x144   : > { %v3736_v48 = vmax.f32 %v2840_v39, 0.0  ;;  %v1950_v53 = vld [vmem:[%s14438_s1 + $0x17d8] sm:$0xff]  ;;  %v7578_v54 = vpack.c.bf16 %v3730_v43, %v3723_v37  ;;  %v3743_v55 = vmax.f32 %v2847_v44, 0.0  ;;  %v2839_v56 = vadd.f32 %v1943_v52, %v1047_v47  ;;  %v1056_v59 = vld [vmem:[%s14437_s0 + $0x17e8] sm:$0xff]  ;;  %v1945_v60 = vld [vmem:[%s14438_s1 + $0x17b0] sm:$0xff] }
 0x145   : > { %7323 = vmatpush1.bf16.msra.mxu0 %v7322_v42  ;;  %v2846_v57 = vadd.f32 %v1950_v53, %v1054_v51  ;;  %v3738_v61 = vmax.f32 %v2842_v49, 0.0  ;;  %v3745_v62 = vmax.f32 %v2849_v50, 0.0  ;;  %v1952_v63 = vld [vmem:[%s14438_s1 + $0x17e8] sm:$0xff]  ;;  %v2841_v0 = vadd.f32 %v1945_v60, %v1049_v58  ;;  %v3935_v2 = vld [vmem:[%s9273_s11 + $0x1e0] sm:$0xff]  ;;  %v1062_v7 = vld [vmem:[%s14437_s0 + $0x1818] sm:$0xff] }
 0x146   : > { %v3936_v1 = vld [vmem:[%s9273_s11 + $0x1e8] sm:$0xff]  ;;  %7579 = vmatpush1.bf16.msra.mxu1 %v7578_v54  ;;  %v7324_v3 = vpack.c.bf16 %v3743_v55, %v3736_v48  ;;  %v3735_v4 = vmax.f32 %v2839_v56, 0.0  ;;  %v2848_v6 = vadd.f32 %v1952_v63, %v1056_v59  ;;  %v1069_v8 = vld [vmem:[%s14437_s0 + $0x1850] sm:$0xff]  ;;  %v1958_v9 = vld [vmem:[%s14438_s1 + $0x1818] sm:$0xff] }
 0x147   : > { %v3742_v5 = vmax.f32 %v2846_v57, 0.0  ;;  %4431 = vmatprep.mubr.f32.mxu0 %v3936_v1  ;;  %v7580_v10 = vpack.c.bf16 %v3745_v62, %v3738_v61  ;;  %v3737_v11 = vmax.f32 %v2841_v0, 0.0  ;;  %5075 = vmatprep.mubr.f32.mxu1 %v3936_v1  ;;  %v1965_v12 = vld [vmem:[%s14438_s1 + $0x1850] sm:$0xff]  ;;  %v2854_v13 = vadd.f32 %v1958_v9, %v1062_v7  ;;  %v1064_v14 = vld [vmem:[%s14437_s0 + $0x1828] sm:$0xff]  ;;  %v1071_v15 = vld [vmem:[%s14437_s0 + $0x1860] sm:$0xff] }
 0x148   : > { %4432 = vmatmul.mubr.f32.gmra.mrb[14].mxu0 %v3935_v2  ;;  %7325 = vmatprep.subr.bf16.mxu0 %v7324_v3  ;;  %v3744_v17 = vmax.f32 %v2848_v6, 0.0  ;;  %v2861_v18 = vadd.f32 %v1965_v12, %v1069_v8  ;;  %v1960_v19 = vld [vmem:[%s14438_s1 + $0x1828] sm:$0xff]  ;;  %v1967_v20 = vld [vmem:[%s14438_s1 + $0x1860] sm:$0xff]  ;;  %v1061_v21 = vld [vmem:[%s14437_s0 + $0x1810] sm:$0xff] }
 0x149   : > { %v7326_v16 = vpack.c.bf16 %v3742_v5, %v3735_v4  ;;  %5076 = vmatmul.mubr.f32.gmra.mrb[14].mxu1 %v3935_v2  ;;  %7581 = vmatprep.subr.bf16.mxu1 %v7580_v10  ;;  %v3750_v22 = vmax.f32 %v2854_v13, 0.0  ;;  %v2856_v23 = vadd.f32 %v1960_v19, %v1064_v14  ;;  %v2863_v24 = vadd.f32 %v1967_v20, %v1071_v15  ;;  %v1068_v25 = vld [vmem:[%s14437_s0 + $0x1848] sm:$0xff]  ;;  %v1957_v26 = vld [vmem:[%s14438_s1 + $0x1810] sm:$0xff]  ;;  %v1063_v32 = vld [vmem:[%s14437_s0 + $0x1820] sm:$0xff] }
 0x14a   : > { %v1964_v27 = vld [vmem:[%s14438_s1 + $0x1848] sm:$0xff]  ;;  %v7582_v28 = vpack.c.bf16 %v3744_v17, %v3737_v11  ;;  %v3757_v29 = vmax.f32 %v2861_v18, 0.0  ;;  %v2853_v30 = vadd.f32 %v1957_v26, %v1061_v21  ;;  %v1070_v33 = vld [vmem:[%s14437_s0 + $0x1858] sm:$0xff]  ;;  %v1959_v34 = vld [vmem:[%s14438_s1 + $0x1820] sm:$0xff] }
 0x14b   : > { %7327 = vmatpush1.bf16.msra.mxu0 %v7326_v16  ;;  %v2860_v31 = vadd.f32 %v1964_v27, %v1068_v25  ;;  %v3752_v35 = vmax.f32 %v2856_v23, 0.0  ;;  %v3759_v36 = vmax.f32 %v2863_v24, 0.0  ;;  %v1966_v37 = vld [vmem:[%s14438_s1 + $0x1858] sm:$0xff]  ;;  %v2855_v38 = vadd.f32 %v1959_v34, %v1063_v32  ;;  %v3944_v39 = vld [vmem:[%s9273_s11 + $0x228] sm:$0xff]  ;;  %v3943_v40 = vld [vmem:[%s9273_s11 + $0x220] sm:$0xff] }
 0x14c   : > { %7583 = vmatpush1.bf16.msra.mxu1 %v7582_v28  ;;  %v7328_v41 = vpack.c.bf16 %v3757_v29, %v3750_v22  ;;  %v3749_v42 = vmax.f32 %v2853_v30, 0.0  ;;  %v2862_v44 = vadd.f32 %v1966_v37, %v1070_v33  ;;  %4437 = vmatprep.mubr.f32.mxu0 %v3944_v39  ;;  %v1076_v45 = vld [vmem:[%s14437_s0 + $0x1888] sm:$0xff]  ;;  %v1083_v46 = vld [vmem:[%s14437_s0 + $0x18c0] sm:$0xff]  ;;  %v1078_v52 = vld [vmem:[%s14437_s0 + $0x1898] sm:$0xff] }
 0x14d   : > { %v3756_v43 = vmax.f32 %v2860_v31, 0.0  ;;  %v1972_v47 = vld [vmem:[%s14438_s1 + $0x1888] sm:$0xff]  ;;  %v7584_v48 = vpack.c.bf16 %v3759_v36, %v3752_v35  ;;  %v3751_v49 = vmax.f32 %v2855_v38, 0.0  ;;  %5081 = vmatprep.mubr.f32.mxu1 %v3944_v39  ;;  %4438 = vmatmul.mubr.f32.gmra.mrb[16].mxu0 %v3943_v40  ;;  %v1979_v50 = vld [vmem:[%s14438_s1 + $0x18c0] sm:$0xff]  ;;  %v1085_v53 = vld [vmem:[%s14437_s0 + $0x18d0] sm:$0xff] }
 0x14e   : > { %v2868_v51 = vadd.f32 %v1972_v47, %v1076_v45  ;;  %7329 = vmatprep.subr.bf16.mxu0 %v7328_v41  ;;  %v3758_v55 = vmax.f32 %v2862_v44, 0.0  ;;  %v2875_v56 = vadd.f32 %v1979_v50, %v1083_v46  ;;  %5082 = vmatmul.mubr.f32.gmra.mrb[16].mxu1 %v3943_v40  ;;  %v1974_v57 = vld [vmem:[%s14438_s1 + $0x1898] sm:$0xff]  ;;  %v1981_v58 = vld [vmem:[%s14438_s1 + $0x18d0] sm:$0xff]  ;;  %v1075_v59 = vld [vmem:[%s14437_s0 + $0x1880] sm:$0xff] }
 0x14f   : > { %v7330_v54 = vpack.c.bf16 %v3756_v43, %v3749_v42  ;;  %7585 = vmatprep.subr.bf16.mxu1 %v7584_v48  ;;  %v2870_v61 = vadd.f32 %v1974_v57, %v1078_v52  ;;  %v2877_v62 = vadd.f32 %v1981_v58, %v1085_v53  ;;  %v1082_v63 = vld [vmem:[%s14437_s0 + $0x18b8] sm:$0xff]  ;;  %v1971_v0 = vld [vmem:[%s14438_s1 + $0x1880] sm:$0xff]  ;;  %v1077_v6 = vld [vmem:[%s14437_s0 + $0x1890] sm:$0xff] }
 0x150   : > { %v3764_v60 = vmax.f32 %v2868_v51, 0.0  ;;  %v1978_v1 = vld [vmem:[%s14438_s1 + $0x18b8] sm:$0xff]  ;;  %v7586_v2 = vpack.c.bf16 %v3758_v55, %v3751_v49  ;;  %v3771_v3 = vmax.f32 %v2875_v56, 0.0  ;;  %v2867_v4 = vadd.f32 %v1971_v0, %v1075_v59  ;;  %v1084_v7 = vld [vmem:[%s14437_s0 + $0x18c8] sm:$0xff]  ;;  %v1973_v8 = vld [vmem:[%s14438_s1 + $0x1890] sm:$0xff] }
 0x151   : > { %7331 = vmatpush1.bf16.msra.mxu0 %v7330_v54  ;;  %v2874_v5 = vadd.f32 %v1978_v1, %v1082_v63  ;;  %v3766_v9 = vmax.f32 %v2870_v61, 0.0  ;;  %v3773_v10 = vmax.f32 %v2877_v62, 0.0  ;;  %v1980_v11 = vld [vmem:[%s14438_s1 + $0x18c8] sm:$0xff]  ;;  %v2869_v12 = vadd.f32 %v1973_v8, %v1077_v6  ;;  %v3951_v14 = vld [vmem:[%s9273_s11 + $0x260] sm:$0xff]  ;;  %v1090_v19 = vld [vmem:[%s14437_s0 + $0x18f8] sm:$0xff] }
 0x152   : > { %v3952_v13 = vld [vmem:[%s9273_s11 + $0x268] sm:$0xff]  ;;  %7587 = vmatpush1.bf16.msra.mxu1 %v7586_v2  ;;  %v7332_v15 = vpack.c.bf16 %v3771_v3, %v3764_v60  ;;  %v3763_v16 = vmax.f32 %v2867_v4, 0.0  ;;  %v2876_v18 = vadd.f32 %v1980_v11, %v1084_v7  ;;  %v1097_v20 = vld [vmem:[%s14437_s0 + $0x1930] sm:$0xff]  ;;  %v1986_v21 = vld [vmem:[%s14438_s1 + $0x18f8] sm:$0xff] }
 0x153   : > { %v3770_v17 = vmax.f32 %v2874_v5, 0.0  ;;  %4443 = vmatprep.mubr.f32.mxu0 %v3952_v13  ;;  %v7588_v22 = vpack.c.bf16 %v3773_v10, %v3766_v9  ;;  %v3765_v23 = vmax.f32 %v2869_v12, 0.0  ;;  %5087 = vmatprep.mubr.f32.mxu1 %v3952_v13  ;;  %v1993_v24 = vld [vmem:[%s14438_s1 + $0x1930] sm:$0xff]  ;;  %v2882_v25 = vadd.f32 %v1986_v21, %v1090_v19  ;;  %v1092_v26 = vld [vmem:[%s14437_s0 + $0x1908] sm:$0xff]  ;;  %v1099_v27 = vld [vmem:[%s14437_s0 + $0x1940] sm:$0xff] }
 0x154   : > { %4444 = vmatmul.mubr.f32.gmra.mrb[18].mxu0 %v3951_v14  ;;  %7333 = vmatprep.subr.bf16.mxu0 %v7332_v15  ;;  %v3772_v29 = vmax.f32 %v2876_v18, 0.0  ;;  %v2889_v30 = vadd.f32 %v1993_v24, %v1097_v20  ;;  %v1988_v31 = vld [vmem:[%s14438_s1 + $0x1908] sm:$0xff]  ;;  %v1995_v32 = vld [vmem:[%s14438_s1 + $0x1940] sm:$0xff]  ;;  %v1089_v33 = vld [vmem:[%s14437_s0 + $0x18f0] sm:$0xff] }
 0x155   : > { %v7334_v28 = vpack.c.bf16 %v3770_v17, %v3763_v16  ;;  %5088 = vmatmul.mubr.f32.gmra.mrb[18].mxu1 %v3951_v14  ;;  %7589 = vmatprep.subr.bf16.mxu1 %v7588_v22  ;;  %v3778_v34 = vmax.f32 %v2882_v25, 0.0  ;;  %v2884_v35 = vadd.f32 %v1988_v31, %v1092_v26  ;;  %v2891_v36 = vadd.f32 %v1995_v32, %v1099_v27  ;;  %v1096_v37 = vld [vmem:[%s14437_s0 + $0x1928] sm:$0xff]  ;;  %v1985_v38 = vld [vmem:[%s14438_s1 + $0x18f0] sm:$0xff]  ;;  %v1091_v44 = vld [vmem:[%s14437_s0 + $0x1900] sm:$0xff] }
 0x156   : > { %v1992_v39 = vld [vmem:[%s14438_s1 + $0x1928] sm:$0xff]  ;;  %v7590_v40 = vpack.c.bf16 %v3772_v29, %v3765_v23  ;;  %v3785_v41 = vmax.f32 %v2889_v30, 0.0  ;;  %v2881_v42 = vadd.f32 %v1985_v38, %v1089_v33  ;;  %v1098_v45 = vld [vmem:[%s14437_s0 + $0x1938] sm:$0xff]  ;;  %v1987_v46 = vld [vmem:[%s14438_s1 + $0x1900] sm:$0xff] }
 0x157   : > { %7335 = vmatpush1.bf16.msra.mxu0 %v7334_v28  ;;  %v2888_v43 = vadd.f32 %v1992_v39, %v1096_v37  ;;  %v3780_v47 = vmax.f32 %v2884_v35, 0.0  ;;  %v3787_v48 = vmax.f32 %v2891_v36, 0.0  ;;  %v1994_v49 = vld [vmem:[%s14438_s1 + $0x1938] sm:$0xff]  ;;  %v2883_v50 = vadd.f32 %v1987_v46, %v1091_v44  ;;  %v3960_v51 = vld [vmem:[%s9273_s11 + $0x2a8] sm:$0xff]  ;;  %v3959_v52 = vld [vmem:[%s9273_s11 + $0x2a0] sm:$0xff] }
 0x158   : > { %7591 = vmatpush1.bf16.msra.mxu1 %v7590_v40  ;;  %v7336_v53 = vpack.c.bf16 %v3785_v41, %v3778_v34  ;;  %v3777_v54 = vmax.f32 %v2881_v42, 0.0  ;;  %v2890_v56 = vadd.f32 %v1994_v49, %v1098_v45  ;;  %4449 = vmatprep.mubr.f32.mxu0 %v3960_v51  ;;  %v1104_v57 = vld [vmem:[%s14437_s0 + $0x1968] sm:$0xff]  ;;  %v1111_v58 = vld [vmem:[%s14437_s0 + $0x19a0] sm:$0xff]  ;;  %v1106_v0 = vld [vmem:[%s14437_s0 + $0x1978] sm:$0xff] }
 0x159   : > { %v3784_v55 = vmax.f32 %v2888_v43, 0.0  ;;  %v2000_v59 = vld [vmem:[%s14438_s1 + $0x1968] sm:$0xff]  ;;  %v7592_v60 = vpack.c.bf16 %v3787_v48, %v3780_v47  ;;  %v3779_v61 = vmax.f32 %v2883_v50, 0.0  ;;  %5093 = vmatprep.mubr.f32.mxu1 %v3960_v51  ;;  %4450 = vmatmul.mubr.f32.gmra.mrb[20].mxu0 %v3959_v52  ;;  %v2007_v62 = vld [vmem:[%s14438_s1 + $0x19a0] sm:$0xff]  ;;  %v1113_v1 = vld [vmem:[%s14437_s0 + $0x19b0] sm:$0xff] }
 0x15a   : > { %v2896_v63 = vadd.f32 %v2000_v59, %v1104_v57  ;;  %7337 = vmatprep.subr.bf16.mxu0 %v7336_v53  ;;  %v3786_v3 = vmax.f32 %v2890_v56, 0.0  ;;  %v2903_v4 = vadd.f32 %v2007_v62, %v1111_v58  ;;  %5094 = vmatmul.mubr.f32.gmra.mrb[20].mxu1 %v3959_v52  ;;  %v2002_v5 = vld [vmem:[%s14438_s1 + $0x1978] sm:$0xff]  ;;  %v2009_v6 = vld [vmem:[%s14438_s1 + $0x19b0] sm:$0xff]  ;;  %v1103_v7 = vld [vmem:[%s14437_s0 + $0x1960] sm:$0xff] }
 0x15b   : > { %v7338_v2 = vpack.c.bf16 %v3784_v55, %v3777_v54  ;;  %7593 = vmatprep.subr.bf16.mxu1 %v7592_v60  ;;  %v2898_v9 = vadd.f32 %v2002_v5, %v1106_v0  ;;  %v2905_v10 = vadd.f32 %v2009_v6, %v1113_v1  ;;  %v1110_v11 = vld [vmem:[%s14437_s0 + $0x1998] sm:$0xff]  ;;  %v1999_v12 = vld [vmem:[%s14438_s1 + $0x1960] sm:$0xff]  ;;  %v1105_v18 = vld [vmem:[%s14437_s0 + $0x1970] sm:$0xff] }
 0x15c   : > { %v3792_v8 = vmax.f32 %v2896_v63, 0.0  ;;  %v2006_v13 = vld [vmem:[%s14438_s1 + $0x1998] sm:$0xff]  ;;  %v7594_v14 = vpack.c.bf16 %v3786_v3, %v3779_v61  ;;  %v3799_v15 = vmax.f32 %v2903_v4, 0.0  ;;  %v2895_v16 = vadd.f32 %v1999_v12, %v1103_v7  ;;  %v1112_v19 = vld [vmem:[%s14437_s0 + $0x19a8] sm:$0xff]  ;;  %v2001_v20 = vld [vmem:[%s14438_s1 + $0x1970] sm:$0xff] }
 0x15d   : > { %7339 = vmatpush1.bf16.msra.mxu0 %v7338_v2  ;;  %v2902_v17 = vadd.f32 %v2006_v13, %v1110_v11  ;;  %v3794_v21 = vmax.f32 %v2898_v9, 0.0  ;;  %v3801_v22 = vmax.f32 %v2905_v10, 0.0  ;;  %v2008_v23 = vld [vmem:[%s14438_s1 + $0x19a8] sm:$0xff]  ;;  %v2897_v24 = vadd.f32 %v2001_v20, %v1105_v18  ;;  %v3967_v26 = vld [vmem:[%s9273_s11 + $0x2e0] sm:$0xff]  ;;  %v1118_v31 = vld [vmem:[%s14437_s0 + $0x19d8] sm:$0xff] }
 0x15e   : > { %v3968_v25 = vld [vmem:[%s9273_s11 + $0x2e8] sm:$0xff]  ;;  %7595 = vmatpush1.bf16.msra.mxu1 %v7594_v14  ;;  %v7340_v27 = vpack.c.bf16 %v3799_v15, %v3792_v8  ;;  %v3791_v28 = vmax.f32 %v2895_v16, 0.0  ;;  %v2904_v30 = vadd.f32 %v2008_v23, %v1112_v19  ;;  %v1125_v32 = vld [vmem:[%s14437_s0 + $0x1a10] sm:$0xff]  ;;  %v2014_v33 = vld [vmem:[%s14438_s1 + $0x19d8] sm:$0xff] }
 0x15f   : > { %v3798_v29 = vmax.f32 %v2902_v17, 0.0  ;;  %4455 = vmatprep.mubr.f32.mxu0 %v3968_v25  ;;  %v7596_v34 = vpack.c.bf16 %v3801_v22, %v3794_v21  ;;  %v3793_v35 = vmax.f32 %v2897_v24, 0.0  ;;  %5099 = vmatprep.mubr.f32.mxu1 %v3968_v25  ;;  %v2021_v36 = vld [vmem:[%s14438_s1 + $0x1a10] sm:$0xff]  ;;  %v2910_v37 = vadd.f32 %v2014_v33, %v1118_v31  ;;  %v1120_v38 = vld [vmem:[%s14437_s0 + $0x19e8] sm:$0xff]  ;;  %v1127_v39 = vld [vmem:[%s14437_s0 + $0x1a20] sm:$0xff] }
 0x160   : > { %4456 = vmatmul.mubr.f32.gmra.mrb[22].mxu0 %v3967_v26  ;;  %7341 = vmatprep.subr.bf16.mxu0 %v7340_v27  ;;  %v3800_v41 = vmax.f32 %v2904_v30, 0.0  ;;  %v2917_v42 = vadd.f32 %v2021_v36, %v1125_v32  ;;  %v2016_v43 = vld [vmem:[%s14438_s1 + $0x19e8] sm:$0xff]  ;;  %v2023_v44 = vld [vmem:[%s14438_s1 + $0x1a20] sm:$0xff]  ;;  %v1117_v45 = vld [vmem:[%s14437_s0 + $0x19d0] sm:$0xff] }
 0x161   : > { %v7342_v40 = vpack.c.bf16 %v3798_v29, %v3791_v28  ;;  %5100 = vmatmul.mubr.f32.gmra.mrb[22].mxu1 %v3967_v26  ;;  %7597 = vmatprep.subr.bf16.mxu1 %v7596_v34  ;;  %v3806_v46 = vmax.f32 %v2910_v37, 0.0  ;;  %v2912_v47 = vadd.f32 %v2016_v43, %v1120_v38  ;;  %v2919_v48 = vadd.f32 %v2023_v44, %v1127_v39  ;;  %v1124_v49 = vld [vmem:[%s14437_s0 + $0x1a08] sm:$0xff]  ;;  %v2013_v50 = vld [vmem:[%s14438_s1 + $0x19d0] sm:$0xff]  ;;  %v1119_v56 = vld [vmem:[%s14437_s0 + $0x19e0] sm:$0xff] }
 0x162   : > { %v2020_v51 = vld [vmem:[%s14438_s1 + $0x1a08] sm:$0xff]  ;;  %v7598_v52 = vpack.c.bf16 %v3800_v41, %v3793_v35  ;;  %v3813_v53 = vmax.f32 %v2917_v42, 0.0  ;;  %v2909_v54 = vadd.f32 %v2013_v50, %v1117_v45  ;;  %v1126_v57 = vld [vmem:[%s14437_s0 + $0x1a18] sm:$0xff]  ;;  %v2015_v58 = vld [vmem:[%s14438_s1 + $0x19e0] sm:$0xff] }
 0x163   : > { %7343 = vmatpush1.bf16.msra.mxu0 %v7342_v40  ;;  %v2916_v55 = vadd.f32 %v2020_v51, %v1124_v49  ;;  %v3808_v59 = vmax.f32 %v2912_v47, 0.0  ;;  %v3815_v60 = vmax.f32 %v2919_v48, 0.0  ;;  %v2022_v61 = vld [vmem:[%s14438_s1 + $0x1a18] sm:$0xff]  ;;  %v2911_v62 = vadd.f32 %v2015_v58, %v1119_v56  ;;  %v3976_v63 = vld [vmem:[%s9273_s11 + $0x328] sm:$0xff]  ;;  %v3975_v0 = vld [vmem:[%s9273_s11 + $0x320] sm:$0xff] }
 0x164   : > { %7599 = vmatpush1.bf16.msra.mxu1 %v7598_v52  ;;  %v7344_v1 = vpack.c.bf16 %v3813_v53, %v3806_v46  ;;  %v3805_v2 = vmax.f32 %v2909_v54, 0.0  ;;  %v2918_v4 = vadd.f32 %v2022_v61, %v1126_v57  ;;  %4461 = vmatprep.mubr.f32.mxu0 %v3976_v63  ;;  %v1132_v5 = vld [vmem:[%s14437_s0 + $0x1a48] sm:$0xff]  ;;  %v1139_v6 = vld [vmem:[%s14437_s0 + $0x1a80] sm:$0xff]  ;;  %v1134_v12 = vld [vmem:[%s14437_s0 + $0x1a58] sm:$0xff] }
 0x165   : > { %v3812_v3 = vmax.f32 %v2916_v55, 0.0  ;;  %v2028_v7 = vld [vmem:[%s14438_s1 + $0x1a48] sm:$0xff]  ;;  %v7600_v8 = vpack.c.bf16 %v3815_v60, %v3808_v59  ;;  %v3807_v9 = vmax.f32 %v2911_v62, 0.0  ;;  %5105 = vmatprep.mubr.f32.mxu1 %v3976_v63  ;;  %4462 = vmatmul.mubr.f32.gmra.mrb[24].mxu0 %v3975_v0  ;;  %v2035_v10 = vld [vmem:[%s14438_s1 + $0x1a80] sm:$0xff]  ;;  %v1141_v13 = vld [vmem:[%s14437_s0 + $0x1a90] sm:$0xff] }
 0x166   : > { %v2924_v11 = vadd.f32 %v2028_v7, %v1132_v5  ;;  %7345 = vmatprep.subr.bf16.mxu0 %v7344_v1  ;;  %v3814_v15 = vmax.f32 %v2918_v4, 0.0  ;;  %v2931_v16 = vadd.f32 %v2035_v10, %v1139_v6  ;;  %5106 = vmatmul.mubr.f32.gmra.mrb[24].mxu1 %v3975_v0  ;;  %v2030_v17 = vld [vmem:[%s14438_s1 + $0x1a58] sm:$0xff]  ;;  %v2037_v18 = vld [vmem:[%s14438_s1 + $0x1a90] sm:$0xff]  ;;  %v1131_v19 = vld [vmem:[%s14437_s0 + $0x1a40] sm:$0xff] }
 0x167   : > { %v7346_v14 = vpack.c.bf16 %v3812_v3, %v3805_v2  ;;  %7601 = vmatprep.subr.bf16.mxu1 %v7600_v8  ;;  %v2926_v21 = vadd.f32 %v2030_v17, %v1134_v12  ;;  %v2933_v22 = vadd.f32 %v2037_v18, %v1141_v13  ;;  %v1138_v23 = vld [vmem:[%s14437_s0 + $0x1a78] sm:$0xff]  ;;  %v2027_v24 = vld [vmem:[%s14438_s1 + $0x1a40] sm:$0xff]  ;;  %v1133_v30 = vld [vmem:[%s14437_s0 + $0x1a50] sm:$0xff] }
 0x168   : > { %v3820_v20 = vmax.f32 %v2924_v11, 0.0  ;;  %v2034_v25 = vld [vmem:[%s14438_s1 + $0x1a78] sm:$0xff]  ;;  %v7602_v26 = vpack.c.bf16 %v3814_v15, %v3807_v9  ;;  %v3827_v27 = vmax.f32 %v2931_v16, 0.0  ;;  %v2923_v28 = vadd.f32 %v2027_v24, %v1131_v19  ;;  %v1140_v31 = vld [vmem:[%s14437_s0 + $0x1a88] sm:$0xff]  ;;  %v2029_v32 = vld [vmem:[%s14438_s1 + $0x1a50] sm:$0xff] }
 0x169   : > { %7347 = vmatpush1.bf16.msra.mxu0 %v7346_v14  ;;  %v2930_v29 = vadd.f32 %v2034_v25, %v1138_v23  ;;  %v3822_v33 = vmax.f32 %v2926_v21, 0.0  ;;  %v3829_v34 = vmax.f32 %v2933_v22, 0.0  ;;  %v2036_v35 = vld [vmem:[%s14438_s1 + $0x1a88] sm:$0xff]  ;;  %v2925_v36 = vadd.f32 %v2029_v32, %v1133_v30  ;;  %v3983_v38 = vld [vmem:[%s9273_s11 + $0x360] sm:$0xff]  ;;  %v1146_v43 = vld [vmem:[%s14437_s0 + $0x1ab8] sm:$0xff] }
 0x16a   : > { %v3984_v37 = vld [vmem:[%s9273_s11 + $0x368] sm:$0xff]  ;;  %7603 = vmatpush1.bf16.msra.mxu1 %v7602_v26  ;;  %v7348_v39 = vpack.c.bf16 %v3827_v27, %v3820_v20  ;;  %v3819_v40 = vmax.f32 %v2923_v28, 0.0  ;;  %v2932_v42 = vadd.f32 %v2036_v35, %v1140_v31  ;;  %v1153_v44 = vld [vmem:[%s14437_s0 + $0x1af0] sm:$0xff]  ;;  %v2042_v45 = vld [vmem:[%s14438_s1 + $0x1ab8] sm:$0xff] }
 0x16b   : > { %v3826_v41 = vmax.f32 %v2930_v29, 0.0  ;;  %4467 = vmatprep.mubr.f32.mxu0 %v3984_v37  ;;  %v7604_v46 = vpack.c.bf16 %v3829_v34, %v3822_v33  ;;  %v3821_v47 = vmax.f32 %v2925_v36, 0.0  ;;  %5111 = vmatprep.mubr.f32.mxu1 %v3984_v37  ;;  %v2049_v48 = vld [vmem:[%s14438_s1 + $0x1af0] sm:$0xff]  ;;  %v2938_v49 = vadd.f32 %v2042_v45, %v1146_v43  ;;  %v1148_v50 = vld [vmem:[%s14437_s0 + $0x1ac8] sm:$0xff]  ;;  %v1155_v51 = vld [vmem:[%s14437_s0 + $0x1b00] sm:$0xff] }
 0x16c   : > { %4468 = vmatmul.mubr.f32.gmra.mrb[26].mxu0 %v3983_v38  ;;  %7349 = vmatprep.subr.bf16.mxu0 %v7348_v39  ;;  %v3828_v53 = vmax.f32 %v2932_v42, 0.0  ;;  %v2945_v54 = vadd.f32 %v2049_v48, %v1153_v44  ;;  %v2044_v55 = vld [vmem:[%s14438_s1 + $0x1ac8] sm:$0xff]  ;;  %v2051_v56 = vld [vmem:[%s14438_s1 + $0x1b00] sm:$0xff]  ;;  %v1145_v57 = vld [vmem:[%s14437_s0 + $0x1ab0] sm:$0xff] }
 0x16d   : > { %v7350_v52 = vpack.c.bf16 %v3826_v41, %v3819_v40  ;;  %5112 = vmatmul.mubr.f32.gmra.mrb[26].mxu1 %v3983_v38  ;;  %7605 = vmatprep.subr.bf16.mxu1 %v7604_v46  ;;  %v3834_v58 = vmax.f32 %v2938_v49, 0.0  ;;  %v2940_v59 = vadd.f32 %v2044_v55, %v1148_v50  ;;  %v2947_v60 = vadd.f32 %v2051_v56, %v1155_v51  ;;  %v1152_v61 = vld [vmem:[%s14437_s0 + $0x1ae8] sm:$0xff]  ;;  %v2041_v62 = vld [vmem:[%s14438_s1 + $0x1ab0] sm:$0xff]  ;;  %v1147_v4 = vld [vmem:[%s14437_s0 + $0x1ac0] sm:$0xff] }
 0x16e   : > { %v2048_v63 = vld [vmem:[%s14438_s1 + $0x1ae8] sm:$0xff]  ;;  %v7606_v0 = vpack.c.bf16 %v3828_v53, %v3821_v47  ;;  %v3841_v1 = vmax.f32 %v2945_v54, 0.0  ;;  %v2937_v2 = vadd.f32 %v2041_v62, %v1145_v57  ;;  %v1154_v5 = vld [vmem:[%s14437_s0 + $0x1af8] sm:$0xff]  ;;  %v2043_v6 = vld [vmem:[%s14438_s1 + $0x1ac0] sm:$0xff] }
 0x16f   : > { %7351 = vmatpush1.bf16.msra.mxu0 %v7350_v52  ;;  %v2944_v3 = vadd.f32 %v2048_v63, %v1152_v61  ;;  %v3836_v7 = vmax.f32 %v2940_v59, 0.0  ;;  %v3843_v8 = vmax.f32 %v2947_v60, 0.0  ;;  %v2050_v9 = vld [vmem:[%s14438_s1 + $0x1af8] sm:$0xff]  ;;  %v2939_v10 = vadd.f32 %v2043_v6, %v1147_v4  ;;  %v3992_v11 = vld [vmem:[%s9273_s11 + $0x3a8] sm:$0xff]  ;;  %v3991_v12 = vld [vmem:[%s9273_s11 + $0x3a0] sm:$0xff] }
 0x170   : > { %7607 = vmatpush1.bf16.msra.mxu1 %v7606_v0  ;;  %v7352_v13 = vpack.c.bf16 %v3841_v1, %v3834_v58  ;;  %v3833_v14 = vmax.f32 %v2937_v2, 0.0  ;;  %v2946_v16 = vadd.f32 %v2050_v9, %v1154_v5  ;;  %4473 = vmatprep.mubr.f32.mxu0 %v3992_v11  ;;  %v1160_v17 = vld [vmem:[%s14437_s0 + $0x1b28] sm:$0xff]  ;;  %v1167_v18 = vld [vmem:[%s14437_s0 + $0x1b60] sm:$0xff]  ;;  %v1162_v24 = vld [vmem:[%s14437_s0 + $0x1b38] sm:$0xff] }
 0x171   : > { %v3840_v15 = vmax.f32 %v2944_v3, 0.0  ;;  %v2056_v19 = vld [vmem:[%s14438_s1 + $0x1b28] sm:$0xff]  ;;  %v7608_v20 = vpack.c.bf16 %v3843_v8, %v3836_v7  ;;  %v3835_v21 = vmax.f32 %v2939_v10, 0.0  ;;  %5117 = vmatprep.mubr.f32.mxu1 %v3992_v11  ;;  %4474 = vmatmul.mubr.f32.gmra.mrb[28].mxu0 %v3991_v12  ;;  %v2063_v22 = vld [vmem:[%s14438_s1 + $0x1b60] sm:$0xff]  ;;  %v1169_v25 = vld [vmem:[%s14437_s0 + $0x1b70] sm:$0xff] }
 0x172   : > { %v2952_v23 = vadd.f32 %v2056_v19, %v1160_v17  ;;  %7353 = vmatprep.subr.bf16.mxu0 %v7352_v13  ;;  %v3842_v27 = vmax.f32 %v2946_v16, 0.0  ;;  %v2959_v28 = vadd.f32 %v2063_v22, %v1167_v18  ;;  %5118 = vmatmul.mubr.f32.gmra.mrb[28].mxu1 %v3991_v12  ;;  %v2058_v29 = vld [vmem:[%s14438_s1 + $0x1b38] sm:$0xff]  ;;  %v2065_v30 = vld [vmem:[%s14438_s1 + $0x1b70] sm:$0xff]  ;;  %v1159_v31 = vld [vmem:[%s14437_s0 + $0x1b20] sm:$0xff] }
 0x173   : > { %v7354_v26 = vpack.c.bf16 %v3840_v15, %v3833_v14  ;;  %7609 = vmatprep.subr.bf16.mxu1 %v7608_v20  ;;  %v2954_v33 = vadd.f32 %v2058_v29, %v1162_v24  ;;  %v2961_v34 = vadd.f32 %v2065_v30, %v1169_v25  ;;  %v1166_v35 = vld [vmem:[%s14437_s0 + $0x1b58] sm:$0xff]  ;;  %v2055_v36 = vld [vmem:[%s14438_s1 + $0x1b20] sm:$0xff]  ;;  %v1161_v42 = vld [vmem:[%s14437_s0 + $0x1b30] sm:$0xff] }
 0x174   : > { %v3848_v32 = vmax.f32 %v2952_v23, 0.0  ;;  %v2062_v37 = vld [vmem:[%s14438_s1 + $0x1b58] sm:$0xff]  ;;  %v7610_v38 = vpack.c.bf16 %v3842_v27, %v3835_v21  ;;  %v3855_v39 = vmax.f32 %v2959_v28, 0.0  ;;  %v2951_v40 = vadd.f32 %v2055_v36, %v1159_v31  ;;  %v1168_v43 = vld [vmem:[%s14437_s0 + $0x1b68] sm:$0xff]  ;;  %v2057_v44 = vld [vmem:[%s14438_s1 + $0x1b30] sm:$0xff] }
 0x175   : > { %7355 = vmatpush1.bf16.msra.mxu0 %v7354_v26  ;;  %v2958_v41 = vadd.f32 %v2062_v37, %v1166_v35  ;;  %v3850_v45 = vmax.f32 %v2954_v33, 0.0  ;;  %v3857_v46 = vmax.f32 %v2961_v34, 0.0  ;;  %v2064_v47 = vld [vmem:[%s14438_s1 + $0x1b68] sm:$0xff]  ;;  %v2953_v48 = vadd.f32 %v2057_v44, %v1161_v42  ;;  %v3999_v50 = vld [vmem:[%s9273_s11 + $0x3e0] sm:$0xff]  ;;  %v1174_v55 = vld [vmem:[%s14437_s0 + $0x1b98] sm:$0xff] }
 0x176   : > { %v4000_v49 = vld [vmem:[%s9273_s11 + $0x3e8] sm:$0xff]  ;;  %7611 = vmatpush1.bf16.msra.mxu1 %v7610_v38  ;;  %v7356_v51 = vpack.c.bf16 %v3855_v39, %v3848_v32  ;;  %v3847_v52 = vmax.f32 %v2951_v40, 0.0  ;;  %v2960_v54 = vadd.f32 %v2064_v47, %v1168_v43  ;;  %v1181_v56 = vld [vmem:[%s14437_s0 + $0x1bd0] sm:$0xff]  ;;  %v2070_v57 = vld [vmem:[%s14438_s1 + $0x1b98] sm:$0xff] }
 0x177   : > { %v3854_v53 = vmax.f32 %v2958_v41, 0.0  ;;  %4479 = vmatprep.mubr.f32.mxu0 %v4000_v49  ;;  %v7612_v58 = vpack.c.bf16 %v3857_v46, %v3850_v45  ;;  %v3849_v59 = vmax.f32 %v2953_v48, 0.0  ;;  %5123 = vmatprep.mubr.f32.mxu1 %v4000_v49  ;;  %v2077_v60 = vld [vmem:[%s14438_s1 + $0x1bd0] sm:$0xff]  ;;  %v2966_v61 = vadd.f32 %v2070_v57, %v1174_v55  ;;  %v1176_v62 = vld [vmem:[%s14437_s0 + $0x1ba8] sm:$0xff]  ;;  %v1183_v63 = vld [vmem:[%s14437_s0 + $0x1be0] sm:$0xff] }
 0x178   : > { %4480 = vmatmul.mubr.f32.gmra.mrb[30].mxu0 %v3999_v50  ;;  %7357 = vmatprep.subr.bf16.mxu0 %v7356_v51  ;;  %v3856_v1 = vmax.f32 %v2960_v54, 0.0  ;;  %v2973_v2 = vadd.f32 %v2077_v60, %v1181_v56  ;;  %v2072_v3 = vld [vmem:[%s14438_s1 + $0x1ba8] sm:$0xff]  ;;  %v2079_v4 = vld [vmem:[%s14438_s1 + $0x1be0] sm:$0xff]  ;;  %v1173_v5 = vld [vmem:[%s14437_s0 + $0x1b90] sm:$0xff] }
 0x179   : > { %v7358_v0 = vpack.c.bf16 %v3854_v53, %v3847_v52  ;;  %5124 = vmatmul.mubr.f32.gmra.mrb[30].mxu1 %v3999_v50  ;;  %7613 = vmatprep.subr.bf16.mxu1 %v7612_v58  ;;  %v3862_v6 = vmax.f32 %v2966_v61, 0.0  ;;  %v2968_v7 = vadd.f32 %v2072_v3, %v1176_v62  ;;  %v2975_v8 = vadd.f32 %v2079_v4, %v1183_v63  ;;  %v1180_v9 = vld [vmem:[%s14437_s0 + $0x1bc8] sm:$0xff]  ;;  %v2069_v10 = vld [vmem:[%s14438_s1 + $0x1b90] sm:$0xff]  ;;  %v1175_v16 = vld [vmem:[%s14437_s0 + $0x1ba0] sm:$0xff] }
 0x17a   : > { %v2076_v11 = vld [vmem:[%s14438_s1 + $0x1bc8] sm:$0xff]  ;;  %v7614_v12 = vpack.c.bf16 %v3856_v1, %v3849_v59  ;;  %v3869_v13 = vmax.f32 %v2973_v2, 0.0  ;;  %v2965_v14 = vadd.f32 %v2069_v10, %v1173_v5  ;;  %v1182_v17 = vld [vmem:[%s14437_s0 + $0x1bd8] sm:$0xff]  ;;  %v2071_v18 = vld [vmem:[%s14438_s1 + $0x1ba0] sm:$0xff] }
 0x17b   : > { %7359 = vmatpush1.bf16.msra.mxu0 %v7358_v0  ;;  %v2972_v15 = vadd.f32 %v2076_v11, %v1180_v9  ;;  %v3864_v19 = vmax.f32 %v2968_v7, 0.0  ;;  %v3871_v20 = vmax.f32 %v2975_v8, 0.0  ;;  %v2078_v21 = vld [vmem:[%s14438_s1 + $0x1bd8] sm:$0xff]  ;;  %v2967_v22 = vadd.f32 %v2071_v18, %v1175_v16  ;;  %v296_v28 = vld [vmem:[%s14437_s0 + $0x28] sm:$0xff]  ;;  %v303_v29 = vld [vmem:[%s14437_s0 + $0x60] sm:$0xff] }
 0x17c   : > { %v3882_v23 = vld [vmem:[%s9273_s11 + $0x38] sm:$0xff]  ;;  %7615 = vmatpush1.bf16.msra.mxu1 %v7614_v12  ;;  %v7360_v24 = vpack.c.bf16 %v3869_v13, %v3862_v6  ;;  %v3861_v25 = vmax.f32 %v2965_v14, 0.0  ;;  %v2974_v27 = vadd.f32 %v2078_v21, %v1182_v17  ;;  %v1192_v30 = vld [vmem:[%s14438_s1 + $0x28] sm:$0xff]  ;;  %v1199_v33 = vld [vmem:[%s14438_s1 + $0x60] sm:$0xff] }
 0x17d   : > { %v3868_v26 = vmax.f32 %v2972_v15, 0.0  ;;  %4550 = vmatprep.mubr.f32.mxu0 %v3882_v23  ;;  %v7616_v31 = vpack.c.bf16 %v3871_v20, %v3864_v19  ;;  %v3863_v32 = vmax.f32 %v2967_v22, 0.0  ;;  %5194 = vmatprep.mubr.f32.mxu1 %v3882_v23  ;;  %v2088_v34 = vadd.f32 %v1192_v30, %v296_v28  ;;  %v409_v35 = vld [vmem:[%s14437_s0 + $0x3b0] sm:$0xff]  ;;  %v416_v36 = vld [vmem:[%s14437_s0 + $0x3e8] sm:$0xff]  ;;  %v295_v43 = vld [vmem:[%s14437_s0 + $0x20] sm:$0xff] }
 0x17e   : > { %7361 = vmatprep.subr.bf16.mxu0 %v7360_v24  ;;  %v3870_v38 = vmax.f32 %v2974_v27, 0.0  ;;  %v3881_v39 = vld [vmem:[%s9273_s11 + $0x30] sm:$0xff]  ;;  %v2095_v40 = vadd.f32 %v1199_v33, %v303_v29  ;;  %v1312_v42 = vld [vmem:[%s14438_s1 + $0x3e8] sm:$0xff]  ;;  %v302_v47 = vld [vmem:[%s14437_s0 + $0x58] sm:$0xff] }
 0x17f   : > { %v7362_v37 = vpack.c.bf16 %v3868_v26, %v3861_v25  ;;  %v1305_v41 = vld [vmem:[%s14438_s1 + $0x3b0] sm:$0xff]  ;;  %7617 = vmatprep.subr.bf16.mxu1 %v7616_v31  ;;  %v2984_v44 = vmax.f32 %v2088_v34, 0.0  ;;  %v2208_v46 = vadd.f32 %v1312_v42, %v416_v36  ;;  %v1191_v48 = vld [vmem:[%s14438_s1 + $0x20] sm:$0xff]  ;;  %v1198_v49 = vld [vmem:[%s14438_s1 + $0x58] sm:$0xff] }
 0x180   : > { %v2201_v45 = vadd.f32 %v1305_v41, %v409_v35  ;;  %v7618_v50 = vpack.c.bf16 %v3870_v38, %v3863_v32  ;;  %v2991_v51 = vmax.f32 %v2095_v40, 0.0  ;;  %v2087_v52 = vadd.f32 %v1191_v48, %v295_v43  ;;  %v297_v54 = vld [vmem:[%s14437_s0 + $0x30] sm:$0xff]  ;;  %v304_v55 = vld [vmem:[%s14437_s0 + $0x68] sm:$0xff]  ;;  %v3890_v61 = vld [vmem:[%s9273_s11 + $0x78] sm:$0xff] }
 0x181   : > { %7363 = vmatpush1.bf16.msra.mxu0 %v7362_v37  ;;  %v2094_v53 = vadd.f32 %v1198_v49, %v302_v47  ;;  %v1193_v56 = vld [vmem:[%s14438_s1 + $0x30] sm:$0xff]  ;;  %v3104_v58 = vmax.f32 %v2208_v46, 0.0  ;;  %v1200_v59 = vld [vmem:[%s14438_s1 + $0x68] sm:$0xff]  ;;  %v310_v2 = vld [vmem:[%s14437_s0 + $0x98] sm:$0xff] }
 0x182   : > { %v3097_v57 = vmax.f32 %v2201_v45, 0.0  ;;  %v2089_v60 = vadd.f32 %v1193_v56, %v297_v54  ;;  %7619 = vmatpush1.bf16.msra.mxu1 %v7618_v50  ;;  %v7620_v62 = vpack.c.bf16 %v2991_v51, %v2984_v44  ;;  %v2983_v63 = vmax.f32 %v2087_v52, 0.0  ;;  %v317_v3 = vld [vmem:[%s14437_s0 + $0xd0] sm:$0xff]  ;;  %v1206_v4 = vld [vmem:[%s14438_s1 + $0x98] sm:$0xff]  ;;  %v316_v10 = vld [vmem:[%s14437_s0 + $0xc8] sm:$0xff] }
 0x183   : > { %v2990_v0 = vmax.f32 %v2094_v53, 0.0  ;;  %v2096_v1 = vadd.f32 %v1200_v59, %v304_v55  ;;  %v1213_v7 = vld [vmem:[%s14438_s1 + $0xd0] sm:$0xff]  ;;  %v2102_v8 = vadd.f32 %v1206_v4, %v310_v2  ;;  %v1212_v16 = vld [vmem:[%s14438_s1 + $0xc8] sm:$0xff]  ;;  %v3898_v20 = vld [vmem:[%s9273_s11 + $0xb8] sm:$0xff] }
 0x184   : > { %4551 = vmatmul.mubr.f32.vlgmr.msra.gmra.mrb[0].mxu0 %v3881_v39  ;;  %v7876_v5 = vpack.c.bf16 %v3104_v58, %v3097_v57  ;;  %v2985_v6 = vmax.f32 %v2089_v60, 0.0  ;;  %v309_v9 = vld [vmem:[%s14437_s0 + $0x90] sm:$0xff]  ;;  %7621 = vmatprep.subr.bf16.mxu0 %v7620_v62  ;;  %v2109_v14 = vadd.f32 %v1213_v7, %v317_v3  ;;  %v2108_v19 = vadd.f32 %v1212_v16, %v316_v10  ;;  %v324_v21 = vld [vmem:[%s14437_s0 + $0x108] sm:$0xff]  ;;  %v331_v22 = vld [vmem:[%s14437_s0 + $0x140] sm:$0xff] }
 0x185   : > { %v7622_v11 = vpack.c.bf16 %v2990_v0, %v2983_v63  ;;  %v2992_v12 = vmax.f32 %v2096_v1, 0.0  ;;  %4556 = vmatprep.mubr.f32.mxu0 %v3890_v61  ;;  %v3889_v13 = vld [vmem:[%s9273_s11 + $0x70] sm:$0xff]  ;;  %5195 = vmatmul.mubr.f32.vlgmr.msra.gmra.mrb[0].mxu1 %v3881_v39  ;;  %v2998_v17 = vmax.f32 %v2102_v8, 0.0  ;;  %v1220_v25 = vld [vmem:[%s14438_s1 + $0x108] sm:$0xff]  ;;  %v1227_v26 = vld [vmem:[%s14438_s1 + $0x140] sm:$0xff] }
 0x186   : > { %v1205_v15 = vld [vmem:[%s14438_s1 + $0x90] sm:$0xff]  ;;  %7877 = vmatprep.subr.bf16.mxu1 %v7876_v5  ;;  %5200 = vmatprep.mubr.f32.mxu1 %v3890_v61  ;;  %v3005_v24 = vmax.f32 %v2109_v14, 0.0  ;;  %v423_v27 = vld [vmem:[%s14437_s0 + $0x420] sm:$0xff]  ;;  %v3004_v29 = vmax.f32 %v2108_v19, 0.0  ;;  %v2116_v31 = vadd.f32 %v1220_v25, %v324_v21  ;;  %v2123_v32 = vadd.f32 %v1227_v26, %v331_v22  ;;  %v430_v33 = vld [vmem:[%s14437_s0 + $0x458] sm:$0xff] }
 0x187   : > { %v2101_v18 = vadd.f32 %v1205_v15, %v309_v9  ;;  %7623 = vmatpush1.bf16.msra.mxu0 %v7622_v11  ;;  %v7878_v23 = vpack.c.bf16 %v2992_v12, %v2985_v6  ;;  %v3897_v30 = vld [vmem:[%s9273_s11 + $0xb0] sm:$0xff]  ;;  %v1319_v34 = vld [vmem:[%s14438_s1 + $0x420] sm:$0xff]  ;;  %v1326_v35 = vld [vmem:[%s14438_s1 + $0x458] sm:$0xff] }
 0x188   : > { %4557 = vmatmul.mubr.f32.gmra.mrb[2].mxu0 %v3889_v13  ;;  %v7624_v36 = vpack.c.bf16 %v3005_v24, %v2998_v17  ;;  %v2215_v37 = vadd.f32 %v1319_v34, %v423_v27  ;;  %v2222_v38 = vadd.f32 %v1326_v35, %v430_v33  ;;  %v323_v39 = vld [vmem:[%s14437_s0 + $0x100] sm:$0xff]  ;;  %v330_v40 = vld [vmem:[%s14437_s0 + $0x138] sm:$0xff]  ;;  %v3012_v43 = vmax.f32 %v2116_v31, 0.0  ;;  %v345_v60 = vld [vmem:[%s14437_s0 + $0x1b0] sm:$0xff] }
 0x189   : > { %v2997_v28 = vmax.f32 %v2101_v18, 0.0  ;;  %7879 = vmatpush3.bf16.msra.mxu1 %v7878_v23  ;;  %4562 = vmatprep.mubr.f32.mxu0 %v3898_v20  ;;  %v1219_v41 = vld [vmem:[%s14438_s1 + $0x100] sm:$0xff]  ;;  %v3019_v44 = vmax.f32 %v2123_v32, 0.0  ;;  %v1226_v45 = vld [vmem:[%s14438_s1 + $0x138] sm:$0xff]  ;;  %v1241_v0 = vld [vmem:[%s14438_s1 + $0x1b0] sm:$0xff] }
 0x18a   : > { %5201 = vmatmul.mubr.f32.gmra.mrb[2].mxu1 %v3889_v13  ;;  %v2115_v46 = vadd.f32 %v1219_v41, %v323_v39  ;;  %v311_v47 = vld [vmem:[%s14437_s0 + $0xa0] sm:$0xff]  ;;  %v318_v48 = vld [vmem:[%s14437_s0 + $0xd8] sm:$0xff]  ;;  %7625 = vmatprep.subr.bf16.mxu0 %v7624_v36  ;;  %v3111_v49 = vmax.f32 %v2215_v37, 0.0  ;;  %v3118_v50 = vmax.f32 %v2222_v38, 0.0  ;;  %v2122_v51 = vadd.f32 %v1226_v45, %v330_v40  ;;  %v337_v1 = vld [vmem:[%s14437_s0 + $0x170] sm:$0xff] }
 0x18b   : > { %v7626_v42 = vpack.c.bf16 %v3004_v29, %v2997_v28  ;;  %5206 = vmatprep.mubr.f32.mxu1 %v3898_v20  ;;  %v1207_v52 = vld [vmem:[%s14438_s1 + $0xa0] sm:$0xff]  ;;  %v1214_v53 = vld [vmem:[%s14438_s1 + $0xd8] sm:$0xff]  ;;  %v7628_v54 = vpack.c.bf16 %v3019_v44, %v3012_v43  ;;  %v2137_v5 = vadd.f32 %v1241_v0, %v345_v60  ;;  %v344_v6 = vld [vmem:[%s14437_s0 + $0x1a8] sm:$0xff] }
 0x18c   : > { %v3011_v55 = vmax.f32 %v2115_v46, 0.0  ;;  %v2103_v56 = vadd.f32 %v1207_v52, %v311_v47  ;;  %v2110_v57 = vadd.f32 %v1214_v53, %v318_v48  ;;  %v3906_v58 = vld [vmem:[%s9273_s11 + $0xf8] sm:$0xff]  ;;  %4563 = vmatmul.mubr.f32.gmra.mrb[4].mxu0 %v3897_v30  ;;  %v7880_v61 = vpack.c.bf16 %v3118_v50, %v3111_v49  ;;  %v1233_v7 = vld [vmem:[%s14438_s1 + $0x170] sm:$0xff]  ;;  %v1240_v8 = vld [vmem:[%s14438_s1 + $0x1a8] sm:$0xff] }
 0x18d   : > { %7627 = vmatpush1.bf16.msra.mxu0 %v7626_v42  ;;  %v338_v59 = vld [vmem:[%s14437_s0 + $0x178] sm:$0xff]  ;;  %v3018_v62 = vmax.f32 %v2122_v51, 0.0  ;;  %4568 = vmatprep.mubr.f32.mxu0 %v3906_v58  ;;  %v3905_v10 = vld [vmem:[%s9273_s11 + $0xf0] sm:$0xff]  ;;  %v2129_v11 = vadd.f32 %v1233_v7, %v337_v1  ;;  %v2136_v12 = vadd.f32 %v1240_v8, %v344_v6  ;;  %v352_v14 = vld [vmem:[%s14437_s0 + $0x1e8] sm:$0xff]  ;;  %v3033_v17 = vmax.f32 %v2137_v5, 0.0 }
 0x18e   : > { %v1234_v63 = vld [vmem:[%s14438_s1 + $0x178] sm:$0xff]  ;;  %5207 = vmatmul.mubr.f32.gmra.mrb[4].mxu1 %v3897_v30  ;;  %7629 = vmatprep.subr.bf16.mxu0 %v7628_v54  ;;  %v2999_v2 = vmax.f32 %v2103_v56, 0.0  ;;  %v3006_v3 = vmax.f32 %v2110_v57, 0.0  ;;  %v359_v18 = vld [vmem:[%s14437_s0 + $0x220] sm:$0xff]  ;;  %v1248_v19 = vld [vmem:[%s14438_s1 + $0x1e8] sm:$0xff] }
 0x18f   : > { %v2130_v4 = vadd.f32 %v1234_v63, %v338_v59  ;;  %7881 = vmatprep.subr.bf16.mxu1 %v7880_v61  ;;  %v7630_v9 = vpack.c.bf16 %v3018_v62, %v3011_v55  ;;  %v3914_v13 = vld [vmem:[%s9273_s11 + $0x138] sm:$0xff]  ;;  %5212 = vmatprep.mubr.f32.mxu1 %v3906_v58  ;;  %v1255_v20 = vld [vmem:[%s14438_s1 + $0x220] sm:$0xff]  ;;  %v3025_v21 = vmax.f32 %v2129_v11, 0.0  ;;  %v3032_v22 = vmax.f32 %v2136_v12, 0.0  ;;  %v3913_v23 = vld [vmem:[%s9273_s11 + $0x130] sm:$0xff] }
 0x190   : > { %v7882_v15 = vpack.c.bf16 %v3006_v3, %v2999_v2  ;;  %v2144_v24 = vadd.f32 %v1248_v19, %v352_v14  ;;  %v2151_v25 = vadd.f32 %v1255_v20, %v359_v18  ;;  %v437_v26 = vld [vmem:[%s14437_s0 + $0x490] sm:$0xff]  ;;  %v444_v27 = vld [vmem:[%s14437_s0 + $0x4c8] sm:$0xff]  ;;  %4569 = vmatmul.mubr.f32.gmra.mrb[6].mxu0 %v3905_v10  ;;  %v351_v32 = vld [vmem:[%s14437_s0 + $0x1e0] sm:$0xff] }
 0x191   : > { %v3026_v16 = vmax.f32 %v2130_v4, 0.0  ;;  %7631 = vmatpush1.bf16.msra.mxu0 %v7630_v9  ;;  %v1333_v28 = vld [vmem:[%s14438_s1 + $0x490] sm:$0xff]  ;;  %v1340_v30 = vld [vmem:[%s14438_s1 + $0x4c8] sm:$0xff]  ;;  %v358_v33 = vld [vmem:[%s14437_s0 + $0x218] sm:$0xff]  ;;  %v7634_v34 = vpack.c.bf16 %v3032_v22, %v3025_v21  ;;  %4574 = vmatprep.mubr.f32.mxu0 %v3914_v13 }
 0x192   : > { %7883 = vmatpush3.bf16.msra.mxu1 %v7882_v15  ;;  %v2229_v31 = vadd.f32 %v1333_v28, %v437_v26  ;;  %v3040_v35 = vmax.f32 %v2144_v24, 0.0  ;;  %v3047_v36 = vmax.f32 %v2151_v25, 0.0  ;;  %v2236_v37 = vadd.f32 %v1340_v30, %v444_v27  ;;  %v1247_v38 = vld [vmem:[%s14438_s1 + $0x1e0] sm:$0xff]  ;;  %v1254_v39 = vld [vmem:[%s14438_s1 + $0x218] sm:$0xff]  ;;  %v325_v40 = vld [vmem:[%s14437_s0 + $0x110] sm:$0xff] }
 0x193   : > { %v7632_v29 = vpack.c.bf16 %v3033_v17, %v3026_v16  ;;  %5213 = vmatmul.mubr.f32.gmra.mrb[6].mxu1 %v3905_v10  ;;  %v2143_v42 = vadd.f32 %v1247_v38, %v351_v32  ;;  %v2150_v43 = vadd.f32 %v1254_v39, %v358_v33  ;;  %v332_v44 = vld [vmem:[%s14437_s0 + $0x148] sm:$0xff]  ;;  %v1221_v45 = vld [vmem:[%s14438_s1 + $0x110] sm:$0xff]  ;;  %v3922_v51 = vld [vmem:[%s9273_s11 + $0x178] sm:$0xff] }
 0x194   : > { %5218 = vmatprep.mubr.f32.mxu1 %v3914_v13  ;;  %v3125_v41 = vmax.f32 %v2229_v31, 0.0  ;;  %v1228_v46 = vld [vmem:[%s14438_s1 + $0x148] sm:$0xff]  ;;  %v7636_v47 = vpack.c.bf16 %v3047_v36, %v3040_v35  ;;  %v3132_v48 = vmax.f32 %v2236_v37, 0.0  ;;  %v2117_v49 = vadd.f32 %v1221_v45, %v325_v40  ;;  %v366_v52 = vld [vmem:[%s14437_s0 + $0x258] sm:$0xff]  ;;  %4575 = vmatmul.mubr.f32.gmra.mrb[8].mxu0 %v3913_v23  ;;  %v373_v55 = vld [vmem:[%s14437_s0 + $0x290] sm:$0xff] }
 0x195   : > { %7633 = vmatprep.subr.bf16.mxu0 %v7632_v29  ;;  %v2124_v50 = vadd.f32 %v1228_v46, %v332_v44  ;;  %v3039_v53 = vmax.f32 %v2143_v42, 0.0  ;;  %v3046_v54 = vmax.f32 %v2150_v43, 0.0  ;;  %v1262_v56 = vld [vmem:[%s14438_s1 + $0x258] sm:$0xff]  ;;  %v1269_v57 = vld [vmem:[%s14438_s1 + $0x290] sm:$0xff]  ;;  %v372_v63 = vld [vmem:[%s14437_s0 + $0x288] sm:$0xff]  ;;  %4580 = vmatprep.mubr.f32.mxu0 %v3922_v51 }
 0x196   : > { %7635 = vmatpush1.bf16.msra.mxu0 %v7634_v34  ;;  %v7884_v58 = vpack.c.bf16 %v3132_v48, %v3125_v41  ;;  %v3013_v59 = vmax.f32 %v2117_v49, 0.0  ;;  %v2158_v61 = vadd.f32 %v1262_v56, %v366_v52  ;;  %v365_v62 = vld [vmem:[%s14437_s0 + $0x250] sm:$0xff]  ;;  %v2165_v3 = vadd.f32 %v1269_v57, %v373_v55  ;;  %v1268_v4 = vld [vmem:[%s14438_s1 + $0x288] sm:$0xff]  ;;  %v3930_v6 = vld [vmem:[%s9273_s11 + $0x1b8] sm:$0xff] }
 0x197   : > { %5219 = vmatmul.mubr.f32.gmra.mrb[8].mxu1 %v3913_v23  ;;  %7637 = vmatprep.subr.bf16.mxu0 %v7636_v47  ;;  %v3020_v60 = vmax.f32 %v2124_v50, 0.0  ;;  %v1261_v0 = vld [vmem:[%s14438_s1 + $0x250] sm:$0xff]  ;;  %v7638_v1 = vpack.c.bf16 %v3046_v54, %v3039_v53  ;;  %v2164_v9 = vadd.f32 %v1268_v4, %v372_v63  ;;  %v380_v10 = vld [vmem:[%s14437_s0 + $0x2c8] sm:$0xff]  ;;  %v387_v11 = vld [vmem:[%s14437_s0 + $0x300] sm:$0xff] }
 0x198   : > { %5224 = vmatprep.mubr.f32.mxu1 %v3922_v51  ;;  %v3921_v2 = vld [vmem:[%s9273_s11 + $0x170] sm:$0xff]  ;;  %v2157_v5 = vadd.f32 %v1261_v0, %v365_v62  ;;  %7885 = vmatprep.subr.bf16.mxu1 %v7884_v58  ;;  %v3054_v8 = vmax.f32 %v2158_v61, 0.0  ;;  %v1276_v12 = vld [vmem:[%s14438_s1 + $0x2c8] sm:$0xff]  ;;  %v3061_v13 = vmax.f32 %v2165_v3, 0.0  ;;  %v1283_v15 = vld [vmem:[%s14438_s1 + $0x300] sm:$0xff] }
 0x199   : > { %v7886_v7 = vpack.c.bf16 %v3020_v60, %v3013_v59  ;;  %v2172_v16 = vadd.f32 %v1276_v12, %v380_v10  ;;  %v451_v17 = vld [vmem:[%s14437_s0 + $0x500] sm:$0xff]  ;;  %v458_v18 = vld [vmem:[%s14437_s0 + $0x538] sm:$0xff]  ;;  %4581 = vmatmul.mubr.f32.gmra.mrb[10].mxu0 %v3921_v2  ;;  %v3060_v19 = vmax.f32 %v2164_v9, 0.0  ;;  %v3929_v20 = vld [vmem:[%s9273_s11 + $0x1b0] sm:$0xff]  ;;  %v2179_v21 = vadd.f32 %v1283_v15, %v387_v11 }
 0x19a   : > { %7639 = vmatpush1.bf16.msra.mxu0 %v7638_v1  ;;  %v3053_v14 = vmax.f32 %v2157_v5, 0.0  ;;  %v1347_v22 = vld [vmem:[%s14438_s1 + $0x500] sm:$0xff]  ;;  %v1354_v23 = vld [vmem:[%s14438_s1 + $0x538] sm:$0xff]  ;;  %v7640_v25 = vpack.c.bf16 %v3061_v13, %v3054_v8  ;;  %4586 = vmatprep.mubr.f32.mxu0 %v3930_v6  ;;  %v401_v49 = vld [vmem:[%s14437_s0 + $0x370] sm:$0xff] }
 0x19b   : > { %7887 = vmatpush3.bf16.msra.mxu1 %v7886_v7  ;;  %v379_v24 = vld [vmem:[%s14437_s0 + $0x2c0] sm:$0xff]  ;;  %v3068_v26 = vmax.f32 %v2172_v16, 0.0  ;;  %v2243_v27 = vadd.f32 %v1347_v22, %v451_v17  ;;  %v2250_v28 = vadd.f32 %v1354_v23, %v458_v18  ;;  %v386_v29 = vld [vmem:[%s14437_s0 + $0x2f8] sm:$0xff]  ;;  %v3075_v33 = vmax.f32 %v2179_v21, 0.0  ;;  %v1297_v53 = vld [vmem:[%s14438_s1 + $0x370] sm:$0xff] }
 0x19c   : > { %5225 = vmatmul.mubr.f32.gmra.mrb[10].mxu1 %v3921_v2  ;;  %v1275_v30 = vld [vmem:[%s14438_s1 + $0x2c0] sm:$0xff]  ;;  %v1282_v31 = vld [vmem:[%s14438_s1 + $0x2f8] sm:$0xff]  ;;  %v7642_v32 = vpack.c.bf16 %v3060_v19, %v3053_v14  ;;  %7641 = vmatprep.subr.bf16.mxu0 %v7640_v25  ;;  %v393_v55 = vld [vmem:[%s14437_s0 + $0x330] sm:$0xff]  ;;  %v2193_v60 = vadd.f32 %v1297_v53, %v401_v49 }
 0x19d   : > { %5230 = vmatprep.mubr.f32.mxu1 %v3930_v6  ;;  %v2171_v34 = vadd.f32 %v1275_v30, %v379_v24  ;;  %v2178_v35 = vadd.f32 %v1282_v31, %v386_v29  ;;  %v339_v36 = vld [vmem:[%s14437_s0 + $0x180] sm:$0xff]  ;;  %v346_v37 = vld [vmem:[%s14437_s0 + $0x1b8] sm:$0xff]  ;;  %v3139_v39 = vmax.f32 %v2243_v27, 0.0  ;;  %v3146_v40 = vmax.f32 %v2250_v28, 0.0  ;;  %4587 = vmatmul.mubr.f32.gmra.mrb[12].mxu0 %v3929_v20  ;;  %v400_v56 = vld [vmem:[%s14437_s0 + $0x368] sm:$0xff] }
 0x19e   : > { %v1235_v38 = vld [vmem:[%s14438_s1 + $0x180] sm:$0xff]  ;;  %v1242_v41 = vld [vmem:[%s14438_s1 + $0x1b8] sm:$0xff]  ;;  %7643 = vmatpush1.bf16.msra.mxu0 %v7642_v32  ;;  %v7644_v44 = vpack.c.bf16 %v3075_v33, %v3068_v26  ;;  %v3937_v59 = vld [vmem:[%s9273_s11 + $0x1f0] sm:$0xff]  ;;  %v3089_v6 = vmax.f32 %v2193_v60, 0.0 }
 0x19f   : > { %v2131_v42 = vadd.f32 %v1235_v38, %v339_v36  ;;  %v3938_v43 = vld [vmem:[%s9273_s11 + $0x1f8] sm:$0xff]  ;;  %v3067_v45 = vmax.f32 %v2171_v34, 0.0  ;;  %v3074_v46 = vmax.f32 %v2178_v35, 0.0  ;;  %v2138_v47 = vadd.f32 %v1242_v41, %v346_v37  ;;  %v1289_v61 = vld [vmem:[%s14438_s1 + $0x330] sm:$0xff]  ;;  %v1296_v62 = vld [vmem:[%s14438_s1 + $0x368] sm:$0xff] }
 0x1a0   : > { %v394_v48 = vld [vmem:[%s14437_s0 + $0x338] sm:$0xff]  ;;  %5231 = vmatmul.mubr.f32.gmra.mrb[12].mxu1 %v3929_v20  ;;  %v7888_v51 = vpack.c.bf16 %v3146_v40, %v3139_v39  ;;  %7645 = vmatprep.subr.bf16.mxu0 %v7644_v44  ;;  %v2185_v0 = vadd.f32 %v1289_v61, %v393_v55  ;;  %v2192_v1 = vadd.f32 %v1296_v62, %v400_v56  ;;  %v408_v3 = vld [vmem:[%s14437_s0 + $0x3a8] sm:$0xff]  ;;  %v415_v4 = vld [vmem:[%s14437_s0 + $0x3e0] sm:$0xff] }
 0x1a1   : > { %v1290_v50 = vld [vmem:[%s14438_s1 + $0x338] sm:$0xff]  ;;  %v3027_v52 = vmax.f32 %v2131_v42, 0.0  ;;  %v7646_v57 = vpack.c.bf16 %v3074_v46, %v3067_v45  ;;  %v3034_v58 = vmax.f32 %v2138_v47, 0.0  ;;  %4592 = vmatprep.mubr.f32.mxu0 %v3938_v43  ;;  %5236 = vmatprep.mubr.f32.mxu1 %v3938_v43  ;;  %v3945_v7 = vld [vmem:[%s9273_s11 + $0x230] sm:$0xff]  ;;  %v1304_v8 = vld [vmem:[%s14438_s1 + $0x3a8] sm:$0xff] }
 0x1a2   : > { %v2186_v54 = vadd.f32 %v1290_v50, %v394_v48  ;;  %7889 = vmatprep.subr.bf16.mxu1 %v7888_v51  ;;  %v3946_v2 = vld [vmem:[%s9273_s11 + $0x238] sm:$0xff]  ;;  %v1311_v9 = vld [vmem:[%s14438_s1 + $0x3e0] sm:$0xff]  ;;  %v465_v10 = vld [vmem:[%s14437_s0 + $0x570] sm:$0xff]  ;;  %4593 = vmatmul.mubr.f32.gmra.mrb[14].mxu0 %v3937_v59  ;;  %v3081_v11 = vmax.f32 %v2185_v0, 0.0  ;;  %v3088_v12 = vmax.f32 %v2192_v1, 0.0  ;;  %v2200_v13 = vadd.f32 %v1304_v8, %v408_v3 }
 0x1a3   : > { %7647 = vmatpush1.bf16.msra.mxu0 %v7646_v57  ;;  %v7890_v5 = vpack.c.bf16 %v3034_v58, %v3027_v52  ;;  %v2207_v14 = vadd.f32 %v1311_v9, %v415_v4  ;;  %v472_v15 = vld [vmem:[%s14437_s0 + $0x5a8] sm:$0xff]  ;;  %v1361_v16 = vld [vmem:[%s14438_s1 + $0x570] sm:$0xff]  ;;  %4598 = vmatprep.mubr.f32.mxu0 %v3946_v2  ;;  %v407_v21 = vld [vmem:[%s14437_s0 + $0x3a0] sm:$0xff] }
 0x1a4   : > { %v3082_v63 = vmax.f32 %v2186_v54, 0.0  ;;  %5237 = vmatmul.mubr.f32.gmra.mrb[14].mxu1 %v3937_v59  ;;  %v1368_v17 = vld [vmem:[%s14438_s1 + $0x5a8] sm:$0xff]  ;;  %v2257_v19 = vadd.f32 %v1361_v16, %v465_v10  ;;  %v414_v22 = vld [vmem:[%s14437_s0 + $0x3d8] sm:$0xff]  ;;  %v1303_v23 = vld [vmem:[%s14438_s1 + $0x3a0] sm:$0xff]  ;;  %v7650_v24 = vpack.c.bf16 %v3088_v12, %v3081_v11  ;;  %v3096_v25 = vmax.f32 %v2200_v13, 0.0 }
 0x1a5   : > { %7891 = vmatpush3.bf16.msra.mxu1 %v7890_v5  ;;  %v2264_v20 = vadd.f32 %v1368_v17, %v472_v15  ;;  %5242 = vmatprep.mubr.f32.mxu1 %v3946_v2  ;;  %v3103_v26 = vmax.f32 %v2207_v14, 0.0  ;;  %v1310_v27 = vld [vmem:[%s14438_s1 + $0x3d8] sm:$0xff]  ;;  %v2199_v28 = vadd.f32 %v1303_v23, %v407_v21  ;;  %v353_v29 = vld [vmem:[%s14437_s0 + $0x1f0] sm:$0xff]  ;;  %v360_v30 = vld [vmem:[%s14437_s0 + $0x228] sm:$0xff] }
 0x1a6   : > { %v7648_v18 = vpack.c.bf16 %v3089_v6, %v3082_v63  ;;  %v3153_v31 = vmax.f32 %v2257_v19, 0.0  ;;  %v2206_v33 = vadd.f32 %v1310_v27, %v414_v22  ;;  %v1249_v34 = vld [vmem:[%s14438_s1 + $0x1f0] sm:$0xff]  ;;  %v1256_v35 = vld [vmem:[%s14438_s1 + $0x228] sm:$0xff]  ;;  %v3954_v36 = vld [vmem:[%s9273_s11 + $0x278] sm:$0xff]  ;;  %4599 = vmatmul.mubr.f32.gmra.mrb[16].mxu0 %v3945_v7 }
 0x1a7   : > { %v3160_v32 = vmax.f32 %v2264_v20, 0.0  ;;  %v7652_v37 = vpack.c.bf16 %v3103_v26, %v3096_v25  ;;  %v3095_v38 = vmax.f32 %v2199_v28, 0.0  ;;  %v2145_v39 = vadd.f32 %v1249_v34, %v353_v29  ;;  %v3953_v41 = vld [vmem:[%s9273_s11 + $0x270] sm:$0xff]  ;;  %v422_v42 = vld [vmem:[%s14437_s0 + $0x418] sm:$0xff]  ;;  %4604 = vmatprep.mubr.f32.mxu0 %v3954_v36  ;;  %v428_v53 = vld [vmem:[%s14437_s0 + $0x448] sm:$0xff] }
 0x1a8   : > { %7649 = vmatprep.subr.bf16.mxu0 %v7648_v18  ;;  %5243 = vmatmul.mubr.f32.gmra.mrb[16].mxu1 %v3945_v7  ;;  %v2152_v40 = vadd.f32 %v1256_v35, %v360_v30  ;;  %v429_v43 = vld [vmem:[%s14437_s0 + $0x450] sm:$0xff]  ;;  %v3102_v45 = vmax.f32 %v2206_v33, 0.0  ;;  %v1318_v46 = vld [vmem:[%s14438_s1 + $0x418] sm:$0xff]  ;;  %v1324_v55 = vld [vmem:[%s14438_s1 + $0x448] sm:$0xff] }
 0x1a9   : > { %7651 = vmatpush1.bf16.msra.mxu0 %v7650_v24  ;;  %v7892_v44 = vpack.c.bf16 %v3160_v32, %v3153_v31  ;;  %5248 = vmatprep.mubr.f32.mxu1 %v3954_v36  ;;  %v1325_v47 = vld [vmem:[%s14438_s1 + $0x450] sm:$0xff]  ;;  %v3041_v49 = vmax.f32 %v2145_v39, 0.0  ;;  %v2214_v51 = vadd.f32 %v1318_v46, %v422_v42  ;;  %v2220_v58 = vadd.f32 %v1324_v55, %v428_v53  ;;  %v3962_v59 = vld [vmem:[%s9273_s11 + $0x2b8] sm:$0xff]  ;;  %v436_v61 = vld [vmem:[%s14437_s0 + $0x488] sm:$0xff] }
 0x1aa   : > { %v421_v48 = vld [vmem:[%s14437_s0 + $0x410] sm:$0xff]  ;;  %7653 = vmatprep.subr.bf16.mxu0 %v7652_v37  ;;  %v3048_v50 = vmax.f32 %v2152_v40, 0.0  ;;  %v2221_v52 = vadd.f32 %v1325_v47, %v429_v43  ;;  %v7654_v56 = vpack.c.bf16 %v3102_v45, %v3095_v38  ;;  %v443_v1 = vld [vmem:[%s14437_s0 + $0x4c0] sm:$0xff]  ;;  %v1332_v2 = vld [vmem:[%s14438_s1 + $0x488] sm:$0xff]  ;;  %4605 = vmatmul.mubr.f32.gmra.mrb[18].mxu0 %v3953_v41 }
 0x1ab   : > { %v1317_v54 = vld [vmem:[%s14438_s1 + $0x410] sm:$0xff]  ;;  %7893 = vmatprep.subr.bf16.mxu1 %v7892_v44  ;;  %v3110_v63 = vmax.f32 %v2214_v51, 0.0  ;;  %v1339_v3 = vld [vmem:[%s14438_s1 + $0x4c0] sm:$0xff]  ;;  %v3116_v5 = vmax.f32 %v2220_v58, 0.0  ;;  %v2228_v6 = vadd.f32 %v1332_v2, %v436_v61  ;;  %v486_v9 = vld [vmem:[%s14437_s0 + $0x618] sm:$0xff]  ;;  %4610 = vmatprep.mubr.f32.mxu0 %v3962_v59 }
 0x1ac   : > { %v2213_v57 = vadd.f32 %v1317_v54, %v421_v48  ;;  %v3961_v60 = vld [vmem:[%s9273_s11 + $0x2b0] sm:$0xff]  ;;  %v7894_v62 = vpack.c.bf16 %v3048_v50, %v3041_v49  ;;  %5249 = vmatmul.mubr.f32.gmra.mrb[18].mxu1 %v3953_v41  ;;  %v3117_v0 = vmax.f32 %v2221_v52, 0.0  ;;  %v2235_v7 = vadd.f32 %v1339_v3, %v443_v1  ;;  %v479_v8 = vld [vmem:[%s14437_s0 + $0x5e0] sm:$0xff]  ;;  %v1382_v12 = vld [vmem:[%s14438_s1 + $0x618] sm:$0xff] }
 0x1ad   : > { %7655 = vmatpush1.bf16.msra.mxu0 %v7654_v56  ;;  %5254 = vmatprep.mubr.f32.mxu1 %v3962_v59  ;;  %v1375_v10 = vld [vmem:[%s14438_s1 + $0x5e0] sm:$0xff]  ;;  %v442_v15 = vld [vmem:[%s14437_s0 + $0x4b8] sm:$0xff]  ;;  %v3124_v17 = vmax.f32 %v2228_v6, 0.0  ;;  %v2278_v19 = vadd.f32 %v1382_v12, %v486_v9  ;;  %v3969_v34 = vld [vmem:[%s9273_s11 + $0x2f0] sm:$0xff] }
 0x1ae   : > { %v3109_v4 = vmax.f32 %v2213_v57, 0.0  ;;  %7895 = vmatpush3.bf16.msra.mxu1 %v7894_v62  ;;  %v7656_v11 = vpack.c.bf16 %v3117_v0, %v3110_v63  ;;  %v2271_v13 = vadd.f32 %v1375_v10, %v479_v8  ;;  %v435_v14 = vld [vmem:[%s14437_s0 + $0x480] sm:$0xff]  ;;  %v3131_v18 = vmax.f32 %v2235_v7, 0.0  ;;  %v1338_v21 = vld [vmem:[%s14438_s1 + $0x4b8] sm:$0xff]  ;;  %4611 = vmatmul.mubr.f32.gmra.mrb[20].mxu0 %v3961_v60  ;;  %v457_v38 = vld [vmem:[%s14437_s0 + $0x530] sm:$0xff] }
 0x1af   : > { %v1331_v20 = vld [vmem:[%s14438_s1 + $0x480] sm:$0xff]  ;;  %v2234_v25 = vadd.f32 %v1338_v21, %v442_v15  ;;  %v374_v26 = vld [vmem:[%s14437_s0 + $0x298] sm:$0xff]  ;;  %v3174_v30 = vmax.f32 %v2278_v19, 0.0  ;;  %v1353_v40 = vld [vmem:[%s14438_s1 + $0x530] sm:$0xff] }
 0x1b0   : > { %v7658_v16 = vpack.c.bf16 %v3116_v5, %v3109_v4  ;;  %v367_v22 = vld [vmem:[%s14437_s0 + $0x260] sm:$0xff]  ;;  %7657 = vmatprep.subr.bf16.mxu0 %v7656_v11  ;;  %5255 = vmatmul.mubr.f32.gmra.mrb[20].mxu1 %v3961_v60  ;;  %v3167_v23 = vmax.f32 %v2271_v13, 0.0  ;;  %v2227_v24 = vadd.f32 %v1331_v20, %v435_v14  ;;  %v1270_v28 = vld [vmem:[%s14438_s1 + $0x298] sm:$0xff]  ;;  %v7660_v29 = vpack.c.bf16 %v3131_v18, %v3124_v17  ;;  %v449_v45 = vld [vmem:[%s14437_s0 + $0x4f0] sm:$0xff] }
 0x1b1   : > { %v1263_v27 = vld [vmem:[%s14438_s1 + $0x260] sm:$0xff]  ;;  %v2166_v32 = vadd.f32 %v1270_v28, %v374_v26  ;;  %v3970_v33 = vld [vmem:[%s9273_s11 + $0x2f8] sm:$0xff]  ;;  %v3130_v37 = vmax.f32 %v2234_v25, 0.0  ;;  %v456_v46 = vld [vmem:[%s14437_s0 + $0x528] sm:$0xff]  ;;  %v2249_v49 = vadd.f32 %v1353_v40, %v457_v38 }
 0x1b2   : > { %7659 = vmatpush1.bf16.msra.mxu0 %v7658_v16  ;;  %v2159_v31 = vadd.f32 %v1263_v27, %v367_v22  ;;  %v450_v35 = vld [vmem:[%s14437_s0 + $0x4f8] sm:$0xff]  ;;  %v3123_v36 = vmax.f32 %v2227_v24, 0.0  ;;  %5260 = vmatprep.mubr.f32.mxu1 %v3970_v33  ;;  %v7896_v41 = vpack.c.bf16 %v3174_v30, %v3167_v23  ;;  %v1345_v47 = vld [vmem:[%s14438_s1 + $0x4f0] sm:$0xff]  ;;  %v1352_v50 = vld [vmem:[%s14438_s1 + $0x528] sm:$0xff] }
 0x1b3   : > { %v1346_v39 = vld [vmem:[%s14438_s1 + $0x4f8] sm:$0xff]  ;;  %7661 = vmatprep.subr.bf16.mxu0 %v7660_v29  ;;  %v3062_v43 = vmax.f32 %v2166_v32, 0.0  ;;  %4616 = vmatprep.mubr.f32.mxu0 %v3970_v33  ;;  %v2241_v51 = vadd.f32 %v1345_v47, %v449_v45  ;;  %v3977_v53 = vld [vmem:[%s9273_s11 + $0x330] sm:$0xff]  ;;  %v2248_v56 = vadd.f32 %v1352_v50, %v456_v46  ;;  %v464_v57 = vld [vmem:[%s14437_s0 + $0x568] sm:$0xff]  ;;  %v3145_v60 = vmax.f32 %v2249_v49, 0.0 }
 0x1b4   : > { %v3055_v42 = vmax.f32 %v2159_v31, 0.0  ;;  %v2242_v44 = vadd.f32 %v1346_v39, %v450_v35  ;;  %v7662_v48 = vpack.c.bf16 %v3130_v37, %v3123_v36  ;;  %5261 = vmatmul.mubr.f32.gmra.mrb[22].mxu1 %v3969_v34  ;;  %v3978_v52 = vld [vmem:[%s9273_s11 + $0x338] sm:$0xff]  ;;  %7897 = vmatprep.subr.bf16.mxu1 %v7896_v41  ;;  %v471_v58 = vld [vmem:[%s14437_s0 + $0x5a0] sm:$0xff]  ;;  %v1360_v59 = vld [vmem:[%s14438_s1 + $0x568] sm:$0xff] }
 0x1b5   : > { %5266 = vmatprep.mubr.f32.mxu1 %v3978_v52  ;;  %v3137_v61 = vmax.f32 %v2241_v51, 0.0  ;;  %v1367_v62 = vld [vmem:[%s14438_s1 + $0x5a0] sm:$0xff]  ;;  %v2256_v63 = vadd.f32 %v1360_v59, %v464_v57  ;;  %v493_v0 = vld [vmem:[%s14437_s0 + $0x650] sm:$0xff]  ;;  %v500_v1 = vld [vmem:[%s14437_s0 + $0x688] sm:$0xff]  ;;  %4617 = vmatmul.mubr.f32.gmra.mrb[22].mxu0 %v3969_v34  ;;  %v3144_v2 = vmax.f32 %v2248_v56, 0.0 }
 0x1b6   : > { %v7898_v54 = vpack.c.bf16 %v3062_v43, %v3055_v42  ;;  %v3138_v55 = vmax.f32 %v2242_v44, 0.0  ;;  %7663 = vmatpush1.bf16.msra.mxu0 %v7662_v48  ;;  %v2263_v3 = vadd.f32 %v1367_v62, %v471_v58  ;;  %v1389_v4 = vld [vmem:[%s14438_s1 + $0x650] sm:$0xff]  ;;  %v1396_v5 = vld [vmem:[%s14438_s1 + $0x688] sm:$0xff]  ;;  %v463_v6 = vld [vmem:[%s14437_s0 + $0x560] sm:$0xff]  ;;  %4622 = vmatprep.mubr.f32.mxu0 %v3978_v52 }
 0x1b7   : > { %v3152_v8 = vmax.f32 %v2256_v63, 0.0  ;;  %v2285_v9 = vadd.f32 %v1389_v4, %v493_v0  ;;  %v2292_v10 = vadd.f32 %v1396_v5, %v500_v1  ;;  %v470_v11 = vld [vmem:[%s14437_s0 + $0x598] sm:$0xff]  ;;  %v1359_v12 = vld [vmem:[%s14438_s1 + $0x560] sm:$0xff]  ;;  %v7666_v14 = vpack.c.bf16 %v3144_v2, %v3137_v61  ;;  %v381_v18 = vld [vmem:[%s14437_s0 + $0x2d0] sm:$0xff] }
 0x1b8   : > { %7899 = vmatpush3.bf16.msra.mxu1 %v7898_v54  ;;  %v7664_v7 = vpack.c.bf16 %v3145_v60, %v3138_v55  ;;  %v1366_v13 = vld [vmem:[%s14438_s1 + $0x598] sm:$0xff]  ;;  %v3159_v15 = vmax.f32 %v2263_v3, 0.0  ;;  %v2255_v16 = vadd.f32 %v1359_v12, %v463_v6  ;;  %v388_v19 = vld [vmem:[%s14437_s0 + $0x308] sm:$0xff]  ;;  %v1277_v20 = vld [vmem:[%s14438_s1 + $0x2d0] sm:$0xff] }
 0x1b9   : > { %5267 = vmatmul.mubr.f32.gmra.mrb[24].mxu1 %v3977_v53  ;;  %v2262_v17 = vadd.f32 %v1366_v13, %v470_v11  ;;  %v3181_v21 = vmax.f32 %v2285_v9, 0.0  ;;  %v3188_v22 = vmax.f32 %v2292_v10, 0.0  ;;  %v1284_v23 = vld [vmem:[%s14438_s1 + $0x308] sm:$0xff]  ;;  %v2173_v24 = vadd.f32 %v1277_v20, %v381_v18  ;;  %v3986_v25 = vld [vmem:[%s9273_s11 + $0x378] sm:$0xff]  ;;  %v3985_v26 = vld [vmem:[%s9273_s11 + $0x370] sm:$0xff]  ;;  %4623 = vmatmul.mubr.f32.gmra.mrb[24].mxu0 %v3977_v53 }
 0x1ba   : > { %7665 = vmatprep.subr.bf16.mxu0 %v7664_v7  ;;  %v7668_v27 = vpack.c.bf16 %v3159_v15, %v3152_v8  ;;  %v3151_v28 = vmax.f32 %v2255_v16, 0.0  ;;  %v2180_v30 = vadd.f32 %v1284_v23, %v388_v19  ;;  %5272 = vmatprep.mubr.f32.mxu1 %v3986_v25  ;;  %v478_v31 = vld [vmem:[%s14437_s0 + $0x5d8] sm:$0xff]  ;;  %v485_v32 = vld [vmem:[%s14437_s0 + $0x610] sm:$0xff]  ;;  %v484_v39 = vld [vmem:[%s14437_s0 + $0x608] sm:$0xff] }
 0x1bb   : > { %7667 = vmatpush1.bf16.msra.mxu0 %v7666_v14  ;;  %v3158_v29 = vmax.f32 %v2262_v17, 0.0  ;;  %v1374_v33 = vld [vmem:[%s14438_s1 + $0x5d8] sm:$0xff]  ;;  %v7900_v34 = vpack.c.bf16 %v3188_v22, %v3181_v21  ;;  %v3069_v35 = vmax.f32 %v2173_v24, 0.0  ;;  %v1381_v36 = vld [vmem:[%s14438_s1 + $0x610] sm:$0xff]  ;;  %4628 = vmatprep.mubr.f32.mxu0 %v3986_v25  ;;  %v1380_v44 = vld [vmem:[%s14438_s1 + $0x608] sm:$0xff] }
 0x1bc   : > { %v2270_v37 = vadd.f32 %v1374_v33, %v478_v31  ;;  %v477_v38 = vld [vmem:[%s14437_s0 + $0x5d0] sm:$0xff]  ;;  %7669 = vmatprep.subr.bf16.mxu0 %v7668_v27  ;;  %v3076_v41 = vmax.f32 %v2180_v30, 0.0  ;;  %v2277_v42 = vadd.f32 %v1381_v36, %v485_v32  ;;  %v3994_v45 = vld [vmem:[%s9273_s11 + $0x3b8] sm:$0xff]  ;;  %v2276_v48 = vadd.f32 %v1380_v44, %v484_v39  ;;  %v492_v50 = vld [vmem:[%s14437_s0 + $0x648] sm:$0xff] }
 0x1bd   : > { %5273 = vmatmul.mubr.f32.gmra.mrb[26].mxu1 %v3985_v26  ;;  %v7670_v40 = vpack.c.bf16 %v3158_v29, %v3151_v28  ;;  %v1373_v43 = vld [vmem:[%s14438_s1 + $0x5d0] sm:$0xff]  ;;  %7901 = vmatprep.subr.bf16.mxu1 %v7900_v34  ;;  %v499_v51 = vld [vmem:[%s14437_s0 + $0x680] sm:$0xff]  ;;  %v1388_v54 = vld [vmem:[%s14438_s1 + $0x648] sm:$0xff] }
 0x1be   : > { %v3166_v46 = vmax.f32 %v2270_v37, 0.0  ;;  %v2269_v47 = vadd.f32 %v1373_v43, %v477_v38  ;;  %5278 = vmatprep.mubr.f32.mxu1 %v3994_v45  ;;  %v3993_v49 = vld [vmem:[%s9273_s11 + $0x3b0] sm:$0xff]  ;;  %v7902_v52 = vpack.c.bf16 %v3076_v41, %v3069_v35  ;;  %v3173_v53 = vmax.f32 %v2277_v42, 0.0  ;;  %v1395_v55 = vld [vmem:[%s14438_s1 + $0x680] sm:$0xff]  ;;  %4629 = vmatmul.mubr.f32.gmra.mrb[26].mxu0 %v3985_v26  ;;  %v514_v61 = vld [vmem:[%s14437_s0 + $0x6f8] sm:$0xff] }
 0x1bf   : > { %7671 = vmatpush1.bf16.msra.mxu0 %v7670_v40  ;;  %v507_v56 = vld [vmem:[%s14437_s0 + $0x6c0] sm:$0xff]  ;;  %v3172_v58 = vmax.f32 %v2276_v48, 0.0  ;;  %v2284_v59 = vadd.f32 %v1388_v54, %v492_v50  ;;  %v2291_v60 = vadd.f32 %v1395_v55, %v499_v51  ;;  %v1410_v63 = vld [vmem:[%s14438_s1 + $0x6f8] sm:$0xff]  ;;  %4634 = vmatprep.mubr.f32.mxu0 %v3994_v45  ;;  %v4001_v23 = vld [vmem:[%s9273_s11 + $0x3f0] sm:$0xff] }
 0x1c0   : > { %v3165_v57 = vmax.f32 %v2269_v47, 0.0  ;;  %v1403_v62 = vld [vmem:[%s14438_s1 + $0x6c0] sm:$0xff]  ;;  %7903 = vmatpush3.bf16.msra.mxu1 %v7902_v52  ;;  %v7672_v0 = vpack.c.bf16 %v3173_v53, %v3166_v46  ;;  %v2306_v2 = vadd.f32 %v1410_v63, %v514_v61  ;;  %v498_v4 = vld [vmem:[%s14437_s0 + $0x678] sm:$0xff]  ;;  %v513_v25 = vld [vmem:[%s14437_s0 + $0x6f0] sm:$0xff] }
 0x1c1   : > { %5279 = vmatmul.mubr.f32.gmra.mrb[28].mxu1 %v3993_v49  ;;  %v2299_v1 = vadd.f32 %v1403_v62, %v507_v56  ;;  %v491_v3 = vld [vmem:[%s14437_s0 + $0x640] sm:$0xff]  ;;  %v3180_v7 = vmax.f32 %v2284_v59, 0.0  ;;  %v3187_v8 = vmax.f32 %v2291_v60, 0.0  ;;  %v1394_v9 = vld [vmem:[%s14438_s1 + $0x678] sm:$0xff]  ;;  %v1409_v29 = vld [vmem:[%s14438_s1 + $0x6f0] sm:$0xff] }
 0x1c2   : > { %v1387_v5 = vld [vmem:[%s14438_s1 + $0x640] sm:$0xff]  ;;  %v7674_v6 = vpack.c.bf16 %v3172_v58, %v3165_v57  ;;  %v402_v12 = vld [vmem:[%s14437_s0 + $0x378] sm:$0xff]  ;;  %7673 = vmatprep.subr.bf16.mxu0 %v7672_v0  ;;  %v3202_v14 = vmax.f32 %v2306_v2, 0.0  ;;  %v2290_v15 = vadd.f32 %v1394_v9, %v498_v4  ;;  %4635 = vmatmul.mubr.f32.gmra.mrb[28].mxu0 %v3993_v49  ;;  %v505_v30 = vld [vmem:[%s14437_s0 + $0x6b0] sm:$0xff]  ;;  %v2305_v34 = vadd.f32 %v1409_v29, %v513_v25 }
 0x1c3   : > { %v2283_v10 = vadd.f32 %v1387_v5, %v491_v3  ;;  %v395_v11 = vld [vmem:[%s14437_s0 + $0x340] sm:$0xff]  ;;  %v3195_v13 = vmax.f32 %v2299_v1, 0.0  ;;  %v1298_v17 = vld [vmem:[%s14438_s1 + $0x378] sm:$0xff]  ;;  %v7676_v19 = vpack.c.bf16 %v3187_v8, %v3180_v7  ;;  %v512_v35 = vld [vmem:[%s14437_s0 + $0x6e8] sm:$0xff] }
 0x1c4   : > { %v1291_v16 = vld [vmem:[%s14438_s1 + $0x340] sm:$0xff]  ;;  %v4002_v18 = vld [vmem:[%s9273_s11 + $0x3f8] sm:$0xff]  ;;  %7675 = vmatpush1.bf16.msra.mxu0 %v7674_v6  ;;  %v2194_v22 = vadd.f32 %v1298_v17, %v402_v12  ;;  %v3186_v27 = vmax.f32 %v2290_v15, 0.0  ;;  %v1401_v36 = vld [vmem:[%s14438_s1 + $0x6b0] sm:$0xff]  ;;  %v3201_v47 = vmax.f32 %v2305_v34, 0.0 }
 0x1c5   : > { %v3179_v20 = vmax.f32 %v2283_v10, 0.0  ;;  %v2187_v21 = vadd.f32 %v1291_v16, %v395_v11  ;;  %5284 = vmatprep.mubr.f32.mxu1 %v4002_v18  ;;  %v506_v24 = vld [vmem:[%s14437_s0 + $0x6b8] sm:$0xff]  ;;  %v7904_v26 = vpack.c.bf16 %v3202_v14, %v3195_v13  ;;  %7677 = vmatprep.subr.bf16.mxu0 %v7676_v19  ;;  %v1408_v37 = vld [vmem:[%s14438_s1 + $0x6e8] sm:$0xff]  ;;  %v2297_v39 = vadd.f32 %v1401_v36, %v505_v30  ;;  %v527_v43 = vld [vmem:[%s14437_s0 + $0x760] sm:$0xff] }
 0x1c6   : > { %5285 = vmatmul.mubr.f32.gmra.mrb[30].mxu1 %v4001_v23  ;;  %v1402_v28 = vld [vmem:[%s14438_s1 + $0x6b8] sm:$0xff]  ;;  %v3090_v32 = vmax.f32 %v2194_v22, 0.0  ;;  %4640 = vmatprep.mubr.f32.mxu0 %v4002_v18  ;;  %v2304_v40 = vadd.f32 %v1408_v37, %v512_v35  ;;  %v8317_v41 = vld [vmem:[%s9273_s11 + $0x8] sm:$0xff]  ;;  %v1423_v48 = vld [vmem:[%s14438_s1 + $0x760] sm:$0xff] }
 0x1c7   : > { %v3083_v31 = vmax.f32 %v2187_v21, 0.0  ;;  %v2298_v33 = vadd.f32 %v1402_v28, %v506_v24  ;;  %7905 = vmatprep.subr.bf16.mxu1 %v7904_v26  ;;  %v7678_v38 = vpack.c.bf16 %v3186_v27, %v3179_v20  ;;  %5999 = vmatprep.mubr.f32.mxu1 %v8317_v41  ;;  %v520_v42 = vld [vmem:[%s14437_s0 + $0x728] sm:$0xff]  ;;  %v633_v50 = vld [vmem:[%s14437_s0 + $0xab0] sm:$0xff]  ;;  %v3193_v52 = vmax.f32 %v2297_v39, 0.0  ;;  %v519_v57 = vld [vmem:[%s14437_s0 + $0x720] sm:$0xff] }
 0x1c8   : > { %v1416_v44 = vld [vmem:[%s14438_s1 + $0x728] sm:$0xff]  ;;  %v3200_v53 = vmax.f32 %v2304_v40, 0.0  ;;  %v2319_v54 = vadd.f32 %v1423_v48, %v527_v43  ;;  %v1529_v55 = vld [vmem:[%s14438_s1 + $0xab0] sm:$0xff]  ;;  %4641 = vmatmul.mubr.f32.gmra.mrb[30].mxu0 %v4001_v23  ;;  %v526_v62 = vld [vmem:[%s14437_s0 + $0x758] sm:$0xff] }
 0x1c9   : > { %v7906_v45 = vpack.c.bf16 %v3090_v32, %v3083_v31  ;;  %v3194_v46 = vmax.f32 %v2298_v33, 0.0  ;;  %v2312_v49 = vadd.f32 %v1416_v44, %v520_v42  ;;  %v640_v51 = vld [vmem:[%s14437_s0 + $0xae8] sm:$0xff]  ;;  %7679 = vmatpush1.bf16.msra.mxu0 %v7678_v38  ;;  %v2425_v60 = vadd.f32 %v1529_v55, %v633_v50  ;;  %v1415_v63 = vld [vmem:[%s14438_s1 + $0x720] sm:$0xff]  ;;  %v1422_v0 = vld [vmem:[%s14438_s1 + $0x758] sm:$0xff]  ;;  %5355 = vmatprep.mubr.f32.mxu0 %v8317_v41 }
 0x1ca   : > { %v1536_v56 = vld [vmem:[%s14438_s1 + $0xae8] sm:$0xff]  ;;  %v7682_v1 = vpack.c.bf16 %v3200_v53, %v3193_v52  ;;  %v3215_v2 = vmax.f32 %v2319_v54, 0.0  ;;  %v2311_v3 = vadd.f32 %v1415_v63, %v519_v57  ;;  %v2318_v4 = vadd.f32 %v1422_v0, %v526_v62  ;;  %v521_v5 = vld [vmem:[%s14437_s0 + $0x730] sm:$0xff]  ;;  %v534_v12 = vld [vmem:[%s14437_s0 + $0x798] sm:$0xff] }
 0x1cb   : > { %7907 = vmatpush3.bf16.msra.mxu1 %v7906_v45  ;;  %v7680_v58 = vpack.c.bf16 %v3201_v47, %v3194_v46  ;;  %v3208_v59 = vmax.f32 %v2312_v49, 0.0  ;;  %v2432_v61 = vadd.f32 %v1536_v56, %v640_v51  ;;  %v528_v6 = vld [vmem:[%s14437_s0 + $0x768] sm:$0xff]  ;;  %v1417_v7 = vld [vmem:[%s14438_s1 + $0x730] sm:$0xff]  ;;  %v3321_v8 = vmax.f32 %v2425_v60, 0.0  ;;  %v8318_v15 = vld [vmem:[%s9273_s11] sm:$0xff] }
 0x1cc   : > { %v1424_v10 = vld [vmem:[%s14438_s1 + $0x768] sm:$0xff]  ;;  %v2313_v11 = vadd.f32 %v1417_v7, %v521_v5  ;;  %v541_v13 = vld [vmem:[%s14437_s0 + $0x7d0] sm:$0xff]  ;;  %v3207_v16 = vmax.f32 %v2311_v3, 0.0  ;;  %v3214_v17 = vmax.f32 %v2318_v4, 0.0  ;;  %v1430_v19 = vld [vmem:[%s14438_s1 + $0x798] sm:$0xff] }
 0x1cd   : > { %7681 = vmatprep.subr.bf16.mxu0 %v7680_v58  ;;  %v3328_v9 = vmax.f32 %v2432_v61, 0.0  ;;  %v7684_v14 = vpack.c.bf16 %v3215_v2, %v3208_v59  ;;  %v2320_v18 = vadd.f32 %v1424_v10, %v528_v6  ;;  %v1437_v20 = vld [vmem:[%s14438_s1 + $0x7d0] sm:$0xff]  ;;  %v8319_v24 = vld [vmem:[%s9273_s11 + $0x48] sm:$0xff]  ;;  %v2326_v25 = vadd.f32 %v1430_v19, %v534_v12  ;;  %v555_v35 = vld [vmem:[%s14437_s0 + $0x840] sm:$0xff] }
 0x1ce   : > { %7683 = vmatpush1.bf16.msra.mxu0 %v7682_v1  ;;  %6000 = vmatmul.mubr.f32.vlgmr.msra.gmra.mrb[32].mxu1 %v8318_v15  ;;  %v533_v21 = vld [vmem:[%s14437_s0 + $0x790] sm:$0xff]  ;;  %v3209_v23 = vmax.f32 %v2313_v11, 0.0  ;;  %v2333_v26 = vadd.f32 %v1437_v20, %v541_v13  ;;  %v540_v27 = vld [vmem:[%s14437_s0 + $0x7c8] sm:$0xff]  ;;  %v7686_v30 = vpack.c.bf16 %v3214_v17, %v3207_v16  ;;  %v1451_v39 = vld [vmem:[%s14438_s1 + $0x840] sm:$0xff] }
 0x1cf   : > { %v7908_v22 = vpack.c.bf16 %v3328_v9, %v3321_v8  ;;  %6004 = vmatprep.mubr.f32.mxu1 %v8319_v24  ;;  %v1429_v28 = vld [vmem:[%s14438_s1 + $0x790] sm:$0xff]  ;;  %v1436_v29 = vld [vmem:[%s14438_s1 + $0x7c8] sm:$0xff]  ;;  %7685 = vmatprep.subr.bf16.mxu0 %v7684_v14  ;;  %v3216_v31 = vmax.f32 %v2320_v18, 0.0  ;;  %v3222_v37 = vmax.f32 %v2326_v25, 0.0  ;;  %v647_v41 = vld [vmem:[%s14437_s0 + $0xb20] sm:$0xff]  ;;  %v2347_v46 = vadd.f32 %v1451_v39, %v555_v35 }
 0x1d0   : > { %v2325_v32 = vadd.f32 %v1429_v28, %v533_v21  ;;  %v2332_v33 = vadd.f32 %v1436_v29, %v540_v27  ;;  %v548_v34 = vld [vmem:[%s14437_s0 + $0x808] sm:$0xff]  ;;  %v3229_v38 = vmax.f32 %v2333_v26, 0.0  ;;  %v654_v42 = vld [vmem:[%s14437_s0 + $0xb58] sm:$0xff]  ;;  %v1543_v47 = vld [vmem:[%s14438_s1 + $0xb20] sm:$0xff] }
 0x1d1   : > { %v1444_v36 = vld [vmem:[%s14438_s1 + $0x808] sm:$0xff]  ;;  %5356 = vmatmul.mubr.f32.vlgmr.msra.gmra.mrb[32].mxu0 %v8318_v15  ;;  %7909 = vmatprep.subr.bf16.mxu1 %v7908_v22  ;;  %v7910_v43 = vpack.c.bf16 %v3216_v31, %v3209_v23  ;;  %v1550_v48 = vld [vmem:[%s14438_s1 + $0xb58] sm:$0xff]  ;;  %v547_v49 = vld [vmem:[%s14437_s0 + $0x800] sm:$0xff]  ;;  %v2439_v53 = vadd.f32 %v1543_v47, %v647_v41  ;;  %v3243_v60 = vmax.f32 %v2347_v46, 0.0 }
 0x1d2   : > { %v2340_v40 = vadd.f32 %v1444_v36, %v548_v34  ;;  %7687 = vmatpush1.bf16.msra.mxu0 %v7686_v30  ;;  %5361 = vmatprep.mubr.f32.mxu0 %v8319_v24  ;;  %v3221_v44 = vmax.f32 %v2325_v32, 0.0  ;;  %v3228_v45 = vmax.f32 %v2332_v33, 0.0  ;;  %v7688_v50 = vpack.c.bf16 %v3229_v38, %v3222_v37  ;;  %v8320_v51 = vld [vmem:[%s9273_s11 + $0x40] sm:$0xff]  ;;  %v554_v55 = vld [vmem:[%s14437_s0 + $0x838] sm:$0xff]  ;;  %v8321_v59 = vld [vmem:[%s9273_s11 + $0x88] sm:$0xff] }
 0x1d3   : > { %6005 = vmatmul.mubr.f32.gmra.mrb[34].mxu1 %v8320_v51  ;;  %v2446_v54 = vadd.f32 %v1550_v48, %v654_v42  ;;  %v1443_v56 = vld [vmem:[%s14438_s1 + $0x800] sm:$0xff]  ;;  %v1450_v57 = vld [vmem:[%s14438_s1 + $0x838] sm:$0xff]  ;;  %v3335_v2 = vmax.f32 %v2439_v53, 0.0  ;;  %v569_v7 = vld [vmem:[%s14437_s0 + $0x8b0] sm:$0xff] }
 0x1d4   : > { %v3236_v52 = vmax.f32 %v2340_v40, 0.0  ;;  %7911 = vmatpush3.bf16.msra.mxu1 %v7910_v43  ;;  %v7690_v58 = vpack.c.bf16 %v3228_v45, %v3221_v44  ;;  %6009 = vmatprep.mubr.f32.mxu1 %v8321_v59  ;;  %v2339_v61 = vadd.f32 %v1443_v56, %v547_v49  ;;  %v2346_v62 = vadd.f32 %v1450_v57, %v554_v55  ;;  %v535_v63 = vld [vmem:[%s14437_s0 + $0x7a0] sm:$0xff]  ;;  %v542_v0 = vld [vmem:[%s14437_s0 + $0x7d8] sm:$0xff]  ;;  %v1465_v13 = vld [vmem:[%s14438_s1 + $0x8b0] sm:$0xff] }
 0x1d5   : > { %v1431_v1 = vld [vmem:[%s14438_s1 + $0x7a0] sm:$0xff]  ;;  %5362 = vmatmul.mubr.f32.gmra.mrb[34].mxu0 %v8320_v51  ;;  %7689 = vmatprep.subr.bf16.mxu0 %v7688_v50  ;;  %v3342_v3 = vmax.f32 %v2446_v54, 0.0  ;;  %v1438_v4 = vld [vmem:[%s14438_s1 + $0x7d8] sm:$0xff]  ;;  %v561_v14 = vld [vmem:[%s14437_s0 + $0x870] sm:$0xff]  ;;  %v2361_v19 = vadd.f32 %v1465_v13, %v569_v7 }
 0x1d6   : > { %v2327_v5 = vadd.f32 %v1431_v1, %v535_v63  ;;  %v562_v6 = vld [vmem:[%s14437_s0 + $0x878] sm:$0xff]  ;;  %7691 = vmatpush1.bf16.msra.mxu0 %v7690_v58  ;;  %5367 = vmatprep.mubr.f32.mxu0 %v8321_v59  ;;  %v7692_v8 = vpack.c.bf16 %v3243_v60, %v3236_v52  ;;  %v3235_v9 = vmax.f32 %v2339_v61, 0.0  ;;  %v3242_v10 = vmax.f32 %v2346_v62, 0.0  ;;  %v8322_v15 = vld [vmem:[%s9273_s11 + $0x80] sm:$0xff]  ;;  %v568_v20 = vld [vmem:[%s14437_s0 + $0x8a8] sm:$0xff] }
 0x1d7   : > { %v2334_v11 = vadd.f32 %v1438_v4, %v542_v0  ;;  %v1458_v12 = vld [vmem:[%s14438_s1 + $0x878] sm:$0xff]  ;;  %6010 = vmatmul.mubr.f32.gmra.mrb[36].mxu1 %v8322_v15  ;;  %v7912_v16 = vpack.c.bf16 %v3342_v3, %v3335_v2  ;;  %v1457_v21 = vld [vmem:[%s14438_s1 + $0x870] sm:$0xff]  ;;  %v1464_v22 = vld [vmem:[%s14438_s1 + $0x8a8] sm:$0xff]  ;;  %v3257_v32 = vmax.f32 %v2361_v19, 0.0 }
 0x1d8   : > { %v3223_v17 = vmax.f32 %v2327_v5, 0.0  ;;  %v2354_v18 = vadd.f32 %v1458_v12, %v562_v6  ;;  %7693 = vmatprep.subr.bf16.mxu0 %v7692_v8  ;;  %v7694_v23 = vpack.c.bf16 %v3242_v10, %v3235_v9  ;;  %v8323_v25 = vld [vmem:[%s9273_s11 + $0xc8] sm:$0xff]  ;;  %v2353_v26 = vadd.f32 %v1457_v21, %v561_v14  ;;  %v583_v29 = vld [vmem:[%s14437_s0 + $0x920] sm:$0xff]  ;;  %v661_v35 = vld [vmem:[%s14437_s0 + $0xb90] sm:$0xff] }
 0x1d9   : > { %v3230_v24 = vmax.f32 %v2334_v11, 0.0  ;;  %6014 = vmatprep.mubr.f32.mxu1 %v8323_v25  ;;  %v2360_v27 = vadd.f32 %v1464_v22, %v568_v20  ;;  %v576_v28 = vld [vmem:[%s14437_s0 + $0x8e8] sm:$0xff]  ;;  %5368 = vmatmul.mubr.f32.gmra.mrb[36].mxu0 %v8322_v15  ;;  %v1479_v33 = vld [vmem:[%s14438_s1 + $0x920] sm:$0xff]  ;;  %v1557_v41 = vld [vmem:[%s14438_s1 + $0xb90] sm:$0xff] }
 0x1da   : > { %v1472_v30 = vld [vmem:[%s14438_s1 + $0x8e8] sm:$0xff]  ;;  %7913 = vmatprep.subr.bf16.mxu1 %v7912_v16  ;;  %v3250_v31 = vmax.f32 %v2354_v18, 0.0  ;;  %7695 = vmatpush1.bf16.msra.mxu0 %v7694_v23  ;;  %v3249_v38 = vmax.f32 %v2353_v26, 0.0  ;;  %v2375_v40 = vadd.f32 %v1479_v33, %v583_v29  ;;  %v575_v43 = vld [vmem:[%s14437_s0 + $0x8e0] sm:$0xff]  ;;  %v2453_v47 = vadd.f32 %v1557_v41, %v661_v35  ;;  %v582_v49 = vld [vmem:[%s14437_s0 + $0x918] sm:$0xff] }
 0x1db   : > { %v2368_v34 = vadd.f32 %v1472_v30, %v576_v28  ;;  %v668_v36 = vld [vmem:[%s14437_s0 + $0xbc8] sm:$0xff]  ;;  %v7914_v37 = vpack.c.bf16 %v3230_v24, %v3223_v17  ;;  %5373 = vmatprep.mubr.f32.mxu0 %v8323_v25  ;;  %v3256_v39 = vmax.f32 %v2360_v27, 0.0  ;;  %v8324_v45 = vld [vmem:[%s9273_s11 + $0xc0] sm:$0xff]  ;;  %v1478_v51 = vld [vmem:[%s14438_s1 + $0x918] sm:$0xff] }
 0x1dc   : > { %v1564_v42 = vld [vmem:[%s14438_s1 + $0xbc8] sm:$0xff]  ;;  %v7696_v44 = vpack.c.bf16 %v3257_v32, %v3250_v31  ;;  %6015 = vmatmul.mubr.f32.gmra.mrb[38].mxu1 %v8324_v45  ;;  %v1471_v50 = vld [vmem:[%s14438_s1 + $0x8e0] sm:$0xff]  ;;  %v3271_v54 = vmax.f32 %v2375_v40, 0.0  ;;  %v2374_v56 = vadd.f32 %v1478_v51, %v582_v49  ;;  %v549_v57 = vld [vmem:[%s14437_s0 + $0x810] sm:$0xff]  ;;  %v3349_v60 = vmax.f32 %v2453_v47, 0.0 }
 0x1dd   : > { %v3264_v46 = vmax.f32 %v2368_v34, 0.0  ;;  %v2460_v48 = vadd.f32 %v1564_v42, %v668_v36  ;;  %7915 = vmatpush3.bf16.msra.mxu1 %v7914_v37  ;;  %v7698_v52 = vpack.c.bf16 %v3256_v39, %v3249_v38  ;;  %v8325_v53 = vld [vmem:[%s9273_s11 + $0x108] sm:$0xff]  ;;  %v2367_v55 = vadd.f32 %v1471_v50, %v575_v43  ;;  %v1445_v59 = vld [vmem:[%s14438_s1 + $0x810] sm:$0xff]  ;;  %5374 = vmatmul.mubr.f32.gmra.mrb[38].mxu0 %v8324_v45  ;;  %v590_v0 = vld [vmem:[%s14437_s0 + $0x958] sm:$0xff] }
 0x1de   : > { %6019 = vmatprep.mubr.f32.mxu1 %v8325_v53  ;;  %v556_v58 = vld [vmem:[%s14437_s0 + $0x848] sm:$0xff]  ;;  %7697 = vmatprep.subr.bf16.mxu0 %v7696_v44  ;;  %v2341_v63 = vadd.f32 %v1445_v59, %v549_v57  ;;  %v597_v1 = vld [vmem:[%s14437_s0 + $0x990] sm:$0xff]  ;;  %v3270_v4 = vmax.f32 %v2374_v56, 0.0  ;;  %v1486_v6 = vld [vmem:[%s14438_s1 + $0x958] sm:$0xff] }
 0x1df   : > { %v3356_v61 = vmax.f32 %v2460_v48, 0.0  ;;  %v1452_v62 = vld [vmem:[%s14438_s1 + $0x848] sm:$0xff]  ;;  %7699 = vmatpush1.bf16.msra.mxu0 %v7698_v52  ;;  %5379 = vmatprep.mubr.f32.mxu0 %v8325_v53  ;;  %v7700_v2 = vpack.c.bf16 %v3271_v54, %v3264_v46  ;;  %v3263_v3 = vmax.f32 %v2367_v55, 0.0  ;;  %v1493_v7 = vld [vmem:[%s14438_s1 + $0x990] sm:$0xff]  ;;  %v8326_v9 = vld [vmem:[%s9273_s11 + $0x100] sm:$0xff]  ;;  %v2382_v12 = vadd.f32 %v1486_v6, %v590_v0 }
 0x1e0   : > { %v2348_v5 = vadd.f32 %v1452_v62, %v556_v58  ;;  %v589_v8 = vld [vmem:[%s14437_s0 + $0x950] sm:$0xff]  ;;  %6020 = vmatmul.mubr.f32.gmra.mrb[40].mxu1 %v8326_v9  ;;  %v3237_v11 = vmax.f32 %v2341_v63, 0.0  ;;  %v2389_v13 = vadd.f32 %v1493_v7, %v597_v1  ;;  %v596_v14 = vld [vmem:[%s14437_s0 + $0x988] sm:$0xff]  ;;  %v611_v23 = vld [vmem:[%s14437_s0 + $0xa00] sm:$0xff] }
 0x1e1   : > { %v7916_v10 = vpack.c.bf16 %v3356_v61, %v3349_v60  ;;  %v1485_v15 = vld [vmem:[%s14438_s1 + $0x950] sm:$0xff]  ;;  %v1492_v16 = vld [vmem:[%s14438_s1 + $0x988] sm:$0xff]  ;;  %7701 = vmatprep.subr.bf16.mxu0 %v7700_v2  ;;  %v7702_v17 = vpack.c.bf16 %v3270_v4, %v3263_v3  ;;  %5380 = vmatmul.mubr.f32.gmra.mrb[40].mxu0 %v8326_v9  ;;  %v3278_v25 = vmax.f32 %v2382_v12, 0.0  ;;  %v1507_v27 = vld [vmem:[%s14438_s1 + $0xa00] sm:$0xff] }
 0x1e2   : > { %v3244_v18 = vmax.f32 %v2348_v5, 0.0  ;;  %v8327_v19 = vld [vmem:[%s9273_s11 + $0x148] sm:$0xff]  ;;  %v2381_v20 = vadd.f32 %v1485_v15, %v589_v8  ;;  %v2388_v21 = vadd.f32 %v1492_v16, %v596_v14  ;;  %v3285_v26 = vmax.f32 %v2389_v13, 0.0  ;;  %v675_v29 = vld [vmem:[%s14437_s0 + $0xc00] sm:$0xff]  ;;  %v682_v30 = vld [vmem:[%s14437_s0 + $0xc38] sm:$0xff] }
 0x1e3   : > { %6024 = vmatprep.mubr.f32.mxu1 %v8327_v19  ;;  %v604_v22 = vld [vmem:[%s14437_s0 + $0x9c8] sm:$0xff]  ;;  %7917 = vmatprep.subr.bf16.mxu1 %v7916_v10  ;;  %v2403_v34 = vadd.f32 %v1507_v27, %v611_v23  ;;  %v1571_v35 = vld [vmem:[%s14438_s1 + $0xc00] sm:$0xff]  ;;  %v1578_v36 = vld [vmem:[%s14438_s1 + $0xc38] sm:$0xff] }
 0x1e4   : > { %v1500_v24 = vld [vmem:[%s14438_s1 + $0x9c8] sm:$0xff]  ;;  %7703 = vmatpush1.bf16.msra.mxu0 %v7702_v17  ;;  %v7918_v31 = vpack.c.bf16 %v3244_v18, %v3237_v11  ;;  %5385 = vmatprep.mubr.f32.mxu0 %v8327_v19  ;;  %v3277_v32 = vmax.f32 %v2381_v20, 0.0  ;;  %v3284_v33 = vmax.f32 %v2388_v21, 0.0  ;;  %v603_v37 = vld [vmem:[%s14437_s0 + $0x9c0] sm:$0xff]  ;;  %v7704_v38 = vpack.c.bf16 %v3285_v26, %v3278_v25  ;;  %v610_v43 = vld [vmem:[%s14437_s0 + $0x9f8] sm:$0xff] }
 0x1e5   : > { %v2396_v28 = vadd.f32 %v1500_v24, %v604_v22  ;;  %v8328_v39 = vld [vmem:[%s9273_s11 + $0x140] sm:$0xff]  ;;  %v2467_v41 = vadd.f32 %v1571_v35, %v675_v29  ;;  %v2474_v42 = vadd.f32 %v1578_v36, %v682_v30  ;;  %v1506_v45 = vld [vmem:[%s14438_s1 + $0x9f8] sm:$0xff]  ;;  %v8329_v47 = vld [vmem:[%s9273_s11 + $0x188] sm:$0xff]  ;;  %v3299_v48 = vmax.f32 %v2403_v34, 0.0 }
 0x1e6   : > { %6025 = vmatmul.mubr.f32.gmra.mrb[42].mxu1 %v8328_v39  ;;  %v1499_v44 = vld [vmem:[%s14438_s1 + $0x9c0] sm:$0xff]  ;;  %v7706_v46 = vpack.c.bf16 %v3284_v33, %v3277_v32  ;;  %v2402_v50 = vadd.f32 %v1506_v45, %v610_v43  ;;  %v570_v52 = vld [vmem:[%s14437_s0 + $0x8b8] sm:$0xff]  ;;  %5386 = vmatmul.mubr.f32.gmra.mrb[42].mxu0 %v8328_v39  ;;  %v625_v59 = vld [vmem:[%s14437_s0 + $0xa70] sm:$0xff] }
 0x1e7   : > { %v3292_v40 = vmax.f32 %v2396_v28, 0.0  ;;  %7919 = vmatpush3.bf16.msra.mxu1 %v7918_v31  ;;  %6029 = vmatprep.mubr.f32.mxu1 %v8329_v47  ;;  %v2395_v49 = vadd.f32 %v1499_v44, %v603_v37  ;;  %v563_v51 = vld [vmem:[%s14437_s0 + $0x880] sm:$0xff]  ;;  %v3363_v54 = vmax.f32 %v2467_v41, 0.0  ;;  %v3370_v55 = vmax.f32 %v2474_v42, 0.0  ;;  %v1466_v56 = vld [vmem:[%s14438_s1 + $0x8b8] sm:$0xff]  ;;  %v1521_v1 = vld [vmem:[%s14438_s1 + $0xa70] sm:$0xff] }
 0x1e8   : > { %v1459_v53 = vld [vmem:[%s14438_s1 + $0x880] sm:$0xff]  ;;  %7705 = vmatprep.subr.bf16.mxu0 %v7704_v38  ;;  %v618_v58 = vld [vmem:[%s14437_s0 + $0xa38] sm:$0xff]  ;;  %5391 = vmatprep.mubr.f32.mxu0 %v8329_v47  ;;  %v3298_v62 = vmax.f32 %v2402_v50, 0.0  ;;  %v2362_v63 = vadd.f32 %v1466_v56, %v570_v52  ;;  %v617_v2 = vld [vmem:[%s14437_s0 + $0xa30] sm:$0xff]  ;;  %v2417_v7 = vadd.f32 %v1521_v1, %v625_v59 }
 0x1e9   : > { %v2355_v57 = vadd.f32 %v1459_v53, %v563_v51  ;;  %7707 = vmatpush1.bf16.msra.mxu0 %v7706_v46  ;;  %v7708_v60 = vpack.c.bf16 %v3299_v48, %v3292_v40  ;;  %v3291_v61 = vmax.f32 %v2395_v49, 0.0  ;;  %v1514_v0 = vld [vmem:[%s14438_s1 + $0xa38] sm:$0xff]  ;;  %v8330_v3 = vld [vmem:[%s9273_s11 + $0x180] sm:$0xff]  ;;  %v7920_v4 = vpack.c.bf16 %v3370_v55, %v3363_v54  ;;  %v624_v8 = vld [vmem:[%s14437_s0 + $0xa68] sm:$0xff] }
 0x1ea   : > { %6030 = vmatmul.mubr.f32.gmra.mrb[44].mxu1 %v8330_v3  ;;  %v2410_v6 = vadd.f32 %v1514_v0, %v618_v58  ;;  %v1513_v9 = vld [vmem:[%s14438_s1 + $0xa30] sm:$0xff]  ;;  %v1520_v10 = vld [vmem:[%s14438_s1 + $0xa68] sm:$0xff]  ;;  %v3258_v12 = vmax.f32 %v2362_v63, 0.0  ;;  %v639_v17 = vld [vmem:[%s14437_s0 + $0xae0] sm:$0xff]  ;;  %5392 = vmatmul.mubr.f32.gmra.mrb[44].mxu0 %v8330_v3  ;;  %v3313_v20 = vmax.f32 %v2417_v7, 0.0 }
 0x1eb   : > { %v3251_v5 = vmax.f32 %v2355_v57, 0.0  ;;  %7709 = vmatprep.subr.bf16.mxu0 %v7708_v60  ;;  %v7710_v11 = vpack.c.bf16 %v3298_v62, %v3291_v61  ;;  %v8331_v13 = vld [vmem:[%s9273_s11 + $0x1c8] sm:$0xff]  ;;  %v2409_v14 = vadd.f32 %v1513_v9, %v617_v2  ;;  %v2416_v15 = vadd.f32 %v1520_v10, %v624_v8  ;;  %7921 = vmatprep.subr.bf16.mxu1 %v7920_v4  ;;  %v1535_v21 = vld [vmem:[%s14438_s1 + $0xae0] sm:$0xff]  ;;  %v689_v23 = vld [vmem:[%s14437_s0 + $0xc70] sm:$0xff] }
 0x1ec   : > { %6034 = vmatprep.mubr.f32.mxu1 %v8331_v13  ;;  %v632_v16 = vld [vmem:[%s14437_s0 + $0xaa8] sm:$0xff]  ;;  %v3306_v19 = vmax.f32 %v2410_v6, 0.0  ;;  %5397 = vmatprep.mubr.f32.mxu0 %v8331_v13  ;;  %v2431_v28 = vadd.f32 %v1535_v21, %v639_v17  ;;  %v1585_v29 = vld [vmem:[%s14438_s1 + $0xc70] sm:$0xff]  ;;  %v631_v31 = vld [vmem:[%s14437_s0 + $0xaa0] sm:$0xff] }
 0x1ed   : > { %v1528_v18 = vld [vmem:[%s14438_s1 + $0xaa8] sm:$0xff]  ;;  %7711 = vmatpush1.bf16.msra.mxu0 %v7710_v11  ;;  %v7922_v25 = vpack.c.bf16 %v3258_v12, %v3251_v5  ;;  %v3305_v26 = vmax.f32 %v2409_v14, 0.0  ;;  %v3312_v27 = vmax.f32 %v2416_v15, 0.0  ;;  %v8332_v33 = vld [vmem:[%s9273_s11 + $0x1c0] sm:$0xff]  ;;  %v2481_v35 = vadd.f32 %v1585_v29, %v689_v23  ;;  %v638_v37 = vld [vmem:[%s14437_s0 + $0xad8] sm:$0xff] }
 0x1ee   : > { %v2424_v22 = vadd.f32 %v1528_v18, %v632_v16  ;;  %v696_v24 = vld [vmem:[%s14437_s0 + $0xca8] sm:$0xff]  ;;  %v7712_v32 = vpack.c.bf16 %v3313_v20, %v3306_v19  ;;  %6035 = vmatmul.mubr.f32.gmra.mrb[46].mxu1 %v8332_v33  ;;  %v1527_v38 = vld [vmem:[%s14438_s1 + $0xaa0] sm:$0xff]  ;;  %v1534_v39 = vld [vmem:[%s14438_s1 + $0xad8] sm:$0xff]  ;;  %v3327_v42 = vmax.f32 %v2431_v28, 0.0  ;;  %5398 = vmatmul.mubr.f32.gmra.mrb[46].mxu0 %v8332_v33 }
 0x1ef   : > { %v1592_v30 = vld [vmem:[%s14438_s1 + $0xca8] sm:$0xff]  ;;  %7923 = vmatpush3.bf16.msra.mxu1 %v7922_v25  ;;  %v7714_v40 = vpack.c.bf16 %v3312_v27, %v3305_v26  ;;  %v2423_v43 = vadd.f32 %v1527_v38, %v631_v31  ;;  %v2430_v44 = vadd.f32 %v1534_v39, %v638_v37  ;;  %v577_v45 = vld [vmem:[%s14437_s0 + $0x8f0] sm:$0xff]  ;;  %v3377_v48 = vmax.f32 %v2481_v35, 0.0  ;;  %v646_v52 = vld [vmem:[%s14437_s0 + $0xb18] sm:$0xff] }
 0x1f0   : > { %v3320_v34 = vmax.f32 %v2424_v22, 0.0  ;;  %v2488_v36 = vadd.f32 %v1592_v30, %v696_v24  ;;  %v8333_v41 = vld [vmem:[%s9273_s11 + $0x208] sm:$0xff]  ;;  %v1473_v47 = vld [vmem:[%s14438_s1 + $0x8f0] sm:$0xff]  ;;  %7713 = vmatprep.subr.bf16.mxu0 %v7712_v32  ;;  %v1542_v58 = vld [vmem:[%s14438_s1 + $0xb18] sm:$0xff] }
 0x1f1   : > { %6039 = vmatprep.mubr.f32.mxu1 %v8333_v41  ;;  %v584_v46 = vld [vmem:[%s14437_s0 + $0x928] sm:$0xff]  ;;  %v2369_v51 = vadd.f32 %v1473_v47, %v577_v45  ;;  %v653_v53 = vld [vmem:[%s14437_s0 + $0xb50] sm:$0xff]  ;;  %7715 = vmatpush1.bf16.msra.mxu0 %v7714_v40  ;;  %v3319_v55 = vmax.f32 %v2423_v43, 0.0  ;;  %v3326_v56 = vmax.f32 %v2430_v44, 0.0  ;;  %v8334_v61 = vld [vmem:[%s9273_s11 + $0x200] sm:$0xff]  ;;  %v2438_v0 = vadd.f32 %v1542_v58, %v646_v52 }
 0x1f2   : > { %v3384_v49 = vmax.f32 %v2488_v36, 0.0  ;;  %v1480_v50 = vld [vmem:[%s14438_s1 + $0x928] sm:$0xff]  ;;  %5403 = vmatprep.mubr.f32.mxu0 %v8333_v41  ;;  %v7716_v54 = vpack.c.bf16 %v3327_v42, %v3320_v34  ;;  %v1549_v59 = vld [vmem:[%s14438_s1 + $0xb50] sm:$0xff]  ;;  %6040 = vmatmul.mubr.f32.gmra.mrb[48].mxu1 %v8334_v61  ;;  %v667_v11 = vld [vmem:[%s14437_s0 + $0xbc0] sm:$0xff] }
 0x1f3   : > { %v2376_v57 = vadd.f32 %v1480_v50, %v584_v46  ;;  %v645_v60 = vld [vmem:[%s14437_s0 + $0xb10] sm:$0xff]  ;;  %v3265_v63 = vmax.f32 %v2369_v51, 0.0  ;;  %v2445_v1 = vadd.f32 %v1549_v59, %v653_v53  ;;  %v652_v2 = vld [vmem:[%s14437_s0 + $0xb48] sm:$0xff]  ;;  %v7718_v5 = vpack.c.bf16 %v3326_v56, %v3319_v55  ;;  %5404 = vmatmul.mubr.f32.gmra.mrb[48].mxu0 %v8334_v61  ;;  %v1563_v15 = vld [vmem:[%s14438_s1 + $0xbc0] sm:$0xff] }
 0x1f4   : > { %v7924_v62 = vpack.c.bf16 %v3384_v49, %v3377_v48  ;;  %v1541_v3 = vld [vmem:[%s14438_s1 + $0xb10] sm:$0xff]  ;;  %v1548_v4 = vld [vmem:[%s14438_s1 + $0xb48] sm:$0xff]  ;;  %7717 = vmatprep.subr.bf16.mxu0 %v7716_v54  ;;  %v3334_v13 = vmax.f32 %v2438_v0, 0.0  ;;  %v703_v17 = vld [vmem:[%s14437_s0 + $0xce0] sm:$0xff]  ;;  %v2459_v22 = vadd.f32 %v1563_v15, %v667_v11 }
 0x1f5   : > { %v3272_v6 = vmax.f32 %v2376_v57, 0.0  ;;  %v8335_v7 = vld [vmem:[%s9273_s11 + $0x248] sm:$0xff]  ;;  %v2437_v8 = vadd.f32 %v1541_v3, %v645_v60  ;;  %v2444_v9 = vadd.f32 %v1548_v4, %v652_v2  ;;  %v3341_v14 = vmax.f32 %v2445_v1, 0.0  ;;  %v710_v18 = vld [vmem:[%s14437_s0 + $0xd18] sm:$0xff]  ;;  %7719 = vmatpush1.bf16.msra.mxu0 %v7718_v5  ;;  %v1599_v23 = vld [vmem:[%s14438_s1 + $0xce0] sm:$0xff] }
 0x1f6   : > { %6044 = vmatprep.mubr.f32.mxu1 %v8335_v7  ;;  %v660_v10 = vld [vmem:[%s14437_s0 + $0xb88] sm:$0xff]  ;;  %7925 = vmatprep.subr.bf16.mxu1 %v7924_v62  ;;  %v1606_v24 = vld [vmem:[%s14438_s1 + $0xd18] sm:$0xff]  ;;  %v659_v25 = vld [vmem:[%s14437_s0 + $0xb80] sm:$0xff]  ;;  %v2495_v29 = vadd.f32 %v1599_v23, %v703_v17  ;;  %v3355_v36 = vmax.f32 %v2459_v22, 0.0 }
 0x1f7   : > { %v1556_v12 = vld [vmem:[%s14438_s1 + $0xb88] sm:$0xff]  ;;  %v7926_v19 = vpack.c.bf16 %v3272_v6, %v3265_v63  ;;  %5409 = vmatprep.mubr.f32.mxu0 %v8335_v7  ;;  %v3333_v20 = vmax.f32 %v2437_v8, 0.0  ;;  %v3340_v21 = vmax.f32 %v2444_v9, 0.0  ;;  %v7720_v26 = vpack.c.bf16 %v3341_v14, %v3334_v13  ;;  %v8336_v27 = vld [vmem:[%s9273_s11 + $0x240] sm:$0xff]  ;;  %v666_v31 = vld [vmem:[%s14437_s0 + $0xbb8] sm:$0xff] }
 0x1f8   : > { %v2452_v16 = vadd.f32 %v1556_v12, %v660_v10  ;;  %6045 = vmatmul.mubr.f32.gmra.mrb[50].mxu1 %v8336_v27  ;;  %v2502_v30 = vadd.f32 %v1606_v24, %v710_v18  ;;  %v1555_v32 = vld [vmem:[%s14438_s1 + $0xb80] sm:$0xff]  ;;  %v1562_v33 = vld [vmem:[%s14438_s1 + $0xbb8] sm:$0xff]  ;;  %v8337_v35 = vld [vmem:[%s9273_s11 + $0x288] sm:$0xff]  ;;  %5410 = vmatmul.mubr.f32.gmra.mrb[50].mxu0 %v8336_v27  ;;  %v3391_v42 = vmax.f32 %v2495_v29, 0.0 }
 0x1f9   : > { %7927 = vmatpush3.bf16.msra.mxu1 %v7926_v19  ;;  %v7722_v34 = vpack.c.bf16 %v3340_v21, %v3333_v20  ;;  %6049 = vmatprep.mubr.f32.mxu1 %v8337_v35  ;;  %v2451_v37 = vadd.f32 %v1555_v32, %v659_v25  ;;  %v2458_v38 = vadd.f32 %v1562_v33, %v666_v31  ;;  %v591_v39 = vld [vmem:[%s14437_s0 + $0x960] sm:$0xff]  ;;  %v598_v40 = vld [vmem:[%s14437_s0 + $0x998] sm:$0xff]  ;;  %v681_v47 = vld [vmem:[%s14437_s0 + $0xc30] sm:$0xff] }
 0x1fa   : > { %v3348_v28 = vmax.f32 %v2452_v16, 0.0  ;;  %v1487_v41 = vld [vmem:[%s14438_s1 + $0x960] sm:$0xff]  ;;  %7721 = vmatprep.subr.bf16.mxu0 %v7720_v26  ;;  %v3398_v43 = vmax.f32 %v2502_v30, 0.0  ;;  %v1494_v44 = vld [vmem:[%s14438_s1 + $0x998] sm:$0xff]  ;;  %5415 = vmatprep.mubr.f32.mxu0 %v8337_v35  ;;  %v1577_v53 = vld [vmem:[%s14438_s1 + $0xc30] sm:$0xff] }
 0x1fb   : > { %v2383_v45 = vadd.f32 %v1487_v41, %v591_v39  ;;  %v674_v46 = vld [vmem:[%s14437_s0 + $0xbf8] sm:$0xff]  ;;  %7723 = vmatpush1.bf16.msra.mxu0 %v7722_v34  ;;  %v3347_v49 = vmax.f32 %v2451_v37, 0.0  ;;  %v3354_v50 = vmax.f32 %v2458_v38, 0.0  ;;  %v2390_v51 = vadd.f32 %v1494_v44, %v598_v40  ;;  %v673_v54 = vld [vmem:[%s14437_s0 + $0xbf0] sm:$0xff]  ;;  %v8338_v55 = vld [vmem:[%s9273_s11 + $0x280] sm:$0xff] }
 0x1fc   : > { %v7724_v48 = vpack.c.bf16 %v3355_v36, %v3348_v28  ;;  %v1570_v52 = vld [vmem:[%s14438_s1 + $0xbf8] sm:$0xff]  ;;  %6050 = vmatmul.mubr.f32.gmra.mrb[52].mxu1 %v8338_v55  ;;  %v7928_v56 = vpack.c.bf16 %v3398_v43, %v3391_v42  ;;  %v2473_v59 = vadd.f32 %v1577_v53, %v681_v47  ;;  %v680_v60 = vld [vmem:[%s14437_s0 + $0xc28] sm:$0xff]  ;;  %v1569_v61 = vld [vmem:[%s14438_s1 + $0xbf0] sm:$0xff]  ;;  %5416 = vmatmul.mubr.f32.gmra.mrb[52].mxu0 %v8338_v55 }
 0x1fd   : > { %v3279_v57 = vmax.f32 %v2383_v45, 0.0  ;;  %v2466_v58 = vadd.f32 %v1570_v52, %v674_v46  ;;  %v1576_v62 = vld [vmem:[%s14438_s1 + $0xc28] sm:$0xff]  ;;  %v7726_v63 = vpack.c.bf16 %v3354_v50, %v3347_v49  ;;  %v3286_v0 = vmax.f32 %v2390_v51, 0.0  ;;  %v695_v5 = vld [vmem:[%s14437_s0 + $0xca0] sm:$0xff]  ;;  %v717_v11 = vld [vmem:[%s14437_s0 + $0xd50] sm:$0xff] }
 0x1fe   : > { %7725 = vmatprep.subr.bf16.mxu0 %v7724_v48  ;;  %v8339_v1 = vld [vmem:[%s9273_s11 + $0x2c8] sm:$0xff]  ;;  %v2465_v2 = vadd.f32 %v1569_v61, %v673_v54  ;;  %v2472_v3 = vadd.f32 %v1576_v62, %v680_v60  ;;  %7929 = vmatprep.subr.bf16.mxu1 %v7928_v56  ;;  %v3369_v8 = vmax.f32 %v2473_v59, 0.0  ;;  %v1591_v9 = vld [vmem:[%s14438_s1 + $0xca0] sm:$0xff]  ;;  %v1613_v17 = vld [vmem:[%s14438_s1 + $0xd50] sm:$0xff] }
 0x1ff   : > { %6054 = vmatprep.mubr.f32.mxu1 %v8339_v1  ;;  %v688_v4 = vld [vmem:[%s14437_s0 + $0xc68] sm:$0xff]  ;;  %v3362_v7 = vmax.f32 %v2466_v58, 0.0  ;;  %7727 = vmatpush1.bf16.msra.mxu0 %v7726_v63  ;;  %v7930_v13 = vpack.c.bf16 %v3286_v0, %v3279_v57  ;;  %v2487_v16 = vadd.f32 %v1591_v9, %v695_v5  ;;  %v687_v19 = vld [vmem:[%s14437_s0 + $0xc60] sm:$0xff]  ;;  %v2509_v23 = vadd.f32 %v1613_v17, %v717_v11  ;;  %v694_v25 = vld [vmem:[%s14437_s0 + $0xc98] sm:$0xff] }
 0x200   : > { %v1584_v6 = vld [vmem:[%s14438_s1 + $0xc68] sm:$0xff]  ;;  %5421 = vmatprep.mubr.f32.mxu0 %v8339_v1  ;;  %v3361_v14 = vmax.f32 %v2465_v2, 0.0  ;;  %v3368_v15 = vmax.f32 %v2472_v3, 0.0  ;;  %v8340_v21 = vld [vmem:[%s9273_s11 + $0x2c0] sm:$0xff]  ;;  %v1590_v27 = vld [vmem:[%s14438_s1 + $0xc98] sm:$0xff] }
 0x201   : > { %v2480_v10 = vadd.f32 %v1584_v6, %v688_v4  ;;  %v724_v12 = vld [vmem:[%s14437_s0 + $0xd88] sm:$0xff]  ;;  %v7728_v20 = vpack.c.bf16 %v3369_v8, %v3362_v7  ;;  %6055 = vmatmul.mubr.f32.gmra.mrb[54].mxu1 %v8340_v21  ;;  %v1583_v26 = vld [vmem:[%s14438_s1 + $0xc60] sm:$0xff]  ;;  %v3383_v30 = vmax.f32 %v2487_v16, 0.0  ;;  %v2486_v32 = vadd.f32 %v1590_v27, %v694_v25  ;;  %v605_v33 = vld [vmem:[%s14437_s0 + $0x9d0] sm:$0xff]  ;;  %5422 = vmatmul.mubr.f32.gmra.mrb[54].mxu0 %v8340_v21 }
 0x202   : > { %v1620_v18 = vld [vmem:[%s14438_s1 + $0xd88] sm:$0xff]  ;;  %7931 = vmatpush3.bf16.msra.mxu1 %v7930_v13  ;;  %v7730_v28 = vpack.c.bf16 %v3368_v15, %v3361_v14  ;;  %v2479_v31 = vadd.f32 %v1583_v26, %v687_v19  ;;  %v1501_v35 = vld [vmem:[%s14438_s1 + $0x9d0] sm:$0xff]  ;;  %v3405_v36 = vmax.f32 %v2509_v23, 0.0  ;;  %v702_v40 = vld [vmem:[%s14437_s0 + $0xcd8] sm:$0xff] }
 0x203   : > { %v3376_v22 = vmax.f32 %v2480_v10, 0.0  ;;  %v2516_v24 = vadd.f32 %v1620_v18, %v724_v12  ;;  %v8341_v29 = vld [vmem:[%s9273_s11 + $0x308] sm:$0xff]  ;;  %7729 = vmatprep.subr.bf16.mxu0 %v7728_v20  ;;  %v2397_v39 = vadd.f32 %v1501_v35, %v605_v33  ;;  %v709_v41 = vld [vmem:[%s14437_s0 + $0xd10] sm:$0xff]  ;;  %v3382_v44 = vmax.f32 %v2486_v32, 0.0  ;;  %v1598_v46 = vld [vmem:[%s14438_s1 + $0xcd8] sm:$0xff] }
 0x204   : > { %6059 = vmatprep.mubr.f32.mxu1 %v8341_v29  ;;  %v612_v34 = vld [vmem:[%s14437_s0 + $0xa08] sm:$0xff]  ;;  %7731 = vmatpush1.bf16.msra.mxu0 %v7730_v28  ;;  %v3375_v43 = vmax.f32 %v2479_v31, 0.0  ;;  %v1605_v47 = vld [vmem:[%s14438_s1 + $0xd10] sm:$0xff]  ;;  %v8342_v49 = vld [vmem:[%s9273_s11 + $0x300] sm:$0xff]  ;;  %v2494_v52 = vadd.f32 %v1598_v46, %v702_v40 }
 0x205   : > { %v3412_v37 = vmax.f32 %v2516_v24, 0.0  ;;  %v1508_v38 = vld [vmem:[%s14438_s1 + $0xa08] sm:$0xff]  ;;  %5427 = vmatprep.mubr.f32.mxu0 %v8341_v29  ;;  %v7732_v42 = vpack.c.bf16 %v3383_v30, %v3376_v22  ;;  %v701_v48 = vld [vmem:[%s14437_s0 + $0xcd0] sm:$0xff]  ;;  %6060 = vmatmul.mubr.f32.gmra.mrb[56].mxu1 %v8342_v49  ;;  %v3293_v51 = vmax.f32 %v2397_v39, 0.0  ;;  %v2501_v53 = vadd.f32 %v1605_v47, %v709_v41  ;;  %v723_v63 = vld [vmem:[%s14437_s0 + $0xd80] sm:$0xff] }
 0x206   : > { %v2404_v45 = vadd.f32 %v1508_v38, %v612_v34  ;;  %v708_v54 = vld [vmem:[%s14437_s0 + $0xd08] sm:$0xff]  ;;  %v1597_v55 = vld [vmem:[%s14438_s1 + $0xcd0] sm:$0xff]  ;;  %v7734_v57 = vpack.c.bf16 %v3382_v44, %v3375_v43  ;;  %5428 = vmatmul.mubr.f32.gmra.mrb[56].mxu0 %v8342_v49  ;;  %v3390_v1 = vmax.f32 %v2494_v52, 0.0  ;;  %v1619_v3 = vld [vmem:[%s14438_s1 + $0xd80] sm:$0xff] }
 0x207   : > { %v7932_v50 = vpack.c.bf16 %v3412_v37, %v3405_v36  ;;  %v1604_v56 = vld [vmem:[%s14438_s1 + $0xd08] sm:$0xff]  ;;  %7733 = vmatprep.subr.bf16.mxu0 %v7732_v42  ;;  %v2493_v60 = vadd.f32 %v1597_v55, %v701_v48  ;;  %v3397_v2 = vmax.f32 %v2501_v53, 0.0  ;;  %v731_v5 = vld [vmem:[%s14437_s0 + $0xdc0] sm:$0xff]  ;;  %v738_v6 = vld [vmem:[%s14437_s0 + $0xdf8] sm:$0xff]  ;;  %v2515_v10 = vadd.f32 %v1619_v3, %v723_v63 }
 0x208   : > { %v3300_v58 = vmax.f32 %v2404_v45, 0.0  ;;  %v8343_v59 = vld [vmem:[%s9273_s11 + $0x348] sm:$0xff]  ;;  %v2500_v61 = vadd.f32 %v1604_v56, %v708_v54  ;;  %7735 = vmatpush1.bf16.msra.mxu0 %v7734_v57  ;;  %v1627_v11 = vld [vmem:[%s14438_s1 + $0xdc0] sm:$0xff]  ;;  %v1634_v12 = vld [vmem:[%s14438_s1 + $0xdf8] sm:$0xff] }
 0x209   : > { %6064 = vmatprep.mubr.f32.mxu1 %v8343_v59  ;;  %v716_v62 = vld [vmem:[%s14437_s0 + $0xd48] sm:$0xff]  ;;  %7933 = vmatprep.subr.bf16.mxu1 %v7932_v50  ;;  %v3389_v8 = vmax.f32 %v2493_v60, 0.0  ;;  %v715_v13 = vld [vmem:[%s14437_s0 + $0xd40] sm:$0xff]  ;;  %v7736_v14 = vpack.c.bf16 %v3397_v2, %v3390_v1  ;;  %v2523_v17 = vadd.f32 %v1627_v11, %v731_v5  ;;  %v2530_v18 = vadd.f32 %v1634_v12, %v738_v6  ;;  %v722_v19 = vld [vmem:[%s14437_s0 + $0xd78] sm:$0xff] }
 0x20a   : > { %v1612_v0 = vld [vmem:[%s14438_s1 + $0xd48] sm:$0xff]  ;;  %v7934_v7 = vpack.c.bf16 %v3300_v58, %v3293_v51  ;;  %5433 = vmatprep.mubr.f32.mxu0 %v8343_v59  ;;  %v3396_v9 = vmax.f32 %v2500_v61, 0.0  ;;  %v8344_v15 = vld [vmem:[%s9273_s11 + $0x340] sm:$0xff]  ;;  %v1618_v21 = vld [vmem:[%s14438_s1 + $0xd78] sm:$0xff]  ;;  %v3411_v24 = vmax.f32 %v2515_v10, 0.0 }
 0x20b   : > { %v2508_v4 = vadd.f32 %v1612_v0, %v716_v62  ;;  %6065 = vmatmul.mubr.f32.gmra.mrb[58].mxu1 %v8344_v15  ;;  %v1611_v20 = vld [vmem:[%s14438_s1 + $0xd40] sm:$0xff]  ;;  %v8345_v23 = vld [vmem:[%s9273_s11 + $0x388] sm:$0xff]  ;;  %v2514_v26 = vadd.f32 %v1618_v21, %v722_v19  ;;  %v626_v28 = vld [vmem:[%s14437_s0 + $0xa78] sm:$0xff]  ;;  %5434 = vmatmul.mubr.f32.gmra.mrb[58].mxu0 %v8344_v15  ;;  %v3419_v30 = vmax.f32 %v2523_v17, 0.0  ;;  %v3426_v31 = vmax.f32 %v2530_v18, 0.0 }
 0x20c   : > { %7935 = vmatpush3.bf16.msra.mxu1 %v7934_v7  ;;  %v7738_v22 = vpack.c.bf16 %v3396_v9, %v3389_v8  ;;  %6069 = vmatprep.mubr.f32.mxu1 %v8345_v23  ;;  %v2507_v25 = vadd.f32 %v1611_v20, %v715_v13  ;;  %v619_v27 = vld [vmem:[%s14437_s0 + $0xa40] sm:$0xff]  ;;  %v1522_v32 = vld [vmem:[%s14438_s1 + $0xa78] sm:$0xff]  ;;  %v737_v35 = vld [vmem:[%s14437_s0 + $0xdf0] sm:$0xff] }
 0x20d   : > { %v3404_v16 = vmax.f32 %v2508_v4, 0.0  ;;  %v1515_v29 = vld [vmem:[%s14438_s1 + $0xa40] sm:$0xff]  ;;  %7737 = vmatprep.subr.bf16.mxu0 %v7736_v14  ;;  %v730_v34 = vld [vmem:[%s14437_s0 + $0xdb8] sm:$0xff]  ;;  %5439 = vmatprep.mubr.f32.mxu0 %v8345_v23  ;;  %v3410_v38 = vmax.f32 %v2514_v26, 0.0  ;;  %v2418_v39 = vadd.f32 %v1522_v32, %v626_v28  ;;  %v1633_v41 = vld [vmem:[%s14438_s1 + $0xdf0] sm:$0xff]  ;;  %v7936_v44 = vpack.c.bf16 %v3426_v31, %v3419_v30 }
 0x20e   : > { %v2411_v33 = vadd.f32 %v1515_v29, %v619_v27  ;;  %7739 = vmatpush1.bf16.msra.mxu0 %v7738_v22  ;;  %v3403_v37 = vmax.f32 %v2507_v25, 0.0  ;;  %v1626_v40 = vld [vmem:[%s14438_s1 + $0xdb8] sm:$0xff]  ;;  %v729_v42 = vld [vmem:[%s14437_s0 + $0xdb0] sm:$0xff]  ;;  %v8346_v43 = vld [vmem:[%s9273_s11 + $0x380] sm:$0xff]  ;;  %v2529_v47 = vadd.f32 %v1633_v41, %v737_v35 }
 0x20f   : > { %v7740_v36 = vpack.c.bf16 %v3411_v24, %v3404_v16  ;;  %6070 = vmatmul.mubr.f32.gmra.mrb[60].mxu1 %v8346_v43  ;;  %v2522_v46 = vadd.f32 %v1626_v40, %v730_v34  ;;  %v736_v48 = vld [vmem:[%s14437_s0 + $0xde8] sm:$0xff]  ;;  %v1625_v49 = vld [vmem:[%s14438_s1 + $0xdb0] sm:$0xff]  ;;  %v3314_v52 = vmax.f32 %v2418_v39, 0.0  ;;  %v751_v57 = vld [vmem:[%s14437_s0 + $0xe60] sm:$0xff]  ;;  %5440 = vmatmul.mubr.f32.gmra.mrb[60].mxu0 %v8346_v43 }
 0x210   : > { %v3307_v45 = vmax.f32 %v2411_v33, 0.0  ;;  %v1632_v50 = vld [vmem:[%s14438_s1 + $0xde8] sm:$0xff]  ;;  %v7742_v51 = vpack.c.bf16 %v3410_v38, %v3403_v37  ;;  %v2521_v54 = vadd.f32 %v1625_v49, %v729_v42  ;;  %7937 = vmatprep.subr.bf16.mxu1 %v7936_v44  ;;  %v3425_v60 = vmax.f32 %v2529_v47, 0.0  ;;  %v1647_v61 = vld [vmem:[%s14438_s1 + $0xe60] sm:$0xff]  ;;  %v857_v63 = vld [vmem:[%s14437_s0 + $0x11b0] sm:$0xff] }
 0x211   : > { %7741 = vmatprep.subr.bf16.mxu0 %v7740_v36  ;;  %v8347_v53 = vld [vmem:[%s9273_s11 + $0x3c8] sm:$0xff]  ;;  %v2528_v55 = vadd.f32 %v1632_v50, %v736_v48  ;;  %v3418_v59 = vmax.f32 %v2522_v46, 0.0  ;;  %v2543_v4 = vadd.f32 %v1647_v61, %v751_v57  ;;  %v1753_v5 = vld [vmem:[%s14438_s1 + $0x11b0] sm:$0xff]  ;;  %v743_v7 = vld [vmem:[%s14437_s0 + $0xe20] sm:$0xff] }
 0x212   : > { %6074 = vmatprep.mubr.f32.mxu1 %v8347_v53  ;;  %v744_v56 = vld [vmem:[%s14437_s0 + $0xe28] sm:$0xff]  ;;  %7743 = vmatpush1.bf16.msra.mxu0 %v7742_v51  ;;  %v7938_v1 = vpack.c.bf16 %v3314_v52, %v3307_v45  ;;  %v3417_v2 = vmax.f32 %v2521_v54, 0.0  ;;  %v8348_v9 = vld [vmem:[%s9273_s11 + $0x3c0] sm:$0xff]  ;;  %v2649_v11 = vadd.f32 %v1753_v5, %v857_v63  ;;  %v750_v13 = vld [vmem:[%s14437_s0 + $0xe58] sm:$0xff] }
 0x213   : > { %v1640_v58 = vld [vmem:[%s14438_s1 + $0xe28] sm:$0xff]  ;;  %5445 = vmatprep.mubr.f32.mxu0 %v8347_v53  ;;  %v3424_v3 = vmax.f32 %v2528_v55, 0.0  ;;  %v7744_v8 = vpack.c.bf16 %v3425_v60, %v3418_v59  ;;  %6075 = vmatmul.mubr.f32.gmra.mrb[62].mxu1 %v8348_v9  ;;  %v1639_v14 = vld [vmem:[%s14438_s1 + $0xe20] sm:$0xff]  ;;  %v1646_v15 = vld [vmem:[%s14438_s1 + $0xe58] sm:$0xff]  ;;  %v3439_v18 = vmax.f32 %v2543_v4, 0.0 }
 0x214   : > { %v2536_v62 = vadd.f32 %v1640_v58, %v744_v56  ;;  %v864_v0 = vld [vmem:[%s14437_s0 + $0x11e8] sm:$0xff]  ;;  %7939 = vmatpush3.bf16.msra.mxu1 %v7938_v1  ;;  %v8349_v17 = vld [vmem:[%s9273_s11 + $0x18] sm:$0xff]  ;;  %v2535_v19 = vadd.f32 %v1639_v14, %v743_v7  ;;  %v2542_v20 = vadd.f32 %v1646_v15, %v750_v13  ;;  %v745_v21 = vld [vmem:[%s14437_s0 + $0xe30] sm:$0xff]  ;;  %5446 = vmatmul.mubr.f32.gmra.mrb[62].mxu0 %v8348_v9  ;;  %v3545_v24 = vmax.f32 %v2649_v11, 0.0 }
 0x215   : > { %v1760_v6 = vld [vmem:[%s14438_s1 + $0x11e8] sm:$0xff]  ;;  %v7746_v16 = vpack.c.bf16 %v3424_v3, %v3417_v2  ;;  %6144 = vmatprep.mubr.f32.mxu1 %v8349_v17  ;;  %v1641_v23 = vld [vmem:[%s14438_s1 + $0xe30] sm:$0xff]  ;;  %7745 = vmatprep.subr.bf16.mxu0 %v7744_v8  ;;  %v758_v28 = vld [vmem:[%s14437_s0 + $0xe98] sm:$0xff] }
 0x216   : > { %v3432_v10 = vmax.f32 %v2536_v62, 0.0  ;;  %v2656_v12 = vadd.f32 %v1760_v6, %v864_v0  ;;  %v752_v22 = vld [vmem:[%s14437_s0 + $0xe68] sm:$0xff]  ;;  %v2537_v27 = vadd.f32 %v1641_v23, %v745_v21  ;;  %v765_v29 = vld [vmem:[%s14437_s0 + $0xed0] sm:$0xff]  ;;  %5516 = vmatprep.mubr.f32.mxu0 %v8349_v17  ;;  %v3431_v31 = vmax.f32 %v2535_v19, 0.0  ;;  %v1654_v34 = vld [vmem:[%s14438_s1 + $0xe98] sm:$0xff] }
 0x217   : > { %v1648_v26 = vld [vmem:[%s14438_s1 + $0xe68] sm:$0xff]  ;;  %7747 = vmatpush1.bf16.msra.mxu0 %v7746_v16  ;;  %v3438_v32 = vmax.f32 %v2542_v20, 0.0  ;;  %v1661_v35 = vld [vmem:[%s14438_s1 + $0xed0] sm:$0xff]  ;;  %v2550_v40 = vadd.f32 %v1654_v34, %v758_v28  ;;  %v8351_v47 = vld [vmem:[%s9273_s11 + $0x58] sm:$0xff] }
 0x218   : > { %v3552_v25 = vmax.f32 %v2656_v12, 0.0  ;;  %v7748_v30 = vpack.c.bf16 %v3439_v18, %v3432_v10  ;;  %v2544_v33 = vadd.f32 %v1648_v26, %v752_v22  ;;  %v757_v36 = vld [vmem:[%s14437_s0 + $0xe90] sm:$0xff]  ;;  %v3433_v39 = vmax.f32 %v2537_v27, 0.0  ;;  %v764_v42 = vld [vmem:[%s14437_s0 + $0xec8] sm:$0xff]  ;;  %v779_v51 = vld [vmem:[%s14437_s0 + $0xf40] sm:$0xff] }
 0x219   : > { %v8350_v37 = vld [vmem:[%s9273_s11 + $0x10] sm:$0xff]  ;;  %v2557_v41 = vadd.f32 %v1661_v35, %v765_v29  ;;  %v1660_v44 = vld [vmem:[%s14438_s1 + $0xec8] sm:$0xff]  ;;  %v7750_v45 = vpack.c.bf16 %v3438_v32, %v3431_v31  ;;  %v3446_v53 = vmax.f32 %v2550_v40, 0.0  ;;  %v1675_v55 = vld [vmem:[%s14438_s1 + $0xf40] sm:$0xff] }
 0x21a   : > { %6145 = vmatmul.mubr.f32.vlgmr.msra.gmra.mrb[64].mxu1 %v8350_v37  ;;  %v7940_v38 = vpack.c.bf16 %v3552_v25, %v3545_v24  ;;  %v1653_v43 = vld [vmem:[%s14438_s1 + $0xe90] sm:$0xff]  ;;  %7749 = vmatprep.subr.bf16.mxu0 %v7748_v30  ;;  %v3440_v46 = vmax.f32 %v2544_v33, 0.0  ;;  %v2556_v49 = vadd.f32 %v1660_v44, %v764_v42  ;;  %v772_v50 = vld [vmem:[%s14437_s0 + $0xf08] sm:$0xff]  ;;  %v871_v57 = vld [vmem:[%s14437_s0 + $0x1220] sm:$0xff]  ;;  %v2571_v62 = vadd.f32 %v1675_v55, %v779_v51 }
 0x21b   : > { %6149 = vmatprep.mubr.f32.mxu1 %v8351_v47  ;;  %v2549_v48 = vadd.f32 %v1653_v43, %v757_v36  ;;  %v1668_v52 = vld [vmem:[%s14438_s1 + $0xf08] sm:$0xff]  ;;  %5517 = vmatmul.mubr.f32.vlgmr.msra.gmra.mrb[32].mxu0 %v8350_v37  ;;  %v3453_v54 = vmax.f32 %v2557_v41, 0.0  ;;  %v878_v58 = vld [vmem:[%s14437_s0 + $0x1258] sm:$0xff]  ;;  %v1767_v63 = vld [vmem:[%s14438_s1 + $0x1220] sm:$0xff] }
 0x21c   : > { %7941 = vmatprep.subr.bf16.mxu1 %v7940_v38  ;;  %v2564_v56 = vadd.f32 %v1668_v52, %v772_v50  ;;  %7751 = vmatpush1.bf16.msra.mxu0 %v7750_v45  ;;  %v7942_v59 = vpack.c.bf16 %v3440_v46, %v3433_v39  ;;  %v3452_v61 = vmax.f32 %v2556_v49, 0.0  ;;  %v1774_v0 = vld [vmem:[%s14438_s1 + $0x1258] sm:$0xff]  ;;  %v771_v1 = vld [vmem:[%s14437_s0 + $0xf00] sm:$0xff]  ;;  %v8352_v3 = vld [vmem:[%s9273_s11 + $0x50] sm:$0xff]  ;;  %v2663_v5 = vadd.f32 %v1767_v63, %v871_v57 }
 0x21d   : > { %5522 = vmatprep.mubr.f32.mxu0 %v8351_v47  ;;  %v3445_v60 = vmax.f32 %v2549_v48, 0.0  ;;  %v7752_v2 = vpack.c.bf16 %v3453_v54, %v3446_v53  ;;  %v2670_v6 = vadd.f32 %v1774_v0, %v878_v58  ;;  %v778_v7 = vld [vmem:[%s14437_s0 + $0xf38] sm:$0xff]  ;;  %v1667_v8 = vld [vmem:[%s14438_s1 + $0xf00] sm:$0xff]  ;;  %v3467_v12 = vmax.f32 %v2571_v62, 0.0  ;;  %v793_v23 = vld [vmem:[%s14437_s0 + $0xfb0] sm:$0xff] }
 0x21e   : > { %6150 = vmatmul.mubr.f32.gmra.mrb[66].mxu1 %v8352_v3  ;;  %v3460_v4 = vmax.f32 %v2564_v56, 0.0  ;;  %v1674_v9 = vld [vmem:[%s14438_s1 + $0xf38] sm:$0xff]  ;;  %v2563_v13 = vadd.f32 %v1667_v8, %v771_v1  ;;  %v759_v15 = vld [vmem:[%s14437_s0 + $0xea0] sm:$0xff]  ;;  %v3559_v18 = vmax.f32 %v2663_v5, 0.0  ;;  %v1689_v29 = vld [vmem:[%s14438_s1 + $0xfb0] sm:$0xff] }
 0x21f   : > { %7943 = vmatpush3.bf16.msra.mxu1 %v7942_v59  ;;  %v7754_v10 = vpack.c.bf16 %v3452_v61, %v3445_v60  ;;  %v8353_v11 = vld [vmem:[%s9273_s11 + $0x98] sm:$0xff]  ;;  %v2570_v14 = vadd.f32 %v1674_v9, %v778_v7  ;;  %v1655_v17 = vld [vmem:[%s14438_s1 + $0xea0] sm:$0xff]  ;;  %5523 = vmatmul.mubr.f32.gmra.mrb[34].mxu0 %v8352_v3  ;;  %v3566_v19 = vmax.f32 %v2670_v6, 0.0  ;;  %v785_v30 = vld [vmem:[%s14437_s0 + $0xf70] sm:$0xff]  ;;  %v2585_v35 = vadd.f32 %v1689_v29, %v793_v23 }
 0x220   : > { %6154 = vmatprep.mubr.f32.mxu1 %v8353_v11  ;;  %v766_v16 = vld [vmem:[%s14437_s0 + $0xed8] sm:$0xff]  ;;  %7753 = vmatprep.subr.bf16.mxu0 %v7752_v2  ;;  %v2551_v21 = vadd.f32 %v1655_v17, %v759_v15  ;;  %v7756_v24 = vpack.c.bf16 %v3467_v12, %v3460_v4  ;;  %v3459_v25 = vmax.f32 %v2563_v13, 0.0  ;;  %v8354_v31 = vld [vmem:[%s9273_s11 + $0x90] sm:$0xff]  ;;  %v792_v36 = vld [vmem:[%s14437_s0 + $0xfa8] sm:$0xff] }
 0x221   : > { %v1662_v20 = vld [vmem:[%s14438_s1 + $0xed8] sm:$0xff]  ;;  %7755 = vmatpush1.bf16.msra.mxu0 %v7754_v10  ;;  %5528 = vmatprep.mubr.f32.mxu0 %v8353_v11  ;;  %v3466_v26 = vmax.f32 %v2570_v14, 0.0  ;;  %v7944_v32 = vpack.c.bf16 %v3566_v19, %v3559_v18  ;;  %v1681_v37 = vld [vmem:[%s14438_s1 + $0xf70] sm:$0xff]  ;;  %v1688_v38 = vld [vmem:[%s14438_s1 + $0xfa8] sm:$0xff]  ;;  %v3481_v48 = vmax.f32 %v2585_v35, 0.0 }
 0x222   : > { %v786_v22 = vld [vmem:[%s14437_s0 + $0xf78] sm:$0xff]  ;;  %v2558_v27 = vadd.f32 %v1662_v20, %v766_v16  ;;  %6155 = vmatmul.mubr.f32.gmra.mrb[68].mxu1 %v8354_v31  ;;  %v3447_v33 = vmax.f32 %v2551_v21, 0.0  ;;  %7757 = vmatprep.subr.bf16.mxu0 %v7756_v24  ;;  %v2577_v42 = vadd.f32 %v1681_v37, %v785_v30  ;;  %v2584_v43 = vadd.f32 %v1688_v38, %v792_v36  ;;  %v800_v44 = vld [vmem:[%s14437_s0 + $0xfe8] sm:$0xff]  ;;  %v807_v45 = vld [vmem:[%s14437_s0 + $0x1020] sm:$0xff] }
 0x223   : > { %v1682_v28 = vld [vmem:[%s14438_s1 + $0xf78] sm:$0xff]  ;;  %v7758_v39 = vpack.c.bf16 %v3466_v26, %v3459_v25  ;;  %v1696_v46 = vld [vmem:[%s14438_s1 + $0xfe8] sm:$0xff]  ;;  %5529 = vmatmul.mubr.f32.gmra.mrb[36].mxu0 %v8354_v31  ;;  %7945 = vmatprep.subr.bf16.mxu1 %v7944_v32  ;;  %v1703_v49 = vld [vmem:[%s14438_s1 + $0x1020] sm:$0xff] }
 0x224   : > { %v2578_v34 = vadd.f32 %v1682_v28, %v786_v22  ;;  %v3454_v40 = vmax.f32 %v2558_v27, 0.0  ;;  %v8355_v41 = vld [vmem:[%s9273_s11 + $0xd8] sm:$0xff]  ;;  %v2592_v50 = vadd.f32 %v1696_v46, %v800_v44  ;;  %v885_v51 = vld [vmem:[%s14437_s0 + $0x1290] sm:$0xff]  ;;  %v892_v52 = vld [vmem:[%s14437_s0 + $0x12c8] sm:$0xff]  ;;  %v3473_v54 = vmax.f32 %v2577_v42, 0.0 }
 0x225   : > { %6159 = vmatprep.mubr.f32.mxu1 %v8355_v41  ;;  %7759 = vmatpush1.bf16.msra.mxu0 %v7758_v39  ;;  %v3480_v55 = vmax.f32 %v2584_v43, 0.0  ;;  %v2599_v56 = vadd.f32 %v1703_v49, %v807_v45  ;;  %v1781_v57 = vld [vmem:[%s14438_s1 + $0x1290] sm:$0xff]  ;;  %v1788_v58 = vld [vmem:[%s14438_s1 + $0x12c8] sm:$0xff]  ;;  %v799_v59 = vld [vmem:[%s14437_s0 + $0xfe0] sm:$0xff] }
 0x226   : > { %v3474_v47 = vmax.f32 %v2578_v34, 0.0  ;;  %v7946_v53 = vpack.c.bf16 %v3454_v40, %v3447_v33  ;;  %5534 = vmatprep.mubr.f32.mxu0 %v8355_v41  ;;  %v8356_v61 = vld [vmem:[%s9273_s11 + $0xd0] sm:$0xff]  ;;  %v3488_v62 = vmax.f32 %v2592_v50, 0.0  ;;  %v2677_v63 = vadd.f32 %v1781_v57, %v885_v51  ;;  %v806_v1 = vld [vmem:[%s14437_s0 + $0x1018] sm:$0xff]  ;;  %v1695_v2 = vld [vmem:[%s14438_s1 + $0xfe0] sm:$0xff] }
 0x227   : > { %6160 = vmatmul.mubr.f32.gmra.mrb[70].mxu1 %v8356_v61  ;;  %v2684_v0 = vadd.f32 %v1788_v58, %v892_v52  ;;  %v1702_v3 = vld [vmem:[%s14438_s1 + $0x1018] sm:$0xff]  ;;  %v7762_v4 = vpack.c.bf16 %v3480_v55, %v3473_v54  ;;  %v3495_v6 = vmax.f32 %v2599_v56, 0.0  ;;  %v2591_v7 = vadd.f32 %v1695_v2, %v799_v59  ;;  %v773_v9 = vld [vmem:[%s14437_s0 + $0xf10] sm:$0xff]  ;;  %v780_v10 = vld [vmem:[%s14437_s0 + $0xf48] sm:$0xff]  ;;  %5535 = vmatmul.mubr.f32.gmra.mrb[38].mxu0 %v8356_v61 }
 0x228   : > { %v7760_v60 = vpack.c.bf16 %v3481_v48, %v3474_v47  ;;  %7947 = vmatpush3.bf16.msra.mxu1 %v7946_v53  ;;  %v8357_v5 = vld [vmem:[%s9273_s11 + $0x118] sm:$0xff]  ;;  %v2598_v8 = vadd.f32 %v1702_v3, %v806_v1  ;;  %v1669_v11 = vld [vmem:[%s14438_s1 + $0xf10] sm:$0xff]  ;;  %v3573_v12 = vmax.f32 %v2677_v63, 0.0  ;;  %v1676_v14 = vld [vmem:[%s14438_s1 + $0xf48] sm:$0xff] }
 0x229   : > { %6164 = vmatprep.mubr.f32.mxu1 %v8357_v5  ;;  %v3580_v13 = vmax.f32 %v2684_v0, 0.0  ;;  %v2565_v15 = vadd.f32 %v1669_v11, %v773_v9  ;;  %v814_v16 = vld [vmem:[%s14437_s0 + $0x1058] sm:$0xff]  ;;  %v821_v17 = vld [vmem:[%s14437_s0 + $0x1090] sm:$0xff]  ;;  %5540 = vmatprep.mubr.f32.mxu0 %v8357_v5  ;;  %v7764_v18 = vpack.c.bf16 %v3495_v6, %v3488_v62  ;;  %v3487_v19 = vmax.f32 %v2591_v7, 0.0  ;;  %v820_v30 = vld [vmem:[%s14437_s0 + $0x1088] sm:$0xff] }
 0x22a   : > { %7761 = vmatprep.subr.bf16.mxu0 %v7760_v60  ;;  %v3494_v20 = vmax.f32 %v2598_v8, 0.0  ;;  %v2572_v21 = vadd.f32 %v1676_v14, %v780_v10  ;;  %v1710_v22 = vld [vmem:[%s14438_s1 + $0x1058] sm:$0xff]  ;;  %v1717_v23 = vld [vmem:[%s14438_s1 + $0x1090] sm:$0xff]  ;;  %v1716_v32 = vld [vmem:[%s14438_s1 + $0x1088] sm:$0xff] }
 0x22b   : > { %7763 = vmatpush1.bf16.msra.mxu0 %v7762_v4  ;;  %v813_v24 = vld [vmem:[%s14437_s0 + $0x1050] sm:$0xff]  ;;  %v7948_v26 = vpack.c.bf16 %v3580_v13, %v3573_v12  ;;  %v3461_v27 = vmax.f32 %v2565_v15, 0.0  ;;  %v2606_v28 = vadd.f32 %v1710_v22, %v814_v16  ;;  %v2613_v29 = vadd.f32 %v1717_v23, %v821_v17  ;;  %v8359_v35 = vld [vmem:[%s9273_s11 + $0x158] sm:$0xff]  ;;  %v828_v38 = vld [vmem:[%s14437_s0 + $0x10c8] sm:$0xff] }
 0x22c   : > { %v8358_v25 = vld [vmem:[%s9273_s11 + $0x110] sm:$0xff]  ;;  %7765 = vmatprep.subr.bf16.mxu0 %v7764_v18  ;;  %v7766_v33 = vpack.c.bf16 %v3494_v20, %v3487_v19  ;;  %v3468_v34 = vmax.f32 %v2572_v21, 0.0  ;;  %v2612_v37 = vadd.f32 %v1716_v32, %v820_v30  ;;  %v835_v39 = vld [vmem:[%s14437_s0 + $0x1100] sm:$0xff]  ;;  %v1724_v40 = vld [vmem:[%s14438_s1 + $0x10c8] sm:$0xff] }
 0x22d   : > { %6165 = vmatmul.mubr.f32.gmra.mrb[72].mxu1 %v8358_v25  ;;  %v1709_v31 = vld [vmem:[%s14438_s1 + $0x1050] sm:$0xff]  ;;  %5541 = vmatmul.mubr.f32.gmra.mrb[40].mxu0 %v8358_v25  ;;  %v3502_v41 = vmax.f32 %v2606_v28, 0.0  ;;  %v3509_v42 = vmax.f32 %v2613_v29, 0.0  ;;  %v1731_v43 = vld [vmem:[%s14438_s1 + $0x1100] sm:$0xff]  ;;  %v2620_v44 = vadd.f32 %v1724_v40, %v828_v38  ;;  %v906_v46 = vld [vmem:[%s14437_s0 + $0x1338] sm:$0xff] }
 0x22e   : > { %6169 = vmatprep.mubr.f32.mxu1 %v8359_v35  ;;  %v2605_v36 = vadd.f32 %v1709_v31, %v813_v24  ;;  %7949 = vmatprep.subr.bf16.mxu1 %v7948_v26  ;;  %v899_v45 = vld [vmem:[%s14437_s0 + $0x1300] sm:$0xff]  ;;  %v7950_v47 = vpack.c.bf16 %v3468_v34, %v3461_v27  ;;  %v3508_v49 = vmax.f32 %v2612_v37, 0.0  ;;  %v2627_v50 = vadd.f32 %v1731_v43, %v835_v39  ;;  %v1802_v52 = vld [vmem:[%s14438_s1 + $0x1338] sm:$0xff]  ;;  %v8360_v55 = vld [vmem:[%s9273_s11 + $0x150] sm:$0xff] }
 0x22f   : > { %7767 = vmatpush1.bf16.msra.mxu0 %v7766_v33  ;;  %5546 = vmatprep.mubr.f32.mxu0 %v8359_v35  ;;  %v1795_v51 = vld [vmem:[%s14438_s1 + $0x1300] sm:$0xff]  ;;  %v7768_v54 = vpack.c.bf16 %v3509_v42, %v3502_v41  ;;  %v3516_v56 = vmax.f32 %v2620_v44, 0.0  ;;  %v2698_v58 = vadd.f32 %v1802_v52, %v906_v46  ;;  %v834_v59 = vld [vmem:[%s14437_s0 + $0x10f8] sm:$0xff]  ;;  %v849_v11 = vld [vmem:[%s14437_s0 + $0x1170] sm:$0xff] }
 0x230   : > { %v3501_v48 = vmax.f32 %v2605_v36, 0.0  ;;  %v827_v53 = vld [vmem:[%s14437_s0 + $0x10c0] sm:$0xff]  ;;  %v2691_v57 = vadd.f32 %v1795_v51, %v899_v45  ;;  %v1730_v61 = vld [vmem:[%s14438_s1 + $0x10f8] sm:$0xff]  ;;  %7951 = vmatpush3.bf16.msra.mxu1 %v7950_v47  ;;  %v3523_v0 = vmax.f32 %v2627_v50, 0.0  ;;  %v1745_v17 = vld [vmem:[%s14438_s1 + $0x1170] sm:$0xff] }
 0x231   : > { %6170 = vmatmul.mubr.f32.gmra.mrb[74].mxu1 %v8360_v55  ;;  %v1723_v60 = vld [vmem:[%s14438_s1 + $0x10c0] sm:$0xff]  ;;  %v8361_v63 = vld [vmem:[%s9273_s11 + $0x198] sm:$0xff]  ;;  %v2626_v2 = vadd.f32 %v1730_v61, %v834_v59  ;;  %5547 = vmatmul.mubr.f32.gmra.mrb[42].mxu0 %v8360_v55  ;;  %v3594_v7 = vmax.f32 %v2698_v58, 0.0  ;;  %v841_v18 = vld [vmem:[%s14437_s0 + $0x1130] sm:$0xff]  ;;  %v2641_v23 = vadd.f32 %v1745_v17, %v849_v11 }
 0x232   : > { %v7770_v62 = vpack.c.bf16 %v3508_v49, %v3501_v48  ;;  %6174 = vmatprep.mubr.f32.mxu1 %v8361_v63  ;;  %v2619_v1 = vadd.f32 %v1723_v60, %v827_v53  ;;  %v787_v3 = vld [vmem:[%s14437_s0 + $0xf80] sm:$0xff]  ;;  %v794_v4 = vld [vmem:[%s14437_s0 + $0xfb8] sm:$0xff]  ;;  %7769 = vmatprep.subr.bf16.mxu0 %v7768_v54  ;;  %v3587_v6 = vmax.f32 %v2691_v57, 0.0  ;;  %v7772_v12 = vpack.c.bf16 %v3523_v0, %v3516_v56  ;;  %v8362_v19 = vld [vmem:[%s9273_s11 + $0x190] sm:$0xff] }
 0x233   : > { %v1683_v5 = vld [vmem:[%s14438_s1 + $0xf80] sm:$0xff]  ;;  %v1690_v8 = vld [vmem:[%s14438_s1 + $0xfb8] sm:$0xff]  ;;  %5552 = vmatprep.mubr.f32.mxu0 %v8361_v63  ;;  %v3522_v14 = vmax.f32 %v2626_v2, 0.0  ;;  %v848_v24 = vld [vmem:[%s14437_s0 + $0x1168] sm:$0xff]  ;;  %v3537_v36 = vmax.f32 %v2641_v23, 0.0 }
 0x234   : > { %v2579_v9 = vadd.f32 %v1683_v5, %v787_v3  ;;  %v842_v10 = vld [vmem:[%s14437_s0 + $0x1138] sm:$0xff]  ;;  %7771 = vmatpush1.bf16.msra.mxu0 %v7770_v62  ;;  %v3515_v13 = vmax.f32 %v2619_v1, 0.0  ;;  %v2586_v15 = vadd.f32 %v1690_v8, %v794_v4  ;;  %v7952_v20 = vpack.c.bf16 %v3594_v7, %v3587_v6  ;;  %v1737_v25 = vld [vmem:[%s14438_s1 + $0x1130] sm:$0xff]  ;;  %v1744_v26 = vld [vmem:[%s14438_s1 + $0x1168] sm:$0xff] }
 0x235   : > { %v1738_v16 = vld [vmem:[%s14438_s1 + $0x1138] sm:$0xff]  ;;  %6175 = vmatmul.mubr.f32.gmra.mrb[76].mxu1 %v8362_v19  ;;  %7773 = vmatprep.subr.bf16.mxu0 %v7772_v12  ;;  %v2633_v30 = vadd.f32 %v1737_v25, %v841_v18  ;;  %v2640_v31 = vadd.f32 %v1744_v26, %v848_v24  ;;  %v856_v32 = vld [vmem:[%s14437_s0 + $0x11a8] sm:$0xff]  ;;  %v863_v33 = vld [vmem:[%s14437_s0 + $0x11e0] sm:$0xff] }
 0x236   : > { %v3475_v21 = vmax.f32 %v2579_v9, 0.0  ;;  %v2634_v22 = vadd.f32 %v1738_v16, %v842_v10  ;;  %v7774_v27 = vpack.c.bf16 %v3522_v14, %v3515_v13  ;;  %v3482_v28 = vmax.f32 %v2586_v15, 0.0  ;;  %v8363_v29 = vld [vmem:[%s9273_s11 + $0x1d8] sm:$0xff]  ;;  %v1752_v34 = vld [vmem:[%s14438_s1 + $0x11a8] sm:$0xff]  ;;  %5553 = vmatmul.mubr.f32.gmra.mrb[44].mxu0 %v8362_v19  ;;  %7953 = vmatprep.subr.bf16.mxu1 %v7952_v20  ;;  %v1759_v37 = vld [vmem:[%s14438_s1 + $0x11e0] sm:$0xff] }
 0x237   : > { %6179 = vmatprep.mubr.f32.mxu1 %v8363_v29  ;;  %v2648_v38 = vadd.f32 %v1752_v34, %v856_v32  ;;  %v913_v39 = vld [vmem:[%s14437_s0 + $0x1370] sm:$0xff]  ;;  %v920_v40 = vld [vmem:[%s14437_s0 + $0x13a8] sm:$0xff]  ;;  %5558 = vmatprep.mubr.f32.mxu0 %v8363_v29  ;;  %v3529_v42 = vmax.f32 %v2633_v30, 0.0  ;;  %v3536_v43 = vmax.f32 %v2640_v31, 0.0  ;;  %v2655_v44 = vadd.f32 %v1759_v37, %v863_v33  ;;  %v855_v47 = vld [vmem:[%s14437_s0 + $0x11a0] sm:$0xff] }
 0x238   : > { %v3530_v35 = vmax.f32 %v2634_v22, 0.0  ;;  %7775 = vmatpush1.bf16.msra.mxu0 %v7774_v27  ;;  %v7954_v41 = vpack.c.bf16 %v3482_v28, %v3475_v21  ;;  %v1809_v45 = vld [vmem:[%s14438_s1 + $0x1370] sm:$0xff]  ;;  %v1816_v46 = vld [vmem:[%s14438_s1 + $0x13a8] sm:$0xff]  ;;  %v862_v53 = vld [vmem:[%s14437_s0 + $0x11d8] sm:$0xff] }
 0x239   : > { %v8364_v49 = vld [vmem:[%s9273_s11 + $0x1d0] sm:$0xff]  ;;  %v3544_v50 = vmax.f32 %v2648_v38, 0.0  ;;  %v2705_v51 = vadd.f32 %v1809_v45, %v913_v39  ;;  %v2712_v52 = vadd.f32 %v1816_v46, %v920_v40  ;;  %v1751_v54 = vld [vmem:[%s14438_s1 + $0x11a0] sm:$0xff]  ;;  %v1758_v55 = vld [vmem:[%s14438_s1 + $0x11d8] sm:$0xff]  ;;  %v7778_v56 = vpack.c.bf16 %v3536_v43, %v3529_v42 }
 0x23a   : > { %v7776_v48 = vpack.c.bf16 %v3537_v36, %v3530_v35  ;;  %6180 = vmatmul.mubr.f32.gmra.mrb[78].mxu1 %v8364_v49  ;;  %v8365_v57 = vld [vmem:[%s9273_s11 + $0x218] sm:$0xff]  ;;  %v3551_v58 = vmax.f32 %v2655_v44, 0.0  ;;  %v2647_v59 = vadd.f32 %v1751_v54, %v855_v47  ;;  %v2654_v60 = vadd.f32 %v1758_v55, %v862_v53  ;;  %v801_v61 = vld [vmem:[%s14437_s0 + $0xff0] sm:$0xff]  ;;  %v808_v62 = vld [vmem:[%s14437_s0 + $0x1028] sm:$0xff]  ;;  %5559 = vmatmul.mubr.f32.gmra.mrb[46].mxu0 %v8364_v49 }
 0x23b   : > { %7955 = vmatpush3.bf16.msra.mxu1 %v7954_v41  ;;  %6184 = vmatprep.mubr.f32.mxu1 %v8365_v57  ;;  %v1697_v63 = vld [vmem:[%s14438_s1 + $0xff0] sm:$0xff]  ;;  %v3601_v0 = vmax.f32 %v2705_v51, 0.0  ;;  %v3608_v1 = vmax.f32 %v2712_v52, 0.0  ;;  %v1704_v2 = vld [vmem:[%s14438_s1 + $0x1028] sm:$0xff]  ;;  %v870_v4 = vld [vmem:[%s14437_s0 + $0x1218] sm:$0xff] }
 0x23c   : > { %7777 = vmatprep.subr.bf16.mxu0 %v7776_v48  ;;  %v2593_v3 = vadd.f32 %v1697_v63, %v801_v61  ;;  %v877_v5 = vld [vmem:[%s14437_s0 + $0x1250] sm:$0xff]  ;;  %5564 = vmatprep.mubr.f32.mxu0 %v8365_v57  ;;  %v7780_v6 = vpack.c.bf16 %v3551_v58, %v3544_v50  ;;  %v3543_v7 = vmax.f32 %v2647_v59, 0.0  ;;  %v3550_v8 = vmax.f32 %v2654_v60, 0.0  ;;  %v1766_v10 = vld [vmem:[%s14438_s1 + $0x1218] sm:$0xff]  ;;  %v876_v18 = vld [vmem:[%s14437_s0 + $0x1248] sm:$0xff] }
 0x23d   : > { %7779 = vmatpush1.bf16.msra.mxu0 %v7778_v56  ;;  %v2600_v9 = vadd.f32 %v1704_v2, %v808_v62  ;;  %v1773_v11 = vld [vmem:[%s14438_s1 + $0x1250] sm:$0xff]  ;;  %v7956_v14 = vpack.c.bf16 %v3608_v1, %v3601_v0  ;;  %v2662_v16 = vadd.f32 %v1766_v10, %v870_v4  ;;  %v1772_v20 = vld [vmem:[%s14438_s1 + $0x1248] sm:$0xff]  ;;  %v8367_v23 = vld [vmem:[%s9273_s11 + $0x258] sm:$0xff] }
 0x23e   : > { %v869_v12 = vld [vmem:[%s14437_s0 + $0x1210] sm:$0xff]  ;;  %v3489_v15 = vmax.f32 %v2593_v3, 0.0  ;;  %v2669_v17 = vadd.f32 %v1773_v11, %v877_v5  ;;  %7781 = vmatprep.subr.bf16.mxu0 %v7780_v6  ;;  %v7782_v21 = vpack.c.bf16 %v3550_v8, %v3543_v7  ;;  %v2668_v25 = vadd.f32 %v1772_v20, %v876_v18  ;;  %v884_v26 = vld [vmem:[%s14437_s0 + $0x1288] sm:$0xff]  ;;  %v891_v27 = vld [vmem:[%s14437_s0 + $0x12c0] sm:$0xff] }
 0x23f   : > { %v8366_v13 = vld [vmem:[%s9273_s11 + $0x210] sm:$0xff]  ;;  %v3496_v22 = vmax.f32 %v2600_v9, 0.0  ;;  %v1780_v28 = vld [vmem:[%s14438_s1 + $0x1288] sm:$0xff]  ;;  %7957 = vmatprep.subr.bf16.mxu1 %v7956_v14  ;;  %v3558_v29 = vmax.f32 %v2662_v16, 0.0  ;;  %v1787_v31 = vld [vmem:[%s14438_s1 + $0x12c0] sm:$0xff] }
 0x240   : > { %6185 = vmatmul.mubr.f32.gmra.mrb[80].mxu1 %v8366_v13  ;;  %v1765_v19 = vld [vmem:[%s14438_s1 + $0x1210] sm:$0xff]  ;;  %5565 = vmatmul.mubr.f32.gmra.mrb[48].mxu0 %v8366_v13  ;;  %v3565_v30 = vmax.f32 %v2669_v17, 0.0  ;;  %v2676_v32 = vadd.f32 %v1780_v28, %v884_v26  ;;  %v927_v33 = vld [vmem:[%s14437_s0 + $0x13e0] sm:$0xff]  ;;  %v934_v34 = vld [vmem:[%s14437_s0 + $0x1418] sm:$0xff]  ;;  %v3564_v37 = vmax.f32 %v2668_v25, 0.0  ;;  %v2683_v38 = vadd.f32 %v1787_v31, %v891_v27 }
 0x241   : > { %6189 = vmatprep.mubr.f32.mxu1 %v8367_v23  ;;  %v2661_v24 = vadd.f32 %v1765_v19, %v869_v12  ;;  %7783 = vmatpush1.bf16.msra.mxu0 %v7782_v21  ;;  %v7958_v35 = vpack.c.bf16 %v3496_v22, %v3489_v15  ;;  %v1823_v39 = vld [vmem:[%s14438_s1 + $0x13e0] sm:$0xff]  ;;  %v1830_v40 = vld [vmem:[%s14438_s1 + $0x1418] sm:$0xff]  ;;  %v8368_v43 = vld [vmem:[%s9273_s11 + $0x250] sm:$0xff] }
 0x242   : > { %5570 = vmatprep.mubr.f32.mxu0 %v8367_v23  ;;  %v883_v41 = vld [vmem:[%s14437_s0 + $0x1280] sm:$0xff]  ;;  %v7784_v42 = vpack.c.bf16 %v3565_v30, %v3558_v29  ;;  %v3572_v44 = vmax.f32 %v2676_v32, 0.0  ;;  %v2719_v45 = vadd.f32 %v1823_v39, %v927_v33  ;;  %v2726_v46 = vadd.f32 %v1830_v40, %v934_v34  ;;  %v890_v47 = vld [vmem:[%s14437_s0 + $0x12b8] sm:$0xff]  ;;  %v905_v63 = vld [vmem:[%s14437_s0 + $0x1330] sm:$0xff] }
 0x243   : > { %v3557_v36 = vmax.f32 %v2661_v24, 0.0  ;;  %v1779_v48 = vld [vmem:[%s14438_s1 + $0x1280] sm:$0xff]  ;;  %v1786_v49 = vld [vmem:[%s14438_s1 + $0x12b8] sm:$0xff]  ;;  %7959 = vmatpush3.bf16.msra.mxu1 %v7958_v35  ;;  %v3579_v52 = vmax.f32 %v2683_v38, 0.0  ;;  %v1801_v5 = vld [vmem:[%s14438_s1 + $0x1330] sm:$0xff] }
 0x244   : > { %6190 = vmatmul.mubr.f32.gmra.mrb[82].mxu1 %v8368_v43  ;;  %v8369_v51 = vld [vmem:[%s9273_s11 + $0x298] sm:$0xff]  ;;  %v2675_v53 = vadd.f32 %v1779_v48, %v883_v41  ;;  %v2682_v54 = vadd.f32 %v1786_v49, %v890_v47  ;;  %v815_v55 = vld [vmem:[%s14437_s0 + $0x1060] sm:$0xff]  ;;  %5571 = vmatmul.mubr.f32.gmra.mrb[50].mxu0 %v8368_v43  ;;  %v3615_v58 = vmax.f32 %v2719_v45, 0.0  ;;  %v3622_v59 = vmax.f32 %v2726_v46, 0.0  ;;  %v897_v6 = vld [vmem:[%s14437_s0 + $0x12f0] sm:$0xff] }
 0x245   : > { %v7786_v50 = vpack.c.bf16 %v3564_v37, %v3557_v36  ;;  %6194 = vmatprep.mubr.f32.mxu1 %v8369_v51  ;;  %v822_v56 = vld [vmem:[%s14437_s0 + $0x1098] sm:$0xff]  ;;  %v1711_v57 = vld [vmem:[%s14438_s1 + $0x1060] sm:$0xff]  ;;  %7785 = vmatprep.subr.bf16.mxu0 %v7784_v42  ;;  %v7788_v0 = vpack.c.bf16 %v3579_v52, %v3572_v44  ;;  %v8370_v7 = vld [vmem:[%s9273_s11 + $0x290] sm:$0xff]  ;;  %v2697_v11 = vadd.f32 %v1801_v5, %v905_v63 }
 0x246   : > { %v1718_v60 = vld [vmem:[%s14438_s1 + $0x1098] sm:$0xff]  ;;  %v2607_v61 = vadd.f32 %v1711_v57, %v815_v55  ;;  %5576 = vmatprep.mubr.f32.mxu0 %v8369_v51  ;;  %v3571_v1 = vmax.f32 %v2675_v53, 0.0  ;;  %v3578_v2 = vmax.f32 %v2682_v54, 0.0  ;;  %v7960_v8 = vpack.c.bf16 %v3622_v59, %v3615_v58  ;;  %v904_v12 = vld [vmem:[%s14437_s0 + $0x1328] sm:$0xff]  ;;  %v1793_v13 = vld [vmem:[%s14438_s1 + $0x12f0] sm:$0xff] }
 0x247   : > { %v898_v62 = vld [vmem:[%s14437_s0 + $0x12f8] sm:$0xff]  ;;  %7787 = vmatpush1.bf16.msra.mxu0 %v7786_v50  ;;  %v2614_v3 = vadd.f32 %v1718_v60, %v822_v56  ;;  %v1800_v14 = vld [vmem:[%s14438_s1 + $0x1328] sm:$0xff]  ;;  %v2689_v18 = vadd.f32 %v1793_v13, %v897_v6  ;;  %v919_v21 = vld [vmem:[%s14437_s0 + $0x13a0] sm:$0xff]  ;;  %v3593_v24 = vmax.f32 %v2697_v11, 0.0 }
 0x248   : > { %v1794_v4 = vld [vmem:[%s14438_s1 + $0x12f8] sm:$0xff]  ;;  %6195 = vmatmul.mubr.f32.gmra.mrb[84].mxu1 %v8370_v7  ;;  %v3503_v9 = vmax.f32 %v2607_v61, 0.0  ;;  %7789 = vmatprep.subr.bf16.mxu0 %v7788_v0  ;;  %v7790_v15 = vpack.c.bf16 %v3578_v2, %v3571_v1  ;;  %v2696_v19 = vadd.f32 %v1800_v14, %v904_v12  ;;  %v912_v20 = vld [vmem:[%s14437_s0 + $0x1368] sm:$0xff]  ;;  %v1815_v25 = vld [vmem:[%s14438_s1 + $0x13a0] sm:$0xff] }
 0x249   : > { %v2690_v10 = vadd.f32 %v1794_v4, %v898_v62  ;;  %v3510_v16 = vmax.f32 %v2614_v3, 0.0  ;;  %v8371_v17 = vld [vmem:[%s9273_s11 + $0x2d8] sm:$0xff]  ;;  %v1808_v22 = vld [vmem:[%s14438_s1 + $0x1368] sm:$0xff]  ;;  %5577 = vmatmul.mubr.f32.gmra.mrb[52].mxu0 %v8370_v7  ;;  %7961 = vmatprep.subr.bf16.mxu1 %v7960_v8  ;;  %v941_v27 = vld [vmem:[%s14437_s0 + $0x1450] sm:$0xff]  ;;  %v3585_v30 = vmax.f32 %v2689_v18, 0.0  ;;  %v2711_v32 = vadd.f32 %v1815_v25, %v919_v21 }
 0x24a   : > { %6199 = vmatprep.mubr.f32.mxu1 %v8371_v17  ;;  %v2704_v26 = vadd.f32 %v1808_v22, %v912_v20  ;;  %v948_v28 = vld [vmem:[%s14437_s0 + $0x1488] sm:$0xff]  ;;  %5582 = vmatprep.mubr.f32.mxu0 %v8371_v17  ;;  %v3592_v31 = vmax.f32 %v2696_v19, 0.0  ;;  %v1837_v33 = vld [vmem:[%s14438_s1 + $0x1450] sm:$0xff]  ;;  %v911_v35 = vld [vmem:[%s14437_s0 + $0x1360] sm:$0xff] }
 0x24b   : > { %v3586_v23 = vmax.f32 %v2690_v10, 0.0  ;;  %7791 = vmatpush1.bf16.msra.mxu0 %v7790_v15  ;;  %v7962_v29 = vpack.c.bf16 %v3510_v16, %v3503_v9  ;;  %v1844_v34 = vld [vmem:[%s14438_s1 + $0x1488] sm:$0xff]  ;;  %v8372_v37 = vld [vmem:[%s9273_s11 + $0x2d0] sm:$0xff]  ;;  %v2733_v39 = vadd.f32 %v1837_v33, %v941_v27  ;;  %v918_v41 = vld [vmem:[%s14437_s0 + $0x1398] sm:$0xff]  ;;  %v3607_v46 = vmax.f32 %v2711_v32, 0.0 }
 0x24c   : > { %6200 = vmatmul.mubr.f32.gmra.mrb[86].mxu1 %v8372_v37  ;;  %v3600_v38 = vmax.f32 %v2704_v26, 0.0  ;;  %v2740_v40 = vadd.f32 %v1844_v34, %v948_v28  ;;  %v1807_v42 = vld [vmem:[%s14438_s1 + $0x1360] sm:$0xff]  ;;  %v1814_v43 = vld [vmem:[%s14438_s1 + $0x1398] sm:$0xff]  ;;  %v7794_v44 = vpack.c.bf16 %v3592_v31, %v3585_v30  ;;  %v829_v49 = vld [vmem:[%s14437_s0 + $0x10d0] sm:$0xff] }
 0x24d   : > { %v7792_v36 = vpack.c.bf16 %v3593_v24, %v3586_v23  ;;  %7963 = vmatpush3.bf16.msra.mxu1 %v7962_v29  ;;  %v8373_v45 = vld [vmem:[%s9273_s11 + $0x318] sm:$0xff]  ;;  %v2703_v47 = vadd.f32 %v1807_v42, %v911_v35  ;;  %v2710_v48 = vadd.f32 %v1814_v43, %v918_v41  ;;  %v836_v50 = vld [vmem:[%s14437_s0 + $0x1108] sm:$0xff]  ;;  %v1725_v51 = vld [vmem:[%s14438_s1 + $0x10d0] sm:$0xff]  ;;  %5583 = vmatmul.mubr.f32.gmra.mrb[54].mxu0 %v8372_v37  ;;  %v3629_v52 = vmax.f32 %v2733_v39, 0.0 }
 0x24e   : > { %6204 = vmatprep.mubr.f32.mxu1 %v8373_v45  ;;  %v3636_v53 = vmax.f32 %v2740_v40, 0.0  ;;  %v1732_v54 = vld [vmem:[%s14438_s1 + $0x1108] sm:$0xff]  ;;  %v2621_v55 = vadd.f32 %v1725_v51, %v829_v49  ;;  %v926_v56 = vld [vmem:[%s14437_s0 + $0x13d8] sm:$0xff]  ;;  %v933_v57 = vld [vmem:[%s14437_s0 + $0x1410] sm:$0xff]  ;;  %5588 = vmatprep.mubr.f32.mxu0 %v8373_v45  ;;  %v7796_v58 = vpack.c.bf16 %v3607_v46, %v3600_v38 }
 0x24f   : > { %7793 = vmatprep.subr.bf16.mxu0 %v7792_v36  ;;  %v3599_v59 = vmax.f32 %v2703_v47, 0.0  ;;  %v3606_v60 = vmax.f32 %v2710_v48, 0.0  ;;  %v2628_v61 = vadd.f32 %v1732_v54, %v836_v50  ;;  %v1822_v62 = vld [vmem:[%s14438_s1 + $0x13d8] sm:$0xff]  ;;  %v1829_v63 = vld [vmem:[%s14438_s1 + $0x1410] sm:$0xff]  ;;  %v932_v6 = vld [vmem:[%s14437_s0 + $0x1408] sm:$0xff] }
 0x250   : > { %7795 = vmatpush1.bf16.msra.mxu0 %v7794_v44  ;;  %v925_v0 = vld [vmem:[%s14437_s0 + $0x13d0] sm:$0xff]  ;;  %v7964_v2 = vpack.c.bf16 %v3636_v53, %v3629_v52  ;;  %v3517_v3 = vmax.f32 %v2621_v55, 0.0  ;;  %v2718_v4 = vadd.f32 %v1822_v62, %v926_v56  ;;  %v2725_v5 = vadd.f32 %v1829_v63, %v933_v57  ;;  %v1828_v8 = vld [vmem:[%s14438_s1 + $0x1408] sm:$0xff]  ;;  %v8375_v11 = vld [vmem:[%s9273_s11 + $0x358] sm:$0xff] }
 0x251   : > { %v8374_v1 = vld [vmem:[%s9273_s11 + $0x310] sm:$0xff]  ;;  %7797 = vmatprep.subr.bf16.mxu0 %v7796_v58  ;;  %v7798_v9 = vpack.c.bf16 %v3606_v60, %v3599_v59  ;;  %v3524_v10 = vmax.f32 %v2628_v61, 0.0  ;;  %v2724_v13 = vadd.f32 %v1828_v8, %v932_v6  ;;  %v940_v14 = vld [vmem:[%s14437_s0 + $0x1448] sm:$0xff]  ;;  %v947_v15 = vld [vmem:[%s14437_s0 + $0x1480] sm:$0xff] }
 0x252   : > { %6205 = vmatmul.mubr.f32.gmra.mrb[88].mxu1 %v8374_v1  ;;  %v1821_v7 = vld [vmem:[%s14438_s1 + $0x13d0] sm:$0xff]  ;;  %v1836_v16 = vld [vmem:[%s14438_s1 + $0x1448] sm:$0xff]  ;;  %5589 = vmatmul.mubr.f32.gmra.mrb[56].mxu0 %v8374_v1  ;;  %v3614_v17 = vmax.f32 %v2718_v4, 0.0  ;;  %v3621_v18 = vmax.f32 %v2725_v5, 0.0  ;;  %v1843_v19 = vld [vmem:[%s14438_s1 + $0x1480] sm:$0xff] }
 0x253   : > { %6209 = vmatprep.mubr.f32.mxu1 %v8375_v11  ;;  %v2717_v12 = vadd.f32 %v1821_v7, %v925_v0  ;;  %7965 = vmatprep.subr.bf16.mxu1 %v7964_v2  ;;  %v2732_v20 = vadd.f32 %v1836_v16, %v940_v14  ;;  %v955_v21 = vld [vmem:[%s14437_s0 + $0x14c0] sm:$0xff]  ;;  %v962_v22 = vld [vmem:[%s14437_s0 + $0x14f8] sm:$0xff]  ;;  %v7966_v23 = vpack.c.bf16 %v3524_v10, %v3517_v3  ;;  %v3620_v25 = vmax.f32 %v2724_v13, 0.0  ;;  %v8376_v31 = vld [vmem:[%s9273_s11 + $0x350] sm:$0xff] }
 0x254   : > { %7799 = vmatpush1.bf16.msra.mxu0 %v7798_v9  ;;  %5594 = vmatprep.mubr.f32.mxu0 %v8375_v11  ;;  %v2739_v26 = vadd.f32 %v1843_v19, %v947_v15  ;;  %v1851_v27 = vld [vmem:[%s14438_s1 + $0x14c0] sm:$0xff]  ;;  %v1858_v28 = vld [vmem:[%s14438_s1 + $0x14f8] sm:$0xff]  ;;  %v7800_v30 = vpack.c.bf16 %v3621_v18, %v3614_v17  ;;  %v961_v51 = vld [vmem:[%s14437_s0 + $0x14f0] sm:$0xff] }
 0x255   : > { %v3613_v24 = vmax.f32 %v2717_v12, 0.0  ;;  %v939_v29 = vld [vmem:[%s14437_s0 + $0x1440] sm:$0xff]  ;;  %v3628_v32 = vmax.f32 %v2732_v20, 0.0  ;;  %v2747_v33 = vadd.f32 %v1851_v27, %v955_v21  ;;  %v2754_v34 = vadd.f32 %v1858_v28, %v962_v22  ;;  %v946_v35 = vld [vmem:[%s14437_s0 + $0x1478] sm:$0xff]  ;;  %7967 = vmatpush3.bf16.msra.mxu1 %v7966_v23  ;;  %v1857_v57 = vld [vmem:[%s14438_s1 + $0x14f0] sm:$0xff] }
 0x256   : > { %6210 = vmatmul.mubr.f32.gmra.mrb[90].mxu1 %v8376_v31  ;;  %v1835_v36 = vld [vmem:[%s14438_s1 + $0x1440] sm:$0xff]  ;;  %v1842_v37 = vld [vmem:[%s14438_s1 + $0x1478] sm:$0xff]  ;;  %v3635_v40 = vmax.f32 %v2739_v26, 0.0  ;;  %5595 = vmatmul.mubr.f32.gmra.mrb[58].mxu0 %v8376_v31  ;;  %v953_v58 = vld [vmem:[%s14437_s0 + $0x14b0] sm:$0xff]  ;;  %v2753_v63 = vadd.f32 %v1857_v57, %v961_v51 }
 0x257   : > { %v7802_v38 = vpack.c.bf16 %v3620_v25, %v3613_v24  ;;  %v8377_v39 = vld [vmem:[%s9273_s11 + $0x398] sm:$0xff]  ;;  %v2731_v41 = vadd.f32 %v1835_v36, %v939_v29  ;;  %v2738_v42 = vadd.f32 %v1842_v37, %v946_v35  ;;  %v843_v43 = vld [vmem:[%s14437_s0 + $0x1140] sm:$0xff]  ;;  %7801 = vmatprep.subr.bf16.mxu0 %v7800_v30  ;;  %v3643_v46 = vmax.f32 %v2747_v33, 0.0  ;;  %v8378_v59 = vld [vmem:[%s9273_s11 + $0x390] sm:$0xff] }
 0x258   : > { %6214 = vmatprep.mubr.f32.mxu1 %v8377_v39  ;;  %v850_v44 = vld [vmem:[%s14437_s0 + $0x1178] sm:$0xff]  ;;  %v1739_v45 = vld [vmem:[%s14438_s1 + $0x1140] sm:$0xff]  ;;  %v3650_v47 = vmax.f32 %v2754_v34, 0.0  ;;  %5600 = vmatprep.mubr.f32.mxu0 %v8377_v39  ;;  %v7804_v52 = vpack.c.bf16 %v3635_v40, %v3628_v32  ;;  %v960_v0 = vld [vmem:[%s14437_s0 + $0x14e8] sm:$0xff]  ;;  %v3649_v12 = vmax.f32 %v2753_v63, 0.0 }
 0x259   : > { %v1746_v48 = vld [vmem:[%s14438_s1 + $0x1178] sm:$0xff]  ;;  %v2635_v49 = vadd.f32 %v1739_v45, %v843_v43  ;;  %7803 = vmatpush1.bf16.msra.mxu0 %v7802_v38  ;;  %v3627_v53 = vmax.f32 %v2731_v41, 0.0  ;;  %v3634_v54 = vmax.f32 %v2738_v42, 0.0  ;;  %v1849_v1 = vld [vmem:[%s14438_s1 + $0x14b0] sm:$0xff]  ;;  %v1856_v2 = vld [vmem:[%s14438_s1 + $0x14e8] sm:$0xff] }
 0x25a   : > { %v954_v50 = vld [vmem:[%s14437_s0 + $0x14b8] sm:$0xff]  ;;  %v2642_v55 = vadd.f32 %v1746_v48, %v850_v44  ;;  %6215 = vmatmul.mubr.f32.gmra.mrb[92].mxu1 %v8378_v59  ;;  %v7968_v60 = vpack.c.bf16 %v3650_v47, %v3643_v46  ;;  %7805 = vmatprep.subr.bf16.mxu0 %v7804_v52  ;;  %v2745_v6 = vadd.f32 %v1849_v1, %v953_v58  ;;  %v968_v8 = vld [vmem:[%s14437_s0 + $0x1528] sm:$0xff]  ;;  %v975_v9 = vld [vmem:[%s14437_s0 + $0x1560] sm:$0xff] }
 0x25b   : > { %v1850_v56 = vld [vmem:[%s14438_s1 + $0x14b8] sm:$0xff]  ;;  %v3531_v61 = vmax.f32 %v2635_v49, 0.0  ;;  %v7806_v3 = vpack.c.bf16 %v3634_v54, %v3627_v53  ;;  %v2752_v7 = vadd.f32 %v1856_v2, %v960_v0  ;;  %v1864_v10 = vld [vmem:[%s14438_s1 + $0x1528] sm:$0xff]  ;;  %5601 = vmatmul.mubr.f32.gmra.mrb[60].mxu0 %v8378_v59  ;;  %v1871_v13 = vld [vmem:[%s14438_s1 + $0x1560] sm:$0xff] }
 0x25c   : > { %v2746_v62 = vadd.f32 %v1850_v56, %v954_v50  ;;  %v3538_v4 = vmax.f32 %v2642_v55, 0.0  ;;  %v8379_v5 = vld [vmem:[%s9273_s11 + $0x3d8] sm:$0xff]  ;;  %7969 = vmatprep.subr.bf16.mxu1 %v7968_v60  ;;  %v2760_v14 = vadd.f32 %v1864_v10, %v968_v8  ;;  %v1081_v15 = vld [vmem:[%s14437_s0 + $0x18b0] sm:$0xff]  ;;  %v1088_v16 = vld [vmem:[%s14437_s0 + $0x18e8] sm:$0xff]  ;;  %v3641_v18 = vmax.f32 %v2745_v6, 0.0 }
 0x25d   : > { %6219 = vmatprep.mubr.f32.mxu1 %v8379_v5  ;;  %7807 = vmatpush1.bf16.msra.mxu0 %v7806_v3  ;;  %v3648_v19 = vmax.f32 %v2752_v7, 0.0  ;;  %v2767_v20 = vadd.f32 %v1871_v13, %v975_v9  ;;  %v1977_v21 = vld [vmem:[%s14438_s1 + $0x18b0] sm:$0xff]  ;;  %v1984_v22 = vld [vmem:[%s14438_s1 + $0x18e8] sm:$0xff]  ;;  %v967_v23 = vld [vmem:[%s14437_s0 + $0x1520] sm:$0xff] }
 0x25e   : > { %v3642_v11 = vmax.f32 %v2746_v62, 0.0  ;;  %v7970_v17 = vpack.c.bf16 %v3538_v4, %v3531_v61  ;;  %5606 = vmatprep.mubr.f32.mxu0 %v8379_v5  ;;  %v8380_v25 = vld [vmem:[%s9273_s11 + $0x3d0] sm:$0xff]  ;;  %v3656_v26 = vmax.f32 %v2760_v14, 0.0  ;;  %v2873_v27 = vadd.f32 %v1977_v21, %v1081_v15  ;;  %v974_v29 = vld [vmem:[%s14437_s0 + $0x1558] sm:$0xff]  ;;  %v1863_v30 = vld [vmem:[%s14438_s1 + $0x1520] sm:$0xff] }
 0x25f   : > { %6220 = vmatmul.mubr.f32.gmra.mrb[94].mxu1 %v8380_v25  ;;  %v2880_v28 = vadd.f32 %v1984_v22, %v1088_v16  ;;  %v1870_v31 = vld [vmem:[%s14438_s1 + $0x1558] sm:$0xff]  ;;  %v7810_v32 = vpack.c.bf16 %v3648_v19, %v3641_v18  ;;  %v8381_v33 = vld [vmem:[%s9273_s11 + $0x28] sm:$0xff]  ;;  %v3663_v34 = vmax.f32 %v2767_v20, 0.0  ;;  %v2759_v35 = vadd.f32 %v1863_v30, %v967_v23  ;;  %v969_v37 = vld [vmem:[%s14437_s0 + $0x1530] sm:$0xff]  ;;  %5607 = vmatmul.mubr.f32.gmra.mrb[62].mxu0 %v8380_v25 }
 0x260   : > { %v7808_v24 = vpack.c.bf16 %v3649_v12, %v3642_v11  ;;  %7971 = vmatpush3.bf16.msra.mxu1 %v7970_v17  ;;  %6289 = vmatprep.mubr.f32.mxu1 %v8381_v33  ;;  %v2766_v36 = vadd.f32 %v1870_v31, %v974_v29  ;;  %v976_v38 = vld [vmem:[%s14437_s0 + $0x1568] sm:$0xff]  ;;  %v1865_v39 = vld [vmem:[%s14438_s1 + $0x1530] sm:$0xff]  ;;  %v3769_v40 = vmax.f32 %v2873_v27, 0.0  ;;  %v982_v44 = vld [vmem:[%s14437_s0 + $0x1598] sm:$0xff] }
 0x261   : > { %v3776_v41 = vmax.f32 %v2880_v28, 0.0  ;;  %v1872_v42 = vld [vmem:[%s14438_s1 + $0x1568] sm:$0xff]  ;;  %v2761_v43 = vadd.f32 %v1865_v39, %v969_v37  ;;  %v989_v45 = vld [vmem:[%s14437_s0 + $0x15d0] sm:$0xff]  ;;  %5677 = vmatprep.mubr.f32.mxu0 %v8381_v33  ;;  %v7812_v46 = vpack.c.bf16 %v3663_v34, %v3656_v26  ;;  %v3655_v47 = vmax.f32 %v2759_v35, 0.0  ;;  %v1878_v50 = vld [vmem:[%s14438_s1 + $0x1598] sm:$0xff] }
 0x262   : > { %7809 = vmatprep.subr.bf16.mxu0 %v7808_v24  ;;  %v3662_v48 = vmax.f32 %v2766_v36, 0.0  ;;  %v2768_v49 = vadd.f32 %v1872_v42, %v976_v38  ;;  %v1885_v51 = vld [vmem:[%s14438_s1 + $0x15d0] sm:$0xff]  ;;  %v8382_v53 = vld [vmem:[%s9273_s11 + $0x20] sm:$0xff]  ;;  %v2774_v56 = vadd.f32 %v1878_v50, %v982_v44  ;;  %v988_v58 = vld [vmem:[%s14437_s0 + $0x15c8] sm:$0xff] }
 0x263   : > { %7811 = vmatpush1.bf16.msra.mxu0 %v7810_v32  ;;  %v981_v52 = vld [vmem:[%s14437_s0 + $0x1590] sm:$0xff]  ;;  %6290 = vmatmul.mubr.f32.vlgmr.msra.gmra.mrb[96].mxu1 %v8382_v53  ;;  %v7972_v54 = vpack.c.bf16 %v3776_v41, %v3769_v40  ;;  %v3657_v55 = vmax.f32 %v2761_v43, 0.0  ;;  %v2781_v57 = vadd.f32 %v1885_v51, %v989_v45  ;;  %v1884_v60 = vld [vmem:[%s14438_s1 + $0x15c8] sm:$0xff]  ;;  %v1003_v3 = vld [vmem:[%s14437_s0 + $0x1640] sm:$0xff] }
 0x264   : > { %v1877_v59 = vld [vmem:[%s14438_s1 + $0x1590] sm:$0xff]  ;;  %7813 = vmatprep.subr.bf16.mxu0 %v7812_v46  ;;  %v7814_v61 = vpack.c.bf16 %v3662_v48, %v3655_v47  ;;  %v3664_v62 = vmax.f32 %v2768_v49, 0.0  ;;  %v8383_v63 = vld [vmem:[%s9273_s11 + $0x68] sm:$0xff]  ;;  %v2780_v1 = vadd.f32 %v1884_v60, %v988_v58  ;;  %v3670_v5 = vmax.f32 %v2774_v56, 0.0  ;;  %v1899_v7 = vld [vmem:[%s14438_s1 + $0x1640] sm:$0xff] }
 0x265   : > { %6294 = vmatprep.mubr.f32.mxu1 %v8383_v63  ;;  %v2773_v0 = vadd.f32 %v1877_v59, %v981_v52  ;;  %v996_v2 = vld [vmem:[%s14437_s0 + $0x1608] sm:$0xff]  ;;  %7973 = vmatprep.subr.bf16.mxu1 %v7972_v54  ;;  %v3677_v6 = vmax.f32 %v2781_v57, 0.0  ;;  %v1095_v9 = vld [vmem:[%s14437_s0 + $0x1920] sm:$0xff]  ;;  %v1102_v10 = vld [vmem:[%s14437_s0 + $0x1958] sm:$0xff]  ;;  %v2795_v14 = vadd.f32 %v1899_v7, %v1003_v3 }
 0x266   : > { %v1892_v4 = vld [vmem:[%s14438_s1 + $0x1608] sm:$0xff]  ;;  %5678 = vmatmul.mubr.f32.vlgmr.msra.gmra.mrb[32].mxu0 %v8382_v53  ;;  %v7974_v11 = vpack.c.bf16 %v3664_v62, %v3657_v55  ;;  %v3676_v13 = vmax.f32 %v2780_v1, 0.0  ;;  %v1991_v15 = vld [vmem:[%s14438_s1 + $0x1920] sm:$0xff]  ;;  %v1998_v16 = vld [vmem:[%s14438_s1 + $0x1958] sm:$0xff] }
 0x267   : > { %v2788_v8 = vadd.f32 %v1892_v4, %v996_v2  ;;  %7815 = vmatpush1.bf16.msra.mxu0 %v7814_v61  ;;  %5683 = vmatprep.mubr.f32.mxu0 %v8383_v63  ;;  %v3669_v12 = vmax.f32 %v2773_v0, 0.0  ;;  %v995_v17 = vld [vmem:[%s14437_s0 + $0x1600] sm:$0xff]  ;;  %v7816_v18 = vpack.c.bf16 %v3677_v6, %v3670_v5  ;;  %v2887_v21 = vadd.f32 %v1991_v15, %v1095_v9  ;;  %v1002_v23 = vld [vmem:[%s14437_s0 + $0x1638] sm:$0xff]  ;;  %v8385_v27 = vld [vmem:[%s9273_s11 + $0xa8] sm:$0xff]  ;;  %v4552_v63 = vpop.f32.mrb[0].mxu0 }
 0x268   : > { %v8384_v19 = vld [vmem:[%s9273_s11 + $0x60] sm:$0xff]  ;;  %v2894_v22 = vadd.f32 %v1998_v16, %v1102_v10  ;;  %v1898_v25 = vld [vmem:[%s14438_s1 + $0x1638] sm:$0xff]  ;;  %7975 = vmatpush3.bf16.msra.mxu1 %v7974_v11  ;;  %v3691_v28 = vmax.f32 %v2795_v14, 0.0  ;;  %v1017_v39 = vld [vmem:[%s14437_s0 + $0x16b0] sm:$0xff]  ;;  %6515 = vst [vmem:[%s13666_s20] sm:$0xff] %v4552_v63  ;;  %v4554_v6 = vpop.f32.mrb[1].mxu0  ;;  %v5196_v14 = vpop.f32.mrb[0].mxu1 }
 0x269   : > { %6295 = vmatmul.mubr.f32.gmra.mrb[98].mxu1 %v8384_v19  ;;  %v3684_v20 = vmax.f32 %v2788_v8, 0.0  ;;  %v1891_v24 = vld [vmem:[%s14438_s1 + $0x1600] sm:$0xff]  ;;  %v7818_v26 = vpack.c.bf16 %v3676_v13, %v3669_v12  ;;  %v2794_v30 = vadd.f32 %v1898_v25, %v1002_v23  ;;  %v990_v32 = vld [vmem:[%s14437_s0 + $0x15d8] sm:$0xff]  ;;  %7817 = vmatprep.subr.bf16.mxu0 %v7816_v18  ;;  %v3783_v34 = vmax.f32 %v2887_v21, 0.0  ;;  %v1913_v45 = vld [vmem:[%s14438_s1 + $0x16b0] sm:$0xff]  ;;  %6516 = vst [vmem:[%s13666_s20 + $0x8] sm:$0xff] %v4554_v6 }
 0x26a   : > { %6299 = vmatprep.mubr.f32.mxu1 %v8385_v27  ;;  %v2787_v29 = vadd.f32 %v1891_v24, %v995_v17  ;;  %v983_v31 = vld [vmem:[%s14437_s0 + $0x15a0] sm:$0xff]  ;;  %5684 = vmatmul.mubr.f32.gmra.mrb[34].mxu0 %v8384_v19  ;;  %v3790_v35 = vmax.f32 %v2894_v22, 0.0  ;;  %v1886_v36 = vld [vmem:[%s14438_s1 + $0x15d8] sm:$0xff]  ;;  %v1009_v46 = vld [vmem:[%s14437_s0 + $0x1670] sm:$0xff]  ;;  %v2809_v51 = vadd.f32 %v1913_v45, %v1017_v39  ;;  %6517 = vst [vmem:[%s13666_s20 + $0x10] sm:$0xff] %v5196_v14  ;;  %v5198_v23 = vpop.f32.mrb[1].mxu1 }
 0x26b   : > { %v1879_v33 = vld [vmem:[%s14438_s1 + $0x15a0] sm:$0xff]  ;;  %v1010_v38 = vld [vmem:[%s14437_s0 + $0x1678] sm:$0xff]  ;;  %7819 = vmatpush1.bf16.msra.mxu0 %v7818_v26  ;;  %5689 = vmatprep.mubr.f32.mxu0 %v8385_v27  ;;  %v7820_v40 = vpack.c.bf16 %v3691_v28, %v3684_v20  ;;  %v3690_v42 = vmax.f32 %v2794_v30, 0.0  ;;  %v2782_v43 = vadd.f32 %v1886_v36, %v990_v32  ;;  %v1016_v52 = vld [vmem:[%s14437_s0 + $0x16a8] sm:$0xff]  ;;  %6518 = vst [vmem:[%s13666_s20 + $0x18] sm:$0xff] %v5198_v23  ;;  %v4558_v32 = vpop.f32.mrb[2].mxu0 }
 0x26c   : > { %v2775_v37 = vadd.f32 %v1879_v33, %v983_v31  ;;  %v3683_v41 = vmax.f32 %v2787_v29, 0.0  ;;  %v1906_v44 = vld [vmem:[%s14438_s1 + $0x1678] sm:$0xff]  ;;  %v8386_v47 = vld [vmem:[%s9273_s11 + $0xa0] sm:$0xff]  ;;  %v7976_v48 = vpack.c.bf16 %v3790_v35, %v3783_v34  ;;  %v1905_v53 = vld [vmem:[%s14438_s1 + $0x1670] sm:$0xff]  ;;  %v3705_v1 = vmax.f32 %v2809_v51, 0.0  ;;  %6523 = vst [vmem:[%s13666_s20 + $0x38] sm:$0xff] %v4558_v32 }
 0x26d   : > { %6300 = vmatmul.mubr.f32.gmra.mrb[100].mxu1 %v8386_v47  ;;  %v2802_v50 = vadd.f32 %v1906_v44, %v1010_v38  ;;  %v1912_v54 = vld [vmem:[%s14438_s1 + $0x16a8] sm:$0xff]  ;;  %7821 = vmatprep.subr.bf16.mxu0 %v7820_v40  ;;  %v3678_v56 = vmax.f32 %v2782_v43, 0.0  ;;  %v2801_v58 = vadd.f32 %v1905_v53, %v1009_v46  ;;  %v1031_v61 = vld [vmem:[%s14437_s0 + $0x1720] sm:$0xff]  ;;  %v1109_v4 = vld [vmem:[%s14437_s0 + $0x1990] sm:$0xff]  ;;  %v4560_v39 = vpop.f32.mrb[3].mxu0 }
 0x26e   : > { %v3671_v49 = vmax.f32 %v2775_v37, 0.0  ;;  %v7822_v55 = vpack.c.bf16 %v3690_v42, %v3683_v41  ;;  %v8387_v57 = vld [vmem:[%s9273_s11 + $0xe8] sm:$0xff]  ;;  %v2808_v59 = vadd.f32 %v1912_v54, %v1016_v52  ;;  %5690 = vmatmul.mubr.f32.gmra.mrb[36].mxu0 %v8386_v47  ;;  %7977 = vmatprep.subr.bf16.mxu1 %v7976_v48  ;;  %v1927_v2 = vld [vmem:[%s14438_s1 + $0x1720] sm:$0xff]  ;;  %v2005_v11 = vld [vmem:[%s14438_s1 + $0x1990] sm:$0xff]  ;;  %v5202_v47 = vpop.f32.mrb[2].mxu1  ;;  %6524 = vst [vmem:[%s13666_s20 + $0x40] sm:$0xff] %v4560_v39 }
 0x26f   : > { %6304 = vmatprep.mubr.f32.mxu1 %v8387_v57  ;;  %v1024_v60 = vld [vmem:[%s14437_s0 + $0x16e8] sm:$0xff]  ;;  %v3698_v0 = vmax.f32 %v2802_v50, 0.0  ;;  %5695 = vmatprep.mubr.f32.mxu0 %v8387_v57  ;;  %v3697_v8 = vmax.f32 %v2801_v58, 0.0  ;;  %v2823_v10 = vadd.f32 %v1927_v2, %v1031_v61  ;;  %v1023_v13 = vld [vmem:[%s14437_s0 + $0x16e0] sm:$0xff]  ;;  %v2901_v18 = vadd.f32 %v2005_v11, %v1109_v4  ;;  %v1030_v20 = vld [vmem:[%s14437_s0 + $0x1718] sm:$0xff]  ;;  %6525 = vst [vmem:[%s13666_s20 + $0x48] sm:$0xff] %v5202_v47 }
 0x270   : > { %v1920_v62 = vld [vmem:[%s14438_s1 + $0x16e8] sm:$0xff]  ;;  %7823 = vmatpush1.bf16.msra.mxu0 %v7822_v55  ;;  %v7978_v7 = vpack.c.bf16 %v3678_v56, %v3671_v49  ;;  %v3704_v9 = vmax.f32 %v2808_v59, 0.0  ;;  %v8388_v16 = vld [vmem:[%s9273_s11 + $0xe0] sm:$0xff]  ;;  %v1926_v22 = vld [vmem:[%s14438_s1 + $0x1718] sm:$0xff]  ;;  %v5204_v56 = vpop.f32.mrb[3].mxu1 }
 0x271   : > { %v2816_v3 = vadd.f32 %v1920_v62, %v1024_v60  ;;  %v1116_v5 = vld [vmem:[%s14437_s0 + $0x19c8] sm:$0xff]  ;;  %v7824_v15 = vpack.c.bf16 %v3705_v1, %v3698_v0  ;;  %6305 = vmatmul.mubr.f32.gmra.mrb[102].mxu1 %v8388_v16  ;;  %v1919_v21 = vld [vmem:[%s14438_s1 + $0x16e0] sm:$0xff]  ;;  %v3719_v26 = vmax.f32 %v2823_v10, 0.0  ;;  %v2822_v28 = vadd.f32 %v1926_v22, %v1030_v20  ;;  %v997_v29 = vld [vmem:[%s14437_s0 + $0x1610] sm:$0xff]  ;;  %6526 = vst [vmem:[%s13666_s20 + $0x50] sm:$0xff] %v5204_v56 }
 0x272   : > { %v2012_v12 = vld [vmem:[%s14438_s1 + $0x19c8] sm:$0xff]  ;;  %7979 = vmatpush3.bf16.msra.mxu1 %v7978_v7  ;;  %v7826_v24 = vpack.c.bf16 %v3704_v9, %v3697_v8  ;;  %v2815_v27 = vadd.f32 %v1919_v21, %v1023_v13  ;;  %v1893_v31 = vld [vmem:[%s14438_s1 + $0x1610] sm:$0xff]  ;;  %5696 = vmatmul.mubr.f32.gmra.mrb[38].mxu0 %v8388_v16  ;;  %v3797_v33 = vmax.f32 %v2901_v18, 0.0  ;;  %v1038_v37 = vld [vmem:[%s14437_s0 + $0x1758] sm:$0xff]  ;;  %v4564_v7 = vpop.f32.mrb[4].mxu0 }
 0x273   : > { %v3712_v17 = vmax.f32 %v2816_v3, 0.0  ;;  %v2908_v19 = vadd.f32 %v2012_v12, %v1116_v5  ;;  %v8389_v25 = vld [vmem:[%s9273_s11 + $0x128] sm:$0xff]  ;;  %7825 = vmatprep.subr.bf16.mxu0 %v7824_v15  ;;  %v2789_v36 = vadd.f32 %v1893_v31, %v997_v29  ;;  %v1045_v38 = vld [vmem:[%s14437_s0 + $0x1790] sm:$0xff]  ;;  %v3718_v42 = vmax.f32 %v2822_v28, 0.0  ;;  %v1934_v44 = vld [vmem:[%s14438_s1 + $0x1758] sm:$0xff]  ;;  %6530 = vst [vmem:[%s13666_s20 + $0x70] sm:$0xff] %v4564_v7 }
 0x274   : > { %6309 = vmatprep.mubr.f32.mxu1 %v8389_v25  ;;  %v1004_v30 = vld [vmem:[%s14437_s0 + $0x1648] sm:$0xff]  ;;  %7827 = vmatpush1.bf16.msra.mxu0 %v7826_v24  ;;  %v3711_v41 = vmax.f32 %v2815_v27, 0.0  ;;  %v1941_v45 = vld [vmem:[%s14438_s1 + $0x1790] sm:$0xff]  ;;  %v8390_v48 = vld [vmem:[%s9273_s11 + $0x120] sm:$0xff]  ;;  %v2830_v51 = vadd.f32 %v1934_v44, %v1038_v37  ;;  %v5208_v15 = vpop.f32.mrb[4].mxu1  ;;  %v4566_v24 = vpop.f32.mrb[5].mxu0 }
 0x275   : > { %v3804_v34 = vmax.f32 %v2908_v19, 0.0  ;;  %v1900_v35 = vld [vmem:[%s14438_s1 + $0x1648] sm:$0xff]  ;;  %5701 = vmatprep.mubr.f32.mxu0 %v8389_v25  ;;  %v7828_v40 = vpack.c.bf16 %v3719_v26, %v3712_v17  ;;  %v1037_v46 = vld [vmem:[%s14437_s0 + $0x1750] sm:$0xff]  ;;  %6310 = vmatmul.mubr.f32.gmra.mrb[104].mxu1 %v8390_v48  ;;  %v3685_v50 = vmax.f32 %v2789_v36, 0.0  ;;  %v2837_v52 = vadd.f32 %v1941_v45, %v1045_v38  ;;  %v1059_v63 = vld [vmem:[%s14437_s0 + $0x1800] sm:$0xff]  ;;  %6532 = vst [vmem:[%s13666_s20 + $0x80] sm:$0xff] %v5208_v15 }
 0x276   : > { %v2796_v43 = vadd.f32 %v1900_v35, %v1004_v30  ;;  %v1044_v53 = vld [vmem:[%s14437_s0 + $0x1788] sm:$0xff]  ;;  %v1933_v54 = vld [vmem:[%s14438_s1 + $0x1750] sm:$0xff]  ;;  %v7830_v57 = vpack.c.bf16 %v3718_v42, %v3711_v41  ;;  %5702 = vmatmul.mubr.f32.gmra.mrb[40].mxu0 %v8390_v48  ;;  %v3726_v1 = vmax.f32 %v2830_v51, 0.0  ;;  %v1955_v3 = vld [vmem:[%s14438_s1 + $0x1800] sm:$0xff]  ;;  %v5210_v25 = vpop.f32.mrb[5].mxu1  ;;  %6531 = vst [vmem:[%s13666_s20 + $0x78] sm:$0xff] %v4566_v24 }
 0x277   : > { %v7980_v49 = vpack.c.bf16 %v3804_v34, %v3797_v33  ;;  %v1940_v55 = vld [vmem:[%s14438_s1 + $0x1788] sm:$0xff]  ;;  %7829 = vmatprep.subr.bf16.mxu0 %v7828_v40  ;;  %v2829_v60 = vadd.f32 %v1933_v54, %v1037_v46  ;;  %v3733_v2 = vmax.f32 %v2837_v52, 0.0  ;;  %v1123_v5 = vld [vmem:[%s14437_s0 + $0x1a00] sm:$0xff]  ;;  %v1130_v6 = vld [vmem:[%s14437_s0 + $0x1a38] sm:$0xff]  ;;  %v2851_v11 = vadd.f32 %v1955_v3, %v1059_v63  ;;  %6533 = vst [vmem:[%s13666_s20 + $0x88] sm:$0xff] %v5210_v25  ;;  %v4570_v47 = vpop.f32.mrb[6].mxu0 }
 0x278   : > { %v3692_v58 = vmax.f32 %v2796_v43, 0.0  ;;  %v8391_v59 = vld [vmem:[%s9273_s11 + $0x168] sm:$0xff]  ;;  %v2836_v61 = vadd.f32 %v1940_v55, %v1044_v53  ;;  %7831 = vmatpush1.bf16.msra.mxu0 %v7830_v57  ;;  %v2019_v12 = vld [vmem:[%s14438_s1 + $0x1a00] sm:$0xff]  ;;  %v2026_v13 = vld [vmem:[%s14438_s1 + $0x1a38] sm:$0xff]  ;;  %6537 = vst [vmem:[%s13666_s20 + $0xa8] sm:$0xff] %v4570_v47  ;;  %v5214_v56 = vpop.f32.mrb[6].mxu1 }
 0x279   : > { %6314 = vmatprep.mubr.f32.mxu1 %v8391_v59  ;;  %v1052_v62 = vld [vmem:[%s14437_s0 + $0x17c8] sm:$0xff]  ;;  %7981 = vmatprep.subr.bf16.mxu1 %v7980_v49  ;;  %v3725_v9 = vmax.f32 %v2829_v60, 0.0  ;;  %v1051_v14 = vld [vmem:[%s14437_s0 + $0x17c0] sm:$0xff]  ;;  %v7832_v16 = vpack.c.bf16 %v3733_v2, %v3726_v1  ;;  %v2915_v19 = vadd.f32 %v2019_v12, %v1123_v5  ;;  %v2922_v20 = vadd.f32 %v2026_v13, %v1130_v6  ;;  %v1058_v21 = vld [vmem:[%s14437_s0 + $0x17f8] sm:$0xff]  ;;  %v4572_v57 = vpop.f32.mrb[7].mxu0  ;;  %v5216_v63 = vpop.f32.mrb[7].mxu1 }
 0x27a   : > { %v1948_v0 = vld [vmem:[%s14438_s1 + $0x17c8] sm:$0xff]  ;;  %v7982_v8 = vpack.c.bf16 %v3692_v58, %v3685_v50  ;;  %5707 = vmatprep.mubr.f32.mxu0 %v8391_v59  ;;  %v3732_v10 = vmax.f32 %v2836_v61, 0.0  ;;  %v8392_v17 = vld [vmem:[%s9273_s11 + $0x160] sm:$0xff]  ;;  %v1954_v23 = vld [vmem:[%s14438_s1 + $0x17f8] sm:$0xff]  ;;  %v3747_v28 = vmax.f32 %v2851_v11, 0.0  ;;  %6539 = vst [vmem:[%s13666_s20 + $0xb8] sm:$0xff] %v5214_v56 }
 0x27b   : > { %v2844_v4 = vadd.f32 %v1948_v0, %v1052_v62  ;;  %6315 = vmatmul.mubr.f32.gmra.mrb[106].mxu1 %v8392_v17  ;;  %v1947_v22 = vld [vmem:[%s14438_s1 + $0x17c0] sm:$0xff]  ;;  %v8393_v27 = vld [vmem:[%s9273_s11 + $0x1a8] sm:$0xff]  ;;  %v2850_v30 = vadd.f32 %v1954_v23, %v1058_v21  ;;  %v1018_v32 = vld [vmem:[%s14437_s0 + $0x16b8] sm:$0xff]  ;;  %5708 = vmatmul.mubr.f32.gmra.mrb[42].mxu0 %v8392_v17  ;;  %v3811_v34 = vmax.f32 %v2915_v19, 0.0  ;;  %v3818_v35 = vmax.f32 %v2922_v20, 0.0  ;;  %6538 = vst [vmem:[%s13666_s20 + $0xb0] sm:$0xff] %v4572_v57 }
 0x27c   : > { %7983 = vmatpush3.bf16.msra.mxu1 %v7982_v8  ;;  %v7834_v26 = vpack.c.bf16 %v3732_v10, %v3725_v9  ;;  %6319 = vmatprep.mubr.f32.mxu1 %v8393_v27  ;;  %v2843_v29 = vadd.f32 %v1947_v22, %v1051_v14  ;;  %v1011_v31 = vld [vmem:[%s14437_s0 + $0x1680] sm:$0xff]  ;;  %v1914_v36 = vld [vmem:[%s14438_s1 + $0x16b8] sm:$0xff]  ;;  %v1073_v39 = vld [vmem:[%s14437_s0 + $0x1870] sm:$0xff]  ;;  %6540 = vst [vmem:[%s13666_s20 + $0xc0] sm:$0xff] %v5216_v63  ;;  %v5220_v25 = vpop.f32.mrb[8].mxu1 }
 0x27d   : > { %v3740_v18 = vmax.f32 %v2844_v4, 0.0  ;;  %v1907_v33 = vld [vmem:[%s14438_s1 + $0x1680] sm:$0xff]  ;;  %7833 = vmatprep.subr.bf16.mxu0 %v7832_v16  ;;  %v1066_v38 = vld [vmem:[%s14437_s0 + $0x1838] sm:$0xff]  ;;  %5713 = vmatprep.mubr.f32.mxu0 %v8393_v27  ;;  %v3746_v42 = vmax.f32 %v2850_v30, 0.0  ;;  %v2810_v43 = vadd.f32 %v1914_v36, %v1018_v32  ;;  %v1969_v45 = vld [vmem:[%s14438_s1 + $0x1870] sm:$0xff]  ;;  %v7984_v49 = vpack.c.bf16 %v3818_v35, %v3811_v34  ;;  %v4576_v16 = vpop.f32.mrb[8].mxu0 }
 0x27e   : > { %v2803_v37 = vadd.f32 %v1907_v33, %v1011_v31  ;;  %7835 = vmatpush1.bf16.msra.mxu0 %v7834_v26  ;;  %v3739_v41 = vmax.f32 %v2843_v29, 0.0  ;;  %v1962_v44 = vld [vmem:[%s14438_s1 + $0x1838] sm:$0xff]  ;;  %v1065_v46 = vld [vmem:[%s14437_s0 + $0x1830] sm:$0xff]  ;;  %v8394_v48 = vld [vmem:[%s9273_s11 + $0x1a0] sm:$0xff]  ;;  %v2865_v52 = vadd.f32 %v1969_v45, %v1073_v39  ;;  %6544 = vst [vmem:[%s13666_s20 + $0xe0] sm:$0xff] %v4576_v16  ;;  %v4578_v26 = vpop.f32.mrb[9].mxu0 }
 0x27f   : > { %v7836_v40 = vpack.c.bf16 %v3747_v28, %v3740_v18  ;;  %6320 = vmatmul.mubr.f32.gmra.mrb[108].mxu1 %v8394_v48  ;;  %v2858_v51 = vadd.f32 %v1962_v44, %v1066_v38  ;;  %v1072_v53 = vld [vmem:[%s14437_s0 + $0x1868] sm:$0xff]  ;;  %v1961_v54 = vld [vmem:[%s14438_s1 + $0x1830] sm:$0xff]  ;;  %v3706_v59 = vmax.f32 %v2810_v43, 0.0  ;;  %v1087_v1 = vld [vmem:[%s14437_s0 + $0x18e0] sm:$0xff]  ;;  %5714 = vmatmul.mubr.f32.gmra.mrb[44].mxu0 %v8394_v48  ;;  %6546 = vst [vmem:[%s13666_s20 + $0xf0] sm:$0xff] %v5220_v25  ;;  %v5222_v35 = vpop.f32.mrb[9].mxu1 }
 0x280   : > { %v3699_v50 = vmax.f32 %v2803_v37, 0.0  ;;  %v1968_v55 = vld [vmem:[%s14438_s1 + $0x1868] sm:$0xff]  ;;  %v7838_v58 = vpack.c.bf16 %v3746_v42, %v3739_v41  ;;  %v2857_v61 = vadd.f32 %v1961_v54, %v1065_v46  ;;  %7985 = vmatprep.subr.bf16.mxu1 %v7984_v49  ;;  %v3761_v4 = vmax.f32 %v2865_v52, 0.0  ;;  %v1983_v5 = vld [vmem:[%s14438_s1 + $0x18e0] sm:$0xff]  ;;  %v1137_v7 = vld [vmem:[%s14437_s0 + $0x1a70] sm:$0xff]  ;;  %6545 = vst [vmem:[%s13666_s20 + $0xe8] sm:$0xff] %v4578_v26 }
 0x281   : > { %7837 = vmatprep.subr.bf16.mxu0 %v7836_v40  ;;  %v8395_v60 = vld [vmem:[%s9273_s11 + $0x1e8] sm:$0xff]  ;;  %v2864_v62 = vadd.f32 %v1968_v55, %v1072_v53  ;;  %v3754_v3 = vmax.f32 %v2858_v51, 0.0  ;;  %v2879_v12 = vadd.f32 %v1983_v5, %v1087_v1  ;;  %v2033_v13 = vld [vmem:[%s14438_s1 + $0x1a70] sm:$0xff]  ;;  %v1079_v15 = vld [vmem:[%s14437_s0 + $0x18a0] sm:$0xff]  ;;  %6547 = vst [vmem:[%s13666_s20 + $0xf8] sm:$0xff] %v5222_v35  ;;  %v4582_v57 = vpop.f32.mrb[10].mxu0 }
 0x282   : > { %6324 = vmatprep.mubr.f32.mxu1 %v8395_v60  ;;  %v1080_v0 = vld [vmem:[%s14437_s0 + $0x18a8] sm:$0xff]  ;;  %7839 = vmatpush1.bf16.msra.mxu0 %v7838_v58  ;;  %v7986_v9 = vpack.c.bf16 %v3706_v59, %v3699_v50  ;;  %v3753_v10 = vmax.f32 %v2857_v61, 0.0  ;;  %v8396_v18 = vld [vmem:[%s9273_s11 + $0x1e0] sm:$0xff]  ;;  %v2929_v20 = vadd.f32 %v2033_v13, %v1137_v7  ;;  %v1086_v22 = vld [vmem:[%s14437_s0 + $0x18d8] sm:$0xff]  ;;  %6551 = vst [vmem:[%s13666_s20 + $0x118] sm:$0xff] %v4582_v57  ;;  %v5226_v63 = vpop.f32.mrb[10].mxu1 }
 0x283   : > { %v1976_v2 = vld [vmem:[%s14438_s1 + $0x18a8] sm:$0xff]  ;;  %5719 = vmatprep.mubr.f32.mxu0 %v8395_v60  ;;  %v3760_v11 = vmax.f32 %v2864_v62, 0.0  ;;  %v7840_v17 = vpack.c.bf16 %v3761_v4, %v3754_v3  ;;  %6325 = vmatmul.mubr.f32.gmra.mrb[110].mxu1 %v8396_v18  ;;  %v1975_v23 = vld [vmem:[%s14438_s1 + $0x18a0] sm:$0xff]  ;;  %v1982_v24 = vld [vmem:[%s14438_s1 + $0x18d8] sm:$0xff]  ;;  %v3775_v29 = vmax.f32 %v2879_v12, 0.0  ;;  %6553 = vst [vmem:[%s13666_s20 + $0x128] sm:$0xff] %v5226_v63 }
 0x284   : > { %v2872_v6 = vadd.f32 %v1976_v2, %v1080_v0  ;;  %v1144_v8 = vld [vmem:[%s14437_s0 + $0x1aa8] sm:$0xff]  ;;  %7987 = vmatpush3.bf16.msra.mxu1 %v7986_v9  ;;  %v2871_v30 = vadd.f32 %v1975_v23, %v1079_v15  ;;  %v2878_v31 = vadd.f32 %v1982_v24, %v1086_v22  ;;  %v1025_v32 = vld [vmem:[%s14437_s0 + $0x16f0] sm:$0xff]  ;;  %5720 = vmatmul.mubr.f32.gmra.mrb[46].mxu0 %v8396_v18  ;;  %v3825_v36 = vmax.f32 %v2929_v20, 0.0  ;;  %v1094_v40 = vld [vmem:[%s14437_s0 + $0x1918] sm:$0xff]  ;;  %v4584_v0 = vpop.f32.mrb[11].mxu0 }
 0x285   : > { %v2040_v14 = vld [vmem:[%s14438_s1 + $0x1aa8] sm:$0xff]  ;;  %v7842_v27 = vpack.c.bf16 %v3760_v11, %v3753_v10  ;;  %v1921_v34 = vld [vmem:[%s14438_s1 + $0x16f0] sm:$0xff]  ;;  %7841 = vmatprep.subr.bf16.mxu0 %v7840_v17  ;;  %v1990_v46 = vld [vmem:[%s14438_s1 + $0x1918] sm:$0xff]  ;;  %6552 = vst [vmem:[%s13666_s20 + $0x120] sm:$0xff] %v4584_v0 }
 0x286   : > { %v3768_v19 = vmax.f32 %v2872_v6, 0.0  ;;  %v2936_v21 = vadd.f32 %v2040_v14, %v1144_v8  ;;  %v8397_v28 = vld [vmem:[%s9273_s11 + $0x228] sm:$0xff]  ;;  %v2817_v39 = vadd.f32 %v1921_v34, %v1025_v32  ;;  %v1101_v41 = vld [vmem:[%s14437_s0 + $0x1950] sm:$0xff]  ;;  %v3767_v43 = vmax.f32 %v2871_v30, 0.0  ;;  %v8398_v49 = vld [vmem:[%s9273_s11 + $0x220] sm:$0xff]  ;;  %v5228_v6 = vpop.f32.mrb[11].mxu1 }
 0x287   : > { %6329 = vmatprep.mubr.f32.mxu1 %v8397_v28  ;;  %v1032_v33 = vld [vmem:[%s14437_s0 + $0x1728] sm:$0xff]  ;;  %7843 = vmatpush1.bf16.msra.mxu0 %v7842_v27  ;;  %v3774_v44 = vmax.f32 %v2878_v31, 0.0  ;;  %v1997_v47 = vld [vmem:[%s14438_s1 + $0x1950] sm:$0xff]  ;;  %v2886_v52 = vadd.f32 %v1990_v46, %v1094_v40  ;;  %v1115_v2 = vld [vmem:[%s14437_s0 + $0x19c0] sm:$0xff]  ;;  %6554 = vst [vmem:[%s13666_s20 + $0x130] sm:$0xff] %v5228_v6  ;;  %v4588_v34 = vpop.f32.mrb[12].mxu0 }
 0x288   : > { %v3832_v37 = vmax.f32 %v2936_v21, 0.0  ;;  %v1928_v38 = vld [vmem:[%s14438_s1 + $0x1728] sm:$0xff]  ;;  %5725 = vmatprep.mubr.f32.mxu0 %v8397_v28  ;;  %v7844_v42 = vpack.c.bf16 %v3775_v29, %v3768_v19  ;;  %v1093_v48 = vld [vmem:[%s14437_s0 + $0x1910] sm:$0xff]  ;;  %6330 = vmatmul.mubr.f32.gmra.mrb[112].mxu1 %v8398_v49  ;;  %v3713_v51 = vmax.f32 %v2817_v39, 0.0  ;;  %v2893_v53 = vadd.f32 %v1997_v47, %v1101_v41  ;;  %v2011_v7 = vld [vmem:[%s14438_s1 + $0x19c0] sm:$0xff]  ;;  %v5232_v35 = vpop.f32.mrb[12].mxu1 }
 0x289   : > { %v2824_v45 = vadd.f32 %v1928_v38, %v1032_v33  ;;  %v1100_v54 = vld [vmem:[%s14437_s0 + $0x1948] sm:$0xff]  ;;  %v1989_v55 = vld [vmem:[%s14438_s1 + $0x1910] sm:$0xff]  ;;  %v7846_v58 = vpack.c.bf16 %v3774_v44, %v3767_v43  ;;  %5726 = vmatmul.mubr.f32.gmra.mrb[48].mxu0 %v8398_v49  ;;  %v3782_v4 = vmax.f32 %v2886_v52, 0.0  ;;  %v1151_v9 = vld [vmem:[%s14437_s0 + $0x1ae0] sm:$0xff]  ;;  %v2907_v14 = vadd.f32 %v2011_v7, %v1115_v2  ;;  %6558 = vst [vmem:[%s13666_s20 + $0x150] sm:$0xff] %v4588_v34  ;;  %v4590_v40 = vpop.f32.mrb[13].mxu0 }
 0x28a   : > { %v7988_v50 = vpack.c.bf16 %v3832_v37, %v3825_v36  ;;  %v1996_v56 = vld [vmem:[%s14438_s1 + $0x1948] sm:$0xff]  ;;  %7845 = vmatprep.subr.bf16.mxu0 %v7844_v42  ;;  %v2885_v61 = vadd.f32 %v1989_v55, %v1093_v48  ;;  %v3789_v5 = vmax.f32 %v2893_v53, 0.0  ;;  %v1158_v10 = vld [vmem:[%s14437_s0 + $0x1b18] sm:$0xff]  ;;  %v2047_v15 = vld [vmem:[%s14438_s1 + $0x1ae0] sm:$0xff]  ;;  %6560 = vst [vmem:[%s13666_s20 + $0x160] sm:$0xff] %v5232_v35  ;;  %v5234_v41 = vpop.f32.mrb[13].mxu1 }
 0x28b   : > { %v3720_v59 = vmax.f32 %v2824_v45, 0.0  ;;  %v8399_v60 = vld [vmem:[%s9273_s11 + $0x268] sm:$0xff]  ;;  %v2892_v62 = vadd.f32 %v1996_v56, %v1100_v54  ;;  %7847 = vmatpush1.bf16.msra.mxu0 %v7846_v58  ;;  %v2054_v16 = vld [vmem:[%s14438_s1 + $0x1b18] sm:$0xff]  ;;  %v1107_v17 = vld [vmem:[%s14437_s0 + $0x1980] sm:$0xff]  ;;  %v2943_v21 = vadd.f32 %v2047_v15, %v1151_v9  ;;  %v3803_v28 = vmax.f32 %v2907_v14, 0.0  ;;  %6559 = vst [vmem:[%s13666_s20 + $0x158] sm:$0xff] %v4590_v40 }
 0x28c   : > { %6334 = vmatprep.mubr.f32.mxu1 %v8399_v60  ;;  %v1108_v1 = vld [vmem:[%s14437_s0 + $0x1988] sm:$0xff]  ;;  %7989 = vmatprep.subr.bf16.mxu1 %v7988_v50  ;;  %v3781_v12 = vmax.f32 %v2885_v61, 0.0  ;;  %v7848_v18 = vpack.c.bf16 %v3789_v5, %v3782_v4  ;;  %v8400_v19 = vld [vmem:[%s9273_s11 + $0x260] sm:$0xff]  ;;  %v2950_v22 = vadd.f32 %v2054_v16, %v1158_v10  ;;  %v1114_v23 = vld [vmem:[%s14437_s0 + $0x19b8] sm:$0xff]  ;;  %6561 = vst [vmem:[%s13666_s20 + $0x168] sm:$0xff] %v5234_v41  ;;  %v4594_v63 = vpop.f32.mrb[14].mxu0 }
 0x28d   : > { %v2004_v3 = vld [vmem:[%s14438_s1 + $0x1988] sm:$0xff]  ;;  %v7990_v11 = vpack.c.bf16 %v3720_v59, %v3713_v51  ;;  %5731 = vmatprep.mubr.f32.mxu0 %v8399_v60  ;;  %v3788_v13 = vmax.f32 %v2892_v62, 0.0  ;;  %6335 = vmatmul.mubr.f32.gmra.mrb[114].mxu1 %v8400_v19  ;;  %v2003_v24 = vld [vmem:[%s14438_s1 + $0x1980] sm:$0xff]  ;;  %v2010_v25 = vld [vmem:[%s14438_s1 + $0x19b8] sm:$0xff]  ;;  %v3839_v36 = vmax.f32 %v2943_v21, 0.0  ;;  %v5238_v0 = vpop.f32.mrb[14].mxu1 }
 0x28e   : > { %v2900_v8 = vadd.f32 %v2004_v3, %v1108_v1  ;;  %v8401_v27 = vld [vmem:[%s9273_s11 + $0x2a8] sm:$0xff]  ;;  %v2899_v29 = vadd.f32 %v2003_v24, %v1107_v17  ;;  %v2906_v30 = vadd.f32 %v2010_v25, %v1114_v23  ;;  %v1039_v31 = vld [vmem:[%s14437_s0 + $0x1760] sm:$0xff]  ;;  %v1046_v32 = vld [vmem:[%s14437_s0 + $0x1798] sm:$0xff]  ;;  %5732 = vmatmul.mubr.f32.gmra.mrb[50].mxu0 %v8400_v19  ;;  %7849 = vmatprep.subr.bf16.mxu0 %v7848_v18  ;;  %v3846_v37 = vmax.f32 %v2950_v22, 0.0  ;;  %v4596_v6 = vpop.f32.mrb[15].mxu0  ;;  %v5240_v7 = vpop.f32.mrb[15].mxu1 }
 0x28f   : > { %7991 = vmatpush3.bf16.msra.mxu1 %v7990_v11  ;;  %v7850_v26 = vpack.c.bf16 %v3788_v13, %v3781_v12  ;;  %6339 = vmatprep.mubr.f32.mxu1 %v8401_v27  ;;  %v1935_v33 = vld [vmem:[%s14438_s1 + $0x1760] sm:$0xff]  ;;  %v1942_v38 = vld [vmem:[%s14438_s1 + $0x1798] sm:$0xff]  ;;  %v1129_v47 = vld [vmem:[%s14437_s0 + $0x1a30] sm:$0xff]  ;;  %6565 = vst [vmem:[%s13666_s20 + $0x188] sm:$0xff] %v4594_v63 }
 0x290   : > { %v3796_v20 = vmax.f32 %v2900_v8, 0.0  ;;  %v2831_v39 = vadd.f32 %v1935_v33, %v1039_v31  ;;  %v1122_v42 = vld [vmem:[%s14437_s0 + $0x19f8] sm:$0xff]  ;;  %5737 = vmatprep.mubr.f32.mxu0 %v8401_v27  ;;  %v3795_v44 = vmax.f32 %v2899_v29, 0.0  ;;  %v3802_v45 = vmax.f32 %v2906_v30, 0.0  ;;  %v2025_v49 = vld [vmem:[%s14438_s1 + $0x1a30] sm:$0xff]  ;;  %v8402_v50 = vld [vmem:[%s9273_s11 + $0x2a0] sm:$0xff] }
 0x291   : > { %7851 = vmatpush1.bf16.msra.mxu0 %v7850_v26  ;;  %v2838_v46 = vadd.f32 %v1942_v38, %v1046_v32  ;;  %v2018_v48 = vld [vmem:[%s14438_s1 + $0x19f8] sm:$0xff]  ;;  %6340 = vmatmul.mubr.f32.gmra.mrb[116].mxu1 %v8402_v50  ;;  %v7992_v51 = vpack.c.bf16 %v3846_v37, %v3839_v36  ;;  %v2921_v54 = vadd.f32 %v2025_v49, %v1129_v47  ;;  %v1121_v55 = vld [vmem:[%s14437_s0 + $0x19f0] sm:$0xff]  ;;  %v1128_v56 = vld [vmem:[%s14437_s0 + $0x1a28] sm:$0xff]  ;;  %v5244_v31 = vpop.f32.mrb[16].mxu1 }
 0x292   : > { %v7852_v43 = vpack.c.bf16 %v3803_v28, %v3796_v20  ;;  %v3727_v52 = vmax.f32 %v2831_v39, 0.0  ;;  %v2914_v53 = vadd.f32 %v2018_v48, %v1122_v42  ;;  %v2017_v57 = vld [vmem:[%s14438_s1 + $0x19f0] sm:$0xff]  ;;  %v7854_v58 = vpack.c.bf16 %v3802_v45, %v3795_v44  ;;  %v8403_v60 = vld [vmem:[%s9273_s11 + $0x2e8] sm:$0xff]  ;;  %v1143_v2 = vld [vmem:[%s14437_s0 + $0x1aa0] sm:$0xff]  ;;  %5738 = vmatmul.mubr.f32.gmra.mrb[52].mxu0 %v8402_v50  ;;  %6567 = vst [vmem:[%s13666_s20 + $0x198] sm:$0xff] %v5238_v0  ;;  %v4600_v39 = vpop.f32.mrb[16].mxu0 }
 0x293   : > { %v3734_v59 = vmax.f32 %v2838_v46, 0.0  ;;  %6344 = vmatprep.mubr.f32.mxu1 %v8403_v60  ;;  %v2024_v61 = vld [vmem:[%s14438_s1 + $0x1a28] sm:$0xff]  ;;  %v2913_v62 = vadd.f32 %v2017_v57, %v1121_v55  ;;  %7993 = vmatprep.subr.bf16.mxu1 %v7992_v51  ;;  %v3817_v4 = vmax.f32 %v2921_v54, 0.0  ;;  %v2039_v9 = vld [vmem:[%s14438_s1 + $0x1aa0] sm:$0xff]  ;;  %6566 = vst [vmem:[%s13666_s20 + $0x190] sm:$0xff] %v4596_v6  ;;  %6568 = vst [vmem:[%s13666_s20 + $0x1a0] sm:$0xff] %v5240_v7 }
 0x294   : > { %7853 = vmatprep.subr.bf16.mxu0 %v7852_v43  ;;  %v1136_v1 = vld [vmem:[%s14437_s0 + $0x1a68] sm:$0xff]  ;;  %v3810_v3 = vmax.f32 %v2914_v53, 0.0  ;;  %v2920_v5 = vadd.f32 %v2024_v61, %v1128_v56  ;;  %5743 = vmatprep.mubr.f32.mxu0 %v8403_v60  ;;  %v2935_v13 = vadd.f32 %v2039_v9, %v1143_v2  ;;  %v1165_v14 = vld [vmem:[%s14437_s0 + $0x1b50] sm:$0xff]  ;;  %v8404_v18 = vld [vmem:[%s9273_s11 + $0x2e0] sm:$0xff]  ;;  %6574 = vst [vmem:[%s13666_s20 + $0x1d0] sm:$0xff] %v5244_v31  ;;  %v5246_v40 = vpop.f32.mrb[17].mxu1 }
 0x295   : > { %v2032_v8 = vld [vmem:[%s14438_s1 + $0x1a68] sm:$0xff]  ;;  %7855 = vmatpush1.bf16.msra.mxu0 %v7854_v58  ;;  %v7994_v10 = vpack.c.bf16 %v3734_v59, %v3727_v52  ;;  %v3809_v11 = vmax.f32 %v2913_v62, 0.0  ;;  %v2061_v16 = vld [vmem:[%s14438_s1 + $0x1b50] sm:$0xff]  ;;  %6345 = vmatmul.mubr.f32.gmra.mrb[118].mxu1 %v8404_v18  ;;  %v1135_v22 = vld [vmem:[%s14437_s0 + $0x1a60] sm:$0xff]  ;;  %6572 = vst [vmem:[%s13666_s20 + $0x1c0] sm:$0xff] %v4600_v39  ;;  %v4602_v45 = vpop.f32.mrb[17].mxu0 }
 0x296   : > { %v2928_v12 = vadd.f32 %v2032_v8, %v1136_v1  ;;  %v1172_v15 = vld [vmem:[%s14437_s0 + $0x1b88] sm:$0xff]  ;;  %v7856_v17 = vpack.c.bf16 %v3817_v4, %v3810_v3  ;;  %v3816_v19 = vmax.f32 %v2920_v5, 0.0  ;;  %v2957_v21 = vadd.f32 %v2061_v16, %v1165_v14  ;;  %v1142_v23 = vld [vmem:[%s14437_s0 + $0x1a98] sm:$0xff]  ;;  %v2031_v28 = vld [vmem:[%s14438_s1 + $0x1a60] sm:$0xff]  ;;  %5744 = vmatmul.mubr.f32.gmra.mrb[54].mxu0 %v8404_v18  ;;  %6575 = vst [vmem:[%s13666_s20 + $0x1d8] sm:$0xff] %v5246_v40  ;;  %v5250_v63 = vpop.f32.mrb[18].mxu1 }
 0x297   : > { %v2068_v20 = vld [vmem:[%s14438_s1 + $0x1b88] sm:$0xff]  ;;  %7995 = vmatpush3.bf16.msra.mxu1 %v7994_v10  ;;  %v3831_v26 = vmax.f32 %v2935_v13, 0.0  ;;  %v2038_v29 = vld [vmem:[%s14438_s1 + $0x1a98] sm:$0xff]  ;;  %v1053_v30 = vld [vmem:[%s14437_s0 + $0x17d0] sm:$0xff]  ;;  %v2927_v34 = vadd.f32 %v2031_v28, %v1135_v22  ;;  %6573 = vst [vmem:[%s13666_s20 + $0x1c8] sm:$0xff] %v4602_v45  ;;  %v5252_v5 = vpop.f32.mrb[19].mxu1 }
 0x298   : > { %v8405_v24 = vld [vmem:[%s9273_s11 + $0x328] sm:$0xff]  ;;  %v3824_v25 = vmax.f32 %v2928_v12, 0.0  ;;  %v2964_v27 = vadd.f32 %v2068_v20, %v1172_v15  ;;  %7857 = vmatprep.subr.bf16.mxu0 %v7856_v17  ;;  %v7858_v32 = vpack.c.bf16 %v3816_v19, %v3809_v11  ;;  %v3853_v33 = vmax.f32 %v2957_v21, 0.0  ;;  %v1949_v37 = vld [vmem:[%s14438_s1 + $0x17d0] sm:$0xff]  ;;  %v1150_v46 = vld [vmem:[%s14437_s0 + $0x1ad8] sm:$0xff]  ;;  %6581 = vst [vmem:[%s13666_s20 + $0x208] sm:$0xff] %v5250_v63 }
 0x299   : > { %6349 = vmatprep.mubr.f32.mxu1 %v8405_v24  ;;  %v2934_v35 = vadd.f32 %v2038_v29, %v1142_v23  ;;  %v1060_v36 = vld [vmem:[%s14437_s0 + $0x1808] sm:$0xff]  ;;  %5749 = vmatprep.mubr.f32.mxu0 %v8405_v24  ;;  %v2845_v43 = vadd.f32 %v1949_v37, %v1053_v30  ;;  %v1157_v47 = vld [vmem:[%s14437_s0 + $0x1b10] sm:$0xff]  ;;  %v2046_v48 = vld [vmem:[%s14438_s1 + $0x1ad8] sm:$0xff]  ;;  %v3823_v50 = vmax.f32 %v2927_v34, 0.0  ;;  %v4606_v11 = vpop.f32.mrb[18].mxu0  ;;  %6582 = vst [vmem:[%s13666_s20 + $0x210] sm:$0xff] %v5252_v5 }
 0x29a   : > { %v1956_v38 = vld [vmem:[%s14438_s1 + $0x1808] sm:$0xff]  ;;  %v7860_v41 = vpack.c.bf16 %v3831_v26, %v3824_v25  ;;  %v3860_v42 = vmax.f32 %v2964_v27, 0.0  ;;  %7859 = vmatpush1.bf16.msra.mxu0 %v7858_v32  ;;  %v8406_v49 = vld [vmem:[%s9273_s11 + $0x320] sm:$0xff]  ;;  %v2053_v52 = vld [vmem:[%s14438_s1 + $0x1b10] sm:$0xff]  ;;  %v2942_v53 = vadd.f32 %v2046_v48, %v1150_v46  ;;  %6579 = vst [vmem:[%s13666_s20 + $0x1f8] sm:$0xff] %v4606_v11  ;;  %v4608_v20 = vpop.f32.mrb[19].mxu0 }
 0x29b   : > { %v2852_v44 = vadd.f32 %v1956_v38, %v1060_v36  ;;  %6350 = vmatmul.mubr.f32.gmra.mrb[120].mxu1 %v8406_v49  ;;  %v3830_v51 = vmax.f32 %v2934_v35, 0.0  ;;  %v1149_v54 = vld [vmem:[%s14437_s0 + $0x1ad0] sm:$0xff]  ;;  %v1156_v55 = vld [vmem:[%s14437_s0 + $0x1b08] sm:$0xff]  ;;  %v3741_v57 = vmax.f32 %v2845_v43, 0.0  ;;  %v2949_v60 = vadd.f32 %v2053_v52, %v1157_v47  ;;  %5750 = vmatmul.mubr.f32.gmra.mrb[56].mxu0 %v8406_v49  ;;  %v1171_v6 = vld [vmem:[%s14437_s0 + $0x1b80] sm:$0xff]  ;;  %6580 = vst [vmem:[%s13666_s20 + $0x200] sm:$0xff] %v4608_v20 }
 0x29c   : > { %7861 = vmatprep.subr.bf16.mxu0 %v7860_v41  ;;  %v7996_v56 = vpack.c.bf16 %v3860_v42, %v3853_v33  ;;  %v8407_v59 = vld [vmem:[%s9273_s11 + $0x368] sm:$0xff]  ;;  %v2045_v61 = vld [vmem:[%s14438_s1 + $0x1ad0] sm:$0xff]  ;;  %v3838_v2 = vmax.f32 %v2942_v53, 0.0  ;;  %v2067_v8 = vld [vmem:[%s14438_s1 + $0x1b80] sm:$0xff]  ;;  %v5256_v33 = vpop.f32.mrb[20].mxu1  ;;  %v4612_v46 = vpop.f32.mrb[20].mxu0 }
 0x29d   : > { %v3748_v58 = vmax.f32 %v2852_v44, 0.0  ;;  %6354 = vmatprep.mubr.f32.mxu1 %v8407_v59  ;;  %v2052_v62 = vld [vmem:[%s14438_s1 + $0x1b08] sm:$0xff]  ;;  %v7862_v1 = vpack.c.bf16 %v3830_v51, %v3823_v50  ;;  %v2941_v3 = vadd.f32 %v2045_v61, %v1149_v54  ;;  %5755 = vmatprep.mubr.f32.mxu0 %v8407_v59  ;;  %v3845_v10 = vmax.f32 %v2949_v60, 0.0  ;;  %v1179_v14 = vld [vmem:[%s14437_s0 + $0x1bc0] sm:$0xff]  ;;  %v1186_v15 = vld [vmem:[%s14437_s0 + $0x1bf8] sm:$0xff]  ;;  %6588 = vst [vmem:[%s13666_s20 + $0x240] sm:$0xff] %v5256_v33 }
 0x29e   : > { %v1164_v0 = vld [vmem:[%s14437_s0 + $0x1b48] sm:$0xff]  ;;  %v2948_v4 = vadd.f32 %v2052_v62, %v1156_v55  ;;  %7997 = vmatprep.subr.bf16.mxu1 %v7996_v56  ;;  %v2963_v13 = vadd.f32 %v2067_v8, %v1171_v6  ;;  %v2075_v16 = vld [vmem:[%s14438_s1 + $0x1bc0] sm:$0xff]  ;;  %v2082_v21 = vld [vmem:[%s14438_s1 + $0x1bf8] sm:$0xff]  ;;  %v5258_v41 = vpop.f32.mrb[21].mxu1  ;;  %6586 = vst [vmem:[%s13666_s20 + $0x230] sm:$0xff] %v4612_v46  ;;  %v4614_v53 = vpop.f32.mrb[21].mxu0 }
 0x29f   : > { %v2060_v7 = vld [vmem:[%s14438_s1 + $0x1b48] sm:$0xff]  ;;  %v7998_v9 = vpack.c.bf16 %v3748_v58, %v3741_v57  ;;  %7863 = vmatpush1.bf16.msra.mxu0 %v7862_v1  ;;  %v8408_v17 = vld [vmem:[%s9273_s11 + $0x360] sm:$0xff]  ;;  %v3837_v18 = vmax.f32 %v2941_v3, 0.0  ;;  %v2971_v22 = vadd.f32 %v2075_v16, %v1179_v14  ;;  %v1170_v24 = vld [vmem:[%s14437_s0 + $0x1b78] sm:$0xff]  ;;  %v7864_v25 = vpack.c.bf16 %v3845_v10, %v3838_v2  ;;  %6589 = vst [vmem:[%s13666_s20 + $0x248] sm:$0xff] %v5258_v41  ;;  %v5262_v1 = vpop.f32.mrb[22].mxu1 }
 0x2a0   : > { %v2956_v12 = vadd.f32 %v2060_v7, %v1164_v0  ;;  %6355 = vmatmul.mubr.f32.gmra.mrb[122].mxu1 %v8408_v17  ;;  %v3844_v19 = vmax.f32 %v2948_v4, 0.0  ;;  %v1163_v23 = vld [vmem:[%s14437_s0 + $0x1b40] sm:$0xff]  ;;  %v8409_v26 = vld [vmem:[%s9273_s11 + $0x3a8] sm:$0xff]  ;;  %v3859_v28 = vmax.f32 %v2963_v13, 0.0  ;;  %v2978_v29 = vadd.f32 %v2082_v21, %v1186_v15  ;;  %v2066_v31 = vld [vmem:[%s14438_s1 + $0x1b78] sm:$0xff]  ;;  %5756 = vmatmul.mubr.f32.gmra.mrb[58].mxu0 %v8408_v17  ;;  %6587 = vst [vmem:[%s13666_s20 + $0x238] sm:$0xff] %v4614_v53 }
 0x2a1   : > { %7999 = vmatpush3.bf16.msra.mxu1 %v7998_v9  ;;  %6359 = vmatprep.mubr.f32.mxu1 %v8409_v26  ;;  %v2059_v30 = vld [vmem:[%s14438_s1 + $0x1b40] sm:$0xff]  ;;  %v3867_v35 = vmax.f32 %v2971_v22, 0.0  ;;  %v2962_v37 = vadd.f32 %v2066_v31, %v1170_v24  ;;  %v1074_v38 = vld [vmem:[%s14437_s0 + $0x1878] sm:$0xff]  ;;  %v1185_v48 = vld [vmem:[%s14437_s0 + $0x1bf0] sm:$0xff]  ;;  %6595 = vst [vmem:[%s13666_s20 + $0x278] sm:$0xff] %v5262_v1  ;;  %v5264_v6 = vpop.f32.mrb[23].mxu1 }
 0x2a2   : > { %v3852_v27 = vmax.f32 %v2956_v12, 0.0  ;;  %v1067_v32 = vld [vmem:[%s14437_s0 + $0x1840] sm:$0xff]  ;;  %v7866_v34 = vpack.c.bf16 %v3844_v19, %v3837_v18  ;;  %v2955_v36 = vadd.f32 %v2059_v30, %v1163_v23  ;;  %v1970_v40 = vld [vmem:[%s14438_s1 + $0x1878] sm:$0xff]  ;;  %7865 = vmatprep.subr.bf16.mxu0 %v7864_v25  ;;  %5761 = vmatprep.mubr.f32.mxu0 %v8409_v26  ;;  %v3874_v43 = vmax.f32 %v2978_v29, 0.0  ;;  %v2081_v54 = vld [vmem:[%s14438_s1 + $0x1bf0] sm:$0xff]  ;;  %6596 = vst [vmem:[%s13666_s20 + $0x280] sm:$0xff] %v5264_v6 }
 0x2a3   : > { %v1963_v39 = vld [vmem:[%s14438_s1 + $0x1840] sm:$0xff]  ;;  %v2866_v45 = vadd.f32 %v1970_v40, %v1074_v38  ;;  %v1178_v47 = vld [vmem:[%s14437_s0 + $0x1bb8] sm:$0xff]  ;;  %v3858_v52 = vmax.f32 %v2962_v37, 0.0  ;;  %v1177_v56 = vld [vmem:[%s14437_s0 + $0x1bb0] sm:$0xff]  ;;  %v2977_v62 = vadd.f32 %v2081_v54, %v1185_v48  ;;  %v4618_v12 = vpop.f32.mrb[22].mxu0  ;;  %v5268_v16 = vpop.f32.mrb[24].mxu1 }
 0x2a4   : > { %v7868_v42 = vpack.c.bf16 %v3859_v28, %v3852_v27  ;;  %v2859_v44 = vadd.f32 %v1963_v39, %v1067_v32  ;;  %v2074_v49 = vld [vmem:[%s14438_s1 + $0x1bb8] sm:$0xff]  ;;  %7867 = vmatpush1.bf16.msra.mxu0 %v7866_v34  ;;  %v8410_v50 = vld [vmem:[%s9273_s11 + $0x3a0] sm:$0xff]  ;;  %v3851_v51 = vmax.f32 %v2955_v36, 0.0  ;;  %v1184_v57 = vld [vmem:[%s14437_s0 + $0x1be8] sm:$0xff]  ;;  %v8000_v58 = vpack.c.bf16 %v3874_v43, %v3867_v35  ;;  %6593 = vst [vmem:[%s13666_s20 + $0x268] sm:$0xff] %v4618_v12  ;;  %v4620_v15 = vpop.f32.mrb[23].mxu0 }
 0x2a5   : > { %6360 = vmatmul.mubr.f32.gmra.mrb[124].mxu1 %v8410_v50  ;;  %v2970_v55 = vadd.f32 %v2074_v49, %v1178_v47  ;;  %v3762_v60 = vmax.f32 %v2866_v45, 0.0  ;;  %v8411_v61 = vld [vmem:[%s9273_s11 + $0x3e8] sm:$0xff]  ;;  %v2073_v63 = vld [vmem:[%s14438_s1 + $0x1bb0] sm:$0xff]  ;;  %5762 = vmatmul.mubr.f32.gmra.mrb[60].mxu0 %v8410_v50  ;;  %v3873_v8 = vmax.f32 %v2977_v62, 0.0  ;;  %v8412_v9 = vld [vmem:[%s9273_s11 + $0x3e0] sm:$0xff]  ;;  %6594 = vst [vmem:[%s13666_s20 + $0x270] sm:$0xff] %v4620_v15 }
 0x2a6   : > { %7869 = vmatprep.subr.bf16.mxu0 %v7868_v42  ;;  %v3755_v59 = vmax.f32 %v2859_v44, 0.0  ;;  %6364 = vmatprep.mubr.f32.mxu1 %v8411_v61  ;;  %v2080_v0 = vld [vmem:[%s14438_s1 + $0x1be8] sm:$0xff]  ;;  %v7870_v2 = vpack.c.bf16 %v3858_v52, %v3851_v51  ;;  %v2969_v4 = vadd.f32 %v2073_v63, %v1177_v56  ;;  %v8413_v14 = vld [vmem:[%s9273_s11 + $0x38] sm:$0xff]  ;;  %6602 = vst [vmem:[%s13666_s20 + $0x2b0] sm:$0xff] %v5268_v16  ;;  %v5270_v18 = vpop.f32.mrb[25].mxu1  ;;  %v8414_v19 = vld [vmem:[%s9273_s11 + $0x30] sm:$0xff] }
 0x2a7   : > { %v3866_v3 = vmax.f32 %v2970_v55, 0.0  ;;  %v2976_v5 = vadd.f32 %v2080_v0, %v1184_v57  ;;  %8001 = vmatprep.subr.bf16.mxu1 %v8000_v58  ;;  %5767 = vmatprep.mubr.f32.mxu0 %v8411_v61  ;;  %6603 = vst [vmem:[%s13666_s20 + $0x2b8] sm:$0xff] %v5270_v18  ;;  %v4624_v20 = vpop.f32.mrb[24].mxu0  ;;  %v8415_v21 = vld [vmem:[%s9273_s11 + $0x78] sm:$0xff]  ;;  %v5274_v22 = vpop.f32.mrb[26].mxu1  ;;  %v8416_v25 = vld [vmem:[%s9273_s11 + $0x70] sm:$0xff] }
 0x2a8   : > { %v8002_v7 = vpack.c.bf16 %v3762_v60, %v3755_v59  ;;  %7871 = vmatpush1.bf16.msra.mxu0 %v7870_v2  ;;  %v3865_v10 = vmax.f32 %v2969_v4, 0.0  ;;  %6600 = vst [vmem:[%s13666_s20 + $0x2a0] sm:$0xff] %v4624_v20  ;;  %v4626_v23 = vpop.f32.mrb[25].mxu0  ;;  %6609 = vst [vmem:[%s13666_s20 + $0x2e8] sm:$0xff] %v5274_v22  ;;  %v5276_v24 = vpop.f32.mrb[27].mxu1  ;;  %v8417_v27 = vld [vmem:[%s9273_s11 + $0xb8] sm:$0xff] }
 0x2a9   : > { %6365 = vmatmul.mubr.f32.gmra.mrb[126].mxu1 %v8412_v9  ;;  %v3872_v11 = vmax.f32 %v2976_v5, 0.0  ;;  %v7872_v13 = vpack.c.bf16 %v3873_v8, %v3866_v3  ;;  %5768 = vmatmul.mubr.f32.gmra.mrb[62].mxu0 %v8412_v9  ;;  %6601 = vst [vmem:[%s13666_s20 + $0x2a8] sm:$0xff] %v4626_v23  ;;  %6610 = vst [vmem:[%s13666_s20 + $0x2f0] sm:$0xff] %v5276_v24  ;;  %v4630_v26 = vpop.f32.mrb[26].mxu0  ;;  %v5280_v28 = vpop.f32.mrb[28].mxu1  ;;  %v8418_v31 = vld [vmem:[%s9273_s11 + $0xb0] sm:$0xff] }
 0x2aa   : > { %8003 = vmatpush3.bf16.msra.mxu1 %v8002_v7  ;;  %6434 = vmatprep.mubr.f32.mxu1 %v8413_v14  ;;  %6607 = vst [vmem:[%s13666_s20 + $0x2d8] sm:$0xff] %v4630_v26  ;;  %v4632_v29 = vpop.f32.mrb[27].mxu0  ;;  %6616 = vst [vmem:[%s13666_s20 + $0x320] sm:$0xff] %v5280_v28  ;;  %v5282_v30 = vpop.f32.mrb[29].mxu1  ;;  %v8419_v32 = vld [vmem:[%s9273_s11 + $0xf8] sm:$0xff]  ;;  %v8420_v37 = vld [vmem:[%s9273_s11 + $0xf0] sm:$0xff] }
 0x2ab   : > { %v7874_v17 = vpack.c.bf16 %v3872_v11, %v3865_v10  ;;  %7873 = vmatprep.subr.bf16.mxu0 %v7872_v13  ;;  %5838 = vmatprep.mubr.f32.mxu0 %v8413_v14  ;;  %6608 = vst [vmem:[%s13666_s20 + $0x2e0] sm:$0xff] %v4632_v29  ;;  %6617 = vst [vmem:[%s13666_s20 + $0x328] sm:$0xff] %v5282_v30  ;;  %v4636_v33 = vpop.f32.mrb[28].mxu0  ;;  %v5286_v34 = vpop.f32.mrb[30].mxu1  ;;  %v8421_v38 = vld [vmem:[%s9273_s11 + $0x138] sm:$0xff]  ;;  %v8422_v41 = vld [vmem:[%s9273_s11 + $0x130] sm:$0xff] }
 0x2ac   : > { %6614 = vst [vmem:[%s13666_s20 + $0x310] sm:$0xff] %v4636_v33  ;;  %v4638_v35 = vpop.f32.mrb[29].mxu0  ;;  %6623 = vst [vmem:[%s13666_s20 + $0x358] sm:$0xff] %v5286_v34  ;;  %v5288_v36 = vpop.f32.mrb[31].mxu1  ;;  %v8423_v42 = vld [vmem:[%s9273_s11 + $0x178] sm:$0xff]  ;;  %v8424_v46 = vld [vmem:[%s9273_s11 + $0x170] sm:$0xff] }
 0x2ad   : > { %7875 = vmatpush1.bf16.msra.mxu0 %v7874_v17  ;;  %6435 = vmatmul.mubr.f32.vlgmr.msra.gmra.mrb[128].mxu1 %v8414_v19  ;;  %6615 = vst [vmem:[%s13666_s20 + $0x318] sm:$0xff] %v4638_v35  ;;  %6624 = vst [vmem:[%s13666_s20 + $0x360] sm:$0xff] %v5288_v36  ;;  %v4642_v39 = vpop.f32.mrb[30].mxu0  ;;  %v6820_v43 = vpop.f32.mrb[32].mxu1  ;;  %v8425_v47 = vld [vmem:[%s9273_s11 + $0x1b8] sm:$0xff]  ;;  %v8426_v50 = vld [vmem:[%s9273_s11 + $0x1b0] sm:$0xff] }
 0x2ae   : > { %6439 = vmatprep.mubr.f32.mxu1 %v8415_v21  ;;  %6621 = vst [vmem:[%s13666_s20 + $0x348] sm:$0xff] %v4642_v39  ;;  %v4644_v40 = vpop.f32.mrb[31].mxu0  ;;  %v6821_v44 = vpop.f32.mrb[33].mxu1  ;;  %v8427_v52 = vld [vmem:[%s9273_s11 + $0x1f8] sm:$0xff]  ;;  %v8428_v55 = vld [vmem:[%s9273_s11 + $0x1f0] sm:$0xff] }
 0x2af   : > { %6622 = vst [vmem:[%s13666_s20 + $0x350] sm:$0xff] %v4644_v40  ;;  %v14211_v45 = vadd.f32 %v6821_v44, %v6820_v43  ;;  %v6823_v48 = vpop.f32.mrb[34].mxu1  ;;  %v8429_v57 = vld [vmem:[%s9273_s11 + $0x238] sm:$0xff]  ;;  %v8430_v60 = vld [vmem:[%s9273_s11 + $0x230] sm:$0xff] }
 0x2b0   : > { %5839 = vmatmul.mubr.f32.vlgmr.msra.gmra.mrb[32].mxu0 %v8414_v19  ;;  %v6824_v49 = vpop.f32.mrb[35].mxu1  ;;  %v8431_v62 = vld [vmem:[%s9273_s11 + $0x278] sm:$0xff]  ;;  %v8432_v1 = vld [vmem:[%s9273_s11 + $0x270] sm:$0xff] }
 0x2b1   : > { %5844 = vmatprep.mubr.f32.mxu0 %v8415_v21  ;;  %6440 = vmatmul.mubr.f32.gmra.mrb[130].mxu1 %v8416_v25  ;;  %v14216_v51 = vadd.f32 %v6824_v49, %v6823_v48  ;;  %v6826_v53 = vpop.f32.mrb[36].mxu1  ;;  %v8433_v3 = vld [vmem:[%s9273_s11 + $0x2b8] sm:$0xff]  ;;  %v8434_v6 = vld [vmem:[%s9273_s11 + $0x2b0] sm:$0xff] }
 0x2b2   : > { %6444 = vmatprep.mubr.f32.mxu1 %v8417_v27  ;;  %v6827_v54 = vpop.f32.mrb[37].mxu1  ;;  %v8435_v8 = vld [vmem:[%s9273_s11 + $0x2f8] sm:$0xff]  ;;  %v8436_v11 = vld [vmem:[%s9273_s11 + $0x2f0] sm:$0xff] }
 0x2b3   : > { %v14220_v56 = vadd.f32 %v6827_v54, %v6826_v53  ;;  %v6829_v58 = vpop.f32.mrb[38].mxu1  ;;  %v8437_v13 = vld [vmem:[%s9273_s11 + $0x338] sm:$0xff]  ;;  %v8438_v16 = vld [vmem:[%s9273_s11 + $0x330] sm:$0xff] }
 0x2b4   : > { %5845 = vmatmul.mubr.f32.gmra.mrb[34].mxu0 %v8416_v25  ;;  %v6830_v59 = vpop.f32.mrb[39].mxu1  ;;  %v8439_v18 = vld [vmem:[%s9273_s11 + $0x378] sm:$0xff]  ;;  %v8440_v21 = vld [vmem:[%s9273_s11 + $0x370] sm:$0xff] }
 0x2b5   : > { %5850 = vmatprep.mubr.f32.mxu0 %v8417_v27  ;;  %6445 = vmatmul.mubr.f32.gmra.mrb[132].mxu1 %v8418_v31  ;;  %v14224_v61 = vadd.f32 %v6830_v59, %v6829_v58  ;;  %v6832_v63 = vpop.f32.mrb[40].mxu1  ;;  %v8441_v23 = vld [vmem:[%s9273_s11 + $0x3b8] sm:$0xff]  ;;  %v8442_v26 = vld [vmem:[%s9273_s11 + $0x3b0] sm:$0xff] }
 0x2b6   : > { %6449 = vmatprep.mubr.f32.mxu1 %v8419_v32  ;;  %v6833_v0 = vpop.f32.mrb[41].mxu1  ;;  %v8443_v28 = vld [vmem:[%s9273_s11 + $0x3f8] sm:$0xff] }
 0x2b7   : > { %v14228_v2 = vadd.f32 %v6833_v0, %v6832_v63 }
 0x2b8   : > { %5851 = vmatmul.mubr.f32.gmra.mrb[36].mxu0 %v8418_v31  ;;  %v8444_v31 = vld [vmem:[%s9273_s11 + $0x3f0] sm:$0xff] }
 0x2b9   : > { %5856 = vmatprep.mubr.f32.mxu0 %v8419_v32  ;;  %6450 = vmatmul.mubr.f32.gmra.mrb[134].mxu1 %v8420_v37  ;;  %v6835_v4 = vpop.f32.mrb[42].mxu1 }
 0x2ba   : > { %6454 = vmatprep.mubr.f32.mxu1 %v8421_v38  ;;  %v6836_v5 = vpop.f32.mrb[43].mxu1 }
 0x2bb   : > { %v14232_v7 = vadd.f32 %v6836_v5, %v6835_v4 }
 0x2bc   : > { %5857 = vmatmul.mubr.f32.gmra.mrb[38].mxu0 %v8420_v37 }
 0x2bd   : > { %5862 = vmatprep.mubr.f32.mxu0 %v8421_v38  ;;  %6455 = vmatmul.mubr.f32.gmra.mrb[136].mxu1 %v8422_v41  ;;  %v6838_v9 = vpop.f32.mrb[44].mxu1 }
 0x2be   : > { %6459 = vmatprep.mubr.f32.mxu1 %v8423_v42  ;;  %v6839_v10 = vpop.f32.mrb[45].mxu1 }
 0x2bf   : > { %v14236_v12 = vadd.f32 %v6839_v10, %v6838_v9 }
 0x2c0   : > { %5863 = vmatmul.mubr.f32.gmra.mrb[40].mxu0 %v8422_v41 }
 0x2c1   : > { %5868 = vmatprep.mubr.f32.mxu0 %v8423_v42  ;;  %6460 = vmatmul.mubr.f32.gmra.mrb[138].mxu1 %v8424_v46  ;;  %v6841_v14 = vpop.f32.mrb[46].mxu1 }
 0x2c2   : > { %6464 = vmatprep.mubr.f32.mxu1 %v8425_v47  ;;  %v6842_v15 = vpop.f32.mrb[47].mxu1 }
 0x2c3   : > { %v14240_v17 = vadd.f32 %v6842_v15, %v6841_v14 }
 0x2c4   : > { %5869 = vmatmul.mubr.f32.gmra.mrb[42].mxu0 %v8424_v46 }
 0x2c5   : > { %5874 = vmatprep.mubr.f32.mxu0 %v8425_v47  ;;  %6465 = vmatmul.mubr.f32.gmra.mrb[140].mxu1 %v8426_v50  ;;  %v6844_v19 = vpop.f32.mrb[48].mxu1 }
 0x2c6   : > { %6469 = vmatprep.mubr.f32.mxu1 %v8427_v52  ;;  %v6845_v20 = vpop.f32.mrb[49].mxu1 }
 0x2c7   : > { %v14244_v22 = vadd.f32 %v6845_v20, %v6844_v19 }
 0x2c8   : > { %5875 = vmatmul.mubr.f32.gmra.mrb[44].mxu0 %v8426_v50 }
 0x2c9   : > { %5880 = vmatprep.mubr.f32.mxu0 %v8427_v52  ;;  %6470 = vmatmul.mubr.f32.gmra.mrb[142].mxu1 %v8428_v55 }
 0x2ca   : > { %6474 = vmatprep.mubr.f32.mxu1 %v8429_v57 }
 0x2cb   : > { %v6847_v24 = vpop.f32.mrb[50].mxu1 }
 0x2cc   : > { %5881 = vmatmul.mubr.f32.gmra.mrb[46].mxu0 %v8428_v55  ;;  %v6848_v25 = vpop.f32.mrb[51].mxu1 }
 0x2cd   : > { %5886 = vmatprep.mubr.f32.mxu0 %v8429_v57  ;;  %6475 = vmatmul.mubr.f32.gmra.mrb[144].mxu1 %v8430_v60  ;;  %v14248_v27 = vadd.f32 %v6848_v25, %v6847_v24 }
 0x2ce   : > { %6479 = vmatprep.mubr.f32.mxu1 %v8431_v62 }
 0x2cf   : > { %v6850_v29 = vpop.f32.mrb[52].mxu1 }
 0x2d0   : > { %5887 = vmatmul.mubr.f32.gmra.mrb[48].mxu0 %v8430_v60  ;;  %v6851_v30 = vpop.f32.mrb[53].mxu1 }
 0x2d1   : > { %5892 = vmatprep.mubr.f32.mxu0 %v8431_v62  ;;  %6480 = vmatmul.mubr.f32.gmra.mrb[146].mxu1 %v8432_v1  ;;  %v6852_v32 = vadd.f32 %v6851_v30, %v6850_v29 }
 0x2d2   : > { %6484 = vmatprep.mubr.f32.mxu1 %v8433_v3 }
 0x2d4   : > { %5893 = vmatmul.mubr.f32.gmra.mrb[50].mxu0 %v8432_v1  ;;  %v6853_v33 = vpop.f32.mrb[54].mxu1 }
 0x2d5   : > { %5898 = vmatprep.mubr.f32.mxu0 %v8433_v3  ;;  %6485 = vmatmul.mubr.f32.gmra.mrb[148].mxu1 %v8434_v6  ;;  %v6854_v34 = vpop.f32.mrb[55].mxu1 }
 0x2d6   : > { %6489 = vmatprep.mubr.f32.mxu1 %v8435_v8  ;;  %v6855_v35 = vadd.f32 %v6854_v34, %v6853_v33 }
 0x2d8   : > { %5899 = vmatmul.mubr.f32.gmra.mrb[52].mxu0 %v8434_v6  ;;  %v6856_v36 = vpop.f32.mrb[56].mxu1 }
 0x2d9   : > { %5904 = vmatprep.mubr.f32.mxu0 %v8435_v8  ;;  %6490 = vmatmul.mubr.f32.gmra.mrb[150].mxu1 %v8436_v11  ;;  %v6857_v37 = vpop.f32.mrb[57].mxu1 }
 0x2da   : > { %6494 = vmatprep.mubr.f32.mxu1 %v8437_v13  ;;  %v6858_v38 = vadd.f32 %v6857_v37, %v6856_v36 }
 0x2dc   : > { %5905 = vmatmul.mubr.f32.gmra.mrb[54].mxu0 %v8436_v11 }
 0x2dd   : > { %5910 = vmatprep.mubr.f32.mxu0 %v8437_v13  ;;  %6495 = vmatmul.mubr.f32.gmra.mrb[152].mxu1 %v8438_v16 }
 0x2de   : > { %6499 = vmatprep.mubr.f32.mxu1 %v8439_v18  ;;  %v6859_v39 = vpop.f32.mrb[58].mxu1 }
 0x2df   : > { %v6860_v40 = vpop.f32.mrb[59].mxu1 }
 0x2e0   : > { %5911 = vmatmul.mubr.f32.gmra.mrb[56].mxu0 %v8438_v16  ;;  %v6861_v41 = vadd.f32 %v6860_v40, %v6859_v39 }
 0x2e1   : > { %5916 = vmatprep.mubr.f32.mxu0 %v8439_v18  ;;  %6500 = vmatmul.mubr.f32.gmra.mrb[154].mxu1 %v8440_v21 }
 0x2e2   : > { %6504 = vmatprep.mubr.f32.mxu1 %v8441_v23  ;;  %v6862_v42 = vpop.f32.mrb[60].mxu1 }
 0x2e3   : > { %v6863_v43 = vpop.f32.mrb[61].mxu1 }
 0x2e4   : > { %5917 = vmatmul.mubr.f32.gmra.mrb[58].mxu0 %v8440_v21  ;;  %v14252_v44 = vadd.f32 %v6863_v43, %v6862_v42 }
 0x2e5   : > { %5922 = vmatprep.mubr.f32.mxu0 %v8441_v23  ;;  %6505 = vmatmul.mubr.f32.gmra.mrb[156].mxu1 %v8442_v26 }
 0x2e6   : > { %6509 = vmatprep.mubr.f32.mxu1 %v8443_v28  ;;  %v6865_v46 = vpop.f32.mrb[62].mxu1 }
 0x2e7   : > { %v6866_v47 = vpop.f32.mrb[63].mxu1 }
 0x2e8   : > { %5923 = vmatmul.mubr.f32.gmra.mrb[60].mxu0 %v8442_v26  ;;  %v14254_v48 = vadd.f32 %v6866_v47, %v6865_v46 }
 0x2e9   : > { %5928 = vmatprep.mubr.f32.mxu0 %v8443_v28  ;;  %6510 = vmatmul.mubr.f32.gmra.mrb[158].mxu1 %v8444_v31 }
 0x2ec   : > { %5929 = vmatmul.mubr.f32.gmra.mrb[62].mxu0 %v8444_v31 }
 0x2ed   : > { %v6900_v49 = vpop.f32.mrb[64].mxu1 }
 0x2ee   : > { %v6901_v50 = vpop.f32.mrb[65].mxu1 }
 0x2ef   : > { %v6902_v52 = vadd.f32 %v6901_v50, %v6900_v49 }
 0x2f1   : > { %v14257_v53 = vadd.f32 %v6902_v52, %v14211_v45  ;;  %v6903_v54 = vpop.f32.mrb[66].mxu1 }
 0x2f2   : > { %v6904_v55 = vpop.f32.mrb[67].mxu1 }
 0x2f3   : > { %v6905_v57 = vadd.f32 %v6904_v55, %v6903_v54 }
 0x2f5   : > { %v14260_v58 = vadd.f32 %v6905_v57, %v14216_v51  ;;  %v6906_v59 = vpop.f32.mrb[68].mxu1 }
 0x2f6   : > { %v6907_v60 = vpop.f32.mrb[69].mxu1 }
 0x2f7   : > { %v6908_v62 = vadd.f32 %v6907_v60, %v6906_v59 }
 0x2f9   : > { %v14263_v63 = vadd.f32 %v6908_v62, %v14220_v56 }
 0x2fa   : > { %v6909_v0 = vpop.f32.mrb[70].mxu1 }
 0x2fb   : > { %v6910_v1 = vpop.f32.mrb[71].mxu1 }
 0x2fc   : > { %v6911_v3 = vadd.f32 %v6910_v1, %v6909_v0 }
 0x2fe   : > { %v14266_v4 = vadd.f32 %v6911_v3, %v14224_v61 }
 0x300   : > { %v6912_v45 = vpop.f32.mrb[72].mxu1 }
 0x301   : > { %v6913_v5 = vpop.f32.mrb[73].mxu1 }
 0x302   : > { %v6914_v6 = vadd.f32 %v6913_v5, %v6912_v45 }
 0x304   : > { %v14269_v8 = vadd.f32 %v6914_v6, %v14228_v2  ;;  %v6915_v51 = vpop.f32.mrb[74].mxu1 }
 0x305   : > { %v6916_v9 = vpop.f32.mrb[75].mxu1 }
 0x306   : > { %v6917_v10 = vadd.f32 %v6916_v9, %v6915_v51 }
 0x308   : > { %v14272_v11 = vadd.f32 %v6917_v10, %v14232_v7  ;;  %v6918_v56 = vpop.f32.mrb[76].mxu1 }
 0x309   : > { %v6919_v13 = vpop.f32.mrb[77].mxu1 }
 0x30a   : > { %v6920_v14 = vadd.f32 %v6919_v13, %v6918_v56 }
 0x30c   : > { %v14275_v15 = vadd.f32 %v6920_v14, %v14236_v12 }
 0x30d   : > { %v6921_v61 = vpop.f32.mrb[78].mxu1 }
 0x30e   : > { %v6922_v16 = vpop.f32.mrb[79].mxu1 }
 0x30f   : > { %v6923_v18 = vadd.f32 %v6922_v16, %v6921_v61 }
 0x311   : > { %v14278_v19 = vadd.f32 %v6923_v18, %v14240_v17 }
 0x313   : > { %v6924_v2 = vpop.f32.mrb[80].mxu1 }
 0x314   : > { %v6925_v20 = vpop.f32.mrb[81].mxu1 }
 0x315   : > { %v6926_v21 = vadd.f32 %v6925_v20, %v6924_v2 }
 0x317   : > { %v14281_v23 = vadd.f32 %v6926_v21, %v14244_v22  ;;  %v6927_v7 = vpop.f32.mrb[82].mxu1 }
 0x318   : > { %v6928_v24 = vpop.f32.mrb[83].mxu1 }
 0x319   : > { %v6929_v25 = vadd.f32 %v6928_v24, %v6927_v7 }
 0x31b   : > { %v14284_v26 = vadd.f32 %v6929_v25, %v14248_v27  ;;  %v6930_v12 = vpop.f32.mrb[84].mxu1 }
 0x31c   : > { %v6931_v28 = vpop.f32.mrb[85].mxu1 }
 0x31d   : > { %v6932_v29 = vadd.f32 %v6931_v28, %v6930_v12 }
 0x31f   : > { %v14286_v30 = vadd.f32 %v6932_v29, %v6852_v32  ;;  %v6933_v31 = vpop.f32.mrb[86].mxu1 }
 0x320   : > { %v6934_v17 = vpop.f32.mrb[87].mxu1 }
 0x321   : > { %v6935_v33 = vadd.f32 %v6934_v17, %v6933_v31 }
 0x323   : > { %v14288_v34 = vadd.f32 %v6935_v33, %v6855_v35 }
 0x325   : > { %v6936_v36 = vpop.f32.mrb[88].mxu1 }
 0x326   : > { %v6937_v37 = vpop.f32.mrb[89].mxu1 }
 0x327   : > { %v6938_v22 = vadd.f32 %v6937_v37, %v6936_v36 }
 0x329   : > { %v14290_v39 = vadd.f32 %v6938_v22, %v6858_v38  ;;  %v6939_v40 = vpop.f32.mrb[90].mxu1 }
 0x32a   : > { %v6940_v42 = vpop.f32.mrb[91].mxu1 }
 0x32b   : > { %v6941_v43 = vadd.f32 %v6940_v42, %v6939_v40 }
 0x32d   : > { %v14292_v27 = vadd.f32 %v6941_v43, %v6861_v41  ;;  %v6942_v46 = vpop.f32.mrb[92].mxu1 }
 0x32e   : > { %v6943_v47 = vpop.f32.mrb[93].mxu1 }
 0x32f   : > { %v6944_v49 = vadd.f32 %v6943_v47, %v6942_v46 }
 0x331   : > { %v14295_v32 = vadd.f32 %v6944_v49, %v14252_v44 }
 0x332   : > { %v6945_v50 = vpop.f32.mrb[94].mxu1 }
 0x333   : > { %v6946_v52 = vpop.f32.mrb[95].mxu1 }
 0x334   : > { %v6947_v35 = vadd.f32 %v6946_v52, %v6945_v50 }
 0x336   : > { %v14298_v54 = vadd.f32 %v6947_v35, %v14254_v48  ;;  %v6980_v55 = vpop.f32.mrb[96].mxu1 }
 0x337   : > { %v6981_v38 = vpop.f32.mrb[97].mxu1 }
 0x338   : > { %v6982_v57 = vadd.f32 %v6981_v38, %v6980_v55 }
 0x33a   : > { %v14301_v59 = vadd.f32 %v6982_v57, %v14257_v53 }
 0x33c   : > { %v6983_v41 = vpop.f32.mrb[98].mxu1 }
 0x33d   : > { %v6984_v60 = vpop.f32.mrb[99].mxu1 }
 0x33e   : > { %v6985_v62 = vadd.f32 %v6984_v60, %v6983_v41 }
 0x340   : > { %v14304_v0 = vadd.f32 %v6985_v62, %v14260_v58  ;;  %v6986_v44 = vpop.f32.mrb[100].mxu1 }
 0x341   : > { %v6987_v1 = vpop.f32.mrb[101].mxu1 }
 0x342   : > { %v6988_v3 = vadd.f32 %v6987_v1, %v6986_v44 }
 0x344   : > { %v14307_v45 = vadd.f32 %v6988_v3, %v14263_v63  ;;  %v6989_v48 = vpop.f32.mrb[102].mxu1 }
 0x345   : > { %v6990_v5 = vpop.f32.mrb[103].mxu1 }
 0x346   : > { %v6991_v6 = vadd.f32 %v6990_v5, %v6989_v48 }
 0x348   : > { %v14310_v51 = vadd.f32 %v6991_v6, %v14266_v4  ;;  %v6992_v53 = vpop.f32.mrb[104].mxu1 }
 0x349   : > { %v6993_v9 = vpop.f32.mrb[105].mxu1 }
 0x34a   : > { %v6994_v10 = vadd.f32 %v6993_v9, %v6992_v53 }
 0x34c   : > { %v14313_v56 = vadd.f32 %v6994_v10, %v14269_v8 }
 0x34e   : > { %v6995_v58 = vpop.f32.mrb[106].mxu1 }
 0x34f   : > { %v6996_v13 = vpop.f32.mrb[107].mxu1 }
 0x350   : > { %v6997_v14 = vadd.f32 %v6996_v13, %v6995_v58 }
 0x352   : > { %v14316_v61 = vadd.f32 %v6997_v14, %v14272_v11  ;;  %v6998_v63 = vpop.f32.mrb[108].mxu1 }
 0x353   : > { %v6999_v16 = vpop.f32.mrb[109].mxu1 }
 0x354   : > { %v7000_v18 = vadd.f32 %v6999_v16, %v6998_v63 }
 0x356   : > { %v14319_v2 = vadd.f32 %v7000_v18, %v14275_v15  ;;  %v7001_v4 = vpop.f32.mrb[110].mxu1 }
 0x357   : > { %v7002_v20 = vpop.f32.mrb[111].mxu1 }
 0x358   : > { %v7003_v21 = vadd.f32 %v7002_v20, %v7001_v4 }
 0x35a   : > { %v14322_v7 = vadd.f32 %v7003_v21, %v14278_v19 }
 0x35b   : > { %v7004_v8 = vpop.f32.mrb[112].mxu1 }
 0x35c   : > { %v7005_v24 = vpop.f32.mrb[113].mxu1 }
 0x35d   : > { %v7006_v25 = vadd.f32 %v7005_v24, %v7004_v8 }
 0x35f   : > { %v14325_v12 = vadd.f32 %v7006_v25, %v14281_v23 }
 0x360   : > { %v7007_v11 = vpop.f32.mrb[114].mxu1 }
 0x361   : > { %v7008_v28 = vpop.f32.mrb[115].mxu1 }
 0x362   : > { %v7009_v29 = vadd.f32 %v7008_v28, %v7007_v11 }
 0x364   : > { %v14328_v31 = vadd.f32 %v7009_v29, %v14284_v26  ;;  %v7010_v15 = vpop.f32.mrb[116].mxu1 }
 0x365   : > { %v7011_v17 = vpop.f32.mrb[117].mxu1 }
 0x366   : > { %v7012_v33 = vadd.f32 %v7011_v17, %v7010_v15 }
 0x368   : > { %v14331_v36 = vadd.f32 %v7012_v33, %v14286_v30  ;;  %v7013_v19 = vpop.f32.mrb[118].mxu1 }
 0x369   : > { %v7014_v37 = vpop.f32.mrb[119].mxu1 }
 0x36a   : > { %v7015_v22 = vadd.f32 %v7014_v37, %v7013_v19 }
 0x36c   : > { %v14334_v40 = vadd.f32 %v7015_v22, %v14288_v34 }
 0x36e   : > { %v7016_v23 = vpop.f32.mrb[120].mxu1 }
 0x36f   : > { %v7017_v42 = vpop.f32.mrb[121].mxu1 }
 0x370   : > { %v7018_v43 = vadd.f32 %v7017_v42, %v7016_v23 }
 0x372   : > { %v14337_v46 = vadd.f32 %v7018_v43, %v14290_v39 }
 0x373   : > { %v7019_v26 = vpop.f32.mrb[122].mxu1 }
 0x374   : > { %v7020_v47 = vpop.f32.mrb[123].mxu1 }
 0x375   : > { %v7021_v49 = vadd.f32 %v7020_v47, %v7019_v26 }
 0x377   : > { %v14340_v50 = vadd.f32 %v7021_v49, %v14292_v27 }
 0x378   : > { %v7022_v30 = vpop.f32.mrb[124].mxu1 }
 0x379   : > { %v7023_v52 = vpop.f32.mrb[125].mxu1 }
 0x37a   : > { %v7024_v35 = vadd.f32 %v7023_v52, %v7022_v30 }
 0x37c   : > { %v14343_v34 = vadd.f32 %v7024_v35, %v14295_v32  ;;  %v7025_v55 = vpop.f32.mrb[126].mxu1 }
 0x37d   : > { %v7026_v38 = vpop.f32.mrb[127].mxu1 }
 0x37e   : > { %v7027_v57 = vadd.f32 %v7026_v38, %v7025_v55 }
 0x380   : > { %v14346_v39 = vadd.f32 %v7027_v57, %v14298_v54  ;;  %v7060_v41 = vpop.f32.mrb[128].mxu1 }
 0x381   : > { %v7061_v60 = vpop.f32.mrb[129].mxu1 }
 0x382   : > { %v7062_v62 = vadd.f32 %v7061_v60, %v7060_v41 }
 0x383   : > { %v5840_v27 = vpop.f32.mrb[32].mxu0 }
 0x384   : > { %6519 = vst [vmem:[%s13666_s20 + $0x20] sm:$0xff] %v5840_v27  ;;  %v5842_v44 = vpop.f32.mrb[33].mxu0  ;;  %v6437_v32 = vadd.f32 %v7062_v62, %v14301_v59  ;;  %v7063_v1 = vpop.f32.mrb[130].mxu1 }
 0x385   : > { %6520 = vst [vmem:[%s13666_s20 + $0x28] sm:$0xff] %v5842_v44  ;;  %v7064_v3 = vpop.f32.mrb[131].mxu1 }
 0x386   : > { %6522 = vst.msk [vmem:[%s13666_s20 + $0x30] sm:$0xff] %vm6521_vm0, %v6437_v32  ;;  %v7065_v54 = vadd.f32 %v7064_v3, %v7063_v1 }
 0x387   : > { %v5846_v48 = vpop.f32.mrb[34].mxu0 }
 0x388   : > { %6527 = vst [vmem:[%s13666_s20 + $0x58] sm:$0xff] %v5846_v48  ;;  %v5848_v5 = vpop.f32.mrb[35].mxu0  ;;  %v6442_v6 = vadd.f32 %v7065_v54, %v14304_v0  ;;  %v7066_v53 = vpop.f32.mrb[132].mxu1 }
 0x389   : > { %6528 = vst [vmem:[%s13666_s20 + $0x60] sm:$0xff] %v5848_v5  ;;  %v7067_v9 = vpop.f32.mrb[133].mxu1 }
 0x38a   : > { %6529 = vst.msk [vmem:[%s13666_s20 + $0x68] sm:$0xff] %vm6521_vm0, %v6442_v6  ;;  %v7068_v59 = vadd.f32 %v7067_v9, %v7066_v53 }
 0x38b   : > { %v5852_v10 = vpop.f32.mrb[36].mxu0 }
 0x38c   : > { %6534 = vst [vmem:[%s13666_s20 + $0x90] sm:$0xff] %v5852_v10  ;;  %v5854_v58 = vpop.f32.mrb[37].mxu0  ;;  %v6447_v13 = vadd.f32 %v7068_v59, %v14307_v45  ;;  %v7069_v14 = vpop.f32.mrb[134].mxu1 }
 0x38d   : > { %6535 = vst [vmem:[%s13666_s20 + $0x98] sm:$0xff] %v5854_v58  ;;  %v7070_v63 = vpop.f32.mrb[135].mxu1 }
 0x38e   : > { %6536 = vst.msk [vmem:[%s13666_s20 + $0xa0] sm:$0xff] %vm6521_vm0, %v6447_v13  ;;  %v7071_v0 = vadd.f32 %v7070_v63, %v7069_v14 }
 0x38f   : > { %v5858_v16 = vpop.f32.mrb[38].mxu0 }
 0x390   : > { %6541 = vst [vmem:[%s13666_s20 + $0xc8] sm:$0xff] %v5858_v16  ;;  %v5860_v18 = vpop.f32.mrb[39].mxu0  ;;  %v6452_v4 = vadd.f32 %v7071_v0, %v14310_v51  ;;  %v7072_v20 = vpop.f32.mrb[136].mxu1 }
 0x391   : > { %6542 = vst [vmem:[%s13666_s20 + $0xd0] sm:$0xff] %v5860_v18  ;;  %v7073_v21 = vpop.f32.mrb[137].mxu1 }
 0x392   : > { %6543 = vst.msk [vmem:[%s13666_s20 + $0xd8] sm:$0xff] %vm6521_vm0, %v6452_v4  ;;  %v7074_v45 = vadd.f32 %v7073_v21, %v7072_v20 }
 0x393   : > { %v5864_v8 = vpop.f32.mrb[40].mxu0 }
 0x394   : > { %6548 = vst [vmem:[%s13666_s20 + $0x100] sm:$0xff] %v5864_v8  ;;  %v5866_v24 = vpop.f32.mrb[41].mxu0  ;;  %v6457_v25 = vadd.f32 %v7074_v45, %v14313_v56  ;;  %v7075_v11 = vpop.f32.mrb[138].mxu1 }
 0x395   : > { %6549 = vst [vmem:[%s13666_s20 + $0x108] sm:$0xff] %v5866_v24  ;;  %v7076_v28 = vpop.f32.mrb[139].mxu1 }
 0x396   : > { %6550 = vst.msk [vmem:[%s13666_s20 + $0x110] sm:$0xff] %vm6521_vm0, %v6457_v25  ;;  %v7077_v51 = vadd.f32 %v7076_v28, %v7075_v11 }
 0x397   : > { %v5870_v29 = vpop.f32.mrb[42].mxu0 }
 0x398   : > { %6555 = vst [vmem:[%s13666_s20 + $0x138] sm:$0xff] %v5870_v29  ;;  %v5872_v15 = vpop.f32.mrb[43].mxu0  ;;  %v6462_v17 = vadd.f32 %v7077_v51, %v14316_v61  ;;  %v7078_v33 = vpop.f32.mrb[140].mxu1 }
 0x399   : > { %6556 = vst [vmem:[%s13666_s20 + $0x140] sm:$0xff] %v5872_v15  ;;  %v7079_v19 = vpop.f32.mrb[141].mxu1 }
 0x39a   : > { %6557 = vst.msk [vmem:[%s13666_s20 + $0x148] sm:$0xff] %vm6521_vm0, %v6462_v17  ;;  %v7080_v56 = vadd.f32 %v7079_v19, %v7078_v33 }
 0x39b   : > { %v5876_v37 = vpop.f32.mrb[44].mxu0 }
 0x39c   : > { %6562 = vst [vmem:[%s13666_s20 + $0x170] sm:$0xff] %v5876_v37  ;;  %v5878_v22 = vpop.f32.mrb[45].mxu0  ;;  %v6467_v23 = vadd.f32 %v7080_v56, %v14319_v2  ;;  %v7081_v42 = vpop.f32.mrb[142].mxu1 }
 0x39d   : > { %6563 = vst [vmem:[%s13666_s20 + $0x178] sm:$0xff] %v5878_v22  ;;  %v7082_v43 = vpop.f32.mrb[143].mxu1 }
 0x39e   : > { %6564 = vst.msk [vmem:[%s13666_s20 + $0x180] sm:$0xff] %vm6521_vm0, %v6467_v23  ;;  %v7083_v61 = vadd.f32 %v7082_v43, %v7081_v42 }
 0x39f   : > { %v5882_v26 = vpop.f32.mrb[46].mxu0 }
 0x3a0   : > { %6569 = vst [vmem:[%s13666_s20 + $0x1a8] sm:$0xff] %v5882_v26  ;;  %v5884_v47 = vpop.f32.mrb[47].mxu0  ;;  %v6472_v49 = vadd.f32 %v7083_v61, %v14322_v7  ;;  %v7084_v30 = vpop.f32.mrb[144].mxu1 }
 0x3a1   : > { %6570 = vst [vmem:[%s13666_s20 + $0x1b0] sm:$0xff] %v5884_v47  ;;  %v7085_v52 = vpop.f32.mrb[145].mxu1 }
 0x3a2   : > { %6571 = vst.msk [vmem:[%s13666_s20 + $0x1b8] sm:$0xff] %vm6521_vm0, %v6472_v49  ;;  %v7086_v2 = vadd.f32 %v7085_v52, %v7084_v30 }
 0x3a3   : > { %v5888_v35 = vpop.f32.mrb[48].mxu0 }
 0x3a4   : > { %6576 = vst [vmem:[%s13666_s20 + $0x1e0] sm:$0xff] %v5888_v35  ;;  %v5890_v55 = vpop.f32.mrb[49].mxu0  ;;  %v6477_v38 = vadd.f32 %v7086_v2, %v14325_v12  ;;  %v7087_v57 = vpop.f32.mrb[146].mxu1 }
 0x3a5   : > { %6577 = vst [vmem:[%s13666_s20 + $0x1e8] sm:$0xff] %v5890_v55  ;;  %v7088_v41 = vpop.f32.mrb[147].mxu1 }
 0x3a6   : > { %6578 = vst.msk [vmem:[%s13666_s20 + $0x1f0] sm:$0xff] %vm6521_vm0, %v6477_v38  ;;  %v7089_v7 = vadd.f32 %v7088_v41, %v7087_v57 }
 0x3a7   : > { %v5894_v60 = vpop.f32.mrb[50].mxu0 }
 0x3a8   : > { %6583 = vst [vmem:[%s13666_s20 + $0x218] sm:$0xff] %v5894_v60  ;;  %v5896_v62 = vpop.f32.mrb[51].mxu0  ;;  %v6482_v27 = vadd.f32 %v7089_v7, %v14328_v31  ;;  %v7090_v44 = vpop.f32.mrb[148].mxu1 }
 0x3a9   : > { %6584 = vst [vmem:[%s13666_s20 + $0x220] sm:$0xff] %v5896_v62  ;;  %v7091_v32 = vpop.f32.mrb[149].mxu1 }
 0x3aa   : > { %6585 = vst.msk [vmem:[%s13666_s20 + $0x228] sm:$0xff] %vm6521_vm0, %v6482_v27  ;;  %v7092_v12 = vadd.f32 %v7091_v32, %v7090_v44 }
 0x3ab   : > { %v5900_v1 = vpop.f32.mrb[52].mxu0 }
 0x3ac   : > { %6590 = vst [vmem:[%s13666_s20 + $0x250] sm:$0xff] %v5900_v1  ;;  %v5902_v3 = vpop.f32.mrb[53].mxu0  ;;  %v6487_v54 = vadd.f32 %v7092_v12, %v14331_v36  ;;  %v7093_v48 = vpop.f32.mrb[150].mxu1 }
 0x3ad   : > { %6591 = vst [vmem:[%s13666_s20 + $0x258] sm:$0xff] %v5902_v3  ;;  %v7094_v5 = vpop.f32.mrb[151].mxu1 }
 0x3ae   : > { %6592 = vst.msk [vmem:[%s13666_s20 + $0x260] sm:$0xff] %vm6521_vm0, %v6487_v54  ;;  %v7095_v31 = vadd.f32 %v7094_v5, %v7093_v48 }
 0x3af   : > { %v5906_v6 = vpop.f32.mrb[54].mxu0 }
 0x3b0   : > { %6597 = vst [vmem:[%s13666_s20 + $0x288] sm:$0xff] %v5906_v6  ;;  %v5908_v53 = vpop.f32.mrb[55].mxu0  ;;  %v6492_v9 = vadd.f32 %v7095_v31, %v14334_v40  ;;  %v7096_v59 = vpop.f32.mrb[152].mxu1 }
 0x3b1   : > { %6598 = vst [vmem:[%s13666_s20 + $0x290] sm:$0xff] %v5908_v53  ;;  %v7097_v10 = vpop.f32.mrb[153].mxu1 }
 0x3b2   : > { %6599 = vst.msk [vmem:[%s13666_s20 + $0x298] sm:$0xff] %vm6521_vm0, %v6492_v9  ;;  %v7098_v36 = vadd.f32 %v7097_v10, %v7096_v59 }
 0x3b3   : > { %v5912_v58 = vpop.f32.mrb[56].mxu0 }
 0x3b4   : > { %6604 = vst [vmem:[%s13666_s20 + $0x2c0] sm:$0xff] %v5912_v58  ;;  %v5914_v13 = vpop.f32.mrb[57].mxu0  ;;  %v6497_v14 = vadd.f32 %v7098_v36, %v14337_v46  ;;  %v7099_v63 = vpop.f32.mrb[154].mxu1 }
 0x3b5   : > { %6605 = vst [vmem:[%s13666_s20 + $0x2c8] sm:$0xff] %v5914_v13  ;;  %v7100_v0 = vpop.f32.mrb[155].mxu1 }
 0x3b6   : > { %6606 = vst.msk [vmem:[%s13666_s20 + $0x2d0] sm:$0xff] %vm6521_vm0, %v6497_v14  ;;  %v7101_v40 = vadd.f32 %v7100_v0, %v7099_v63 }
 0x3b7   : > { %v5918_v16 = vpop.f32.mrb[58].mxu0 }
 0x3b8   : > { %6611 = vst [vmem:[%s13666_s20 + $0x2f8] sm:$0xff] %v5918_v16  ;;  %v5920_v18 = vpop.f32.mrb[59].mxu0  ;;  %v6502_v4 = vadd.f32 %v7101_v40, %v14340_v50  ;;  %v7102_v20 = vpop.f32.mrb[156].mxu1 }
 0x3b9   : > { %6612 = vst [vmem:[%s13666_s20 + $0x300] sm:$0xff] %v5920_v18  ;;  %v7103_v21 = vpop.f32.mrb[157].mxu1 }
 0x3ba   : > { %6613 = vst.msk [vmem:[%s13666_s20 + $0x308] sm:$0xff] %vm6521_vm0, %v6502_v4  ;;  %v7104_v46 = vadd.f32 %v7103_v21, %v7102_v20 }
 0x3bb   : > { %v5924_v45 = vpop.f32.mrb[60].mxu0 }
 0x3bc   : > { %6618 = vst [vmem:[%s13666_s20 + $0x330] sm:$0xff] %v5924_v45  ;;  %v5926_v8 = vpop.f32.mrb[61].mxu0  ;;  %v6507_v24 = vadd.f32 %v7104_v46, %v14343_v34  ;;  %v7105_v25 = vpop.f32.mrb[158].mxu1 }
 0x3bd   : > { %6619 = vst [vmem:[%s13666_s20 + $0x338] sm:$0xff] %v5926_v8  ;;  %v7106_v11 = vpop.f32.mrb[159].mxu1 }
 0x3be   : > { %6620 = vst.msk [vmem:[%s13666_s20 + $0x340] sm:$0xff] %vm6521_vm0, %v6507_v24  ;;  %v7107_v50 = vadd.f32 %v7106_v11, %v7105_v25 }
 0x3bf   : > { %v5930_v28 = vpop.f32.mrb[62].mxu0 }
 0x3c0   : > { %6625 = vst [vmem:[%s13666_s20 + $0x368] sm:$0xff] %v5930_v28  ;;  %v5932_v51 = vpop.f32.mrb[63].mxu0  ;;  %v6512_v29 = vadd.f32 %v7107_v50, %v14346_v39 }
 0x3c1   : > { %6626 = vst [vmem:[%s13666_s20 + $0x370] sm:$0xff] %v5932_v51 }
 0x3c2   : > { %6627 = vst.msk [vmem:[%s13666_s20 + $0x378] sm:$0xff] %vm6521_vm0, %v6512_v29 }
 0x3c3 PF: > { %s13_s14 = sadd.s32 1, %s8467_s14   ;;  %s14442_s12 = smov %s8463_s13 }
 0x3c4   : > { %p10_p5 = scmp.ge.s32.totalorder %s13_s14, 4   ;;  %s14443_s13 = smov %s14445_s15 }
 0x3c6   :  { %12 = sbr.rel (!%p10_p5) target bundleno = 2 (0x2), region = 68 }

</bundles_post_ra>
